<compile_context>
chip_gen: v7x
topology: tpu7x:2x2x1
jax: 0.10.0
libtpu: 0.0.40
codegen_flags: <defaults>
</compile_context>

<pallas_src>
import functools

import numpy as np
import jax
import jax.numpy as jnp
from jax import lax
from jax.experimental import pallas as pl
from jax.experimental.pallas import tpu as pltpu

H = 5
W = 5
HP = 6                    # padded grid height (extra all-zero row)
WP = 6                    # padded grid width  (extra all-zero col)
NP = HP * WP              # 36 padded positions per sample
N_OUT_PAD = 128           # lane-dense padded width of the fused head-2 output
_TAPS = [(di, dj) for di in range(3) for dj in range(3)]


# ----------------------------------------------------------------------------
# Offline weight preparation (plain numpy; one-time setup cost)
# ----------------------------------------------------------------------------
def _conv_taps_matrix(w_oihw):
    """(Cout, Cin, 3, 3) -> (9*Cin, Cout); rows [k*Cin:(k+1)*Cin] = W[:,:,di,dj].T."""
    w = np.asarray(w_oihw, np.float32)
    return np.concatenate([w[:, :, di, dj].T for (di, dj) in _TAPS], axis=0)


def prepare_params(params, n_action):
    """Convs -> 9-tap matrices, heads merged + NCHW-flatten perm folded in."""
    assert 1 + n_action <= N_OUT_PAD
    c3 = int(params["w3"].shape[0])                       # 64

    w1t = _conv_taps_matrix(params["w1"])                  # (9, 16)    f32
    w2t = _conv_taps_matrix(params["w2"])                  # (144, 32)  -> bf16
    w3t = _conv_taps_matrix(params["w3"])                  # (288, 64)  -> bf16

    # Heads: fold the torch NCHW-flatten permutation into the weight rows and
    # merge value/policy into single GEMMs.
    q = np.arange(H * W * c3)
    p_idx, c_idx = np.divmod(q, c3)          # our feature index: p*64 + c
    nchw = c_idx * (H * W) + p_idx           # torch flatten index: c*25 + p
    v1 = np.asarray(params["v1_w"], np.float32).T[nchw]    # (1600, 512)
    p1 = np.asarray(params["p1_w"], np.float32).T[nchw]    # (1600, 512)
    h1 = np.concatenate([v1, p1], axis=1)                  # (1600, 1024)
    bh1 = np.concatenate([np.asarray(params["v1_b"], np.float32),
                          np.asarray(params["p1_b"], np.float32)])  # (1024,)

    d = v1.shape[1]                                        # 512
    h2 = np.zeros((2 * d, N_OUT_PAD), np.float32)          # (1024, 128)
    h2[:d, 0] = np.asarray(params["v2_w"], np.float32)[0]  # value column
    h2[d:, 1:1 + n_action] = np.asarray(params["p2_w"], np.float32).T
    bh2 = np.zeros((N_OUT_PAD,), np.float32)
    bh2[0] = float(np.asarray(params["v2_b"], np.float32)[0])
    bh2[1:1 + n_action] = np.asarray(params["p2_b"], np.float32)

    f32 = lambda a: jnp.asarray(a, jnp.float32)
    bf16 = lambda a: jnp.asarray(a, jnp.bfloat16)
    bias = lambda a: jnp.asarray(a, jnp.float32).reshape(1, -1)
    return {
        "w1t": f32(w1t), "w2t": bf16(w2t), "w3t": bf16(w3t),
        "h1": bf16(h1), "h2": bf16(h2),
        "b1": bias(params["b1"]), "b2": bias(params["b2"]), "b3": bias(params["b3"]),
        "bh1": bias(bh1), "bh2": bias(bh2),
    }


# ----------------------------------------------------------------------------
# Kernel helpers (all static shapes / offsets; tile-aligned data movement)
# ----------------------------------------------------------------------------
def _rotate_rows(a, shift):
    """out[r] = a[(r + shift) % R]; static, sublane-tile-aligned rotate.

    Equivalent to pltpu.roll(a, -shift, axis=0); expressed as two aligned
    slices + concat for maximally robust lowering (shift is a multiple of 8).
    """
    r = a.shape[0]
    k = shift % r
    if k == 0:
        return a
    return jnp.concatenate([a[k:], a[:k]], axis=0)


def _zero_pad_positions(a, bt):
    """Zero rows belonging to the padded grid positions (row 5 / col 5)."""
    rows, cols = a.shape
    r = lax.broadcasted_iota(jnp.int32, (rows, cols), 0)
    bad = r >= 29 * bt                                    # positions 29..35
    for q in (5, 11, 17, 23):                             # (i, j=5) pads
        bad = jnp.logical_or(bad, jnp.logical_and(r >= q * bt, r < (q + 1) * bt))
    return jnp.where(bad, 0.0, a)


def _conv3x3_taps(a, w_ref, bt):
    """3x3 SAME conv on the padded grid as 9 (Cin, Cout) MXU matmuls."""
    cin = a.shape[1]
    acc = None
    for k, (di, dj) in enumerate(_TAPS):
        shift = ((di - 1) * WP + (dj - 1)) * bt
        x = _rotate_rows(a, shift).astype(jnp.bfloat16)
        w = w_ref[k * cin:(k + 1) * cin, :]               # (cin, cout) bf16
        t = jnp.dot(x, w, preferred_element_type=jnp.float32)
        acc = t if acc is None else acc + t
    return acc


# ----------------------------------------------------------------------------
# Single fused Pallas kernel: conv1..3 + both heads, all VMEM-resident
# ----------------------------------------------------------------------------
def _fused_forward_kernel(x_ref, w1t_ref, w2t_ref, w3t_ref, h1_ref, h2_ref,
                          b1_ref, b2_ref, b3_ref, bh1_ref, bh2_ref, o_ref):
    bt = o_ref.shape[0]                 # batch tile (rows ordered (pos, b))
    c3 = w3t_ref.shape[1]               # 64

    # conv1: Cin = 1; the input is replicated across the 16 output lanes in
    # the wrapper, so each tap is a VPU broadcast-multiply (no K=1 matmul).
    x = x_ref[...]                                            # (36*bt, 16) f32
    acc = None
    for k, (di, dj) in enumerate(_TAPS):
        shift = ((di - 1) * WP + (dj - 1)) * bt
        t = _rotate_rows(x, shift) * w1t_ref[k:k + 1, :]
        acc = t if acc is None else acc + t
    a1 = _zero_pad_positions(jnp.maximum(acc + b1_ref[...], 0.0), bt)

    # conv2 / conv3 as 9-tap matmuls (pad rows re-zeroed before reuse).
    a2 = _conv3x3_taps(a1, w2t_ref, bt)
    a2 = _zero_pad_positions(jnp.maximum(a2 + b2_ref[...], 0.0), bt)
    a3 = _conv3x3_taps(a2, w3t_ref, bt)
    a3 = jnp.maximum(a3 + b3_ref[...], 0.0)   # pad rows are never read below

    # Fused heads: v1|p1 as 25 per-position (bt,64)x(64,1024) matmuls that
    # accumulate into one (bt, 1024) block (no activation reshape needed).
    acc = None
    for i in range(H):
        for j in range(W):
            pos = i * WP + j                  # padded-grid row block of a3
            p = i * W + j                     # real-grid feature block in h1
            lhs = a3[pos * bt:(pos + 1) * bt, :].astype(jnp.bfloat16)
            rhs = h1_ref[p * c3:(p + 1) * c3, :]           # (64, 1024) bf16
            d = jnp.dot(lhs, rhs, preferred_element_type=jnp.float32)
            acc = d if acc is None else acc + d
    hid = jnp.maximum(acc + bh1_ref[...], 0.0)             # (bt, 1024)

    out = jnp.dot(hid.astype(jnp.bfloat16), h2_ref[...],
                  preferred_element_type=jnp.float32) + bh2_ref[...]
    o_ref[...] = out                                        # (bt, 128) f32


# ----------------------------------------------------------------------------
# Wrapper: padded-grid layout construction + batch-tiled pallas_call
# ----------------------------------------------------------------------------
def _batch_tiling(batch):
    b8 = max(8, -(-batch // 8) * 8)
    if b8 <= 128:
        return b8, 1
    g = -(-b8 // 128)
    bt = -(-(-(-b8 // g)) // 8) * 8
    return bt, g


@functools.partial(jax.jit, static_argnums=(2,))
def model_forward(x_nchw, kparams, n_action):
    B = x_nchw.shape[0]
    assert x_nchw.shape[1:] == (1, H, W)
    bt, g = _batch_tiling(B)
    b_pad = bt * g
    rp = NP * bt                              # rows per grid step

    # Zero-padded 6x6 grid, rows ordered (tile, position, batch-in-tile),
    # /255 applied in f32 here (precision), replicated across 16 lanes so the
    # kernel's conv1 input is a dense, lane-efficient block.
    x = x_nchw.reshape(B, H, W).astype(jnp.float32) / 255.0
    x = jnp.pad(x, ((0, b_pad - B), (0, 1), (0, 1)))        # (b_pad, 6, 6)
    x = x.reshape(g, bt, NP).transpose(0, 2, 1).reshape(g * rp, 1)
    x16 = jnp.broadcast_to(x, (g * rp, 16))

    ops = (x16, kparams["w1t"], kparams["w2t"], kparams["w3t"],
           kparams["h1"], kparams["h2"],
           kparams["b1"], kparams["b2"], kparams["b3"],
           kparams["bh1"], kparams["bh2"])

    def const_spec(a):                         # weights: fetched once, resident
        return pl.BlockSpec(a.shape, lambda i: (0, 0))

    in_specs = [pl.BlockSpec((rp, 16), lambda i: (i, 0))] \
        + [const_spec(a) for a in ops[1:]]

    wbytes = sum(int(np.prod(kparams[k].shape)) * kparams[k].dtype.itemsize
                 for k in ("w1t", "w2t", "w3t", "h1", "h2",
                           "b1", "b2", "b3", "bh1", "bh2"))
    bytes_accessed = int(wbytes + x16.size * 4 + b_pad * N_OUT_PAD * 4)
    flops = int(b_pad * (H * W * 2 * (9 * 16 + 9 * 16 * 32 + 9 * 32 * 64)
                         + 2 * (1600 * 1024 + 1024 * N_OUT_PAD)))

    out = pl.pallas_call(
        _fused_forward_kernel,
        out_shape=jax.ShapeDtypeStruct((b_pad, N_OUT_PAD), jnp.float32),
        grid=(g,),
        in_specs=in_specs,
        out_specs=pl.BlockSpec((bt, N_OUT_PAD), lambda i: (i, 0)),
        compiler_params=pltpu.CompilerParams(
            dimension_semantics=("parallel",),
            vmem_limit_bytes=(16 if bt <= 64 else 32) * 1024 * 1024),
        cost_estimate=pl.CostEstimate(flops=flops, transcendentals=0,
                                      bytes_accessed=bytes_accessed),
    )(*ops)

    v = out[:B, 0:1]
    p = out[:B, 1:1 + n_action]
    return p, v


# ----------------------------------------------------------------------------
# Pure-JAX reference (NCHW, mirrors the PyTorch forward) for verification
# ----------------------------------------------------------------------------
def reference_forward(x_nchw, params):
    hi = lax.Precision.HIGHEST
    dn = ("NCHW", "OIHW", "NCHW")

    def conv(x, w, b):
        y = lax.conv_general_dilated(x, w, (1, 1), "SAME",
                                     dimension_numbers=dn, precision=hi)
        return jax.nn.relu(y + b[None, :, None, None])

    x = x_nchw / 255.0
    x = conv(x, params["w1"], params["b1"])
    x = conv(x, params["w2"], params["b2"])
    x = conv(x, params["w3"], params["b3"])
    B = x.shape[0]
    feat = x.reshape(B, -1)
    v = jax.nn.relu(jnp.dot(feat, params["v1_w"].T, precision=hi) + params["v1_b"])
    v = jnp.dot(v, params["v2_w"].T, precision=hi) + params["v2_b"]
    p = jax.nn.relu(jnp.dot(feat, params["p1_w"].T, precision=hi) + params["p1_b"])
    p = jnp.dot(p, params["p2_w"].T, precision=hi) + params["p2_b"]
    return p, v


# ----------------------------------------------------------------------------
# Deterministic parameter init (PyTorch-style uniform bounds)
# ----------------------------------------------------------------------------
def init_params(key, n_action):
    def uni(k, shape, fan_in):
        bound = 1.0 / jnp.sqrt(fan_in)
        return jax.random.uniform(k, shape, jnp.float32, -bound, bound)

    ks = jax.random.split(key, 14)
    return {
        "w1": uni(ks[0], (16, 1, 3, 3), 1 * 9),   "b1": uni(ks[1], (16,), 1 * 9),
        "w2": uni(ks[2], (32, 16, 3, 3), 16 * 9), "b2": uni(ks[3], (32,), 16 * 9),
        "w3": uni(ks[4], (64, 32, 3, 3), 32 * 9), "b3": uni(ks[5], (64,), 32 * 9),
        "v1_w": uni(ks[6], (512, 1600), 1600),    "v1_b": uni(ks[7], (512,), 1600),
        "v2_w": uni(ks[8], (1, 512), 512),        "v2_b": uni(ks[9], (1,), 512),
        "p1_w": uni(ks[10], (512, 1600), 1600),   "p1_b": uni(ks[11], (512,), 1600),
        "p2_w": uni(ks[12], (n_action, 512), 512),
        "p2_b": uni(ks[13], (n_action,), 512),
    }


if __name__ == "__main__":
    n_action = 4
    batch = 2

    key = jax.random.PRNGKey(0)
    k_par, k_x = jax.random.split(key)
    params = init_params(k_par, n_action)
    kparams = prepare_params(params, n_action)   # offline folding to kernel form

    # input: (batch, 1, 5, 5), pixel-like values in [0, 255)
    x = jax.random.uniform(k_x, (batch, 1, 5, 5), jnp.float32, 0.0, 255.0)

    p_out, v_out = jax.block_until_ready(model_forward(x, kparams, n_action))

    # verify against the pure-JAX f32 reference (kernel uses bf16 head weights)
    p_ref, v_ref = jax.block_until_ready(reference_forward(x, params))
    assert p_out.shape == (batch, n_action) and v_out.shape == (batch, 1)
    assert jnp.allclose(p_out, p_ref, rtol=2e-2, atol=2e-2), \
        float(jnp.max(jnp.abs(p_out - p_ref)))
    assert jnp.allclose(v_out, v_ref, rtol=2e-2, atol=2e-2), \
        float(jnp.max(jnp.abs(v_out - v_ref)))

    print("KERNEL_OK")
</pallas_src>

<mosaic_0001>
module attributes {stable_mosaic.version = 11 : i64} {
  func.func @_fused_forward_kernel(%arg0: i32, %arg1: memref<288x16xf32, #tpu.memory_space<vmem>>, %arg2: memref<9x16xf32, #tpu.memory_space<vmem>>, %arg3: memref<144x32xbf16, #tpu.memory_space<vmem>>, %arg4: memref<288x64xbf16, #tpu.memory_space<vmem>>, %arg5: memref<1600x1024xbf16, #tpu.memory_space<vmem>>, %arg6: memref<1024x128xbf16, #tpu.memory_space<vmem>>, %arg7: memref<1x16xf32, #tpu.memory_space<vmem>>, %arg8: memref<1x32xf32, #tpu.memory_space<vmem>>, %arg9: memref<1x64xf32, #tpu.memory_space<vmem>>, %arg10: memref<1x1024xf32, #tpu.memory_space<vmem>>, %arg11: memref<1x128xf32, #tpu.memory_space<vmem>>, %arg12: memref<8x128xf32, #tpu.memory_space<vmem>>) attributes {dimension_semantics = [#tpu.dimension_semantics<parallel>], iteration_bounds = array<i64: 1>, scalar_prefetch = 0 : i64, scratch_operands = 0 : i64, tpu.core_type = #tpu.core_type<tc>, window_params = [{transform_indices = @transform_0, window_bounds = array<i64: 288, 16>}, {pipeline_mode = #tpu.pipeline_mode<synchronous>, transform_indices = @transform_1, window_bounds = array<i64: 9, 16>}, {pipeline_mode = #tpu.pipeline_mode<synchronous>, transform_indices = @transform_2, window_bounds = array<i64: 144, 32>}, {pipeline_mode = #tpu.pipeline_mode<synchronous>, transform_indices = @transform_3, window_bounds = array<i64: 288, 64>}, {pipeline_mode = #tpu.pipeline_mode<synchronous>, transform_indices = @transform_4, window_bounds = array<i64: 1600, 1024>}, {pipeline_mode = #tpu.pipeline_mode<synchronous>, transform_indices = @transform_5, window_bounds = array<i64: 1024, 128>}, {pipeline_mode = #tpu.pipeline_mode<synchronous>, transform_indices = @transform_6, window_bounds = array<i64: 1, 16>}, {pipeline_mode = #tpu.pipeline_mode<synchronous>, transform_indices = @transform_7, window_bounds = array<i64: 1, 32>}, {pipeline_mode = #tpu.pipeline_mode<synchronous>, transform_indices = @transform_8, window_bounds = array<i64: 1, 64>}, {pipeline_mode = #tpu.pipeline_mode<synchronous>, transform_indices = @transform_9, window_bounds = array<i64: 1, 1024>}, {pipeline_mode = #tpu.pipeline_mode<synchronous>, transform_indices = @transform_10, window_bounds = array<i64: 1, 128>}, {transform_indices = @transform_11, window_bounds = array<i64: 8, 128>}]} {
    %c0 = arith.constant 0 : index
    %c0_0 = arith.constant 0 : index
    %0 = vector.load %arg1[%c0, %c0_0] : memref<288x16xf32, #tpu.memory_space<vmem>>, vector<288x16xf32>
    %1 = vector.extract_strided_slice %0 {offsets = [232, 0], sizes = [56, 16], strides = [1, 1]} : vector<288x16xf32> to vector<56x16xf32>
    %2 = vector.extract_strided_slice %0 {offsets = [0, 0], sizes = [232, 16], strides = [1, 1]} : vector<288x16xf32> to vector<232x16xf32>
    %3 = tpu.concatenate %1, %2 in 0 : vector<56x16xf32>, vector<232x16xf32> -> vector<288x16xf32>
    %c0_1 = arith.constant 0 : index
    %c0_2 = arith.constant 0 : index
    %4 = vector.load %arg2[%c0_1, %c0_2] : memref<9x16xf32, #tpu.memory_space<vmem>>, vector<1x16xf32>
    %5 = vector.broadcast %4 : vector<1x16xf32> to vector<288x16xf32>
    %6 = arith.mulf %3, %5 : vector<288x16xf32>
    %7 = vector.extract_strided_slice %0 {offsets = [240, 0], sizes = [48, 16], strides = [1, 1]} : vector<288x16xf32> to vector<48x16xf32>
    %8 = vector.extract_strided_slice %0 {offsets = [0, 0], sizes = [240, 16], strides = [1, 1]} : vector<288x16xf32> to vector<240x16xf32>
    %9 = tpu.concatenate %7, %8 in 0 : vector<48x16xf32>, vector<240x16xf32> -> vector<288x16xf32>
    %c1 = arith.constant 1 : index
    %c0_3 = arith.constant 0 : index
    %10 = vector.load %arg2[%c1, %c0_3] : memref<9x16xf32, #tpu.memory_space<vmem>>, vector<1x16xf32>
    %11 = vector.broadcast %10 : vector<1x16xf32> to vector<288x16xf32>
    %12 = arith.mulf %9, %11 : vector<288x16xf32>
    %13 = arith.addf %6, %12 : vector<288x16xf32>
    %14 = vector.extract_strided_slice %0 {offsets = [248, 0], sizes = [40, 16], strides = [1, 1]} : vector<288x16xf32> to vector<40x16xf32>
    %15 = vector.extract_strided_slice %0 {offsets = [0, 0], sizes = [248, 16], strides = [1, 1]} : vector<288x16xf32> to vector<248x16xf32>
    %16 = tpu.concatenate %14, %15 in 0 : vector<40x16xf32>, vector<248x16xf32> -> vector<288x16xf32>
    %c2 = arith.constant 2 : index
    %c0_4 = arith.constant 0 : index
    %17 = vector.load %arg2[%c2, %c0_4] : memref<9x16xf32, #tpu.memory_space<vmem>>, vector<1x16xf32>
    %18 = vector.broadcast %17 : vector<1x16xf32> to vector<288x16xf32>
    %19 = arith.mulf %16, %18 : vector<288x16xf32>
    %20 = arith.addf %13, %19 : vector<288x16xf32>
    %21 = vector.extract_strided_slice %0 {offsets = [280, 0], sizes = [8, 16], strides = [1, 1]} : vector<288x16xf32> to vector<8x16xf32>
    %22 = vector.extract_strided_slice %0 {offsets = [0, 0], sizes = [280, 16], strides = [1, 1]} : vector<288x16xf32> to vector<280x16xf32>
    %23 = tpu.concatenate %21, %22 in 0 : vector<8x16xf32>, vector<280x16xf32> -> vector<288x16xf32>
    %c3 = arith.constant 3 : index
    %c0_5 = arith.constant 0 : index
    %24 = vector.load %arg2[%c3, %c0_5] : memref<9x16xf32, #tpu.memory_space<vmem>>, vector<1x16xf32>
    %25 = vector.broadcast %24 : vector<1x16xf32> to vector<288x16xf32>
    %26 = arith.mulf %23, %25 : vector<288x16xf32>
    %27 = arith.addf %20, %26 : vector<288x16xf32>
    %c4 = arith.constant 4 : index
    %c0_6 = arith.constant 0 : index
    %28 = vector.load %arg2[%c4, %c0_6] : memref<9x16xf32, #tpu.memory_space<vmem>>, vector<1x16xf32>
    %29 = vector.broadcast %28 : vector<1x16xf32> to vector<288x16xf32>
    %30 = arith.mulf %0, %29 : vector<288x16xf32>
    %31 = arith.addf %27, %30 : vector<288x16xf32>
    %32 = vector.extract_strided_slice %0 {offsets = [8, 0], sizes = [280, 16], strides = [1, 1]} : vector<288x16xf32> to vector<280x16xf32>
    %33 = vector.extract_strided_slice %0 {offsets = [0, 0], sizes = [8, 16], strides = [1, 1]} : vector<288x16xf32> to vector<8x16xf32>
    %34 = tpu.concatenate %32, %33 in 0 : vector<280x16xf32>, vector<8x16xf32> -> vector<288x16xf32>
    %c5 = arith.constant 5 : index
    %c0_7 = arith.constant 0 : index
    %35 = vector.load %arg2[%c5, %c0_7] : memref<9x16xf32, #tpu.memory_space<vmem>>, vector<1x16xf32>
    %36 = vector.broadcast %35 : vector<1x16xf32> to vector<288x16xf32>
    %37 = arith.mulf %34, %36 : vector<288x16xf32>
    %38 = arith.addf %31, %37 : vector<288x16xf32>
    %39 = vector.extract_strided_slice %0 {offsets = [40, 0], sizes = [248, 16], strides = [1, 1]} : vector<288x16xf32> to vector<248x16xf32>
    %40 = vector.extract_strided_slice %0 {offsets = [0, 0], sizes = [40, 16], strides = [1, 1]} : vector<288x16xf32> to vector<40x16xf32>
    %41 = tpu.concatenate %39, %40 in 0 : vector<248x16xf32>, vector<40x16xf32> -> vector<288x16xf32>
    %c6 = arith.constant 6 : index
    %c0_8 = arith.constant 0 : index
    %42 = vector.load %arg2[%c6, %c0_8] : memref<9x16xf32, #tpu.memory_space<vmem>>, vector<1x16xf32>
    %43 = vector.broadcast %42 : vector<1x16xf32> to vector<288x16xf32>
    %44 = arith.mulf %41, %43 : vector<288x16xf32>
    %45 = arith.addf %38, %44 : vector<288x16xf32>
    %46 = vector.extract_strided_slice %0 {offsets = [48, 0], sizes = [240, 16], strides = [1, 1]} : vector<288x16xf32> to vector<240x16xf32>
    %47 = vector.extract_strided_slice %0 {offsets = [0, 0], sizes = [48, 16], strides = [1, 1]} : vector<288x16xf32> to vector<48x16xf32>
    %48 = tpu.concatenate %46, %47 in 0 : vector<240x16xf32>, vector<48x16xf32> -> vector<288x16xf32>
    %c7 = arith.constant 7 : index
    %c0_9 = arith.constant 0 : index
    %49 = vector.load %arg2[%c7, %c0_9] : memref<9x16xf32, #tpu.memory_space<vmem>>, vector<1x16xf32>
    %50 = vector.broadcast %49 : vector<1x16xf32> to vector<288x16xf32>
    %51 = arith.mulf %48, %50 : vector<288x16xf32>
    %52 = arith.addf %45, %51 : vector<288x16xf32>
    %53 = vector.extract_strided_slice %0 {offsets = [56, 0], sizes = [232, 16], strides = [1, 1]} : vector<288x16xf32> to vector<232x16xf32>
    %54 = vector.extract_strided_slice %0 {offsets = [0, 0], sizes = [56, 16], strides = [1, 1]} : vector<288x16xf32> to vector<56x16xf32>
    %55 = tpu.concatenate %53, %54 in 0 : vector<232x16xf32>, vector<56x16xf32> -> vector<288x16xf32>
    %c8 = arith.constant 8 : index
    %c0_10 = arith.constant 0 : index
    %56 = vector.load %arg2[%c8, %c0_10] : memref<9x16xf32, #tpu.memory_space<vmem>>, vector<1x16xf32>
    %57 = vector.broadcast %56 : vector<1x16xf32> to vector<288x16xf32>
    %58 = arith.mulf %55, %57 : vector<288x16xf32>
    %59 = arith.addf %52, %58 : vector<288x16xf32>
    %c0_11 = arith.constant 0 : index
    %c0_12 = arith.constant 0 : index
    %60 = vector.load %arg7[%c0_11, %c0_12] : memref<1x16xf32, #tpu.memory_space<vmem>>, vector<1x16xf32>
    %61 = vector.broadcast %60 : vector<1x16xf32> to vector<288x16xf32>
    %62 = arith.addf %59, %61 : vector<288x16xf32>
    %cst = arith.constant 0.000000e+00 : f32
    %63 = vector.broadcast %cst : f32 to vector<288x16xf32>
    %64 = arith.maximumf %62, %63 : vector<288x16xf32>
    %65 = tpu.iota {dimensions = array<i32: 0>} : vector<288x16xi32>
    %c232_i32 = arith.constant 232 : i32
    %66 = vector.broadcast %c232_i32 : i32 to vector<288x16xi32>
    %67 = arith.cmpi sge, %65, %66 : vector<288x16xi32>
    %c40_i32 = arith.constant 40 : i32
    %68 = vector.broadcast %c40_i32 : i32 to vector<288x16xi32>
    %69 = arith.cmpi sge, %65, %68 : vector<288x16xi32>
    %c48_i32 = arith.constant 48 : i32
    %70 = vector.broadcast %c48_i32 : i32 to vector<288x16xi32>
    %71 = arith.cmpi slt, %65, %70 : vector<288x16xi32>
    %72 = arith.andi %69, %71 : vector<288x16xi1>
    %73 = arith.ori %67, %72 : vector<288x16xi1>
    %c88_i32 = arith.constant 88 : i32
    %74 = vector.broadcast %c88_i32 : i32 to vector<288x16xi32>
    %75 = arith.cmpi sge, %65, %74 : vector<288x16xi32>
    %c96_i32 = arith.constant 96 : i32
    %76 = vector.broadcast %c96_i32 : i32 to vector<288x16xi32>
    %77 = arith.cmpi slt, %65, %76 : vector<288x16xi32>
    %78 = arith.andi %75, %77 : vector<288x16xi1>
    %79 = arith.ori %73, %78 : vector<288x16xi1>
    %c136_i32 = arith.constant 136 : i32
    %80 = vector.broadcast %c136_i32 : i32 to vector<288x16xi32>
    %81 = arith.cmpi sge, %65, %80 : vector<288x16xi32>
    %c144_i32 = arith.constant 144 : i32
    %82 = vector.broadcast %c144_i32 : i32 to vector<288x16xi32>
    %83 = arith.cmpi slt, %65, %82 : vector<288x16xi32>
    %84 = arith.andi %81, %83 : vector<288x16xi1>
    %85 = arith.ori %79, %84 : vector<288x16xi1>
    %c184_i32 = arith.constant 184 : i32
    %86 = vector.broadcast %c184_i32 : i32 to vector<288x16xi32>
    %87 = arith.cmpi sge, %65, %86 : vector<288x16xi32>
    %c192_i32 = arith.constant 192 : i32
    %88 = vector.broadcast %c192_i32 : i32 to vector<288x16xi32>
    %89 = arith.cmpi slt, %65, %88 : vector<288x16xi32>
    %90 = arith.andi %87, %89 : vector<288x16xi1>
    %91 = arith.ori %85, %90 : vector<288x16xi1>
    %cst_13 = arith.constant 0.000000e+00 : f32
    %92 = vector.broadcast %cst_13 : f32 to vector<288x16xf32>
    %93 = arith.select %91, %92, %64 : vector<288x16xi1>, vector<288x16xf32>
    %94 = vector.extract_strided_slice %93 {offsets = [232, 0], sizes = [56, 16], strides = [1, 1]} : vector<288x16xf32> to vector<56x16xf32>
    %95 = vector.extract_strided_slice %93 {offsets = [0, 0], sizes = [232, 16], strides = [1, 1]} : vector<288x16xf32> to vector<232x16xf32>
    %96 = tpu.concatenate %94, %95 in 0 : vector<56x16xf32>, vector<232x16xf32> -> vector<288x16xf32>
    %97 = arith.truncf %96 : vector<288x16xf32> to vector<288x16xbf16>
    %c0_14 = arith.constant 0 : index
    %c0_15 = arith.constant 0 : index
    %98 = vector.load %arg3[%c0_14, %c0_15] : memref<144x32xbf16, #tpu.memory_space<vmem>>, vector<16x32xbf16>
    %cst_16 = arith.constant dense<0.000000e+00> : vector<288x32xf32>
    %99 = tpu.matmul %97, %98, %cst_16 {dimension_numbers = #tpu.dot_dimension_numbers<[1], [0], [0], [1], [0, 0, 1, 1], [], []>} : vector<288x16xbf16>, vector<16x32xbf16>, vector<288x32xf32> -> vector<288x32xf32>
    %100 = vector.extract_strided_slice %93 {offsets = [240, 0], sizes = [48, 16], strides = [1, 1]} : vector<288x16xf32> to vector<48x16xf32>
    %101 = vector.extract_strided_slice %93 {offsets = [0, 0], sizes = [240, 16], strides = [1, 1]} : vector<288x16xf32> to vector<240x16xf32>
    %102 = tpu.concatenate %100, %101 in 0 : vector<48x16xf32>, vector<240x16xf32> -> vector<288x16xf32>
    %103 = arith.truncf %102 : vector<288x16xf32> to vector<288x16xbf16>
    %c16 = arith.constant 16 : index
    %c0_17 = arith.constant 0 : index
    %104 = vector.load %arg3[%c16, %c0_17] : memref<144x32xbf16, #tpu.memory_space<vmem>>, vector<16x32xbf16>
    %cst_18 = arith.constant dense<0.000000e+00> : vector<288x32xf32>
    %105 = tpu.matmul %103, %104, %cst_18 {dimension_numbers = #tpu.dot_dimension_numbers<[1], [0], [0], [1], [0, 0, 1, 1], [], []>} : vector<288x16xbf16>, vector<16x32xbf16>, vector<288x32xf32> -> vector<288x32xf32>
    %106 = arith.addf %99, %105 : vector<288x32xf32>
    %107 = vector.extract_strided_slice %93 {offsets = [248, 0], sizes = [40, 16], strides = [1, 1]} : vector<288x16xf32> to vector<40x16xf32>
    %108 = vector.extract_strided_slice %93 {offsets = [0, 0], sizes = [248, 16], strides = [1, 1]} : vector<288x16xf32> to vector<248x16xf32>
    %109 = tpu.concatenate %107, %108 in 0 : vector<40x16xf32>, vector<248x16xf32> -> vector<288x16xf32>
    %110 = arith.truncf %109 : vector<288x16xf32> to vector<288x16xbf16>
    %c32 = arith.constant 32 : index
    %c0_19 = arith.constant 0 : index
    %111 = vector.load %arg3[%c32, %c0_19] : memref<144x32xbf16, #tpu.memory_space<vmem>>, vector<16x32xbf16>
    %cst_20 = arith.constant dense<0.000000e+00> : vector<288x32xf32>
    %112 = tpu.matmul %110, %111, %cst_20 {dimension_numbers = #tpu.dot_dimension_numbers<[1], [0], [0], [1], [0, 0, 1, 1], [], []>} : vector<288x16xbf16>, vector<16x32xbf16>, vector<288x32xf32> -> vector<288x32xf32>
    %113 = arith.addf %106, %112 : vector<288x32xf32>
    %114 = vector.extract_strided_slice %93 {offsets = [280, 0], sizes = [8, 16], strides = [1, 1]} : vector<288x16xf32> to vector<8x16xf32>
    %115 = vector.extract_strided_slice %93 {offsets = [0, 0], sizes = [280, 16], strides = [1, 1]} : vector<288x16xf32> to vector<280x16xf32>
    %116 = tpu.concatenate %114, %115 in 0 : vector<8x16xf32>, vector<280x16xf32> -> vector<288x16xf32>
    %117 = arith.truncf %116 : vector<288x16xf32> to vector<288x16xbf16>
    %c48 = arith.constant 48 : index
    %c0_21 = arith.constant 0 : index
    %118 = vector.load %arg3[%c48, %c0_21] : memref<144x32xbf16, #tpu.memory_space<vmem>>, vector<16x32xbf16>
    %cst_22 = arith.constant dense<0.000000e+00> : vector<288x32xf32>
    %119 = tpu.matmul %117, %118, %cst_22 {dimension_numbers = #tpu.dot_dimension_numbers<[1], [0], [0], [1], [0, 0, 1, 1], [], []>} : vector<288x16xbf16>, vector<16x32xbf16>, vector<288x32xf32> -> vector<288x32xf32>
    %120 = arith.addf %113, %119 : vector<288x32xf32>
    %121 = arith.truncf %93 : vector<288x16xf32> to vector<288x16xbf16>
    %c64 = arith.constant 64 : index
    %c0_23 = arith.constant 0 : index
    %122 = vector.load %arg3[%c64, %c0_23] : memref<144x32xbf16, #tpu.memory_space<vmem>>, vector<16x32xbf16>
    %cst_24 = arith.constant dense<0.000000e+00> : vector<288x32xf32>
    %123 = tpu.matmul %121, %122, %cst_24 {dimension_numbers = #tpu.dot_dimension_numbers<[1], [0], [0], [1], [0, 0, 1, 1], [], []>} : vector<288x16xbf16>, vector<16x32xbf16>, vector<288x32xf32> -> vector<288x32xf32>
    %124 = arith.addf %120, %123 : vector<288x32xf32>
    %125 = vector.extract_strided_slice %93 {offsets = [8, 0], sizes = [280, 16], strides = [1, 1]} : vector<288x16xf32> to vector<280x16xf32>
    %126 = vector.extract_strided_slice %93 {offsets = [0, 0], sizes = [8, 16], strides = [1, 1]} : vector<288x16xf32> to vector<8x16xf32>
    %127 = tpu.concatenate %125, %126 in 0 : vector<280x16xf32>, vector<8x16xf32> -> vector<288x16xf32>
    %128 = arith.truncf %127 : vector<288x16xf32> to vector<288x16xbf16>
    %c80 = arith.constant 80 : index
    %c0_25 = arith.constant 0 : index
    %129 = vector.load %arg3[%c80, %c0_25] : memref<144x32xbf16, #tpu.memory_space<vmem>>, vector<16x32xbf16>
    %cst_26 = arith.constant dense<0.000000e+00> : vector<288x32xf32>
    %130 = tpu.matmul %128, %129, %cst_26 {dimension_numbers = #tpu.dot_dimension_numbers<[1], [0], [0], [1], [0, 0, 1, 1], [], []>} : vector<288x16xbf16>, vector<16x32xbf16>, vector<288x32xf32> -> vector<288x32xf32>
    %131 = arith.addf %124, %130 : vector<288x32xf32>
    %132 = vector.extract_strided_slice %93 {offsets = [40, 0], sizes = [248, 16], strides = [1, 1]} : vector<288x16xf32> to vector<248x16xf32>
    %133 = vector.extract_strided_slice %93 {offsets = [0, 0], sizes = [40, 16], strides = [1, 1]} : vector<288x16xf32> to vector<40x16xf32>
    %134 = tpu.concatenate %132, %133 in 0 : vector<248x16xf32>, vector<40x16xf32> -> vector<288x16xf32>
    %135 = arith.truncf %134 : vector<288x16xf32> to vector<288x16xbf16>
    %c96 = arith.constant 96 : index
    %c0_27 = arith.constant 0 : index
    %136 = vector.load %arg3[%c96, %c0_27] : memref<144x32xbf16, #tpu.memory_space<vmem>>, vector<16x32xbf16>
    %cst_28 = arith.constant dense<0.000000e+00> : vector<288x32xf32>
    %137 = tpu.matmul %135, %136, %cst_28 {dimension_numbers = #tpu.dot_dimension_numbers<[1], [0], [0], [1], [0, 0, 1, 1], [], []>} : vector<288x16xbf16>, vector<16x32xbf16>, vector<288x32xf32> -> vector<288x32xf32>
    %138 = arith.addf %131, %137 : vector<288x32xf32>
    %139 = vector.extract_strided_slice %93 {offsets = [48, 0], sizes = [240, 16], strides = [1, 1]} : vector<288x16xf32> to vector<240x16xf32>
    %140 = vector.extract_strided_slice %93 {offsets = [0, 0], sizes = [48, 16], strides = [1, 1]} : vector<288x16xf32> to vector<48x16xf32>
    %141 = tpu.concatenate %139, %140 in 0 : vector<240x16xf32>, vector<48x16xf32> -> vector<288x16xf32>
    %142 = arith.truncf %141 : vector<288x16xf32> to vector<288x16xbf16>
    %c112 = arith.constant 112 : index
    %c0_29 = arith.constant 0 : index
    %143 = vector.load %arg3[%c112, %c0_29] : memref<144x32xbf16, #tpu.memory_space<vmem>>, vector<16x32xbf16>
    %cst_30 = arith.constant dense<0.000000e+00> : vector<288x32xf32>
    %144 = tpu.matmul %142, %143, %cst_30 {dimension_numbers = #tpu.dot_dimension_numbers<[1], [0], [0], [1], [0, 0, 1, 1], [], []>} : vector<288x16xbf16>, vector<16x32xbf16>, vector<288x32xf32> -> vector<288x32xf32>
    %145 = arith.addf %138, %144 : vector<288x32xf32>
    %146 = vector.extract_strided_slice %93 {offsets = [56, 0], sizes = [232, 16], strides = [1, 1]} : vector<288x16xf32> to vector<232x16xf32>
    %147 = vector.extract_strided_slice %93 {offsets = [0, 0], sizes = [56, 16], strides = [1, 1]} : vector<288x16xf32> to vector<56x16xf32>
    %148 = tpu.concatenate %146, %147 in 0 : vector<232x16xf32>, vector<56x16xf32> -> vector<288x16xf32>
    %149 = arith.truncf %148 : vector<288x16xf32> to vector<288x16xbf16>
    %c128 = arith.constant 128 : index
    %c0_31 = arith.constant 0 : index
    %150 = vector.load %arg3[%c128, %c0_31] : memref<144x32xbf16, #tpu.memory_space<vmem>>, vector<16x32xbf16>
    %cst_32 = arith.constant dense<0.000000e+00> : vector<288x32xf32>
    %151 = tpu.matmul %149, %150, %cst_32 {dimension_numbers = #tpu.dot_dimension_numbers<[1], [0], [0], [1], [0, 0, 1, 1], [], []>} : vector<288x16xbf16>, vector<16x32xbf16>, vector<288x32xf32> -> vector<288x32xf32>
    %152 = arith.addf %145, %151 : vector<288x32xf32>
    %c0_33 = arith.constant 0 : index
    %c0_34 = arith.constant 0 : index
    %153 = vector.load %arg8[%c0_33, %c0_34] : memref<1x32xf32, #tpu.memory_space<vmem>>, vector<1x32xf32>
    %154 = vector.broadcast %153 : vector<1x32xf32> to vector<288x32xf32>
    %155 = arith.addf %152, %154 : vector<288x32xf32>
    %cst_35 = arith.constant 0.000000e+00 : f32
    %156 = vector.broadcast %cst_35 : f32 to vector<288x32xf32>
    %157 = arith.maximumf %155, %156 : vector<288x32xf32>
    %158 = tpu.iota {dimensions = array<i32: 0>} : vector<288x32xi32>
    %c232_i32_36 = arith.constant 232 : i32
    %159 = vector.broadcast %c232_i32_36 : i32 to vector<288x32xi32>
    %160 = arith.cmpi sge, %158, %159 : vector<288x32xi32>
    %c40_i32_37 = arith.constant 40 : i32
    %161 = vector.broadcast %c40_i32_37 : i32 to vector<288x32xi32>
    %162 = arith.cmpi sge, %158, %161 : vector<288x32xi32>
    %c48_i32_38 = arith.constant 48 : i32
    %163 = vector.broadcast %c48_i32_38 : i32 to vector<288x32xi32>
    %164 = arith.cmpi slt, %158, %163 : vector<288x32xi32>
    %165 = arith.andi %162, %164 : vector<288x32xi1>
    %166 = arith.ori %160, %165 : vector<288x32xi1>
    %c88_i32_39 = arith.constant 88 : i32
    %167 = vector.broadcast %c88_i32_39 : i32 to vector<288x32xi32>
    %168 = arith.cmpi sge, %158, %167 : vector<288x32xi32>
    %c96_i32_40 = arith.constant 96 : i32
    %169 = vector.broadcast %c96_i32_40 : i32 to vector<288x32xi32>
    %170 = arith.cmpi slt, %158, %169 : vector<288x32xi32>
    %171 = arith.andi %168, %170 : vector<288x32xi1>
    %172 = arith.ori %166, %171 : vector<288x32xi1>
    %c136_i32_41 = arith.constant 136 : i32
    %173 = vector.broadcast %c136_i32_41 : i32 to vector<288x32xi32>
    %174 = arith.cmpi sge, %158, %173 : vector<288x32xi32>
    %c144_i32_42 = arith.constant 144 : i32
    %175 = vector.broadcast %c144_i32_42 : i32 to vector<288x32xi32>
    %176 = arith.cmpi slt, %158, %175 : vector<288x32xi32>
    %177 = arith.andi %174, %176 : vector<288x32xi1>
    %178 = arith.ori %172, %177 : vector<288x32xi1>
    %c184_i32_43 = arith.constant 184 : i32
    %179 = vector.broadcast %c184_i32_43 : i32 to vector<288x32xi32>
    %180 = arith.cmpi sge, %158, %179 : vector<288x32xi32>
    %c192_i32_44 = arith.constant 192 : i32
    %181 = vector.broadcast %c192_i32_44 : i32 to vector<288x32xi32>
    %182 = arith.cmpi slt, %158, %181 : vector<288x32xi32>
    %183 = arith.andi %180, %182 : vector<288x32xi1>
    %184 = arith.ori %178, %183 : vector<288x32xi1>
    %cst_45 = arith.constant 0.000000e+00 : f32
    %185 = vector.broadcast %cst_45 : f32 to vector<288x32xf32>
    %186 = arith.select %184, %185, %157 : vector<288x32xi1>, vector<288x32xf32>
    %187 = vector.extract_strided_slice %186 {offsets = [232, 0], sizes = [56, 32], strides = [1, 1]} : vector<288x32xf32> to vector<56x32xf32>
    %188 = vector.extract_strided_slice %186 {offsets = [0, 0], sizes = [232, 32], strides = [1, 1]} : vector<288x32xf32> to vector<232x32xf32>
    %189 = tpu.concatenate %187, %188 in 0 : vector<56x32xf32>, vector<232x32xf32> -> vector<288x32xf32>
    %190 = arith.truncf %189 : vector<288x32xf32> to vector<288x32xbf16>
    %c0_46 = arith.constant 0 : index
    %c0_47 = arith.constant 0 : index
    %191 = vector.load %arg4[%c0_46, %c0_47] : memref<288x64xbf16, #tpu.memory_space<vmem>>, vector<32x64xbf16>
    %cst_48 = arith.constant dense<0.000000e+00> : vector<288x64xf32>
    %192 = tpu.matmul %190, %191, %cst_48 {dimension_numbers = #tpu.dot_dimension_numbers<[1], [0], [0], [1], [0, 0, 1, 1], [], []>} : vector<288x32xbf16>, vector<32x64xbf16>, vector<288x64xf32> -> vector<288x64xf32>
    %193 = vector.extract_strided_slice %186 {offsets = [240, 0], sizes = [48, 32], strides = [1, 1]} : vector<288x32xf32> to vector<48x32xf32>
    %194 = vector.extract_strided_slice %186 {offsets = [0, 0], sizes = [240, 32], strides = [1, 1]} : vector<288x32xf32> to vector<240x32xf32>
    %195 = tpu.concatenate %193, %194 in 0 : vector<48x32xf32>, vector<240x32xf32> -> vector<288x32xf32>
    %196 = arith.truncf %195 : vector<288x32xf32> to vector<288x32xbf16>
    %c32_49 = arith.constant 32 : index
    %c0_50 = arith.constant 0 : index
    %197 = vector.load %arg4[%c32_49, %c0_50] : memref<288x64xbf16, #tpu.memory_space<vmem>>, vector<32x64xbf16>
    %cst_51 = arith.constant dense<0.000000e+00> : vector<288x64xf32>
    %198 = tpu.matmul %196, %197, %cst_51 {dimension_numbers = #tpu.dot_dimension_numbers<[1], [0], [0], [1], [0, 0, 1, 1], [], []>} : vector<288x32xbf16>, vector<32x64xbf16>, vector<288x64xf32> -> vector<288x64xf32>
    %199 = arith.addf %192, %198 : vector<288x64xf32>
    %200 = vector.extract_strided_slice %186 {offsets = [248, 0], sizes = [40, 32], strides = [1, 1]} : vector<288x32xf32> to vector<40x32xf32>
    %201 = vector.extract_strided_slice %186 {offsets = [0, 0], sizes = [248, 32], strides = [1, 1]} : vector<288x32xf32> to vector<248x32xf32>
    %202 = tpu.concatenate %200, %201 in 0 : vector<40x32xf32>, vector<248x32xf32> -> vector<288x32xf32>
    %203 = arith.truncf %202 : vector<288x32xf32> to vector<288x32xbf16>
    %c64_52 = arith.constant 64 : index
    %c0_53 = arith.constant 0 : index
    %204 = vector.load %arg4[%c64_52, %c0_53] : memref<288x64xbf16, #tpu.memory_space<vmem>>, vector<32x64xbf16>
    %cst_54 = arith.constant dense<0.000000e+00> : vector<288x64xf32>
    %205 = tpu.matmul %203, %204, %cst_54 {dimension_numbers = #tpu.dot_dimension_numbers<[1], [0], [0], [1], [0, 0, 1, 1], [], []>} : vector<288x32xbf16>, vector<32x64xbf16>, vector<288x64xf32> -> vector<288x64xf32>
    %206 = arith.addf %199, %205 : vector<288x64xf32>
    %207 = vector.extract_strided_slice %186 {offsets = [280, 0], sizes = [8, 32], strides = [1, 1]} : vector<288x32xf32> to vector<8x32xf32>
    %208 = vector.extract_strided_slice %186 {offsets = [0, 0], sizes = [280, 32], strides = [1, 1]} : vector<288x32xf32> to vector<280x32xf32>
    %209 = tpu.concatenate %207, %208 in 0 : vector<8x32xf32>, vector<280x32xf32> -> vector<288x32xf32>
    %210 = arith.truncf %209 : vector<288x32xf32> to vector<288x32xbf16>
    %c96_55 = arith.constant 96 : index
    %c0_56 = arith.constant 0 : index
    %211 = vector.load %arg4[%c96_55, %c0_56] : memref<288x64xbf16, #tpu.memory_space<vmem>>, vector<32x64xbf16>
    %cst_57 = arith.constant dense<0.000000e+00> : vector<288x64xf32>
    %212 = tpu.matmul %210, %211, %cst_57 {dimension_numbers = #tpu.dot_dimension_numbers<[1], [0], [0], [1], [0, 0, 1, 1], [], []>} : vector<288x32xbf16>, vector<32x64xbf16>, vector<288x64xf32> -> vector<288x64xf32>
    %213 = arith.addf %206, %212 : vector<288x64xf32>
    %214 = arith.truncf %186 : vector<288x32xf32> to vector<288x32xbf16>
    %c128_58 = arith.constant 128 : index
    %c0_59 = arith.constant 0 : index
    %215 = vector.load %arg4[%c128_58, %c0_59] : memref<288x64xbf16, #tpu.memory_space<vmem>>, vector<32x64xbf16>
    %cst_60 = arith.constant dense<0.000000e+00> : vector<288x64xf32>
    %216 = tpu.matmul %214, %215, %cst_60 {dimension_numbers = #tpu.dot_dimension_numbers<[1], [0], [0], [1], [0, 0, 1, 1], [], []>} : vector<288x32xbf16>, vector<32x64xbf16>, vector<288x64xf32> -> vector<288x64xf32>
    %217 = arith.addf %213, %216 : vector<288x64xf32>
    %218 = vector.extract_strided_slice %186 {offsets = [8, 0], sizes = [280, 32], strides = [1, 1]} : vector<288x32xf32> to vector<280x32xf32>
    %219 = vector.extract_strided_slice %186 {offsets = [0, 0], sizes = [8, 32], strides = [1, 1]} : vector<288x32xf32> to vector<8x32xf32>
    %220 = tpu.concatenate %218, %219 in 0 : vector<280x32xf32>, vector<8x32xf32> -> vector<288x32xf32>
    %221 = arith.truncf %220 : vector<288x32xf32> to vector<288x32xbf16>
    %c160 = arith.constant 160 : index
    %c0_61 = arith.constant 0 : index
    %222 = vector.load %arg4[%c160, %c0_61] : memref<288x64xbf16, #tpu.memory_space<vmem>>, vector<32x64xbf16>
    %cst_62 = arith.constant dense<0.000000e+00> : vector<288x64xf32>
    %223 = tpu.matmul %221, %222, %cst_62 {dimension_numbers = #tpu.dot_dimension_numbers<[1], [0], [0], [1], [0, 0, 1, 1], [], []>} : vector<288x32xbf16>, vector<32x64xbf16>, vector<288x64xf32> -> vector<288x64xf32>
    %224 = arith.addf %217, %223 : vector<288x64xf32>
    %225 = vector.extract_strided_slice %186 {offsets = [40, 0], sizes = [248, 32], strides = [1, 1]} : vector<288x32xf32> to vector<248x32xf32>
    %226 = vector.extract_strided_slice %186 {offsets = [0, 0], sizes = [40, 32], strides = [1, 1]} : vector<288x32xf32> to vector<40x32xf32>
    %227 = tpu.concatenate %225, %226 in 0 : vector<248x32xf32>, vector<40x32xf32> -> vector<288x32xf32>
    %228 = arith.truncf %227 : vector<288x32xf32> to vector<288x32xbf16>
    %c192 = arith.constant 192 : index
    %c0_63 = arith.constant 0 : index
    %229 = vector.load %arg4[%c192, %c0_63] : memref<288x64xbf16, #tpu.memory_space<vmem>>, vector<32x64xbf16>
    %cst_64 = arith.constant dense<0.000000e+00> : vector<288x64xf32>
    %230 = tpu.matmul %228, %229, %cst_64 {dimension_numbers = #tpu.dot_dimension_numbers<[1], [0], [0], [1], [0, 0, 1, 1], [], []>} : vector<288x32xbf16>, vector<32x64xbf16>, vector<288x64xf32> -> vector<288x64xf32>
    %231 = arith.addf %224, %230 : vector<288x64xf32>
    %232 = vector.extract_strided_slice %186 {offsets = [48, 0], sizes = [240, 32], strides = [1, 1]} : vector<288x32xf32> to vector<240x32xf32>
    %233 = vector.extract_strided_slice %186 {offsets = [0, 0], sizes = [48, 32], strides = [1, 1]} : vector<288x32xf32> to vector<48x32xf32>
    %234 = tpu.concatenate %232, %233 in 0 : vector<240x32xf32>, vector<48x32xf32> -> vector<288x32xf32>
    %235 = arith.truncf %234 : vector<288x32xf32> to vector<288x32xbf16>
    %c224 = arith.constant 224 : index
    %c0_65 = arith.constant 0 : index
    %236 = vector.load %arg4[%c224, %c0_65] : memref<288x64xbf16, #tpu.memory_space<vmem>>, vector<32x64xbf16>
    %cst_66 = arith.constant dense<0.000000e+00> : vector<288x64xf32>
    %237 = tpu.matmul %235, %236, %cst_66 {dimension_numbers = #tpu.dot_dimension_numbers<[1], [0], [0], [1], [0, 0, 1, 1], [], []>} : vector<288x32xbf16>, vector<32x64xbf16>, vector<288x64xf32> -> vector<288x64xf32>
    %238 = arith.addf %231, %237 : vector<288x64xf32>
    %239 = vector.extract_strided_slice %186 {offsets = [56, 0], sizes = [232, 32], strides = [1, 1]} : vector<288x32xf32> to vector<232x32xf32>
    %240 = vector.extract_strided_slice %186 {offsets = [0, 0], sizes = [56, 32], strides = [1, 1]} : vector<288x32xf32> to vector<56x32xf32>
    %241 = tpu.concatenate %239, %240 in 0 : vector<232x32xf32>, vector<56x32xf32> -> vector<288x32xf32>
    %242 = arith.truncf %241 : vector<288x32xf32> to vector<288x32xbf16>
    %c256 = arith.constant 256 : index
    %c0_67 = arith.constant 0 : index
    %243 = vector.load %arg4[%c256, %c0_67] : memref<288x64xbf16, #tpu.memory_space<vmem>>, vector<32x64xbf16>
    %cst_68 = arith.constant dense<0.000000e+00> : vector<288x64xf32>
    %244 = tpu.matmul %242, %243, %cst_68 {dimension_numbers = #tpu.dot_dimension_numbers<[1], [0], [0], [1], [0, 0, 1, 1], [], []>} : vector<288x32xbf16>, vector<32x64xbf16>, vector<288x64xf32> -> vector<288x64xf32>
    %245 = arith.addf %238, %244 : vector<288x64xf32>
    %c0_69 = arith.constant 0 : index
    %c0_70 = arith.constant 0 : index
    %246 = vector.load %arg9[%c0_69, %c0_70] : memref<1x64xf32, #tpu.memory_space<vmem>>, vector<1x64xf32>
    %247 = vector.broadcast %246 : vector<1x64xf32> to vector<288x64xf32>
    %248 = arith.addf %245, %247 : vector<288x64xf32>
    %cst_71 = arith.constant 0.000000e+00 : f32
    %249 = vector.broadcast %cst_71 : f32 to vector<288x64xf32>
    %250 = arith.maximumf %248, %249 : vector<288x64xf32>
    %251 = vector.extract_strided_slice %250 {offsets = [0, 0], sizes = [8, 64], strides = [1, 1]} : vector<288x64xf32> to vector<8x64xf32>
    %252 = arith.truncf %251 : vector<8x64xf32> to vector<8x64xbf16>
    %c0_72 = arith.constant 0 : index
    %c0_73 = arith.constant 0 : index
    %253 = vector.load %arg5[%c0_72, %c0_73] : memref<1600x1024xbf16, #tpu.memory_space<vmem>>, vector<64x1024xbf16>
    %cst_74 = arith.constant dense<0.000000e+00> : vector<8x1024xf32>
    %254 = tpu.matmul %252, %253, %cst_74 {dimension_numbers = #tpu.dot_dimension_numbers<[1], [0], [0], [1], [0, 0, 1, 1], [], []>} : vector<8x64xbf16>, vector<64x1024xbf16>, vector<8x1024xf32> -> vector<8x1024xf32>
    %255 = vector.extract_strided_slice %250 {offsets = [8, 0], sizes = [8, 64], strides = [1, 1]} : vector<288x64xf32> to vector<8x64xf32>
    %256 = arith.truncf %255 : vector<8x64xf32> to vector<8x64xbf16>
    %c64_75 = arith.constant 64 : index
    %c0_76 = arith.constant 0 : index
    %257 = vector.load %arg5[%c64_75, %c0_76] : memref<1600x1024xbf16, #tpu.memory_space<vmem>>, vector<64x1024xbf16>
    %cst_77 = arith.constant dense<0.000000e+00> : vector<8x1024xf32>
    %258 = tpu.matmul %256, %257, %cst_77 {dimension_numbers = #tpu.dot_dimension_numbers<[1], [0], [0], [1], [0, 0, 1, 1], [], []>} : vector<8x64xbf16>, vector<64x1024xbf16>, vector<8x1024xf32> -> vector<8x1024xf32>
    %259 = arith.addf %254, %258 : vector<8x1024xf32>
    %260 = vector.extract_strided_slice %250 {offsets = [16, 0], sizes = [8, 64], strides = [1, 1]} : vector<288x64xf32> to vector<8x64xf32>
    %261 = arith.truncf %260 : vector<8x64xf32> to vector<8x64xbf16>
    %c128_78 = arith.constant 128 : index
    %c0_79 = arith.constant 0 : index
    %262 = vector.load %arg5[%c128_78, %c0_79] : memref<1600x1024xbf16, #tpu.memory_space<vmem>>, vector<64x1024xbf16>
    %cst_80 = arith.constant dense<0.000000e+00> : vector<8x1024xf32>
    %263 = tpu.matmul %261, %262, %cst_80 {dimension_numbers = #tpu.dot_dimension_numbers<[1], [0], [0], [1], [0, 0, 1, 1], [], []>} : vector<8x64xbf16>, vector<64x1024xbf16>, vector<8x1024xf32> -> vector<8x1024xf32>
    %264 = arith.addf %259, %263 : vector<8x1024xf32>
    %265 = vector.extract_strided_slice %250 {offsets = [24, 0], sizes = [8, 64], strides = [1, 1]} : vector<288x64xf32> to vector<8x64xf32>
    %266 = arith.truncf %265 : vector<8x64xf32> to vector<8x64xbf16>
    %c192_81 = arith.constant 192 : index
    %c0_82 = arith.constant 0 : index
    %267 = vector.load %arg5[%c192_81, %c0_82] : memref<1600x1024xbf16, #tpu.memory_space<vmem>>, vector<64x1024xbf16>
    %cst_83 = arith.constant dense<0.000000e+00> : vector<8x1024xf32>
    %268 = tpu.matmul %266, %267, %cst_83 {dimension_numbers = #tpu.dot_dimension_numbers<[1], [0], [0], [1], [0, 0, 1, 1], [], []>} : vector<8x64xbf16>, vector<64x1024xbf16>, vector<8x1024xf32> -> vector<8x1024xf32>
    %269 = arith.addf %264, %268 : vector<8x1024xf32>
    %270 = vector.extract_strided_slice %250 {offsets = [32, 0], sizes = [8, 64], strides = [1, 1]} : vector<288x64xf32> to vector<8x64xf32>
    %271 = arith.truncf %270 : vector<8x64xf32> to vector<8x64xbf16>
    %c256_84 = arith.constant 256 : index
    %c0_85 = arith.constant 0 : index
    %272 = vector.load %arg5[%c256_84, %c0_85] : memref<1600x1024xbf16, #tpu.memory_space<vmem>>, vector<64x1024xbf16>
    %cst_86 = arith.constant dense<0.000000e+00> : vector<8x1024xf32>
    %273 = tpu.matmul %271, %272, %cst_86 {dimension_numbers = #tpu.dot_dimension_numbers<[1], [0], [0], [1], [0, 0, 1, 1], [], []>} : vector<8x64xbf16>, vector<64x1024xbf16>, vector<8x1024xf32> -> vector<8x1024xf32>
    %274 = arith.addf %269, %273 : vector<8x1024xf32>
    %275 = vector.extract_strided_slice %250 {offsets = [48, 0], sizes = [8, 64], strides = [1, 1]} : vector<288x64xf32> to vector<8x64xf32>
    %276 = arith.truncf %275 : vector<8x64xf32> to vector<8x64xbf16>
    %c320 = arith.constant 320 : index
    %c0_87 = arith.constant 0 : index
    %277 = vector.load %arg5[%c320, %c0_87] : memref<1600x1024xbf16, #tpu.memory_space<vmem>>, vector<64x1024xbf16>
    %cst_88 = arith.constant dense<0.000000e+00> : vector<8x1024xf32>
    %278 = tpu.matmul %276, %277, %cst_88 {dimension_numbers = #tpu.dot_dimension_numbers<[1], [0], [0], [1], [0, 0, 1, 1], [], []>} : vector<8x64xbf16>, vector<64x1024xbf16>, vector<8x1024xf32> -> vector<8x1024xf32>
    %279 = arith.addf %274, %278 : vector<8x1024xf32>
    %280 = vector.extract_strided_slice %250 {offsets = [56, 0], sizes = [8, 64], strides = [1, 1]} : vector<288x64xf32> to vector<8x64xf32>
    %281 = arith.truncf %280 : vector<8x64xf32> to vector<8x64xbf16>
    %c384 = arith.constant 384 : index
    %c0_89 = arith.constant 0 : index
    %282 = vector.load %arg5[%c384, %c0_89] : memref<1600x1024xbf16, #tpu.memory_space<vmem>>, vector<64x1024xbf16>
    %cst_90 = arith.constant dense<0.000000e+00> : vector<8x1024xf32>
    %283 = tpu.matmul %281, %282, %cst_90 {dimension_numbers = #tpu.dot_dimension_numbers<[1], [0], [0], [1], [0, 0, 1, 1], [], []>} : vector<8x64xbf16>, vector<64x1024xbf16>, vector<8x1024xf32> -> vector<8x1024xf32>
    %284 = arith.addf %279, %283 : vector<8x1024xf32>
    %285 = vector.extract_strided_slice %250 {offsets = [64, 0], sizes = [8, 64], strides = [1, 1]} : vector<288x64xf32> to vector<8x64xf32>
    %286 = arith.truncf %285 : vector<8x64xf32> to vector<8x64xbf16>
    %c448 = arith.constant 448 : index
    %c0_91 = arith.constant 0 : index
    %287 = vector.load %arg5[%c448, %c0_91] : memref<1600x1024xbf16, #tpu.memory_space<vmem>>, vector<64x1024xbf16>
    %cst_92 = arith.constant dense<0.000000e+00> : vector<8x1024xf32>
    %288 = tpu.matmul %286, %287, %cst_92 {dimension_numbers = #tpu.dot_dimension_numbers<[1], [0], [0], [1], [0, 0, 1, 1], [], []>} : vector<8x64xbf16>, vector<64x1024xbf16>, vector<8x1024xf32> -> vector<8x1024xf32>
    %289 = arith.addf %284, %288 : vector<8x1024xf32>
    %290 = vector.extract_strided_slice %250 {offsets = [72, 0], sizes = [8, 64], strides = [1, 1]} : vector<288x64xf32> to vector<8x64xf32>
    %291 = arith.truncf %290 : vector<8x64xf32> to vector<8x64xbf16>
    %c512 = arith.constant 512 : index
    %c0_93 = arith.constant 0 : index
    %292 = vector.load %arg5[%c512, %c0_93] : memref<1600x1024xbf16, #tpu.memory_space<vmem>>, vector<64x1024xbf16>
    %cst_94 = arith.constant dense<0.000000e+00> : vector<8x1024xf32>
    %293 = tpu.matmul %291, %292, %cst_94 {dimension_numbers = #tpu.dot_dimension_numbers<[1], [0], [0], [1], [0, 0, 1, 1], [], []>} : vector<8x64xbf16>, vector<64x1024xbf16>, vector<8x1024xf32> -> vector<8x1024xf32>
    %294 = arith.addf %289, %293 : vector<8x1024xf32>
    %295 = vector.extract_strided_slice %250 {offsets = [80, 0], sizes = [8, 64], strides = [1, 1]} : vector<288x64xf32> to vector<8x64xf32>
    %296 = arith.truncf %295 : vector<8x64xf32> to vector<8x64xbf16>
    %c576 = arith.constant 576 : index
    %c0_95 = arith.constant 0 : index
    %297 = vector.load %arg5[%c576, %c0_95] : memref<1600x1024xbf16, #tpu.memory_space<vmem>>, vector<64x1024xbf16>
    %cst_96 = arith.constant dense<0.000000e+00> : vector<8x1024xf32>
    %298 = tpu.matmul %296, %297, %cst_96 {dimension_numbers = #tpu.dot_dimension_numbers<[1], [0], [0], [1], [0, 0, 1, 1], [], []>} : vector<8x64xbf16>, vector<64x1024xbf16>, vector<8x1024xf32> -> vector<8x1024xf32>
    %299 = arith.addf %294, %298 : vector<8x1024xf32>
    %300 = vector.extract_strided_slice %250 {offsets = [96, 0], sizes = [8, 64], strides = [1, 1]} : vector<288x64xf32> to vector<8x64xf32>
    %301 = arith.truncf %300 : vector<8x64xf32> to vector<8x64xbf16>
    %c640 = arith.constant 640 : index
    %c0_97 = arith.constant 0 : index
    %302 = vector.load %arg5[%c640, %c0_97] : memref<1600x1024xbf16, #tpu.memory_space<vmem>>, vector<64x1024xbf16>
    %cst_98 = arith.constant dense<0.000000e+00> : vector<8x1024xf32>
    %303 = tpu.matmul %301, %302, %cst_98 {dimension_numbers = #tpu.dot_dimension_numbers<[1], [0], [0], [1], [0, 0, 1, 1], [], []>} : vector<8x64xbf16>, vector<64x1024xbf16>, vector<8x1024xf32> -> vector<8x1024xf32>
    %304 = arith.addf %299, %303 : vector<8x1024xf32>
    %305 = vector.extract_strided_slice %250 {offsets = [104, 0], sizes = [8, 64], strides = [1, 1]} : vector<288x64xf32> to vector<8x64xf32>
    %306 = arith.truncf %305 : vector<8x64xf32> to vector<8x64xbf16>
    %c704 = arith.constant 704 : index
    %c0_99 = arith.constant 0 : index
    %307 = vector.load %arg5[%c704, %c0_99] : memref<1600x1024xbf16, #tpu.memory_space<vmem>>, vector<64x1024xbf16>
    %cst_100 = arith.constant dense<0.000000e+00> : vector<8x1024xf32>
    %308 = tpu.matmul %306, %307, %cst_100 {dimension_numbers = #tpu.dot_dimension_numbers<[1], [0], [0], [1], [0, 0, 1, 1], [], []>} : vector<8x64xbf16>, vector<64x1024xbf16>, vector<8x1024xf32> -> vector<8x1024xf32>
    %309 = arith.addf %304, %308 : vector<8x1024xf32>
    %310 = vector.extract_strided_slice %250 {offsets = [112, 0], sizes = [8, 64], strides = [1, 1]} : vector<288x64xf32> to vector<8x64xf32>
    %311 = arith.truncf %310 : vector<8x64xf32> to vector<8x64xbf16>
    %c768 = arith.constant 768 : index
    %c0_101 = arith.constant 0 : index
    %312 = vector.load %arg5[%c768, %c0_101] : memref<1600x1024xbf16, #tpu.memory_space<vmem>>, vector<64x1024xbf16>
    %cst_102 = arith.constant dense<0.000000e+00> : vector<8x1024xf32>
    %313 = tpu.matmul %311, %312, %cst_102 {dimension_numbers = #tpu.dot_dimension_numbers<[1], [0], [0], [1], [0, 0, 1, 1], [], []>} : vector<8x64xbf16>, vector<64x1024xbf16>, vector<8x1024xf32> -> vector<8x1024xf32>
    %314 = arith.addf %309, %313 : vector<8x1024xf32>
    %315 = vector.extract_strided_slice %250 {offsets = [120, 0], sizes = [8, 64], strides = [1, 1]} : vector<288x64xf32> to vector<8x64xf32>
    %316 = arith.truncf %315 : vector<8x64xf32> to vector<8x64xbf16>
    %c832 = arith.constant 832 : index
    %c0_103 = arith.constant 0 : index
    %317 = vector.load %arg5[%c832, %c0_103] : memref<1600x1024xbf16, #tpu.memory_space<vmem>>, vector<64x1024xbf16>
    %cst_104 = arith.constant dense<0.000000e+00> : vector<8x1024xf32>
    %318 = tpu.matmul %316, %317, %cst_104 {dimension_numbers = #tpu.dot_dimension_numbers<[1], [0], [0], [1], [0, 0, 1, 1], [], []>} : vector<8x64xbf16>, vector<64x1024xbf16>, vector<8x1024xf32> -> vector<8x1024xf32>
    %319 = arith.addf %314, %318 : vector<8x1024xf32>
    %320 = vector.extract_strided_slice %250 {offsets = [128, 0], sizes = [8, 64], strides = [1, 1]} : vector<288x64xf32> to vector<8x64xf32>
    %321 = arith.truncf %320 : vector<8x64xf32> to vector<8x64xbf16>
    %c896 = arith.constant 896 : index
    %c0_105 = arith.constant 0 : index
    %322 = vector.load %arg5[%c896, %c0_105] : memref<1600x1024xbf16, #tpu.memory_space<vmem>>, vector<64x1024xbf16>
    %cst_106 = arith.constant dense<0.000000e+00> : vector<8x1024xf32>
    %323 = tpu.matmul %321, %322, %cst_106 {dimension_numbers = #tpu.dot_dimension_numbers<[1], [0], [0], [1], [0, 0, 1, 1], [], []>} : vector<8x64xbf16>, vector<64x1024xbf16>, vector<8x1024xf32> -> vector<8x1024xf32>
    %324 = arith.addf %319, %323 : vector<8x1024xf32>
    %325 = vector.extract_strided_slice %250 {offsets = [144, 0], sizes = [8, 64], strides = [1, 1]} : vector<288x64xf32> to vector<8x64xf32>
    %326 = arith.truncf %325 : vector<8x64xf32> to vector<8x64xbf16>
    %c960 = arith.constant 960 : index
    %c0_107 = arith.constant 0 : index
    %327 = vector.load %arg5[%c960, %c0_107] : memref<1600x1024xbf16, #tpu.memory_space<vmem>>, vector<64x1024xbf16>
    %cst_108 = arith.constant dense<0.000000e+00> : vector<8x1024xf32>
    %328 = tpu.matmul %326, %327, %cst_108 {dimension_numbers = #tpu.dot_dimension_numbers<[1], [0], [0], [1], [0, 0, 1, 1], [], []>} : vector<8x64xbf16>, vector<64x1024xbf16>, vector<8x1024xf32> -> vector<8x1024xf32>
    %329 = arith.addf %324, %328 : vector<8x1024xf32>
    %330 = vector.extract_strided_slice %250 {offsets = [152, 0], sizes = [8, 64], strides = [1, 1]} : vector<288x64xf32> to vector<8x64xf32>
    %331 = arith.truncf %330 : vector<8x64xf32> to vector<8x64xbf16>
    %c1024 = arith.constant 1024 : index
    %c0_109 = arith.constant 0 : index
    %332 = vector.load %arg5[%c1024, %c0_109] : memref<1600x1024xbf16, #tpu.memory_space<vmem>>, vector<64x1024xbf16>
    %cst_110 = arith.constant dense<0.000000e+00> : vector<8x1024xf32>
    %333 = tpu.matmul %331, %332, %cst_110 {dimension_numbers = #tpu.dot_dimension_numbers<[1], [0], [0], [1], [0, 0, 1, 1], [], []>} : vector<8x64xbf16>, vector<64x1024xbf16>, vector<8x1024xf32> -> vector<8x1024xf32>
    %334 = arith.addf %329, %333 : vector<8x1024xf32>
    %335 = vector.extract_strided_slice %250 {offsets = [160, 0], sizes = [8, 64], strides = [1, 1]} : vector<288x64xf32> to vector<8x64xf32>
    %336 = arith.truncf %335 : vector<8x64xf32> to vector<8x64xbf16>
    %c1088 = arith.constant 1088 : index
    %c0_111 = arith.constant 0 : index
    %337 = vector.load %arg5[%c1088, %c0_111] : memref<1600x1024xbf16, #tpu.memory_space<vmem>>, vector<64x1024xbf16>
    %cst_112 = arith.constant dense<0.000000e+00> : vector<8x1024xf32>
    %338 = tpu.matmul %336, %337, %cst_112 {dimension_numbers = #tpu.dot_dimension_numbers<[1], [0], [0], [1], [0, 0, 1, 1], [], []>} : vector<8x64xbf16>, vector<64x1024xbf16>, vector<8x1024xf32> -> vector<8x1024xf32>
    %339 = arith.addf %334, %338 : vector<8x1024xf32>
    %340 = vector.extract_strided_slice %250 {offsets = [168, 0], sizes = [8, 64], strides = [1, 1]} : vector<288x64xf32> to vector<8x64xf32>
    %341 = arith.truncf %340 : vector<8x64xf32> to vector<8x64xbf16>
    %c1152 = arith.constant 1152 : index
    %c0_113 = arith.constant 0 : index
    %342 = vector.load %arg5[%c1152, %c0_113] : memref<1600x1024xbf16, #tpu.memory_space<vmem>>, vector<64x1024xbf16>
    %cst_114 = arith.constant dense<0.000000e+00> : vector<8x1024xf32>
    %343 = tpu.matmul %341, %342, %cst_114 {dimension_numbers = #tpu.dot_dimension_numbers<[1], [0], [0], [1], [0, 0, 1, 1], [], []>} : vector<8x64xbf16>, vector<64x1024xbf16>, vector<8x1024xf32> -> vector<8x1024xf32>
    %344 = arith.addf %339, %343 : vector<8x1024xf32>
    %345 = vector.extract_strided_slice %250 {offsets = [176, 0], sizes = [8, 64], strides = [1, 1]} : vector<288x64xf32> to vector<8x64xf32>
    %346 = arith.truncf %345 : vector<8x64xf32> to vector<8x64xbf16>
    %c1216 = arith.constant 1216 : index
    %c0_115 = arith.constant 0 : index
    %347 = vector.load %arg5[%c1216, %c0_115] : memref<1600x1024xbf16, #tpu.memory_space<vmem>>, vector<64x1024xbf16>
    %cst_116 = arith.constant dense<0.000000e+00> : vector<8x1024xf32>
    %348 = tpu.matmul %346, %347, %cst_116 {dimension_numbers = #tpu.dot_dimension_numbers<[1], [0], [0], [1], [0, 0, 1, 1], [], []>} : vector<8x64xbf16>, vector<64x1024xbf16>, vector<8x1024xf32> -> vector<8x1024xf32>
    %349 = arith.addf %344, %348 : vector<8x1024xf32>
    %350 = vector.extract_strided_slice %250 {offsets = [192, 0], sizes = [8, 64], strides = [1, 1]} : vector<288x64xf32> to vector<8x64xf32>
    %351 = arith.truncf %350 : vector<8x64xf32> to vector<8x64xbf16>
    %c1280 = arith.constant 1280 : index
    %c0_117 = arith.constant 0 : index
    %352 = vector.load %arg5[%c1280, %c0_117] : memref<1600x1024xbf16, #tpu.memory_space<vmem>>, vector<64x1024xbf16>
    %cst_118 = arith.constant dense<0.000000e+00> : vector<8x1024xf32>
    %353 = tpu.matmul %351, %352, %cst_118 {dimension_numbers = #tpu.dot_dimension_numbers<[1], [0], [0], [1], [0, 0, 1, 1], [], []>} : vector<8x64xbf16>, vector<64x1024xbf16>, vector<8x1024xf32> -> vector<8x1024xf32>
    %354 = arith.addf %349, %353 : vector<8x1024xf32>
    %355 = vector.extract_strided_slice %250 {offsets = [200, 0], sizes = [8, 64], strides = [1, 1]} : vector<288x64xf32> to vector<8x64xf32>
    %356 = arith.truncf %355 : vector<8x64xf32> to vector<8x64xbf16>
    %c1344 = arith.constant 1344 : index
    %c0_119 = arith.constant 0 : index
    %357 = vector.load %arg5[%c1344, %c0_119] : memref<1600x1024xbf16, #tpu.memory_space<vmem>>, vector<64x1024xbf16>
    %cst_120 = arith.constant dense<0.000000e+00> : vector<8x1024xf32>
    %358 = tpu.matmul %356, %357, %cst_120 {dimension_numbers = #tpu.dot_dimension_numbers<[1], [0], [0], [1], [0, 0, 1, 1], [], []>} : vector<8x64xbf16>, vector<64x1024xbf16>, vector<8x1024xf32> -> vector<8x1024xf32>
    %359 = arith.addf %354, %358 : vector<8x1024xf32>
    %360 = vector.extract_strided_slice %250 {offsets = [208, 0], sizes = [8, 64], strides = [1, 1]} : vector<288x64xf32> to vector<8x64xf32>
    %361 = arith.truncf %360 : vector<8x64xf32> to vector<8x64xbf16>
    %c1408 = arith.constant 1408 : index
    %c0_121 = arith.constant 0 : index
    %362 = vector.load %arg5[%c1408, %c0_121] : memref<1600x1024xbf16, #tpu.memory_space<vmem>>, vector<64x1024xbf16>
    %cst_122 = arith.constant dense<0.000000e+00> : vector<8x1024xf32>
    %363 = tpu.matmul %361, %362, %cst_122 {dimension_numbers = #tpu.dot_dimension_numbers<[1], [0], [0], [1], [0, 0, 1, 1], [], []>} : vector<8x64xbf16>, vector<64x1024xbf16>, vector<8x1024xf32> -> vector<8x1024xf32>
    %364 = arith.addf %359, %363 : vector<8x1024xf32>
    %365 = vector.extract_strided_slice %250 {offsets = [216, 0], sizes = [8, 64], strides = [1, 1]} : vector<288x64xf32> to vector<8x64xf32>
    %366 = arith.truncf %365 : vector<8x64xf32> to vector<8x64xbf16>
    %c1472 = arith.constant 1472 : index
    %c0_123 = arith.constant 0 : index
    %367 = vector.load %arg5[%c1472, %c0_123] : memref<1600x1024xbf16, #tpu.memory_space<vmem>>, vector<64x1024xbf16>
    %cst_124 = arith.constant dense<0.000000e+00> : vector<8x1024xf32>
    %368 = tpu.matmul %366, %367, %cst_124 {dimension_numbers = #tpu.dot_dimension_numbers<[1], [0], [0], [1], [0, 0, 1, 1], [], []>} : vector<8x64xbf16>, vector<64x1024xbf16>, vector<8x1024xf32> -> vector<8x1024xf32>
    %369 = arith.addf %364, %368 : vector<8x1024xf32>
    %370 = vector.extract_strided_slice %250 {offsets = [224, 0], sizes = [8, 64], strides = [1, 1]} : vector<288x64xf32> to vector<8x64xf32>
    %371 = arith.truncf %370 : vector<8x64xf32> to vector<8x64xbf16>
    %c1536 = arith.constant 1536 : index
    %c0_125 = arith.constant 0 : index
    %372 = vector.load %arg5[%c1536, %c0_125] : memref<1600x1024xbf16, #tpu.memory_space<vmem>>, vector<64x1024xbf16>
    %cst_126 = arith.constant dense<0.000000e+00> : vector<8x1024xf32>
    %373 = tpu.matmul %371, %372, %cst_126 {dimension_numbers = #tpu.dot_dimension_numbers<[1], [0], [0], [1], [0, 0, 1, 1], [], []>} : vector<8x64xbf16>, vector<64x1024xbf16>, vector<8x1024xf32> -> vector<8x1024xf32>
    %374 = arith.addf %369, %373 : vector<8x1024xf32>
    %c0_127 = arith.constant 0 : index
    %c0_128 = arith.constant 0 : index
    %375 = vector.load %arg10[%c0_127, %c0_128] : memref<1x1024xf32, #tpu.memory_space<vmem>>, vector<1x1024xf32>
    %376 = vector.broadcast %375 : vector<1x1024xf32> to vector<8x1024xf32>
    %377 = arith.addf %374, %376 : vector<8x1024xf32>
    %cst_129 = arith.constant 0.000000e+00 : f32
    %378 = vector.broadcast %cst_129 : f32 to vector<8x1024xf32>
    %379 = arith.maximumf %377, %378 : vector<8x1024xf32>
    %380 = arith.truncf %379 : vector<8x1024xf32> to vector<8x1024xbf16>
    %c0_130 = arith.constant 0 : index
    %c0_131 = arith.constant 0 : index
    %381 = vector.load %arg6[%c0_130, %c0_131] : memref<1024x128xbf16, #tpu.memory_space<vmem>>, vector<1024x128xbf16>
    %cst_132 = arith.constant dense<0.000000e+00> : vector<8x128xf32>
    %382 = tpu.matmul %380, %381, %cst_132 {dimension_numbers = #tpu.dot_dimension_numbers<[1], [0], [0], [1], [0, 0, 1, 1], [], []>} : vector<8x1024xbf16>, vector<1024x128xbf16>, vector<8x128xf32> -> vector<8x128xf32>
    %c0_133 = arith.constant 0 : index
    %c0_134 = arith.constant 0 : index
    %383 = vector.load %arg11[%c0_133, %c0_134] : memref<1x128xf32, #tpu.memory_space<vmem>>, vector<1x128xf32>
    %384 = vector.broadcast %383 : vector<1x128xf32> to vector<8x128xf32>
    %385 = arith.addf %382, %384 : vector<8x128xf32>
    %c0_135 = arith.constant 0 : index
    %c0_136 = arith.constant 0 : index
    %386 = vector.load %arg12[%c0_135, %c0_136] : memref<8x128xf32, #tpu.memory_space<vmem>>, vector<8x128xf32>
    tpu.vector_store %arg12[%c0_135, %c0_136], %385 {strides = array<i32>} : memref<8x128xf32, #tpu.memory_space<vmem>>, vector<8x128xf32>,
    return
  }
  func.func @transform_0(%arg0: i32) -> (i32, i32) {
    %c0_i32 = arith.constant 0 : i32
    %c0_i32_0 = arith.constant 0 : i32
    return %arg0, %c0_i32 : i32, i32
  }
  func.func @transform_1(%arg0: i32) -> (i32, i32) {
    %c0_i32 = arith.constant 0 : i32
    %c0_i32_0 = arith.constant 0 : i32
    %c0_i32_1 = arith.constant 0 : i32
    return %c0_i32, %c0_i32_0 : i32, i32
  }
  func.func @transform_2(%arg0: i32) -> (i32, i32) {
    %c0_i32 = arith.constant 0 : i32
    %c0_i32_0 = arith.constant 0 : i32
    %c0_i32_1 = arith.constant 0 : i32
    return %c0_i32, %c0_i32_0 : i32, i32
  }
  func.func @transform_3(%arg0: i32) -> (i32, i32) {
    %c0_i32 = arith.constant 0 : i32
    %c0_i32_0 = arith.constant 0 : i32
    %c0_i32_1 = arith.constant 0 : i32
    return %c0_i32, %c0_i32_0 : i32, i32
  }
  func.func @transform_4(%arg0: i32) -> (i32, i32) {
    %c0_i32 = arith.constant 0 : i32
    %c0_i32_0 = arith.constant 0 : i32
    %c0_i32_1 = arith.constant 0 : i32
    return %c0_i32, %c0_i32_0 : i32, i32
  }
  func.func @transform_5(%arg0: i32) -> (i32, i32) {
    %c0_i32 = arith.constant 0 : i32
    %c0_i32_0 = arith.constant 0 : i32
    %c0_i32_1 = arith.constant 0 : i32
    return %c0_i32, %c0_i32_0 : i32, i32
  }
  func.func @transform_6(%arg0: i32) -> (i32, i32) {
    %c0_i32 = arith.constant 0 : i32
    %c0_i32_0 = arith.constant 0 : i32
    %c0_i32_1 = arith.constant 0 : i32
    return %c0_i32, %c0_i32_0 : i32, i32
  }
  func.func @transform_7(%arg0: i32) -> (i32, i32) {
    %c0_i32 = arith.constant 0 : i32
    %c0_i32_0 = arith.constant 0 : i32
    %c0_i32_1 = arith.constant 0 : i32
    return %c0_i32, %c0_i32_0 : i32, i32
  }
  func.func @transform_8(%arg0: i32) -> (i32, i32) {
    %c0_i32 = arith.constant 0 : i32
    %c0_i32_0 = arith.constant 0 : i32
    %c0_i32_1 = arith.constant 0 : i32
    return %c0_i32, %c0_i32_0 : i32, i32
  }
  func.func @transform_9(%arg0: i32) -> (i32, i32) {
    %c0_i32 = arith.constant 0 : i32
    %c0_i32_0 = arith.constant 0 : i32
    %c0_i32_1 = arith.constant 0 : i32
    return %c0_i32, %c0_i32_0 : i32, i32
  }
  func.func @transform_10(%arg0: i32) -> (i32, i32) {
    %c0_i32 = arith.constant 0 : i32
    %c0_i32_0 = arith.constant 0 : i32
    %c0_i32_1 = arith.constant 0 : i32
    return %c0_i32, %c0_i32_0 : i32, i32
  }
  func.func @transform_11(%arg0: i32) -> (i32, i32) {
    %c0_i32 = arith.constant 0 : i32
    %c0_i32_0 = arith.constant 0 : i32
    return %arg0, %c0_i32 : i32, i32
  }
}

</mosaic_0001>

<bundles_post_ra>
// kernel: model_forward.1
= control target key start
LH: loop header
LB: loop body
LE: loop exit
PB: predicated region body
PF: predicated region fallthrough
CT: control target
= control target key end

     0   :  { %16 = vsyncpa [#allocation3], 0  ;;  %s21479_s0 = inlined_call_operand.vmem [shape: f32[288,16], index: 0, kind: input, shape index: {}]   ;;  %s21480_s1 = inlined_call_operand.hbm [shape: f32[9,16], index: 1, kind: input, shape index: {}]   ;;  %s21481_s2 = inlined_call_operand.vmem [shape: bf16[144,32], index: 2, kind: input, shape index: {}]   ;;  %s21482_s3 = inlined_call_operand.vmem [shape: bf16[288,64], index: 3, kind: input, shape index: {}]   ;;  %s21483_s4 = inlined_call_operand.hbm [shape: bf16[1600,1024], index: 4, kind: input, shape index: {}]   ;;  %s21484_s5 = inlined_call_operand.hbm [shape: bf16[1024,128], index: 5, kind: input, shape index: {}]   ;;  %s21485_s6 = inlined_call_operand.hbm [shape: f32[1,16], index: 6, kind: input, shape index: {}]   ;;  %s21486_s7 = inlined_call_operand.hbm [shape: f32[1,32], index: 7, kind: input, shape index: {}]   ;;  %s21487_s8 = inlined_call_operand.hbm [shape: f32[1,64], index: 8, kind: input, shape index: {}]   ;;  %s21488_s9 = inlined_call_operand.hbm [shape: f32[1,1024], index: 9, kind: input, shape index: {}]   ;;  %s21489_s10 = inlined_call_operand.hbm [shape: f32[1,128], index: 10, kind: input, shape index: {}]   ;;  %s21490_s11 = inlined_call_operand.vmem [shape: f32[8,128], index: 11, kind: output, shape index: {}]  }
   0x1   :  { %17 = vsyncpa [#allocation5], 0 }
   0x2   :  { %18 = vsyncpa [#allocation8], 0 }
   0x3   :  { %19 = vsyncpa [#allocation11], 0 }
   0x4   :  { %20 = vsyncpa [#allocation14], 0  ;;  %s18646_s17 = smov [#allocation4]   ;;  %s18460_s21 = scalar_lea.hbm %s21483_s4, 102400 }
   0x5   :  { %s44_s18 = sshll.u32 %s18646_s17, 4  ;;  %p18461_p0 = scmp.ne.s32.totalorder %s21483_s4, %s18460_s21  ;;  %s45_s18 = int_to_ptr.vmem [resolvable:$true] %s44_s18 }
   0x6   :  { %p18464_p1 = scmp.lt.u32.totalorder %s18460_s21, %s21483_s4 }
   0x8   :  { %p18466_p2 = pnand %p18464_p1, %p18461_p0 }
   0xa   :  { %18469 = shalt.err (!%p18466_p2)
}
   0xb   :  { %s18470_s26 = scalar_lea.vmem %s45_s18, 102400  ;;  %p18475_p4 = scmp.lt.s32.totalorder %s45_s18, %s45_s18 }
   0xc   :  { %p18471_p3 = scmp.ne.s32.totalorder %s45_s18, %s18470_s26  ;;  %p18476_p5 = scmp.lt.s32.totalorder %s18470_s26, %s18470_s26 }
   0xe   :  { %p18477_p6 = por %p18476_p5, %p18475_p4 }
  0x10   :  { %p18478_p7 = pnand %p18477_p6, %p18471_p3 }
  0x12   :  { %18481 = shalt.err (!%p18478_p7)
}
  0x13   :  { %s18647_s27 = smov 512   ;;  %s18648_s28 = smov 32  }
  0x14   :  { %50 = dma.hbm_to_vmem [thread:$0]  %s21483_s4, 102400, %s45_s18, [#allocation5], %s18647_s27, %s18647_s27, %s18648_s28  }
  0x15   :  { %s18649_s12 = smov [#allocation7]   ;;  %s18650_s14 = smov [#allocation10]  }
  0x16   :  { %s69_s13 = sshll.u32 %s18649_s12, 4  ;;  %s89_s15 = sshll.u32 %s18650_s14, 4  ;;  %s70_s13 = int_to_ptr.vmem [resolvable:$true] %s69_s13  ;;  %s90_s15 = int_to_ptr.vmem [resolvable:$true] %s89_s15 }
  0x17   :  { %s18482_s19 = scalar_lea.hbm %s21485_s6, 16 }
  0x18   :  { %p18483_p8 = scmp.ne.s32.totalorder %s21485_s6, %s18482_s19  ;;  %p18486_p9 = scmp.lt.u32.totalorder %s18482_s19, %s21485_s6 }
  0x1a   :  { %p18488_p10 = pnand %p18486_p9, %p18483_p8 }
  0x1c   :  { %18491 = shalt.err (!%p18488_p10)
}
  0x1d   :  { %s18492_s4 = scalar_lea.vmem %s70_s13, 16  ;;  %s18496_s18 = scalar_lea.vmem %s70_s13, 32 }
  0x1e   :  { %p18493_p11 = scmp.ne.s32.totalorder %s70_s13, %s18492_s4  ;;  %p18497_p12 = scmp.lt.s32.totalorder %s70_s13, %s70_s13 }
  0x1f   :  { %p18498_p13 = scmp.lt.s32.totalorder %s18496_s18, %s18492_s4 }
  0x21   :  { %p18499_p0 = por %p18498_p13, %p18497_p12 }
  0x23   :  { %p18500_p1 = pnand %p18499_p0, %p18493_p11 }
  0x25   :  { %18503 = shalt.err (!%p18500_p1)
}
  0x26   :  { %72 = dma.hbm_to_vmem [thread:$0]  %s21485_s6, 16, %s70_s13, [#allocation8]  }
  0x27   :  { %s18504_s28 = scalar_lea.hbm %s21487_s8, 16 }
  0x28   :  { %p18505_p2 = scmp.ne.s32.totalorder %s21487_s8, %s18504_s28  ;;  %p18508_p3 = scmp.lt.u32.totalorder %s18504_s28, %s21487_s8 }
  0x2a   :  { %p18510_p4 = pnand %p18508_p3, %p18505_p2 }
  0x2c   :  { %18513 = shalt.err (!%p18510_p4)
}
  0x2d   :  { %s18514_s16 = scalar_lea.vmem %s90_s15, 16  ;;  %s18518_s17 = scalar_lea.vmem %s90_s15, 32 }
  0x2e   :  { %p18515_p5 = scmp.ne.s32.totalorder %s90_s15, %s18514_s16  ;;  %p18519_p6 = scmp.lt.s32.totalorder %s90_s15, %s90_s15 }
  0x2f   :  { %p18520_p7 = scmp.lt.s32.totalorder %s18518_s17, %s18514_s16 }
  0x31   :  { %p18521_p8 = por %p18520_p7, %p18519_p6 }
  0x33   :  { %p18522_p9 = pnand %p18521_p8, %p18515_p5 }
  0x35   :  { %18525 = shalt.err (!%p18522_p9)
}
  0x36   :  { %92 = dma.hbm_to_vmem [thread:$0]  %s21487_s8, 16, %s90_s15, [#allocation11]  }
  0x37   :  { %s18651_s19 = smov [#allocation2]   ;;  %s18526_s23 = scalar_lea.hbm %s21480_s1, 256 }
  0x38   :  { %s28_s20 = sshll.u32 %s18651_s19, 4  ;;  %p18527_p10 = scmp.ne.s32.totalorder %s21480_s1, %s18526_s23  ;;  %s29_s20 = int_to_ptr.vmem [resolvable:$true] %s28_s20 }
  0x39   :  { %p18530_p11 = scmp.lt.u32.totalorder %s18526_s23, %s21480_s1 }
  0x3b   :  { %p18532_p12 = pnand %p18530_p11, %p18527_p10 }
  0x3d   :  { %18535 = shalt.err (!%p18532_p12)
}
  0x3e   :  { %s18536_s26 = scalar_lea.vmem %s29_s20, 256  ;;  %p18541_p0 = scmp.lt.s32.totalorder %s29_s20, %s29_s20 }
  0x3f   :  { %p18537_p13 = scmp.ne.s32.totalorder %s29_s20, %s18536_s26  ;;  %p18542_p1 = scmp.lt.s32.totalorder %s18536_s26, %s18536_s26 }
  0x41   :  { %p18543_p2 = por %p18542_p1, %p18541_p0 }
  0x43   :  { %p18544_p3 = pnand %p18543_p2, %p18537_p13 }
  0x45   :  { %18547 = shalt.err (!%p18544_p3)
}
  0x46   :  { %s18652_s8 = smov 128   ;;  %s18653_s15 = smov 8  }
  0x47   :  { %34 = dma.hbm_to_vmem [thread:$0]  %s21480_s1, 256, %s29_s20, [#allocation3], %s18652_s8, %s18652_s8, %s18653_s15  }
  0x48   :  { %s18654_s29 = smov [#allocation6]   ;;  %s18548_s16 = scalar_lea.hbm %s21484_s5, 8192 }
  0x49   :  { %s56_s30 = sshll.u32 %s18654_s29, 4  ;;  %p18549_p4 = scmp.ne.s32.totalorder %s21484_s5, %s18548_s16  ;;  %s57_s30 = int_to_ptr.vmem [resolvable:$true] %s56_s30 }
  0x4a   :  { %p18552_p5 = scmp.lt.u32.totalorder %s18548_s16, %s21484_s5 }
  0x4c   :  { %p18554_p6 = pnand %p18552_p5, %p18549_p4 }
  0x4e   :  { %18557 = shalt.err (!%p18554_p6)
}
  0x4f   :  { %s18558_s21 = scalar_lea.vmem %s57_s30, 8192  ;;  %p18563_p8 = scmp.lt.s32.totalorder %s57_s30, %s57_s30 }
  0x50   :  { %p18559_p7 = scmp.ne.s32.totalorder %s57_s30, %s18558_s21  ;;  %p18564_p9 = scmp.lt.s32.totalorder %s18558_s21, %s18558_s21 }
  0x52   :  { %p18565_p10 = por %p18564_p9, %p18563_p8 }
  0x54   :  { %p18566_p11 = pnand %p18565_p10, %p18559_p7 }
  0x56   :  { %18569 = shalt.err (!%p18566_p11)
}
  0x57   :  { %s18655_s1 = smov 64   ;;  %s18656_s20 = smov 4  }
  0x58   :  { %62 = dma.hbm_to_vmem [thread:$0]  %s21484_s5, 8192, %s57_s30, [#allocation5], %s18655_s1, %s18655_s1, %s18656_s20  }
  0x59   :  { %s18657_s4 = smov [#allocation9]   ;;  %s18658_s24 = smov [#allocation12]  }
  0x5a   :  { %s79_s18 = sshll.u32 %s18657_s4, 4  ;;  %s99_s25 = sshll.u32 %s18658_s24, 4  ;;  %s80_s18 = int_to_ptr.vmem [resolvable:$true] %s79_s18  ;;  %s100_s25 = int_to_ptr.vmem [resolvable:$true] %s99_s25 }
  0x5b   :  { %s18570_s15 = scalar_lea.hbm %s21486_s7, 16 }
  0x5c   :  { %p18571_p12 = scmp.ne.s32.totalorder %s21486_s7, %s18570_s15  ;;  %p18574_p13 = scmp.lt.u32.totalorder %s18570_s15, %s21486_s7 }
  0x5e   :  { %p18576_p0 = pnand %p18574_p13, %p18571_p12 }
  0x60   :  { %18579 = shalt.err (!%p18576_p0)
}
  0x61   :  { %s18580_s5 = scalar_lea.vmem %s80_s18, 16  ;;  %s18584_s30 = scalar_lea.vmem %s80_s18, 32 }
  0x62   :  { %p18581_p1 = scmp.ne.s32.totalorder %s80_s18, %s18580_s5  ;;  %p18585_p2 = scmp.lt.s32.totalorder %s80_s18, %s80_s18 }
  0x63   :  { %p18586_p3 = scmp.lt.s32.totalorder %s18584_s30, %s18580_s5 }
  0x65   :  { %p18587_p4 = por %p18586_p3, %p18585_p2 }
  0x67   :  { %p18588_p5 = pnand %p18587_p4, %p18581_p1 }
  0x69   :  { %18591 = shalt.err (!%p18588_p5)
}
  0x6a   :  { %82 = dma.hbm_to_vmem [thread:$0]  %s21486_s7, 16, %s80_s18, [#allocation8]  }
  0x6b   :  { %s18592_s13 = scalar_lea.hbm %s21488_s9, 128 }
  0x6c   :  { %p18593_p6 = scmp.ne.s32.totalorder %s21488_s9, %s18592_s13  ;;  %p18596_p7 = scmp.lt.u32.totalorder %s18592_s13, %s21488_s9 }
  0x6e   :  { %p18598_p8 = pnand %p18596_p7, %p18593_p6 }
  0x70   :  { %18601 = shalt.err (!%p18598_p8)
}
  0x71   :  { %s18602_s22 = scalar_lea.vmem %s100_s25, 128  ;;  %p18607_p10 = scmp.lt.s32.totalorder %s100_s25, %s100_s25 }
  0x72   :  { %p18603_p9 = scmp.ne.s32.totalorder %s100_s25, %s18602_s22  ;;  %p18608_p11 = scmp.lt.s32.totalorder %s18602_s22, %s18602_s22 }
  0x74   :  { %p18609_p12 = por %p18608_p11, %p18607_p10 }
  0x76   :  { %p18610_p13 = pnand %p18609_p12, %p18603_p9 }
  0x78   :  { %18613 = shalt.err (!%p18610_p13)
}
  0x79   :  { %102 = dma.hbm_to_vmem [thread:$0]  %s21488_s9, 128, %s100_s25, [#allocation11]  }
  0x7a   :  { %s18659_s4 = smov [#allocation13]   ;;  %s18614_s8 = scalar_lea.hbm %s21489_s10, 16 }
  0x7b   :  { %s109_s18 = sshll.u32 %s18659_s4, 4  ;;  %p18615_p0 = scmp.ne.s32.totalorder %s21489_s10, %s18614_s8  ;;  %s110_s18 = int_to_ptr.vmem [resolvable:$true] %s109_s18 }
  0x7c   :  { %p18618_p1 = scmp.lt.u32.totalorder %s18614_s8, %s21489_s10 }
  0x7e   :  { %p18620_p2 = pnand %p18618_p1, %p18615_p0 }
  0x80   :  { %18623 = shalt.err (!%p18620_p2)
}
  0x81   :  { %s18624_s12 = scalar_lea.vmem %s110_s18, 16  ;;  %s18628_s9 = scalar_lea.vmem %s110_s18, 32 }
  0x82   :  { %p18625_p3 = scmp.ne.s32.totalorder %s110_s18, %s18624_s12  ;;  %p18629_p4 = scmp.lt.s32.totalorder %s110_s18, %s110_s18 }
  0x83   :  { %p18630_p5 = scmp.lt.s32.totalorder %s18628_s9, %s18624_s12 }
  0x85   :  { %p18631_p6 = por %p18630_p5, %p18629_p4 }
  0x87   :  { %p18632_p7 = pnand %p18631_p6, %p18625_p3 }
  0x89   :  { %18635 = shalt.err (!%p18632_p7)
}
  0x8a   :  { %112 = dma.hbm_to_vmem [thread:$0]  %s21489_s10, 16, %s110_s18, [#allocation14]  }
  0x8b   :  { %18636 = dma.done.wait [#allocation3], 256  }
  0x8c   :  { %18637 = vsyncadd [#allocation3], 4294967040 }
  0x8d   :  { %18638 = dma.done.wait [#allocation5], 110592  }
  0x8e   :  { %18639 = vsyncadd [#allocation5], 4294856704 }
  0x8f   :  { %18640 = dma.done.wait [#allocation8], 32  }
  0x90   :  { %18641 = vsyncadd [#allocation8], 4294967264 }
  0x91   :  { %18642 = dma.done.wait [#allocation11], 144  }
  0x92   :  { %18643 = vsyncadd [#allocation11], 4294967152 }
  0x93   :  { %18644 = dma.done.wait [#allocation14], 16  }
  0x94   :  { %18645 = vsyncadd [#allocation14], 4294967280  ;;  %v21494_v0 = vmov 0.0|0.0   ;;  %v18351_v1 = vld [vmem:[%s21481_s2 + $0x8] sm:$0xff]   ;;  %v18352_v2 = vld [vmem:[%s21481_s2] sm:$0xff]   ;;  %vm1641_vm0 = vcmask 130048  }
  0x95   :  { %17442 = vmatprep.mubr.bf16.mxu0 %v21494_v0  ;;  %17786 = vmatprep.mubr.bf16.mxu1 %v21494_v0  ;;  %v18830_v3 = vld [vmem:[%s21479_s0] sm:$0xff]  ;;  %v167_v4 = vld [vmem:[%s21479_s0 + $0xe8] sm:$0xff]  ;;  %v168_v5 = vld [vmem:[%s21479_s0 + $0xf0] sm:$0xff]  ;;  %vm3828_vm1 = vcmask 261120   ;;  %vm6013_vm2 = vcmask 523264  }
  0x96   :  { %17440 = vmatprep.subr.bf16.mxu0 %v18351_v1  ;;  %v18841_v6 = vld [vmem:[%s21479_s0 + $0x8] sm:$0xff]  ;;  %v18846_v7 = vld [vmem:[%s21479_s0 + $0x10] sm:$0xff]  ;;  %v169_v8 = vld [vmem:[%s21479_s0 + $0xf8] sm:$0xff] }
  0x97   :  { %17441 = vmatpush3.bf16.msra.mxu0 %v18351_v1  ;;  %v170_v9 = vld [vmem:[%s21479_s0 + $0x100] sm:$0xff]  ;;  %v18857_v10 = vld [vmem:[%s21479_s0 + $0x118] sm:$0xff]  ;;  %v18863_v11 = vld [vmem:[%s21479_s0 + $0x28] sm:$0xff] }
  0x98   :  { %17478 = vmatprep.subr.bf16.mxu0 %v18352_v2  ;;  %v18865_v12 = vld [vmem:[#allocation2] ss:$0 sm:$0xff]  ;;  %v18867_v13 = vld [vmem:[#allocation2 + $0x1] ss:$0 sm:$0xff]  ;;  %v18869_v14 = vld [vmem:[#allocation2 + $0x2] ss:$0 sm:$0xff] }
  0x99   :  { %v179_v15 = vmul.f32 %v18865_v12, %v167_v4  ;;  %v180_v16 = vmul.f32 %v18865_v12, %v168_v5  ;;  %v220_v17 = vmul.f32 %v18867_v13, %v168_v5  ;;  %v18875_v18 = vld [vmem:[#allocation2 + $0x3] ss:$0 sm:$0xff]  ;;  %v18877_v19 = vld [vmem:[#allocation2 + $0x4] ss:$0 sm:$0xff]  ;;  %v18879_v20 = vld [vmem:[#allocation2 + $0x5] ss:$0 sm:$0xff]  ;;  %v221_v22 = vmul.f32 %v18867_v13, %v169_v8 }
  0x9a   :  { %17443 = vmatmul.mubr.bf16.vlgmr.msra.gmra.mrb[0].mxu0 %v21494_v0  ;;  %v18884_v21 = vld [vmem:[%s21479_s0 + $0x30] sm:$0xff]  ;;  %v297_v23 = vmul.f32 %v18869_v14, %v169_v8  ;;  %v298_v24 = vmul.f32 %v18869_v14, %v170_v9  ;;  %v18889_v25 = vld [vmem:[#allocation2 + $0x6] ss:$0 sm:$0xff]  ;;  %v18891_v26 = vld [vmem:[#allocation2 + $0x7] ss:$0 sm:$0xff]  ;;  %v374_v29 = vmul.f32 %v18875_v18, %v18857_v10  ;;  %v375_v30 = vmul.f32 %v18875_v18, %v18830_v3 }
  0x9b   :  { %17479 = vmatpush3.bf16.msra.mxu0 %v18352_v2  ;;  %17446 = vmatprep.mubr.bf16.mxu0 %v21494_v0  ;;  %v18896_v27 = vld [vmem:[%s21479_s0 + $0x38] sm:$0xff]  ;;  %v256_v28 = vadd.f32 %v220_v17, %v179_v15  ;;  %v451_v31 = vmul.f32 %v18877_v19, %v18830_v3  ;;  %v18904_v32 = vld [vmem:[#allocation2 + $0x8] ss:$0 sm:$0xff]  ;;  %v257_v33 = vadd.f32 %v221_v22, %v180_v16  ;;  %v172_v42 = vld [vmem:[%s21479_s0 + $0x110] sm:$0xff] }
  0x9c   :  { %v452_v34 = vmul.f32 %v18877_v19, %v18841_v6  ;;  %v528_v35 = vmul.f32 %v18879_v20, %v18841_v6  ;;  %v529_v36 = vmul.f32 %v18879_v20, %v18846_v7  ;;  %v171_v37 = vld [vmem:[%s21479_s0 + $0x108] sm:$0xff]  ;;  %v605_v39 = vmul.f32 %v18889_v25, %v18863_v11  ;;  %v18932_v47 = vld [vmem:[%s21479_s0 + $0x40] sm:$0xff]  ;;  %v18937_v49 = vld [vmem:[%s21479_s0 + $0x18] sm:$0xff] }
  0x9d   :  { %v333_v38 = vadd.f32 %v297_v23, %v256_v28  ;;  %v606_v40 = vmul.f32 %v18889_v25, %v18884_v21  ;;  %v682_v41 = vmul.f32 %v18891_v26, %v18884_v21  ;;  %v334_v43 = vadd.f32 %v298_v24, %v257_v33  ;;  %v18949_v58 = vld [vmem:[%s21479_s0 + $0x20] sm:$0xff]  ;;  %v18958_v1 = vld [vmem:[%s21479_s0 + $0x48] sm:$0xff] }
  0x9e   :  { %v683_v44 = vmul.f32 %v18891_v26, %v18896_v27  ;;  %v759_v45 = vmul.f32 %v18904_v32, %v18896_v27  ;;  %v181_v46 = vmul.f32 %v18865_v12, %v169_v8  ;;  %v182_v50 = vmul.f32 %v18865_v12, %v170_v9  ;;  %v18967_v8 = vld [vmem:[%s21479_s0 + $0x50] sm:$0xff] }
  0x9f   :  { %v410_v48 = vadd.f32 %v374_v29, %v333_v38  ;;  %v222_v51 = vmul.f32 %v18867_v13, %v170_v9  ;;  %v223_v52 = vmul.f32 %v18867_v13, %v171_v37  ;;  %v411_v53 = vadd.f32 %v375_v30, %v334_v43 }
  0xa0   :  { %v299_v54 = vmul.f32 %v18869_v14, %v171_v37  ;;  %v300_v55 = vmul.f32 %v18869_v14, %v172_v42  ;;  %v376_v56 = vmul.f32 %v18875_v18, %v18841_v6  ;;  %v377_v61 = vmul.f32 %v18875_v18, %v18846_v7 }
  0xa1   :  { %v487_v57 = vadd.f32 %v451_v31, %v410_v48  ;;  %v258_v59 = vadd.f32 %v222_v51, %v181_v46  ;;  %v259_v60 = vadd.f32 %v223_v52, %v182_v50  ;;  %v488_v62 = vadd.f32 %v452_v34, %v411_v53  ;;  %v18979_v34 = vld [vmem:[#allocation7] ss:$0 sm:$0xff] }
  0xa2   :  { %v760_v63 = vmul.f32 %v18904_v32, %v18932_v47  ;;  %v453_v2 = vmul.f32 %v18877_v19, %v18846_v7  ;;  %v454_v4 = vmul.f32 %v18877_v19, %v18937_v49  ;;  %v530_v16 = vmul.f32 %v18879_v20, %v18937_v49 }
  0xa3   :  { %v564_v5 = vadd.f32 %v528_v35, %v487_v57  ;;  %v335_v9 = vadd.f32 %v299_v54, %v258_v59  ;;  %v336_v15 = vadd.f32 %v300_v55, %v259_v60  ;;  %v565_v17 = vadd.f32 %v529_v36, %v488_v62 }
  0xa4   :  { %v531_v22 = vmul.f32 %v18879_v20, %v18949_v58  ;;  %v607_v23 = vmul.f32 %v18889_v25, %v18896_v27  ;;  %v608_v24 = vmul.f32 %v18889_v25, %v18932_v47  ;;  %v684_v31 = vmul.f32 %v18891_v26, %v18932_v47 }
  0xa5   :  { %v641_v28 = vadd.f32 %v605_v39, %v564_v5  ;;  %v412_v29 = vadd.f32 %v376_v56, %v335_v9  ;;  %v413_v30 = vadd.f32 %v377_v61, %v336_v15  ;;  %v642_v33 = vadd.f32 %v606_v40, %v565_v17 }
  0xa6   :  { %v685_v35 = vmul.f32 %v18891_v26, %v18958_v1  ;;  %v761_v36 = vmul.f32 %v18904_v32, %v18958_v1  ;;  %v183_v38 = vmul.f32 %v18865_v12, %v171_v37  ;;  %v224_v48 = vmul.f32 %v18867_v13, %v172_v42  ;;  %v18353_v37 = vld [vmem:[%s21481_s2 + $0x10] sm:$0xff]   ;;  %v18999_v42 = vld [vmem:[%s21479_s0 + $0x58] sm:$0xff] }
  0xa7   :  { %v718_v43 = vadd.f32 %v682_v41, %v641_v28  ;;  %v489_v46 = vadd.f32 %v453_v2, %v412_v29  ;;  %v490_v39 = vadd.f32 %v454_v4, %v413_v30  ;;  %v719_v50 = vadd.f32 %v683_v44, %v642_v33  ;;  %17516 = vmatprep.subr.bf16.mxu0 %v18353_v37 }
  0xa8   :  { %v762_v40 = vmul.f32 %v18904_v32, %v18967_v8  ;;  %v301_v51 = vmul.f32 %v18869_v14, %v18857_v10  ;;  %v378_v52 = vmul.f32 %v18875_v18, %v18937_v49  ;;  %v260_v55 = vadd.f32 %v224_v48, %v183_v38 }
  0xa9   :  { %v795_v41 = vadd.f32 %v759_v45, %v718_v43  ;;  %v566_v53 = vadd.f32 %v530_v16, %v489_v46  ;;  %v567_v54 = vadd.f32 %v531_v22, %v490_v39  ;;  %v796_v56 = vadd.f32 %v760_v63, %v719_v50  ;;  %v19046_v50 = vld [vmem:[%s21479_s0 + $0x68] sm:$0xff] }
  0xaa   :  { %v455_v44 = vmul.f32 %v18877_v19, %v18949_v58  ;;  %v532_v57 = vmul.f32 %v18879_v20, %v18863_v11  ;;  %v609_v59 = vmul.f32 %v18889_v25, %v18958_v1  ;;  %v337_v62 = vadd.f32 %v301_v51, %v260_v55 }
  0xab   :  { %v19008_v45 = vadd.f32 %v18979_v34, %v795_v41  ;;  %v643_v60 = vadd.f32 %v607_v23, %v566_v53  ;;  %v644_v61 = vadd.f32 %v608_v24, %v567_v54  ;;  %v839_v63 = vadd.f32 %v18979_v34, %v796_v56  ;;  %v19057_v56 = vld [vmem:[%s21479_s0 + $0x70] sm:$0xff] }
  0xac   :  { %v686_v2 = vmul.f32 %v18891_v26, %v18967_v8  ;;  %v185_v4 = vmul.f32 %v18865_v12, %v18857_v10  ;;  %v186_v5 = vmul.f32 %v18865_v12, %v18830_v3  ;;  %v414_v17 = vadd.f32 %v378_v52, %v337_v62 }
  0xad   :  { %v21493_v9 = vmax.f32 %v19008_v45, 0.0  ;;  %v720_v15 = vadd.f32 %v684_v31, %v643_v60  ;;  %v721_v16 = vadd.f32 %v685_v35, %v644_v61  ;;  %v875_v22 = vmax.f32 %v839_v63, 0.0 }
  0xae   :  { %v226_v23 = vmul.f32 %v18867_v13, %v18830_v3  ;;  %v227_v24 = vmul.f32 %v18867_v13, %v18841_v6  ;;  %v303_v28 = vmul.f32 %v18869_v14, %v18841_v6  ;;  %v491_v30 = vadd.f32 %v455_v44, %v414_v17 }
  0xaf   :  { %v797_v29 = vadd.f32 %v761_v36, %v720_v15  ;;  %v798_v10 = vadd.f32 %v762_v40, %v721_v16  ;;  %v763_v33 = vmul.f32 %v18904_v32, %v18999_v42  ;;  %v19028_v31 = vpack.c.bf16 %v875_v22, %v21493_v9  ;;  %v19037_v36 = vld [vmem:[%s21479_s0 + $0x60] sm:$0xff] }
  0xb0   :  { %v262_v35 = vadd.f32 %v226_v23, %v185_v4  ;;  %v263_v38 = vadd.f32 %v227_v24, %v186_v5  ;;  %v304_v3 = vmul.f32 %v18869_v14, %v18846_v7  ;;  %v568_v39 = vadd.f32 %v532_v57, %v491_v30  ;;  %v19409_v9 = vld [vmem:[#allocation2 + $0x3] ss:$0 sm:$0xff] }
  0xb1   :  { %v840_v43 = vadd.f32 %v18979_v34, %v797_v29  ;;  %v841_v46 = vadd.f32 %v18979_v34, %v798_v10  ;;  %v380_v48 = vmul.f32 %v18875_v18, %v18863_v11  ;;  %17447 = vmatmul.mubr.msk.bf16.gmra.mrb[4].mxu0 %vm1641_vm0, %v19028_v31  ;;  %v381_v52 = vmul.f32 %v18875_v18, %v18884_v21 }
  0xb2   :  { %v339_v40 = vadd.f32 %v303_v28, %v262_v35  ;;  %v340_v51 = vadd.f32 %v304_v3, %v263_v38  ;;  %v457_v37 = vmul.f32 %v18877_v19, %v18884_v21  ;;  %v645_v54 = vadd.f32 %v609_v59, %v568_v39 }
  0xb3   :  { %v876_v41 = vmax.f32 %v840_v43, 0.0  ;;  %v877_v53 = vmax.f32 %v841_v46, 0.0  ;;  %v458_v55 = vmul.f32 %v18877_v19, %v18896_v27  ;;  %v534_v60 = vmul.f32 %v18879_v20, %v18896_v27 }
  0xb4   :  { %v416_v44 = vadd.f32 %v380_v48, %v339_v40  ;;  %v417_v57 = vadd.f32 %v381_v52, %v340_v51  ;;  %v535_v61 = vmul.f32 %v18879_v20, %v18932_v47  ;;  %v722_v59 = vadd.f32 %v686_v2, %v645_v54 }
  0xb5   :  { %v19063_v62 = vpack.c.bf16 %v876_v41, %v875_v22  ;;  %v19065_v63 = vpack.c.bf16 %v877_v53, %v876_v41  ;;  %v611_v4 = vmul.f32 %v18889_v25, %v18999_v42  ;;  %v612_v16 = vmul.f32 %v18889_v25, %v19037_v36  ;;  %v19101_v41 = vld [vmem:[%s21479_s0 + $0x78] sm:$0xff] }
  0xb6   :  { %v493_v5 = vadd.f32 %v457_v37, %v416_v44  ;;  %v494_v15 = vadd.f32 %v458_v55, %v417_v57  ;;  %v688_v17 = vmul.f32 %v18891_v26, %v19037_v36  ;;  %v799_v23 = vadd.f32 %v763_v33, %v722_v59 }
  0xb7   :  { %17450 = vmatprep.mubr.msk.bf16.mxu0 %vm1641_vm0, %v19065_v63  ;;  %v689_v22 = vmul.f32 %v18891_v26, %v19046_v50  ;;  %v765_v2 = vmul.f32 %v18904_v32, %v19046_v50  ;;  %v766_v24 = vmul.f32 %v18904_v32, %v19057_v56  ;;  %v187_v10 = vmul.f32 %v18865_v12, %v18841_v6 }
  0xb8   :  { %v570_v28 = vadd.f32 %v534_v60, %v493_v5  ;;  %v571_v29 = vadd.f32 %v535_v61, %v494_v15  ;;  %v188_v30 = vmul.f32 %v18865_v12, %v18846_v7  ;;  %v842_v35 = vadd.f32 %v18979_v34, %v799_v23  ;;  %v19115_v15 = vld [vmem:[%s21479_s0 + $0x80] sm:$0xff] }
  0xb9   :  { %v228_v33 = vmul.f32 %v18867_v13, %v18846_v7  ;;  %v229_v38 = vmul.f32 %v18867_v13, %v18937_v49  ;;  %v305_v3 = vmul.f32 %v18869_v14, %v18937_v49  ;;  %v306_v39 = vmul.f32 %v18869_v14, %v18949_v58 }
  0xba   :  { %v647_v43 = vadd.f32 %v611_v4, %v570_v28  ;;  %v648_v46 = vadd.f32 %v612_v16, %v571_v29  ;;  %v382_v6 = vmul.f32 %v18875_v18, %v18896_v27  ;;  %v878_v48 = vmax.f32 %v842_v35, 0.0 }
  0xbb   :  { %v264_v40 = vadd.f32 %v228_v33, %v187_v10  ;;  %v265_v51 = vadd.f32 %v229_v38, %v188_v30  ;;  %v383_v7 = vmul.f32 %v18875_v18, %v18932_v47  ;;  %v459_v54 = vmul.f32 %v18877_v19, %v18932_v47 }
  0xbc   :  { %v724_v52 = vadd.f32 %v688_v17, %v647_v43  ;;  %v725_v37 = vadd.f32 %v689_v22, %v648_v46  ;;  %v460_v55 = vmul.f32 %v18877_v19, %v18958_v1  ;;  %v19107_v44 = vpack.c.bf16 %v878_v48, %v877_v53 }
  0xbd   :  { %v21496_v57 = vmov 0.0   ;;  %v341_v61 = vadd.f32 %v305_v3, %v264_v40  ;;  %v342_v59 = vadd.f32 %v306_v39, %v265_v51  ;;  %v536_v16 = vmul.f32 %v18879_v20, %v18958_v1  ;;  %v19150_v40 = vld [vmem:[%s21479_s0 + $0x88] sm:$0xff] }
  0xbe   :  { %v19110_v60 = vpack.c.bf16 %v21496_v57, %v878_v48  ;;  %v801_v4 = vadd.f32 %v765_v2, %v724_v52  ;;  %v802_v5 = vadd.f32 %v766_v24, %v725_v37  ;;  %v537_v23 = vmul.f32 %v18879_v20, %v18967_v8 }
  0xbf   :  { %v418_v53 = vadd.f32 %v382_v6, %v341_v61  ;;  %v419_v17 = vadd.f32 %v383_v7, %v342_v59  ;;  %v613_v22 = vmul.f32 %v18889_v25, %v19046_v50  ;;  %v614_v28 = vmul.f32 %v18889_v25, %v19057_v56 }
  0xc0   :  { %17451 = vmatmul.mubr.msk.bf16.gmra.mrb[8].mxu0 %vm1641_vm0, %v19110_v60  ;;  %v19126_v2 = vadd.f32 %v18979_v34, %v801_v4  ;;  %v19129_v24 = vadd.f32 %v18979_v34, %v802_v5  ;;  %v690_v29 = vmul.f32 %v18891_v26, %v19057_v56  ;;  %v691_v35 = vmul.f32 %v18891_v26, %v19101_v41 }
  0xc1   :  { %v495_v10 = vadd.f32 %v459_v54, %v418_v53  ;;  %v496_v30 = vadd.f32 %v460_v55, %v419_v17  ;;  %v767_v33 = vmul.f32 %v18904_v32, %v19101_v41  ;;  %v189_v43 = vmul.f32 %v18865_v12, %v18937_v49 }
  0xc2   :  { %v21492_v38 = vmax.f32 %v19126_v2, 0.0  ;;  %v881_v3 = vmax.f32 %v19129_v24, 0.0  ;;  %v230_v46 = vmul.f32 %v18867_v13, %v18949_v58  ;;  %v768_v48 = vmul.f32 %v18904_v32, %v19115_v15 }
  0xc3   :  { %v572_v39 = vadd.f32 %v536_v16, %v495_v10  ;;  %v573_v6 = vadd.f32 %v537_v23, %v496_v30  ;;  %v307_v51 = vmul.f32 %v18869_v14, %v18863_v11  ;;  %v384_v58 = vmul.f32 %v18875_v18, %v18958_v1 }
  0xc4   :  { %v19156_v7 = vpack.c.bf16 %v881_v3, %v21492_v38  ;;  %v266_v49 = vadd.f32 %v230_v46, %v189_v43  ;;  %v461_v52 = vmul.f32 %v18877_v19, %v18967_v8  ;;  %v538_v55 = vmul.f32 %v18879_v20, %v18999_v42 }
  0xc5   :  { %v649_v37 = vadd.f32 %v613_v22, %v572_v39  ;;  %v650_v54 = vadd.f32 %v614_v28, %v573_v6  ;;  %v615_v61 = vmul.f32 %v18889_v25, %v19101_v41  ;;  %v692_v4 = vmul.f32 %v18891_v26, %v19115_v15  ;;  %v19194_v39 = vld [vmem:[%s21479_s0 + $0x98] sm:$0xff] }
  0xc6   :  { %21515 = vst [vmem:[#allocation20_spill] sm:$0xff] %v19156_v7  ;;  %17454 = vmatprep.mubr.msk.bf16.mxu0 %vm1641_vm0, %v19156_v7  ;;  %v343_v59 = vadd.f32 %v307_v51, %v266_v49  ;;  %v769_v5 = vmul.f32 %v18904_v32, %v19150_v40  ;;  %v191_v16 = vmul.f32 %v18865_v12, %v18863_v11 }
  0xc7   :  { %v726_v53 = vadd.f32 %v690_v29, %v649_v37  ;;  %v727_v17 = vadd.f32 %v691_v35, %v650_v54  ;;  %v192_v23 = vmul.f32 %v18865_v12, %v18884_v21  ;;  %v232_v22 = vmul.f32 %v18867_v13, %v18884_v21  ;;  %v19187_v29 = vld [vmem:[%s21479_s0 + $0x90] sm:$0xff] }
  0xc8   :  { %v420_v24 = vadd.f32 %v384_v58, %v343_v59  ;;  %v233_v28 = vmul.f32 %v18867_v13, %v18896_v27  ;;  %v309_v10 = vmul.f32 %v18869_v14, %v18896_v27  ;;  %v310_v30 = vmul.f32 %v18869_v14, %v18932_v47  ;;  %v19205_v58 = vld [vmem:[%s21479_s0 + $0xa0] sm:$0xff] }
  0xc9   :  { %v803_v43 = vadd.f32 %v767_v33, %v726_v53  ;;  %v804_v11 = vadd.f32 %v768_v48, %v727_v17  ;;  %v268_v35 = vadd.f32 %v232_v22, %v191_v16  ;;  %v386_v21 = vmul.f32 %v18875_v18, %v18999_v42 }
  0xca   :  { %v497_v46 = vadd.f32 %v461_v52, %v420_v24  ;;  %v269_v6 = vadd.f32 %v233_v28, %v192_v23  ;;  %v387_v33 = vmul.f32 %v18875_v18, %v19037_v36  ;;  %v463_v48 = vmul.f32 %v18877_v19, %v19037_v36 }
  0xcb   :  { %v846_v51 = vadd.f32 %v18979_v34, %v803_v43  ;;  %v847_v49 = vadd.f32 %v18979_v34, %v804_v11  ;;  %v345_v52 = vadd.f32 %v309_v10, %v268_v35  ;;  %v464_v37 = vmul.f32 %v18877_v19, %v19046_v50 }
  0xcc   :  { %v574_v54 = vadd.f32 %v538_v55, %v497_v46  ;;  %v346_v59 = vadd.f32 %v310_v30, %v269_v6  ;;  %v540_v16 = vmul.f32 %v18879_v20, %v19046_v50  ;;  %v541_v53 = vmul.f32 %v18879_v20, %v19057_v56 }
  0xcd   :  { %v882_v17 = vmax.f32 %v846_v51, 0.0  ;;  %v883_v23 = vmax.f32 %v847_v49, 0.0  ;;  %v422_v22 = vadd.f32 %v386_v21, %v345_v52  ;;  %v617_v24 = vmul.f32 %v18889_v25, %v19150_v40 }
  0xce   :  { %v651_v28 = vadd.f32 %v615_v61, %v574_v54  ;;  %v423_v43 = vadd.f32 %v387_v33, %v346_v59  ;;  %v618_v10 = vmul.f32 %v18889_v25, %v19187_v29  ;;  %v694_v55 = vmul.f32 %v18891_v26, %v19187_v29 }
  0xcf   :  { %v19219_v30 = vpack.c.bf16 %v882_v17, %v881_v3  ;;  %v19221_v11 = vpack.c.bf16 %v883_v23, %v882_v17  ;;  %v499_v35 = vadd.f32 %v463_v48, %v422_v22  ;;  %v695_v46 = vmul.f32 %v18891_v26, %v19194_v39 }
  0xd0   :  { %v728_v21 = vadd.f32 %v692_v4, %v651_v28  ;;  %v500_v6 = vadd.f32 %v464_v37, %v423_v43  ;;  %v771_v61 = vmul.f32 %v18904_v32, %v19194_v39  ;;  %v772_v33 = vmul.f32 %v18904_v32, %v19205_v58 }
  0xd1   :  { %21516 = vst [vmem:[#allocation21_spill] sm:$0xff] %v19221_v11  ;;  %17455 = vmatmul.mubr.msk.bf16.gmra.mrb[12].mxu0 %vm1641_vm0, %v19221_v11  ;;  %v576_v51 = vadd.f32 %v540_v16, %v499_v35  ;;  %v193_v3 = vmul.f32 %v18865_v12, %v18896_v27  ;;  %v194_v48 = vmul.f32 %v18865_v12, %v18932_v47 }
  0xd2   :  { %v234_v4 = vmul.f32 %v18867_v13, %v18932_v47  ;;  %v805_v49 = vadd.f32 %v769_v5, %v728_v21  ;;  %v577_v52 = vadd.f32 %v541_v53, %v500_v6  ;;  %v235_v37 = vmul.f32 %v18867_v13, %v18958_v1  ;;  %v19253_v6 = vld [vmem:[%s21479_s0 + $0xa8] sm:$0xff] }
  0xd3   :  { %v311_v54 = vmul.f32 %v18869_v14, %v18958_v1  ;;  %v653_v59 = vadd.f32 %v617_v24, %v576_v51  ;;  %v312_v16 = vmul.f32 %v18869_v14, %v18967_v8  ;;  %v388_v27 = vmul.f32 %v18875_v18, %v19046_v50 }
  0xd4   :  { %v270_v17 = vadd.f32 %v234_v4, %v193_v3  ;;  %v848_v22 = vadd.f32 %v18979_v34, %v805_v49  ;;  %v654_v28 = vadd.f32 %v618_v10, %v577_v52  ;;  %v271_v47 = vadd.f32 %v235_v37, %v194_v48  ;;  %v19269_v37 = vld [vmem:[%s21479_s0 + $0xb0] sm:$0xff] }
  0xd5   :  { %v389_v5 = vmul.f32 %v18875_v18, %v19057_v56  ;;  %v730_v53 = vadd.f32 %v694_v55, %v653_v59  ;;  %v465_v35 = vmul.f32 %v18877_v19, %v19057_v56  ;;  %v466_v10 = vmul.f32 %v18877_v19, %v19101_v41 }
  0xd6   :  { %v347_v43 = vadd.f32 %v311_v54, %v270_v17  ;;  %v884_v24 = vmax.f32 %v848_v22, 0.0  ;;  %v731_v21 = vadd.f32 %v695_v46, %v654_v28  ;;  %v348_v51 = vadd.f32 %v312_v16, %v271_v47 }
  0xd7   :  { %v807_v3 = vadd.f32 %v771_v61, %v730_v53  ;;  %v542_v55 = vmul.f32 %v18879_v20, %v19101_v41  ;;  %v543_v4 = vmul.f32 %v18879_v20, %v19115_v15  ;;  %v619_v17 = vmul.f32 %v18889_v25, %v19194_v39 }
  0xd8   :  { %v424_v48 = vadd.f32 %v388_v27, %v347_v43  ;;  %v19261_v49 = vpack.c.bf16 %v884_v24, %v883_v23  ;;  %v19264_v46 = vpack.c.bf16 %v21496_v57, %v884_v24  ;;  %v808_v52 = vadd.f32 %v772_v33, %v731_v21  ;;  %v19293_v24 = vld [vmem:[%s21479_s0 + $0xb8] sm:$0xff] }
  0xd9   :  { %v425_v54 = vadd.f32 %v389_v5, %v348_v51  ;;  %v19272_v61 = vadd.f32 %v18979_v34, %v807_v3  ;;  %v620_v23 = vmul.f32 %v18889_v25, %v19205_v58  ;;  %v696_v27 = vmul.f32 %v18891_v26, %v19205_v58 }
  0xda   :  { %21517 = vst [vmem:[#allocation22_spill] sm:$0xff] %v19264_v46  ;;  %v501_v59 = vadd.f32 %v465_v35, %v424_v48  ;;  %17458 = vmatprep.mubr.msk.bf16.mxu0 %vm1641_vm0, %v19264_v46  ;;  %v851_v33 = vadd.f32 %v18979_v34, %v808_v52  ;;  %v697_v22 = vmul.f32 %v18891_v26, %v19253_v6 }
  0xdb   :  { %v502_v16 = vadd.f32 %v466_v10, %v425_v54  ;;  %v21491_v28 = vmax.f32 %v19272_v61, 0.0  ;;  %v773_v5 = vmul.f32 %v18904_v32, %v19253_v6  ;;  %v195_v53 = vmul.f32 %v18865_v12, %v18958_v1 }
  0xdc   :  { %v578_v47 = vadd.f32 %v542_v55, %v501_v59  ;;  %v887_v43 = vmax.f32 %v851_v33, 0.0  ;;  %v236_v21 = vmul.f32 %v18867_v13, %v18967_v8  ;;  %v313_v51 = vmul.f32 %v18869_v14, %v18999_v42 }
  0xdd   :  { %v579_v35 = vadd.f32 %v543_v4, %v502_v16  ;;  %v774_v3 = vmul.f32 %v18904_v32, %v19269_v37  ;;  %v390_v1 = vmul.f32 %v18875_v18, %v19101_v41  ;;  %v467_v48 = vmul.f32 %v18877_v19, %v19115_v15 }
  0xde   :  { %v655_v10 = vadd.f32 %v619_v17, %v578_v47  ;;  %v19307_v55 = vpack.c.bf16 %v887_v43, %v21491_v28  ;;  %v272_v52 = vadd.f32 %v236_v21, %v195_v53  ;;  %v544_v8 = vmul.f32 %v18879_v20, %v19150_v40  ;;  %v19403_v28 = vld [vmem:[#allocation2 + $0x2] ss:$0 sm:$0xff] }
  0xdf   :  { %v656_v4 = vadd.f32 %v620_v23, %v579_v35  ;;  %v621_v59 = vmul.f32 %v18889_v25, %v19253_v6  ;;  %v698_v17 = vmul.f32 %v18891_v26, %v19269_v37  ;;  %v775_v33 = vmul.f32 %v18904_v32, %v19293_v24 }
  0xe0   :  { %21518 = vst [vmem:[#allocation23_spill] sm:$0xff] %v19307_v55  ;;  %v732_v54 = vadd.f32 %v696_v27, %v655_v10  ;;  %17459 = vmatmul.mubr.msk.bf16.gmra.mrb[16].mxu0 %vm1641_vm0, %v19307_v55  ;;  %v349_v16 = vadd.f32 %v313_v51, %v272_v52  ;;  %v197_v23 = vmul.f32 %v18865_v12, %v18999_v42  ;;  %v19342_v51 = vld [vmem:[%s21479_s0 + $0xc0] sm:$0xff] }
  0xe1   :  { %v733_v19 = vadd.f32 %v697_v22, %v656_v4  ;;  %v198_v20 = vmul.f32 %v18865_v12, %v19037_v36  ;;  %v238_v25 = vmul.f32 %v18867_v13, %v19037_v36  ;;  %v239_v26 = vmul.f32 %v18867_v13, %v19046_v50  ;;  %v19355_v52 = vld [vmem:[#allocation2 + $0x5] ss:$0 sm:$0xff] }
  0xe2   :  { %v809_v27 = vadd.f32 %v773_v5, %v732_v54  ;;  %v315_v32 = vmul.f32 %v18869_v14, %v19046_v50  ;;  %v426_v53 = vadd.f32 %v390_v1, %v349_v16  ;;  %v316_v22 = vmul.f32 %v18869_v14, %v19057_v56  ;;  %v19344_v14 = vld [vmem:[#allocation2 + $0x4] ss:$0 sm:$0xff] }
  0xe3   :  { %v810_v47 = vadd.f32 %v774_v3, %v733_v19  ;;  %v392_v42 = vmul.f32 %v18875_v18, %v19150_v40  ;;  %v274_v5 = vadd.f32 %v238_v25, %v197_v23  ;;  %v275_v35 = vadd.f32 %v239_v26, %v198_v20  ;;  %v19362_v20 = vld [vmem:[#allocation2 + $0x6] ss:$0 sm:$0xff] }
  0xe4   :  { %v852_v12 = vadd.f32 %v18979_v34, %v809_v27  ;;  %v393_v36 = vmul.f32 %v18875_v18, %v19187_v29  ;;  %v503_v21 = vadd.f32 %v467_v48, %v426_v53  ;;  %v469_v10 = vmul.f32 %v19344_v14, %v19187_v29  ;;  %v19353_v18 = vld [vmem:[%s21479_s0 + $0xc8] sm:$0xff] }
  0xe5   :  { %v19337_v13 = vadd.f32 %v18979_v34, %v810_v47  ;;  %v470_v3 = vmul.f32 %v19344_v14, %v19194_v39  ;;  %v351_v48 = vadd.f32 %v315_v32, %v274_v5  ;;  %v352_v4 = vadd.f32 %v316_v22, %v275_v35 }
  0xe6   :  { %v888_v1 = vmax.f32 %v852_v12, 0.0  ;;  %v546_v54 = vmul.f32 %v19355_v52, %v19194_v39  ;;  %v580_v16 = vadd.f32 %v544_v8, %v503_v21  ;;  %v547_v23 = vmul.f32 %v19355_v52, %v19205_v58  ;;  %v19375_v8 = vld [vmem:[%s21479_s0 + $0xd0] sm:$0xff]  ;;  %v19377_v12 = vld [vmem:[#allocation2 + $0x7] ss:$0 sm:$0xff] }
  0xe7   :  { %v889_v19 = vmax.f32 %v19337_v13, 0.0  ;;  %v623_v27 = vmul.f32 %v19362_v20, %v19293_v24  ;;  %v428_v26 = vadd.f32 %v392_v42, %v351_v48  ;;  %v429_v32 = vadd.f32 %v393_v36, %v352_v4  ;;  %v19383_v36 = vld [vmem:[#allocation2 + $0x8] ss:$0 sm:$0xff] }
  0xe8   :  { %v19366_v25 = vpack.c.bf16 %v888_v1, %v887_v43  ;;  %v624_v47 = vmul.f32 %v19362_v20, %v19342_v51  ;;  %v657_v22 = vadd.f32 %v621_v59, %v580_v16  ;;  %v700_v5 = vmul.f32 %v19377_v12, %v19342_v51 }
  0xe9   :  { %v19370_v53 = vpack.c.bf16 %v889_v19, %v888_v1  ;;  %v701_v43 = vmul.f32 %v19377_v12, %v19353_v18  ;;  %v505_v42 = vadd.f32 %v469_v10, %v428_v26  ;;  %v506_v35 = vadd.f32 %v470_v3, %v429_v32  ;;  %v19391_v1 = vld [vmem:[#allocation2] ss:$0 sm:$0xff]  ;;  %v19397_v3 = vld [vmem:[#allocation2 + $0x1] ss:$0 sm:$0xff] }
  0xea   :  { %v777_v59 = vmul.f32 %v19383_v36, %v19353_v18  ;;  %v778_v13 = vmul.f32 %v19383_v36, %v19375_v8  ;;  %v734_v21 = vadd.f32 %v698_v17, %v657_v22  ;;  %v199_v48 = vmul.f32 %v19391_v1, %v19046_v50 }
  0xeb   :  { %21519 = vst [vmem:[#allocation24_spill] sm:$0xff] %v19370_v53  ;;  %17462 = vmatprep.mubr.msk.bf16.mxu0 %vm1641_vm0, %v19370_v53  ;;  %v200_v10 = vmul.f32 %v19391_v1, %v19057_v56  ;;  %v240_v4 = vmul.f32 %v19397_v3, %v19057_v56  ;;  %v582_v16 = vadd.f32 %v546_v54, %v505_v42 }
  0xec   :  { %v583_v26 = vadd.f32 %v547_v23, %v506_v35  ;;  %v241_v32 = vmul.f32 %v19397_v3, %v19101_v41  ;;  %v317_v17 = vmul.f32 %v19403_v28, %v19101_v41  ;;  %v811_v22 = vadd.f32 %v775_v33, %v734_v21 }
  0xed   :  { %v276_v50 = vadd.f32 %v240_v4, %v199_v48  ;;  %v318_v38 = vmul.f32 %v19403_v28, %v19115_v15  ;;  %v394_v56 = vmul.f32 %v19409_v9, %v19194_v39  ;;  %v659_v54 = vadd.f32 %v623_v27, %v582_v16 }
  0xee   :  { %v660_v23 = vadd.f32 %v624_v47, %v583_v26  ;;  %v277_v42 = vadd.f32 %v241_v32, %v200_v10  ;;  %v395_v35 = vmul.f32 %v19409_v9, %v19205_v58  ;;  %v854_v0 = vadd.f32 %v18979_v34, %v811_v22  ;;  %v19427_v26 = vld [vmem:[%s21479_s0 + $0xd8] sm:$0xff]  ;;  %v19445_v22 = vld [vmem:[%s21479_s0 + $0xe0] sm:$0xff] }
  0xef   :  { %v353_v57 = vadd.f32 %v317_v17, %v276_v50  ;;  %v471_v33 = vmul.f32 %v19344_v14, %v19205_v58  ;;  %v736_v21 = vadd.f32 %v700_v5, %v659_v54  ;;  %v472_v53 = vmul.f32 %v19344_v14, %v19253_v6 }
  0xf0   :  { %v737_v48 = vadd.f32 %v701_v43, %v660_v23  ;;  %v354_v4 = vadd.f32 %v318_v38, %v277_v42  ;;  %v890_v55 = vmax.f32 %v854_v0, 0.0  ;;  %v548_v27 = vmul.f32 %v19355_v52, %v19253_v6 }
  0xf1   :  { %v430_v46 = vadd.f32 %v394_v56, %v353_v57  ;;  %v549_v47 = vmul.f32 %v19355_v52, %v19269_v37  ;;  %v813_v10 = vadd.f32 %v777_v59, %v736_v21  ;;  %v625_v38 = vmul.f32 %v19362_v20, %v19353_v18 }
  0xf2   :  { %v814_v16 = vadd.f32 %v778_v13, %v737_v48  ;;  %v431_v5 = vadd.f32 %v395_v35, %v354_v4  ;;  %v19431_v43 = vpack.c.bf16 %v890_v55, %v889_v19  ;;  %v21520_v0 = vmov 0.0  }
  0xf3   :  { %v19434_v57 = vpack.c.bf16 %v21520_v0, %v890_v55  ;;  %v507_v32 = vadd.f32 %v471_v33, %v430_v46  ;;  %v626_v17 = vmul.f32 %v19362_v20, %v19375_v8  ;;  %v19439_v59 = vadd.f32 %v18979_v34, %v813_v10 }
  0xf4   :  { %v857_v13 = vadd.f32 %v18979_v34, %v814_v16  ;;  %v508_v50 = vadd.f32 %v472_v53, %v431_v5  ;;  %v702_v19 = vmul.f32 %v19377_v12, %v19375_v8  ;;  %v703_v55 = vmul.f32 %v19377_v12, %v19427_v26 }
  0xf5   :  { %21521 = vst [vmem:[#allocation25_spill] sm:$0xff] %v19434_v57  ;;  %17463 = vmatmul.mubr.msk.bf16.gmra.mrb[20].mxu0 %vm1641_vm0, %v19434_v57  ;;  %v584_v46 = vadd.f32 %v548_v27, %v507_v32  ;;  %v779_v56 = vmul.f32 %v19383_v36, %v19427_v26  ;;  %v201_v34 = vmul.f32 %v19391_v1, %v19101_v41  ;;  %v21504_v54 = vmax.f32 %v19439_v59, 0.0 }
  0xf6   :  { %v893_v23 = vmax.f32 %v857_v13, 0.0  ;;  %v585_v53 = vadd.f32 %v549_v47, %v508_v50  ;;  %v242_v42 = vmul.f32 %v19397_v3, %v19115_v15  ;;  %v780_v33 = vmul.f32 %v19383_v36, %v19445_v22 }
  0xf7   :  { %v661_v35 = vadd.f32 %v625_v38, %v584_v46  ;;  %v319_v21 = vmul.f32 %v19403_v28, %v19150_v40  ;;  %v396_v48 = vmul.f32 %v19409_v9, %v19253_v6  ;;  %v473_v47 = vmul.f32 %v19344_v14, %v19269_v37 }
  0xf8   :  { %v19468_v41 = vpack.c.bf16 %v893_v23, %v21504_v54  ;;  %v662_v4 = vadd.f32 %v626_v17, %v585_v53  ;;  %v278_v27 = vadd.f32 %v242_v42, %v201_v34  ;;  %v550_v10 = vmul.f32 %v19355_v52, %v19293_v24  ;;  %v19483_v17 = vld [vmem:[%s21479_s0 + $0xe8] sm:$0xff] }
  0xf9   :  { %v738_v15 = vadd.f32 %v702_v19, %v661_v35  ;;  %v627_v16 = vmul.f32 %v19362_v20, %v19427_v26  ;;  %v704_v5 = vmul.f32 %v19377_v12, %v19445_v22  ;;  %v781_v13 = vmul.f32 %v19483_v17, %v19383_v36 }
  0xfa   :  { %21522 = vst [vmem:[#allocation26_spill] sm:$0xff] %v19468_v41  ;;  %17466 = vmatprep.mubr.msk.bf16.mxu0 %vm1641_vm0, %v19468_v41  ;;  %v739_v38 = vadd.f32 %v703_v55, %v662_v4  ;;  %v355_v32 = vadd.f32 %v319_v21, %v278_v27  ;;  %v203_v50 = vmul.f32 %v19391_v1, %v19150_v40  ;;  %v19499_v4 = vld [vmem:[#allocation7] ss:$0 sm:$0xff] }
  0xfb   :  { %v815_v19 = vadd.f32 %v779_v56, %v738_v15  ;;  %v204_v46 = vmul.f32 %v19391_v1, %v19187_v29  ;;  %v244_v34 = vmul.f32 %v19397_v3, %v19187_v29  ;;  %v245_v55 = vmul.f32 %v19397_v3, %v19194_v39 }
  0xfc   :  { %v816_v53 = vadd.f32 %v780_v33, %v739_v38  ;;  %v432_v42 = vadd.f32 %v396_v48, %v355_v32  ;;  %v321_v35 = vmul.f32 %v19403_v28, %v19194_v39  ;;  %v322_v21 = vmul.f32 %v19403_v28, %v19205_v58 }
  0xfd   :  { %v858_v40 = vadd.f32 %v19499_v4, %v815_v19  ;;  %v280_v56 = vadd.f32 %v244_v34, %v203_v50  ;;  %v281_v27 = vadd.f32 %v245_v55, %v204_v46  ;;  %v398_v29 = vmul.f32 %v19409_v9, %v19293_v24 }
  0xfe   :  { %v859_v15 = vadd.f32 %v19499_v4, %v816_v53  ;;  %v509_v54 = vadd.f32 %v473_v47, %v432_v42  ;;  %v399_v33 = vmul.f32 %v19409_v9, %v19342_v51  ;;  %v475_v48 = vmul.f32 %v19344_v14, %v19342_v51 }
  0xff   :  { %v894_v38 = vmax.f32 %v858_v40, 0.0  ;;  %v357_v32 = vadd.f32 %v321_v35, %v280_v56  ;;  %v358_v41 = vadd.f32 %v322_v21, %v281_v27  ;;  %v476_v19 = vmul.f32 %v19344_v14, %v19353_v18 }
 0x100   :  { %v895_v50 = vmax.f32 %v859_v15, 0.0  ;;  %v586_v46 = vadd.f32 %v550_v10, %v509_v54  ;;  %v552_v34 = vmul.f32 %v19355_v52, %v19353_v18  ;;  %v553_v47 = vmul.f32 %v19355_v52, %v19375_v8  ;;  %v18453_v54 = vld [vmem:[%s21479_s0 + $0xf0] sm:$0xff]  ;;  %v18455_v15 = vld [vmem:[%s21479_s0 + $0x100] sm:$0xff] }
 0x101   :  { %v19515_v55 = vpack.c.bf16 %v894_v38, %v893_v23  ;;  %v434_v53 = vadd.f32 %v398_v29, %v357_v32  ;;  %v435_v42 = vadd.f32 %v399_v33, %v358_v41  ;;  %v629_v51 = vmul.f32 %v19483_v17, %v19362_v20  ;;  %v18454_v23 = vld [vmem:[%s21479_s0 + $0xf8] sm:$0xff] }
 0x102   :  { %v19519_v35 = vpack.c.bf16 %v895_v50, %v894_v38  ;;  %v663_v21 = vadd.f32 %v627_v16, %v586_v46  ;;  %v630_v10 = vmul.f32 %v18453_v54, %v19362_v20  ;;  %v706_v40 = vmul.f32 %v18453_v54, %v19377_v12 }
 0x103   :  { %v511_v56 = vadd.f32 %v475_v48, %v434_v53  ;;  %v512_v27 = vadd.f32 %v476_v19, %v435_v42  ;;  %v707_v41 = vmul.f32 %v18454_v23, %v19377_v12  ;;  %v783_v29 = vmul.f32 %v18454_v23, %v19383_v36 }
 0x104   :  { %21523 = vst [vmem:[#allocation27_spill] sm:$0xff] %v19519_v35  ;;  %17467 = vmatmul.mubr.msk.bf16.gmra.mrb[24].mxu0 %vm1641_vm0, %v19519_v35  ;;  %v740_v16 = vadd.f32 %v704_v5, %v663_v21  ;;  %v784_v33 = vmul.f32 %v18455_v15, %v19383_v36  ;;  %v205_v48 = vmul.f32 %v19391_v1, %v19194_v39 }
 0x105   :  { %v206_v38 = vmul.f32 %v19391_v1, %v19205_v58  ;;  %v588_v32 = vadd.f32 %v552_v34, %v511_v56  ;;  %v589_v19 = vadd.f32 %v553_v47, %v512_v27  ;;  %v246_v46 = vmul.f32 %v19397_v3, %v19205_v58 }
 0x106   :  { %v247_v5 = vmul.f32 %v19397_v3, %v19253_v6  ;;  %v817_v53 = vadd.f32 %v781_v13, %v740_v16  ;;  %v323_v42 = vmul.f32 %v19403_v28, %v19253_v6  ;;  %v324_v21 = vmul.f32 %v19403_v28, %v19269_v37 }
 0x107   :  { %v400_v39 = vmul.f32 %v19409_v9, %v19353_v18  ;;  %v665_v54 = vadd.f32 %v629_v51, %v588_v32  ;;  %v666_v35 = vadd.f32 %v630_v10, %v589_v19  ;;  %v282_v34 = vadd.f32 %v246_v46, %v205_v48 }
 0x108   :  { %v283_v47 = vadd.f32 %v247_v5, %v206_v38  ;;  %v860_v56 = vadd.f32 %v19499_v4, %v817_v53  ;;  %v401_v58 = vmul.f32 %v19409_v9, %v19375_v8  ;;  %v477_v13 = vmul.f32 %v19344_v14, %v19375_v8 }
 0x109   :  { %v478_v27 = vmul.f32 %v19344_v14, %v19427_v26  ;;  %v742_v16 = vadd.f32 %v706_v40, %v665_v54  ;;  %v743_v57 = vadd.f32 %v707_v41, %v666_v35  ;;  %v359_v11 = vadd.f32 %v323_v42, %v282_v34 }
 0x10a   :  { %v360_v7 = vadd.f32 %v324_v21, %v283_v47  ;;  %v896_v18 = vmax.f32 %v860_v56, 0.0  ;;  %v554_v51 = vmul.f32 %v19355_v52, %v19427_v26  ;;  %v555_v10 = vmul.f32 %v19355_v52, %v19445_v22 }
 0x10b   :  { %v819_v48 = vadd.f32 %v783_v29, %v742_v16  ;;  %v820_v38 = vadd.f32 %v784_v33, %v743_v57  ;;  %v436_v32 = vadd.f32 %v400_v39, %v359_v11  ;;  %v631_v35 = vmul.f32 %v18454_v23, %v19362_v20  ;;  %v18456_v11 = vld [vmem:[%s21479_s0 + $0x108] sm:$0xff] }
 0x10c   :  { %v437_v19 = vadd.f32 %v401_v58, %v360_v7  ;;  %v19562_v46 = vpack.c.bf16 %v896_v18, %v895_v50  ;;  %v19565_v8 = vpack.c.bf16 %v21520_v0, %v896_v18  ;;  %v632_v40 = vmul.f32 %v18455_v15, %v19362_v20 }
 0x10d   :  { %v19570_v41 = vadd.f32 %v19499_v4, %v819_v48  ;;  %v863_v5 = vadd.f32 %v19499_v4, %v820_v38  ;;  %v513_v53 = vadd.f32 %v477_v13, %v436_v32  ;;  %v708_v7 = vmul.f32 %v18455_v15, %v19377_v12 }
 0x10e   :  { %v514_v42 = vadd.f32 %v478_v27, %v437_v19  ;;  %17470 = vmatprep.mubr.msk.bf16.mxu0 %vm1641_vm0, %v19565_v8  ;;  %v709_v57 = vmul.f32 %v18456_v11, %v19377_v12  ;;  %v207_v50 = vmul.f32 %v19391_v1, %v19253_v6  ;;  %v785_v39 = vmul.f32 %v18456_v11, %v19383_v36  ;;  %v18457_v6 = vld [vmem:[%s21479_s0 + $0x110] sm:$0xff] }
 0x10f   :  { %v898_v23 = vmax.f32 %v19570_v41, 0.0  ;;  %v899_v29 = vmax.f32 %v863_v5, 0.0  ;;  %v590_v33 = vadd.f32 %v554_v51, %v513_v53  ;;  %v248_v54 = vmul.f32 %v19397_v3, %v19269_v37 }
 0x110   :  { %v591_v21 = vadd.f32 %v555_v10, %v514_v42  ;;  %v325_v15 = vmul.f32 %v19403_v28, %v19293_v24  ;;  %v786_v1 = vmul.f32 %v18457_v6, %v19383_v36  ;;  %v402_v13 = vmul.f32 %v19409_v9, %v19427_v26 }
 0x111   :  { %v19590_v34 = vpack.c.bf16 %v899_v29, %v898_v23  ;;  %v667_v47 = vadd.f32 %v631_v35, %v590_v33  ;;  %v284_v58 = vadd.f32 %v248_v54, %v207_v50  ;;  %v479_v3 = vmul.f32 %v19344_v14, %v19445_v22 }
 0x112   :  { %v668_v56 = vadd.f32 %v632_v40, %v591_v21  ;;  %v556_v51 = vmul.f32 %v19483_v17, %v19355_v52  ;;  %v633_v26 = vmul.f32 %v18456_v11, %v19362_v20  ;;  %v710_v35 = vmul.f32 %v18457_v6, %v19377_v12  ;;  %v18458_v52 = vld [vmem:[%s21479_s0 + $0x118] sm:$0xff] }
 0x113   :  { %17471 = vmatmul.mubr.msk.bf16.gmra.mrb[28].mxu0 %vm1641_vm0, %v19590_v34  ;;  %v744_v37 = vadd.f32 %v708_v7, %v667_v47  ;;  %v361_v24 = vadd.f32 %v325_v15, %v284_v58  ;;  %v787_v17 = vmul.f32 %v18458_v52, %v19383_v36  ;;  %v21524_v11 = vmov 0.0|0.0   ;;  %v18354_v36 = vld [vmem:[%s21481_s2 + $0x18] sm:$0xff]  }
 0x114   :  { %v745_v28 = vadd.f32 %v709_v57, %v668_v56  ;;  %v21525_v57 = vmax.f32 %v19008_v45, 0.0  ;;  %v21527_v45 = vmax.f32 %v19272_v61, 0.0  ;;  %v19682_v61 = vpack.c.bf16 %v898_v23, %v21520_v0 }
 0x115   :  { %v821_v27 = vadd.f32 %v785_v39, %v744_v37  ;;  %v438_v18 = vadd.f32 %v402_v13, %v361_v24  ;;  %v18356_v24 = vld [vmem:[%s21481_s2 + $0x28] sm:$0xff]  }
 0x116   :  { %v822_v16 = vadd.f32 %v786_v1, %v745_v28  ;;  %v19638_v50 = vpack.c.bf16 %v21525_v57, %v21520_v0  ;;  %v19660_v21 = vpack.c.bf16 %v21527_v45, %v21520_v0 }
 0x117   :  { %v864_v10 = vadd.f32 %v19499_v4, %v821_v27  ;;  %v515_v9 = vadd.f32 %v479_v3, %v438_v18 }
 0x118   :  { %v865_v48 = vadd.f32 %v19499_v4, %v822_v16 }
 0x119   :  { %v900_v38 = vmax.f32 %v864_v10, 0.0  ;;  %v592_v19 = vadd.f32 %v556_v51, %v515_v9 }
 0x11a   :  { %v901_v32 = vmax.f32 %v865_v48, 0.0 }
 0x11b   :  { %v19608_v40 = vpack.c.bf16 %v900_v38, %v899_v29  ;;  %v669_v22 = vadd.f32 %v633_v26, %v592_v19  ;;  %v21526_v29 = vmax.f32 %v19126_v2, 0.0  ;;  %v21528_v2 = vmax.f32 %v19439_v59, 0.0  ;;  %v18355_v59 = vld [vmem:[%s21481_s2 + $0x20] sm:$0xff]  }
 0x11c   :  { %v19610_v14 = vpack.c.bf16 %v901_v32, %v900_v38 }
 0x11d   :  { %v746_v20 = vadd.f32 %v710_v35, %v669_v22  ;;  %v19647_v33 = vpack.c.bf16 %v21526_v29, %v21520_v0  ;;  %v19669_v39 = vpack.c.bf16 %v21528_v2, %v21520_v0  ;;  %v18357_v35 = vld [vmem:[%s21481_s2 + $0x30] sm:$0xff]  }
 0x11e   :  { %17474 = vmatprep.mubr.msk.bf16.mxu0 %vm1641_vm0, %v19610_v14 }
 0x11f   :  { %v823_v5 = vadd.f32 %v787_v17, %v746_v20 }
 0x121   :  { %v866_v53 = vadd.f32 %v19499_v4, %v823_v5  ;;  %v18459_v4 = vld [vmem:[%s21481_s2 + $0x10] sm:$0xff]  }
 0x123   :  { %v902_v42 = vmax.f32 %v866_v53, 0.0 }
 0x125   :  { %v19619_v12 = vpack.c.bf16 %v902_v42, %v901_v32  ;;  %v19622_v7 = vpack.c.bf16 %v21520_v0, %v902_v42 }
 0x127   :  { %17475 = vmatmul.mubr.msk.bf16.gmra.mrb[32].mxu0 %vm1641_vm0, %v19622_v7 }
 0x128   :  { %17480 = vmatprep.mubr.bf16.mxu0 %v21524_v11 }
 0x12f   :  { %17481 = vmatmul.mubr.bf16.vlgmr.msra.gmra.mrb[0].mxu0 %v21524_v11 }
 0x130   :  { %17517 = vmatpush3.bf16.msra.mxu0 %v18459_v4  ;;  %17484 = vmatprep.mubr.bf16.mxu0 %v21524_v11  ;;  %v21530_v4 = vld [vmem:[#allocation21_spill] sm:$0xff] }
 0x131   :  { %17554 = vmatprep.subr.bf16.mxu0 %v18354_v36 }
 0x137   :  { %17485 = vmatmul.mubr.msk.bf16.gmra.mrb[36].mxu0 %vm1641_vm0, %v19638_v50 }
 0x138   :  { %17488 = vmatprep.mubr.msk.bf16.mxu0 %vm1641_vm0, %v19063_v62 }
 0x13f   :  { %17489 = vmatmul.mubr.msk.bf16.gmra.mrb[40].mxu0 %vm1641_vm0, %v19107_v44 }
 0x140   :  { %17492 = vmatprep.mubr.msk.bf16.mxu0 %vm1641_vm0, %v19647_v33 }
 0x147   :  { %17493 = vmatmul.mubr.msk.bf16.gmra.mrb[12].mxu0 %vm1641_vm0, %v19219_v30 }
 0x148   :  { %17496 = vmatprep.mubr.msk.bf16.mxu0 %vm1641_vm0, %v19261_v49 }
 0x14f   :  { %17497 = vmatmul.mubr.msk.bf16.gmra.mrb[44].mxu0 %vm1641_vm0, %v19660_v21 }
 0x150   :  { %17500 = vmatprep.mubr.msk.bf16.mxu0 %vm1641_vm0, %v19366_v25 }
 0x157   :  { %17501 = vmatmul.mubr.msk.bf16.gmra.mrb[48].mxu0 %vm1641_vm0, %v19431_v43 }
 0x158   :  { %17504 = vmatprep.mubr.msk.bf16.mxu0 %vm1641_vm0, %v19669_v39 }
 0x15f   :  { %17505 = vmatmul.mubr.msk.bf16.gmra.mrb[24].mxu0 %vm1641_vm0, %v19515_v55 }
 0x160   :  { %17508 = vmatprep.mubr.msk.bf16.mxu0 %vm1641_vm0, %v19562_v46 }
 0x167   :  { %17509 = vmatmul.mubr.msk.bf16.gmra.mrb[52].mxu0 %vm1641_vm0, %v19682_v61 }
 0x168   :  { %17512 = vmatprep.mubr.msk.bf16.mxu0 %vm1641_vm0, %v19608_v40 }
 0x16f   :  { %17513 = vmatmul.mubr.msk.bf16.gmra.mrb[56].mxu0 %vm1641_vm0, %v19619_v12 }
 0x170   :  { %17518 = vmatprep.mubr.bf16.mxu0 %v21524_v11 }
 0x177   :  { %17519 = vmatmul.mubr.bf16.vlgmr.msra.gmra.mrb[0].mxu0 %v21524_v11 }
 0x178   :  { %17555 = vmatpush3.bf16.msra.mxu0 %v18354_v36  ;;  %17522 = vmatprep.mubr.msk.bf16.mxu0 %vm1641_vm0, %v19638_v50  ;;  %v21529_v36 = vld [vmem:[#allocation20_spill] sm:$0xff] }
 0x179   :  { %17592 = vmatprep.subr.bf16.mxu0 %v18355_v59 }
 0x17f   :  { %17523 = vmatmul.mubr.msk.bf16.gmra.mrb[60].mxu0 %vm1641_vm0, %v19063_v62 }
 0x180   :  { %17526 = vmatprep.mubr.msk.bf16.mxu0 %vm1641_vm0, %v19107_v44 }
 0x184   :  { %v19701_v41 = vpop.f32.mrb[4].mxu0 }
 0x185   :  { %v19703_v23 = vpop.f32.mrb[5].mxu0 }
 0x186   :  { %v19707_v54 = vpop.f32.mrb[6].mxu0 }
 0x187   :  { %17527 = vmatmul.mubr.msk.bf16.gmra.mrb[64].mxu0 %vm1641_vm0, %v19647_v33  ;;  %v1749_v15 = vpop.f32.mrb[7].mxu0 }
 0x188   :  { %17530 = vmatprep.mubr.msk.bf16.mxu0 %vm1641_vm0, %v19219_v30  ;;  %v21531_v15 = vld [vmem:[#allocation22_spill] sm:$0xff] }
 0x18f   :  { %17531 = vmatmul.mubr.msk.bf16.gmra.mrb[12].mxu0 %vm1641_vm0, %v19261_v49 }
 0x190   :  { %17534 = vmatprep.mubr.msk.bf16.mxu0 %vm1641_vm0, %v19660_v21 }
 0x193   :  { %v19715_v47 = vpop.f32.mrb[8].mxu0 }
 0x194   :  { %v19717_v56 = vpop.f32.mrb[9].mxu0 }
 0x195   :  { %v17453_v6 = vpop.f32.mrb[10].mxu0 }
 0x196   :  { %v19719_v1 = vpop.f32.mrb[11].mxu0  ;;  %v21533_v6 = vld [vmem:[#allocation24_spill] sm:$0xff] }
 0x197   :  { %17535 = vmatmul.mubr.msk.bf16.gmra.mrb[68].mxu0 %vm1641_vm0, %v19366_v25 }
 0x198   :  { %17538 = vmatprep.mubr.msk.bf16.mxu0 %vm1641_vm0, %v19431_v43 }
 0x19f   :  { %17539 = vmatmul.mubr.msk.bf16.gmra.mrb[72].mxu0 %vm1641_vm0, %v19669_v39 }
 0x1a0   :  { %17542 = vmatprep.mubr.msk.bf16.mxu0 %vm1641_vm0, %v19515_v55 }
 0x1a7   :  { %17543 = vmatmul.mubr.msk.bf16.gmra.mrb[24].mxu0 %vm1641_vm0, %v19562_v46 }
 0x1a8   :  { %17546 = vmatprep.mubr.msk.bf16.mxu0 %vm1641_vm0, %v19682_v61 }
 0x1af   :  { %17547 = vmatmul.mubr.msk.bf16.gmra.mrb[76].mxu0 %vm1641_vm0, %v19608_v40 }
 0x1b0   :  { %17550 = vmatprep.mubr.msk.bf16.mxu0 %vm1641_vm0, %v19619_v12 }
 0x1b3   :  { %v19737_v58 = vpop.f32.mrb[16].mxu0 }
 0x1b4   :  { %v19739_v13 = vpop.f32.mrb[17].mxu0 }
 0x1b5   :  { %v19741_v37 = vpop.f32.mrb[18].mxu0 }
 0x1b6   :  { %v1797_v28 = vpop.f32.mrb[19].mxu0 }
 0x1b7   :  { %17551 = vmatmul.mubr.bf16.gmra.mrb[80].mxu0 %v21524_v11  ;;  %v21534_v28 = vld [vmem:[#allocation25_spill] sm:$0xff] }
 0x1b8   :  { %17556 = vmatprep.mubr.msk.bf16.mxu0 %vm1641_vm0, %v19638_v50 }
 0x1bf   :  { %17557 = vmatmul.mubr.msk.bf16.vlgmr.msra.gmra.mrb[0].mxu0 %vm1641_vm0, %v19063_v62 }
 0x1c0   :  { %17593 = vmatpush3.bf16.msra.mxu0 %v18355_v59  ;;  %17560 = vmatprep.mubr.msk.bf16.mxu0 %vm1641_vm0, %v19107_v44 }
 0x1c1   :  { %17630 = vmatprep.subr.bf16.mxu0 %v18356_v24 }
 0x1c7   :  { %17561 = vmatmul.mubr.msk.bf16.gmra.mrb[84].mxu0 %vm1641_vm0, %v19647_v33 }
 0x1c8   :  { %v17464_v3 = vpop.f32.mrb[20].mxu0  ;;  %17564 = vmatprep.mubr.msk.bf16.mxu0 %vm1641_vm0, %v19219_v30 }
 0x1c9   :  { %v1810_v27 = vpop.f32.mrb[21].mxu0 }
 0x1ca   :  { %v17465_v16 = vpop.f32.mrb[22].mxu0 }
 0x1cb   :  { %v19757_v18 = vpop.f32.mrb[23].mxu0 }
 0x1cf   :  { %17565 = vmatmul.mubr.msk.bf16.gmra.mrb[88].mxu0 %vm1641_vm0, %v19261_v49 }
 0x1d0   :  { %17568 = vmatprep.mubr.msk.bf16.mxu0 %vm1641_vm0, %v19660_v21 }
 0x1d7   :  { %17569 = vmatmul.mubr.msk.bf16.gmra.mrb[12].mxu0 %vm1641_vm0, %v19366_v25 }
 0x1d8   :  { %17572 = vmatprep.mubr.msk.bf16.mxu0 %vm1641_vm0, %v19431_v43 }
 0x1df   :  { %17573 = vmatmul.mubr.msk.bf16.gmra.mrb[92].mxu0 %vm1641_vm0, %v19669_v39 }
 0x1e0   :  { %17576 = vmatprep.mubr.msk.bf16.mxu0 %vm1641_vm0, %v19515_v55 }
 0x1e6   :  { %v17472_v51 = vpop.f32.mrb[28].mxu0 }
 0x1e7   :  { %v1842_v10 = vpop.f32.mrb[29].mxu0  ;;  %17577 = vmatmul.mubr.msk.bf16.gmra.mrb[96].mxu0 %vm1641_vm0, %v19562_v46 }
 0x1e8   :  { %v17473_v48 = vpop.f32.mrb[30].mxu0  ;;  %17580 = vmatprep.mubr.msk.bf16.mxu0 %vm1641_vm0, %v19682_v61 }
 0x1e9   :  { %v1845_v9 = vpop.f32.mrb[31].mxu0 }
 0x1ea   :  { %v21535_v9 = vld [vmem:[#allocation26_spill] sm:$0xff] }
 0x1ef   :  { %17581 = vmatmul.mubr.msk.bf16.gmra.mrb[24].mxu0 %vm1641_vm0, %v19608_v40 }
 0x1f0   :  { %17584 = vmatprep.mubr.msk.bf16.mxu0 %vm1641_vm0, %v19619_v12 }
 0x1f7   :  { %17585 = vmatmul.mubr.bf16.gmra.mrb[100].mxu0 %v21524_v11 }
 0x1f8   :  { %17588 = vmatprep.mubr.bf16.mxu0 %v21524_v11 }
 0x1fa   :  { %v17476_v26 = vpop.f32.mrb[32].mxu0 }
 0x1fb   :  { %v1858_v38 = vpop.f32.mrb[33].mxu0  ;;  %v21536_v26 = vld [vmem:[#allocation27_spill] sm:$0xff] }
 0x1fc   :  { %v17477_v32 = vpop.f32.mrb[34].mxu0 }
 0x1fd   :  { %v1861_v19 = vpop.f32.mrb[35].mxu0 }
 0x1ff   :  { %17589 = vmatmul.mubr.bf16.gmra.mrb[104].mxu0 %v21524_v11 }
 0x200   :  { %17594 = vmatprep.mubr.msk.bf16.mxu0 %vm1641_vm0, %v19028_v31 }
 0x207   :  { %17595 = vmatmul.mubr.msk.bf16.vlgmr.msra.gmra.mrb[0].mxu0 %vm1641_vm0, %v19065_v63 }
 0x208   :  { %17631 = vmatpush3.bf16.msra.mxu0 %v18356_v24  ;;  %17598 = vmatprep.mubr.msk.bf16.mxu0 %vm1641_vm0, %v19110_v60 }
 0x209   :  { %17668 = vmatprep.subr.bf16.mxu0 %v18357_v35 }
 0x20a   :  { %v17486_v22 = vpop.f32.mrb[36].mxu0 }
 0x20b   :  { %v1992_v52 = vadd.f32 %v17486_v22, %v19701_v41  ;;  %v1983_v17 = vpop.f32.mrb[37].mxu0 }
 0x20c   :  { %v1984_v20 = vadd.f32 %v1983_v17, %v19703_v23  ;;  %v17487_v5 = vpop.f32.mrb[38].mxu0 }
 0x20d   :  { %v1995_v53 = vadd.f32 %v17487_v5, %v19707_v54  ;;  %v1986_v42 = vpop.f32.mrb[39].mxu0  ;;  %v21532_v54 = vld [vmem:[#allocation23_spill] sm:$0xff] }
 0x20f   :  { %17599 = vmatmul.mubr.msk.bf16.gmra.mrb[108].mxu0 %vm1641_vm0, %v21529_v36 }
 0x210   :  { %17602 = vmatprep.mubr.msk.bf16.mxu0 %vm1641_vm0, %v21530_v4 }
 0x212   :  { %v17490_v57 = vpop.f32.mrb[40].mxu0 }
 0x213   :  { %v2008_v29 = vadd.f32 %v17490_v57, %v19715_v47  ;;  %v1999_v45 = vpop.f32.mrb[41].mxu0 }
 0x214   :  { %v2000_v2 = vadd.f32 %v1999_v45, %v19717_v56  ;;  %v17491_v59 = vpop.f32.mrb[42].mxu0 }
 0x215   :  { %v2002_v41 = vpop.f32.mrb[43].mxu0 }
 0x216   :  { %v2003_v23 = vadd.f32 %v2002_v41, %v19719_v1  ;;  %v18358_v41 = vld [vmem:[%s21481_s2 + $0x38] sm:$0xff]  }
 0x217   :  { %17603 = vmatmul.mubr.msk.bf16.gmra.mrb[112].mxu0 %vm1641_vm0, %v21531_v15 }
 0x218   :  { %17606 = vmatprep.mubr.msk.bf16.mxu0 %vm1641_vm0, %v21532_v54 }
 0x21f   :  { %17607 = vmatmul.mubr.msk.bf16.gmra.mrb[12].mxu0 %vm1641_vm0, %v21533_v6 }
 0x220   :  { %17610 = vmatprep.mubr.msk.bf16.mxu0 %vm1641_vm0, %v21534_v28 }
 0x222   :  { %v17498_v47 = vpop.f32.mrb[44].mxu0 }
 0x223   :  { %v2040_v24 = vadd.f32 %v17498_v47, %v19737_v58  ;;  %v2031_v56 = vpop.f32.mrb[45].mxu0 }
 0x224   :  { %v2032_v16 = vadd.f32 %v2031_v56, %v19739_v13  ;;  %v17499_v51 = vpop.f32.mrb[46].mxu0 }
 0x225   :  { %v2043_v1 = vadd.f32 %v17499_v51, %v19741_v37  ;;  %v2034_v48 = vpop.f32.mrb[47].mxu0 }
 0x227   :  { %17611 = vmatmul.mubr.msk.bf16.gmra.mrb[116].mxu0 %vm1641_vm0, %v21535_v9 }
 0x228   :  { %17614 = vmatprep.mubr.msk.bf16.mxu0 %vm1641_vm0, %v21536_v26 }
 0x22a   :  { %v17502_v38 = vpop.f32.mrb[48].mxu0 }
 0x22b   :  { %v2056_v32 = vadd.f32 %v17502_v38, %v17464_v3  ;;  %v2047_v19 = vpop.f32.mrb[49].mxu0 }
 0x22c   :  { %v2048_v22 = vadd.f32 %v2047_v19, %v1810_v27  ;;  %v17503_v17 = vpop.f32.mrb[50].mxu0 }
 0x22d   :  { %v2050_v5 = vpop.f32.mrb[51].mxu0 }
 0x22e   :  { %v2051_v58 = vadd.f32 %v2050_v5, %v19757_v18 }
 0x22f   :  { %17615 = vmatmul.mubr.msk.bf16.gmra.mrb[120].mxu0 %vm1641_vm0, %v19565_v8 }
 0x230   :  { %17618 = vmatprep.mubr.msk.bf16.mxu0 %vm1641_vm0, %v19590_v34 }
 0x237   :  { %17619 = vmatmul.mubr.msk.bf16.gmra.mrb[24].mxu0 %vm1641_vm0, %v19610_v14 }
 0x238   :  { %17622 = vmatprep.mubr.msk.bf16.mxu0 %vm1641_vm0, %v19622_v7 }
 0x23a   :  { %v17510_v13 = vpop.f32.mrb[52].mxu0 }
 0x23b   :  { %v2079_v37 = vpop.f32.mrb[53].mxu0 }
 0x23c   :  { %v2080_v3 = vadd.f32 %v2079_v37, %v1842_v10  ;;  %v17511_v27 = vpop.f32.mrb[54].mxu0 }
 0x23d   :  { %v2082_v42 = vpop.f32.mrb[55].mxu0 }
 0x23f   :  { %17623 = vmatmul.mubr.bf16.gmra.mrb[124].mxu0 %v21524_v11 }
 0x240   :  { %17626 = vmatprep.mubr.bf16.mxu0 %v21524_v11 }
 0x242   :  { %v17514_v18 = vpop.f32.mrb[56].mxu0 }
 0x243   :  { %v2095_v57 = vpop.f32.mrb[57].mxu0 }
 0x244   :  { %v17515_v45 = vpop.f32.mrb[58].mxu0 }
 0x245   :  { %v2098_v59 = vpop.f32.mrb[59].mxu0 }
 0x247   :  { %17627 = vmatmul.mubr.bf16.gmra.mrb[128].mxu0 %v21524_v11 }
 0x248   :  { %17632 = vmatprep.mubr.msk.bf16.mxu0 %vm1641_vm0, %v19063_v62 }
 0x24f   :  { %17633 = vmatmul.mubr.msk.bf16.vlgmr.msra.gmra.mrb[0].mxu0 %vm1641_vm0, %v19107_v44 }
 0x250   :  { %17669 = vmatpush3.bf16.msra.mxu0 %v18357_v35  ;;  %17636 = vmatprep.mubr.msk.bf16.mxu0 %vm1641_vm0, %v19647_v33 }
 0x251   :  { %17706 = vmatprep.subr.bf16.mxu0 %v18358_v41 }
 0x252   :  { %v17524_v10 = vpop.f32.mrb[60].mxu0 }
 0x253   :  { %v2301_v47 = vadd.f32 %v17524_v10, %v1992_v52  ;;  %v2168_v56 = vpop.f32.mrb[61].mxu0 }
 0x254   :  { %v2299_v51 = vadd.f32 %v2168_v56, %v1984_v20  ;;  %v17525_v48 = vpop.f32.mrb[62].mxu0 }
 0x255   :  { %v2302_v38 = vadd.f32 %v17525_v48, %v1995_v53  ;;  %v2171_v19 = vpop.f32.mrb[63].mxu0 }
 0x257   :  { %17637 = vmatmul.mubr.msk.bf16.gmra.mrb[132].mxu0 %vm1641_vm0, %v19219_v30 }
 0x258   :  { %17640 = vmatprep.mubr.msk.bf16.mxu0 %vm1641_vm0, %v19261_v49 }
 0x25a   :  { %v17528_v17 = vpop.f32.mrb[64].mxu0 }
 0x25b   :  { %v2305_v5 = vadd.f32 %v17528_v17, %v2008_v29  ;;  %v2184_v35 = vpop.f32.mrb[65].mxu0 }
 0x25c   :  { %v2303_v13 = vadd.f32 %v2184_v35, %v2000_v2  ;;  %v17529_v37 = vpop.f32.mrb[66].mxu0 }
 0x25d   :  { %v2187_v27 = vpop.f32.mrb[67].mxu0 }
 0x25e   :  { %v2304_v42 = vadd.f32 %v2187_v27, %v2003_v23 }
 0x25f   :  { %17641 = vmatmul.mubr.msk.bf16.gmra.mrb[136].mxu0 %vm1641_vm0, %v19660_v21 }
 0x260   :  { %17644 = vmatprep.mubr.msk.bf16.mxu0 %vm1641_vm0, %v19366_v25 }
 0x267   :  { %17645 = vmatmul.mubr.msk.bf16.gmra.mrb[12].mxu0 %vm1641_vm0, %v19431_v43 }
 0x268   :  { %17648 = vmatprep.mubr.msk.bf16.mxu0 %vm1641_vm0, %v19669_v39 }
 0x26a   :  { %v17536_v52 = vpop.f32.mrb[68].mxu0 }
 0x26b   :  { %v2313_v20 = vadd.f32 %v17536_v52, %v2040_v24  ;;  %v2216_v53 = vpop.f32.mrb[69].mxu0 }
 0x26c   :  { %v2311_v29 = vadd.f32 %v2216_v53, %v2032_v16  ;;  %v17537_v2 = vpop.f32.mrb[70].mxu0 }
 0x26d   :  { %v2314_v18 = vadd.f32 %v17537_v2, %v2043_v1  ;;  %v2219_v57 = vpop.f32.mrb[71].mxu0 }
 0x26f   :  { %17649 = vmatmul.mubr.msk.bf16.gmra.mrb[140].mxu0 %vm1641_vm0, %v19515_v55 }
 0x270   :  { %17652 = vmatprep.mubr.msk.bf16.mxu0 %vm1641_vm0, %v19562_v46 }
 0x272   :  { %v17540_v23 = vpop.f32.mrb[72].mxu0 }
 0x273   :  { %v2317_v45 = vadd.f32 %v17540_v23, %v2056_v32  ;;  %v2232_v59 = vpop.f32.mrb[73].mxu0 }
 0x274   :  { %v2315_v10 = vadd.f32 %v2232_v59, %v2048_v22  ;;  %v17541_v56 = vpop.f32.mrb[74].mxu0 }
 0x275   :  { %v2235_v48 = vpop.f32.mrb[75].mxu0 }
 0x276   :  { %v2316_v19 = vadd.f32 %v2235_v48, %v2051_v58 }
 0x277   :  { %17653 = vmatmul.mubr.msk.bf16.gmra.mrb[144].mxu0 %vm1641_vm0, %v19682_v61 }
 0x278   :  { %17656 = vmatprep.mubr.msk.bf16.mxu0 %vm1641_vm0, %v19608_v40 }
 0x27f   :  { %17657 = vmatmul.mubr.msk.bf16.gmra.mrb[24].mxu0 %vm1641_vm0, %v19619_v12 }
 0x280   :  { %17660 = vmatprep.mubr.bf16.mxu0 %v21524_v11 }
 0x282   :  { %v17548_v24 = vpop.f32.mrb[76].mxu0 }
 0x283   :  { %v2264_v16 = vpop.f32.mrb[77].mxu0 }
 0x284   :  { %v2323_v1 = vadd.f32 %v2264_v16, %v2080_v3  ;;  %v17549_v32 = vpop.f32.mrb[78].mxu0  ;;  %v18359_v3 = vld [vmem:[%s21481_s2 + $0x40] sm:$0xff]  }
 0x285   :  { %v2267_v17 = vpop.f32.mrb[79].mxu0 }
 0x287   :  { %17661 = vmatmul.mubr.bf16.gmra.mrb[148].mxu0 %v21524_v11 }
 0x288   :  { %17664 = vmatprep.mubr.bf16.mxu0 %v21524_v11 }
 0x28a   :  { %v17552_v22 = vpop.f32.mrb[80].mxu0 }
 0x28b   :  { %v2280_v58 = vpop.f32.mrb[81].mxu0 }
 0x28c   :  { %v17553_v35 = vpop.f32.mrb[82].mxu0 }
 0x28d   :  { %v2283_v37 = vpop.f32.mrb[83].mxu0 }
 0x28f   :  { %17665 = vmatmul.mubr.msk.bf16.gmra.mrb[152].mxu0 %vm1641_vm0, %v19638_v50 }
 0x290   :  { %17670 = vmatprep.mubr.msk.bf16.mxu0 %vm1641_vm0, %v19647_v33 }
 0x297   :  { %17671 = vmatmul.mubr.msk.bf16.vlgmr.msra.gmra.mrb[0].mxu0 %vm1641_vm0, %v19219_v30 }
 0x298   :  { %17707 = vmatpush3.bf16.msra.mxu0 %v18358_v41  ;;  %17674 = vmatprep.mubr.msk.bf16.mxu0 %vm1641_vm0, %v19261_v49 }
 0x299   :  { %17744 = vmatprep.subr.bf16.mxu0 %v18359_v3 }
 0x29a   :  { %v17562_v27 = vpop.f32.mrb[84].mxu0 }
 0x29b   :  { %v2522_v52 = vadd.f32 %v17562_v27, %v2301_v47  ;;  %v2389_v53 = vpop.f32.mrb[85].mxu0 }
 0x29c   :  { %v2520_v2 = vadd.f32 %v2389_v53, %v2299_v51  ;;  %v17563_v57 = vpop.f32.mrb[86].mxu0 }
 0x29d   :  { %v2523_v23 = vadd.f32 %v17563_v57, %v2302_v38  ;;  %v2392_v59 = vpop.f32.mrb[87].mxu0 }
 0x29f   :  { %17675 = vmatmul.mubr.msk.bf16.gmra.mrb[156].mxu0 %vm1641_vm0, %v19660_v21 }
 0x2a0   :  { %17678 = vmatprep.mubr.msk.bf16.mxu0 %vm1641_vm0, %v19366_v25 }
 0x2a2   :  { %v17566_v56 = vpop.f32.mrb[88].mxu0 }
 0x2a3   :  { %v2526_v48 = vadd.f32 %v17566_v56, %v2305_v5  ;;  %v2405_v41 = vpop.f32.mrb[89].mxu0 }
 0x2a4   :  { %v2524_v24 = vadd.f32 %v2405_v41, %v2303_v13  ;;  %v17567_v16 = vpop.f32.mrb[90].mxu0 }
 0x2a5   :  { %v2408_v32 = vpop.f32.mrb[91].mxu0 }
 0x2a6   :  { %v2525_v17 = vadd.f32 %v2408_v32, %v2304_v42 }
 0x2a7   :  { %17679 = vmatmul.mubr.msk.bf16.gmra.mrb[160].mxu0 %vm1641_vm0, %v19431_v43 }
 0x2a8   :  { %17682 = vmatprep.mubr.msk.bf16.mxu0 %vm1641_vm0, %v19669_v39 }
 0x2af   :  { %17683 = vmatmul.mubr.msk.bf16.gmra.mrb[12].mxu0 %vm1641_vm0, %v19515_v55 }
 0x2b0   :  { %17686 = vmatprep.mubr.msk.bf16.mxu0 %vm1641_vm0, %v19562_v46 }
 0x2b2   :  { %v17574_v47 = vpop.f32.mrb[92].mxu0 }
 0x2b3   :  { %v2534_v51 = vadd.f32 %v17574_v47, %v2313_v20  ;;  %v2437_v38 = vpop.f32.mrb[93].mxu0 }
 0x2b4   :  { %v2532_v5 = vadd.f32 %v2437_v38, %v2311_v29  ;;  %v17575_v13 = vpop.f32.mrb[94].mxu0 }
 0x2b5   :  { %v2535_v22 = vadd.f32 %v17575_v13, %v2314_v18  ;;  %v2440_v58 = vpop.f32.mrb[95].mxu0 }
 0x2b7   :  { %17687 = vmatmul.mubr.msk.bf16.gmra.mrb[164].mxu0 %vm1641_vm0, %v19682_v61 }
 0x2b8   :  { %17690 = vmatprep.mubr.msk.bf16.mxu0 %vm1641_vm0, %v19608_v40 }
 0x2ba   :  { %v17578_v42 = vpop.f32.mrb[96].mxu0 }
 0x2bb   :  { %v2538_v35 = vadd.f32 %v17578_v42, %v2317_v45  ;;  %v2453_v37 = vpop.f32.mrb[97].mxu0 }
 0x2bc   :  { %v2536_v27 = vadd.f32 %v2453_v37, %v2315_v10  ;;  %v17579_v53 = vpop.f32.mrb[98].mxu0 }
 0x2bd   :  { %v2456_v57 = vpop.f32.mrb[99].mxu0 }
 0x2be   :  { %v2537_v59 = vadd.f32 %v2456_v57, %v2316_v19 }
 0x2bf   :  { %17691 = vmatmul.mubr.msk.bf16.gmra.mrb[168].mxu0 %vm1641_vm0, %v19619_v12 }
 0x2c0   :  { %17694 = vmatprep.mubr.bf16.mxu0 %v21524_v11 }
 0x2c7   :  { %17695 = vmatmul.mubr.bf16.gmra.mrb[24].mxu0 %v21524_v11 }
 0x2c8   :  { %17698 = vmatprep.mubr.bf16.mxu0 %v21524_v11 }
 0x2ca   :  { %v17586_v20 = vpop.f32.mrb[100].mxu0 }
 0x2cb   :  { %v2485_v29 = vpop.f32.mrb[101].mxu0 }
 0x2cc   :  { %v2544_v18 = vadd.f32 %v2485_v29, %v2323_v1  ;;  %v17587_v56 = vpop.f32.mrb[102].mxu0 }
 0x2cd   :  { %v2488_v41 = vpop.f32.mrb[103].mxu0 }
 0x2cf   :  { %17699 = vmatmul.mubr.msk.bf16.gmra.mrb[172].mxu0 %vm1641_vm0, %v19638_v50 }
 0x2d0   :  { %17702 = vmatprep.mubr.msk.bf16.mxu0 %vm1641_vm0, %v19063_v62 }
 0x2d2   :  { %v17590_v45 = vpop.f32.mrb[104].mxu0 }
 0x2d3   :  { %v2501_v10 = vpop.f32.mrb[105].mxu0 }
 0x2d4   :  { %v17591_v19 = vpop.f32.mrb[106].mxu0 }
 0x2d5   :  { %v2504_v16 = vpop.f32.mrb[107].mxu0 }
 0x2d7   :  { %17703 = vmatmul.mubr.msk.bf16.gmra.mrb[176].mxu0 %vm1641_vm0, %v19107_v44 }
 0x2d8   :  { %17708 = vmatprep.mubr.msk.bf16.mxu0 %vm1641_vm0, %v21529_v36 }
 0x2df   :  { %17709 = vmatmul.mubr.msk.bf16.vlgmr.msra.gmra.mrb[0].mxu0 %vm1641_vm0, %v21530_v4 }
 0x2e0   :  { %17745 = vmatpush3.bf16.msra.mxu0 %v18359_v3  ;;  %17712 = vmatprep.mubr.msk.bf16.mxu0 %vm1641_vm0, %v21531_v15 }
 0x2e2   :  { %v17600_v1 = vpop.f32.mrb[108].mxu0 }
 0x2e3   :  { %v2743_v32 = vadd.f32 %v17600_v1, %v2522_v52  ;;  %v2610_v47 = vpop.f32.mrb[109].mxu0 }
 0x2e4   :  { %v2741_v38 = vadd.f32 %v2610_v47, %v2520_v2  ;;  %v17601_v13 = vpop.f32.mrb[110].mxu0 }
 0x2e5   :  { %v2744_v58 = vadd.f32 %v17601_v13, %v2523_v23  ;;  %v2613_v42 = vpop.f32.mrb[111].mxu0 }
 0x2e7   :  { %17713 = vmatmul.mubr.msk.bf16.gmra.mrb[180].mxu0 %vm1641_vm0, %v21532_v54 }
 0x2e8   :  { %17716 = vmatprep.mubr.msk.bf16.mxu0 %vm1641_vm0, %v21533_v6 }
 0x2ea   :  { %v17604_v36 = vpop.f32.mrb[112].mxu0 }
 0x2eb   :  { %v2747_v37 = vadd.f32 %v17604_v36, %v2526_v48  ;;  %v2626_v4 = vpop.f32.mrb[113].mxu0 }
 0x2ec   :  { %v2745_v3 = vadd.f32 %v2626_v4, %v2524_v24  ;;  %v17605_v53 = vpop.f32.mrb[114].mxu0 }
 0x2ed   :  { %v2629_v57 = vpop.f32.mrb[115].mxu0 }
 0x2ee   :  { %v2746_v15 = vadd.f32 %v2629_v57, %v2525_v17 }
 0x2ef   :  { %17717 = vmatmul.mubr.msk.bf16.gmra.mrb[184].mxu0 %vm1641_vm0, %v21534_v28 }
 0x2f0   :  { %17720 = vmatprep.mubr.msk.bf16.mxu0 %vm1641_vm0, %v21535_v9 }
 0x2f7   :  { %17721 = vmatmul.mubr.msk.bf16.gmra.mrb[12].mxu0 %vm1641_vm0, %v21536_v26 }
 0x2f8   :  { %17724 = vmatprep.mubr.msk.bf16.mxu0 %vm1641_vm0, %v19565_v8 }
 0x2fa   :  { %v17612_v54 = vpop.f32.mrb[116].mxu0 }
 0x2fb   :  { %v2755_v6 = vadd.f32 %v17612_v54, %v2534_v51  ;;  %v2658_v52 = vpop.f32.mrb[117].mxu0 }
 0x2fc   :  { %v2753_v2 = vadd.f32 %v2658_v52, %v2532_v5  ;;  %v17613_v23 = vpop.f32.mrb[118].mxu0 }
 0x2fd   :  { %v2756_v48 = vadd.f32 %v17613_v23, %v2535_v22  ;;  %v2661_v24 = vpop.f32.mrb[119].mxu0 }
 0x2ff   :  { %17725 = vmatmul.mubr.msk.bf16.gmra.mrb[188].mxu0 %vm1641_vm0, %v19590_v34 }
 0x300   :  { %17728 = vmatprep.mubr.msk.bf16.mxu0 %vm1641_vm0, %v19610_v14 }
 0x302   :  { %v17616_v28 = vpop.f32.mrb[120].mxu0 }
 0x303   :  { %v2759_v9 = vadd.f32 %v17616_v28, %v2538_v35  ;;  %v2674_v17 = vpop.f32.mrb[121].mxu0 }
 0x304   :  { %v2757_v26 = vadd.f32 %v2674_v17, %v2536_v27  ;;  %v17617_v20 = vpop.f32.mrb[122].mxu0 }
 0x305   :  { %v2677_v29 = vpop.f32.mrb[123].mxu0 }
 0x306   :  { %v2758_v8 = vadd.f32 %v2677_v29, %v2537_v59 }
 0x307   :  { %17729 = vmatmul.mubr.msk.bf16.gmra.mrb[192].mxu0 %vm1641_vm0, %v19622_v7 }
 0x308   :  { %17732 = vmatprep.mubr.bf16.mxu0 %v21524_v11 }
 0x30f   :  { %17733 = vmatmul.mubr.bf16.gmra.mrb[24].mxu0 %v21524_v11 }
 0x310   :  { %17736 = vmatprep.mubr.bf16.mxu0 %v21524_v11 }
 0x312   :  { %v17624_v34 = vpop.f32.mrb[124].mxu0 }
 0x313   :  { %v2706_v51 = vpop.f32.mrb[125].mxu0  ;;  %v18362_v34 = vld [vmem:[%s21482_s3] sm:$0xff]  }
 0x314   :  { %v2765_v5 = vadd.f32 %v2706_v51, %v2544_v18  ;;  %v17625_v14 = vpop.f32.mrb[126].mxu0 }
 0x315   :  { %v2709_v22 = vpop.f32.mrb[127].mxu0 }
 0x317   :  { %17737 = vmatmul.mubr.msk.bf16.gmra.mrb[196].mxu0 %vm1641_vm0, %v19028_v31 }
 0x318   :  { %17740 = vmatprep.mubr.msk.bf16.mxu0 %vm1641_vm0, %v19065_v63 }
 0x31a   :  { %v17628_v35 = vpop.f32.mrb[128].mxu0 }
 0x31b   :  { %v2722_v27 = vpop.f32.mrb[129].mxu0 }
 0x31c   :  { %v17629_v7 = vpop.f32.mrb[130].mxu0 }
 0x31d   :  { %v2725_v59 = vpop.f32.mrb[131].mxu0 }
 0x31f   :  { %17741 = vmatmul.mubr.msk.bf16.gmra.mrb[200].mxu0 %vm1641_vm0, %v19110_v60 }
 0x320   :  { %17746 = vmatprep.mubr.msk.bf16.mxu0 %vm1641_vm0, %v19219_v30 }
 0x327   :  { %17747 = vmatmul.mubr.msk.bf16.vlgmr.msra.gmra.mrb[0].mxu0 %vm1641_vm0, %v19261_v49 }
 0x328   :  { %17750 = vmatprep.mubr.msk.bf16.mxu0 %vm1641_vm0, %v19660_v21 }
 0x32a   :  { %v17638_v31 = vpop.f32.mrb[132].mxu0 }
 0x32b   :  { %v2964_v18 = vadd.f32 %v17638_v31, %v2743_v32  ;;  %v2831_v56 = vpop.f32.mrb[133].mxu0 }
 0x32c   :  { %v2962_v63 = vadd.f32 %v2831_v56, %v2741_v38  ;;  %v17639_v41 = vpop.f32.mrb[134].mxu0 }
 0x32d   :  { %v2965_v45 = vadd.f32 %v17639_v41, %v2744_v58  ;;  %v2834_v10 = vpop.f32.mrb[135].mxu0 }
 0x32f   :  { %17751 = vmatmul.mubr.msk.bf16.gmra.mrb[204].mxu0 %vm1641_vm0, %v19366_v25 }
 0x330   :  { %17754 = vmatprep.mubr.msk.bf16.mxu0 %vm1641_vm0, %v19431_v43 }
 0x332   :  { %v17642_v60 = vpop.f32.mrb[136].mxu0 }
 0x333   :  { %v2968_v30 = vadd.f32 %v17642_v60, %v2747_v37  ;;  %v2847_v19 = vpop.f32.mrb[137].mxu0 }
 0x334   :  { %v2966_v49 = vadd.f32 %v2847_v19, %v2745_v3  ;;  %v17643_v16 = vpop.f32.mrb[138].mxu0 }
 0x335   :  { %v2850_v1 = vpop.f32.mrb[139].mxu0 }
 0x336   :  { %v2967_v21 = vadd.f32 %v2850_v1, %v2746_v15 }
 0x337   :  { %17755 = vmatmul.mubr.msk.bf16.gmra.mrb[208].mxu0 %vm1641_vm0, %v19669_v39 }
 0x338   :  { %17758 = vmatprep.mubr.msk.bf16.mxu0 %vm1641_vm0, %v19515_v55 }
 0x33f   :  { %17759 = vmatmul.mubr.msk.bf16.gmra.mrb[12].mxu0 %vm1641_vm0, %v19562_v46 }
 0x340   :  { %17762 = vmatprep.mubr.msk.bf16.mxu0 %vm1641_vm0, %v19682_v61 }
 0x342   :  { %v17650_v25 = vpop.f32.mrb[140].mxu0 }
 0x343   :  { %v2976_v43 = vadd.f32 %v17650_v25, %v2755_v6  ;;  %v2879_v32 = vpop.f32.mrb[141].mxu0 }
 0x344   :  { %v2974_v47 = vadd.f32 %v2879_v32, %v2753_v2  ;;  %v17651_v38 = vpop.f32.mrb[142].mxu0 }
 0x345   :  { %v2977_v13 = vadd.f32 %v17651_v38, %v2756_v48  ;;  %v2882_v58 = vpop.f32.mrb[143].mxu0 }
 0x347   :  { %17763 = vmatmul.mubr.msk.bf16.gmra.mrb[212].mxu0 %vm1641_vm0, %v19608_v40 }
 0x348   :  { %17766 = vmatprep.mubr.msk.bf16.mxu0 %vm1641_vm0, %v19619_v12 }
 0x34a   :  { %v17654_v55 = vpop.f32.mrb[144].mxu0 }
 0x34b   :  { %v2980_v39 = vadd.f32 %v17654_v55, %v2759_v9  ;;  %v2895_v42 = vpop.f32.mrb[145].mxu0 }
 0x34c   :  { %v2978_v46 = vadd.f32 %v2895_v42, %v2757_v26  ;;  %v17655_v36 = vpop.f32.mrb[146].mxu0  ;;  %v19983_v42 = vld [vmem:[%s21482_s3 + $0x20] sm:$0xff]  }
 0x34d   :  { %v2898_v37 = vpop.f32.mrb[147].mxu0 }
 0x34e   :  { %v2979_v61 = vadd.f32 %v2898_v37, %v2758_v8 }
 0x34f   :  { %17767 = vmatmul.mubr.bf16.gmra.mrb[216].mxu0 %v21524_v11 }
 0x350   :  { %17770 = vmatprep.mubr.bf16.mxu0 %v21524_v11 }
 0x357   :  { %17771 = vmatmul.mubr.bf16.gmra.mrb[24].mxu0 %v21524_v11 }
 0x358   :  { %17774 = vmatprep.mubr.msk.bf16.mxu0 %vm1641_vm0, %v19638_v50  ;;  %v18360_v50 = vld [vmem:[%s21482_s3 + $0x10] sm:$0xff]  }
 0x359   :  { %17782 = vmatprep.subr.bf16.mxu1 %v18360_v50 }
 0x35a   :  { %v17662_v40 = vpop.f32.mrb[148].mxu0  ;;  %17783 = vmatpush3.bf16.msra.mxu1 %v18360_v50 }
 0x35b   :  { %v2927_v4 = vpop.f32.mrb[149].mxu0 }
 0x35c   :  { %v2986_v3 = vadd.f32 %v2927_v4, %v2765_v5  ;;  %v17663_v12 = vpop.f32.mrb[150].mxu0 }
 0x35d   :  { %v2930_v53 = vpop.f32.mrb[151].mxu0 }
 0x35f   :  { %17775 = vmatmul.mubr.msk.bf16.gmra.mrb[220].mxu0 %vm1641_vm0, %v19063_v62 }
 0x360   :  { %17778 = vmatprep.mubr.msk.bf16.mxu0 %vm1641_vm0, %v19107_v44  ;;  %v18361_v44 = vld [vmem:[%s21482_s3 + $0x18] sm:$0xff]  }
 0x361   :  { %17784 = vmatprep.subr.bf16.mxu1 %v18361_v44 }
 0x362   :  { %v17666_v57 = vpop.f32.mrb[152].mxu0  ;;  %17785 = vmatpush3.bf16.msra.mxu1 %v18361_v44 }
 0x363   :  { %v2943_v15 = vpop.f32.mrb[153].mxu0  ;;  %17822 = vmatprep.subr.bf16.mxu1 %v18362_v34 }
 0x364   :  { %v17667_v54 = vpop.f32.mrb[154].mxu0 }
 0x365   :  { %v2946_v6 = vpop.f32.mrb[155].mxu0  ;;  %17787 = vmatmul.mubr.bf16.vlgmr.msra.gmra.mrb[0].mxu1 %v21524_v11 }
 0x366   :  { %17790 = vmatprep.mubr.bf16.mxu1 %v21524_v11  ;;  %17823 = vmatpush3.bf16.msra.mxu1 %v18362_v34 }
 0x367   :  { %17779 = vmatmul.mubr.msk.bf16.gmra.mrb[224].mxu0 %vm1641_vm0, %v19647_v33 }
 0x372   :  { %v17676_v52 = vpop.f32.mrb[156].mxu0 }
 0x373   :  { %v3185_v2 = vadd.f32 %v17676_v52, %v2964_v18  ;;  %v3052_v23 = vpop.f32.mrb[157].mxu0 }
 0x374   :  { %v3183_v48 = vadd.f32 %v3052_v23, %v2962_v63  ;;  %v17677_v24 = vpop.f32.mrb[158].mxu0 }
 0x375   :  { %v3186_v62 = vadd.f32 %v17677_v24, %v2965_v45  ;;  %v3055_v28 = vpop.f32.mrb[159].mxu0 }
 0x37a   :  { %v17680_v33 = vpop.f32.mrb[160].mxu0 }
 0x37b   :  { %v3189_v9 = vadd.f32 %v17680_v33, %v2968_v30  ;;  %v3068_v17 = vpop.f32.mrb[161].mxu0  ;;  %v18363_v30 = vld [vmem:[%s21482_s3 + $0x8] sm:$0xff]  }
 0x37c   :  { %v3187_v26 = vadd.f32 %v3068_v17, %v2966_v49  ;;  %v17681_v20 = vpop.f32.mrb[162].mxu0  ;;  %17824 = vmatprep.subr.bf16.mxu1 %v18363_v30 }
 0x37d   :  { %v3071_v29 = vpop.f32.mrb[163].mxu0  ;;  %17825 = vmatpush3.bf16.msra.mxu1 %v18363_v30 }
 0x37e   :  { %v3188_v8 = vadd.f32 %v3071_v29, %v2967_v21  ;;  %17862 = vmatprep.subr.bf16.mxu1 %v19983_v42 }
 0x38a   :  { %v17688_v51 = vpop.f32.mrb[164].mxu0 }
 0x38b   :  { %v3197_v5 = vadd.f32 %v17688_v51, %v2976_v43  ;;  %v3100_v14 = vpop.f32.mrb[165].mxu0  ;;  %v20006_v51 = vld [vmem:[#allocation9] ss:$0 sm:$0xff] }
 0x38c   :  { %v3195_v22 = vadd.f32 %v3100_v14, %v2974_v47  ;;  %v17689_v35 = vpop.f32.mrb[166].mxu0 }
 0x38d   :  { %v3198_v27 = vadd.f32 %v17689_v35, %v2977_v13  ;;  %v3103_v7 = vpop.f32.mrb[167].mxu0 }
 0x392   :  { %v17692_v59 = vpop.f32.mrb[168].mxu0 }
 0x393   :  { %v3116_v31 = vpop.f32.mrb[169].mxu0  ;;  %v3201_v18 = vadd.f32 %v17692_v59, %v2980_v39 }
 0x394   :  { %v17693_v56 = vpop.f32.mrb[170].mxu0  ;;  %v3199_v63 = vadd.f32 %v3116_v31, %v2978_v46 }
 0x395   :  { %v3119_v41 = vpop.f32.mrb[171].mxu0 }
 0x396   :  { %v3200_v45 = vadd.f32 %v3119_v41, %v2979_v61 }
 0x3a2   :  { %v17700_v10 = vpop.f32.mrb[172].mxu0 }
 0x3a3   :  { %v3148_v60 = vpop.f32.mrb[173].mxu0 }
 0x3a4   :  { %v17701_v19 = vpop.f32.mrb[174].mxu0  ;;  %v3207_v49 = vadd.f32 %v3148_v60, %v2986_v3 }
 0x3a5   :  { %v3151_v16 = vpop.f32.mrb[175].mxu0 }
 0x3aa   :  { %v17704_v1 = vpop.f32.mrb[176].mxu0 }
 0x3ab   :  { %v3164_v21 = vpop.f32.mrb[177].mxu0 }
 0x3ac   :  { %v17705_v25 = vpop.f32.mrb[178].mxu0 }
 0x3ad   :  { %v3167_v43 = vpop.f32.mrb[179].mxu0 }
 0x3ba   :  { %v17714_v32 = vpop.f32.mrb[180].mxu0 }
 0x3bb   :  { %v3273_v47 = vpop.f32.mrb[181].mxu0  ;;  %v3406_v38 = vadd.f32 %v17714_v32, %v3185_v2 }
 0x3bc   :  { %v17715_v13 = vpop.f32.mrb[182].mxu0  ;;  %v3404_v58 = vadd.f32 %v3273_v47, %v3183_v48 }
 0x3bd   :  { %v3276_v55 = vpop.f32.mrb[183].mxu0  ;;  %v3407_v39 = vadd.f32 %v17715_v13, %v3186_v62 }
 0x3c2   :  { %v17718_v46 = vpop.f32.mrb[184].mxu0 }
 0x3c3   :  { %v3289_v36 = vpop.f32.mrb[185].mxu0  ;;  %v19986_v37 = vadd.f32 %v17718_v46, %v3189_v9 }
 0x3c4   :  { %v17719_v61 = vpop.f32.mrb[186].mxu0  ;;  %v19988_v40 = vadd.f32 %v3289_v36, %v3187_v26 }
 0x3c5   :  { %v3292_v4 = vpop.f32.mrb[187].mxu0 }
 0x3c6   :  { %v19990_v3 = vadd.f32 %v3292_v4, %v3188_v8 }
 0x3d2   :  { %v17726_v12 = vpop.f32.mrb[188].mxu0 }
 0x3d3   :  { %v3321_v53 = vpop.f32.mrb[189].mxu0  ;;  %v19992_v57 = vadd.f32 %v17726_v12, %v3197_v5 }
 0x3d4   :  { %v17727_v15 = vpop.f32.mrb[190].mxu0  ;;  %v19994_v54 = vadd.f32 %v3321_v53, %v3195_v22 }
 0x3d5   :  { %v3324_v6 = vpop.f32.mrb[191].mxu0  ;;  %v19996_v52 = vadd.f32 %v17727_v15, %v3198_v27 }
 0x3da   :  { %v17730_v50 = vpop.f32.mrb[192].mxu0 }
 0x3db   :  { %v19998_v2 = vadd.f32 %v17730_v50, %v3201_v18  ;;  %v3337_v23 = vpop.f32.mrb[193].mxu0 }
 0x3dc   :  { %v20000_v48 = vadd.f32 %v3337_v23, %v3199_v63  ;;  %v17731_v24 = vpop.f32.mrb[194].mxu0 }
 0x3dd   :  { %v3340_v62 = vpop.f32.mrb[195].mxu0 }
 0x3de   :  { %v20002_v28 = vadd.f32 %v3340_v62, %v3200_v45 }
 0x3ea   :  { %v17738_v44 = vpop.f32.mrb[196].mxu0 }
 0x3eb   :  { %v3369_v33 = vpop.f32.mrb[197].mxu0 }
 0x3ec   :  { %v20004_v9 = vadd.f32 %v3369_v33, %v3207_v49  ;;  %v17739_v17 = vpop.f32.mrb[198].mxu0 }
 0x3ed   :  { %v3372_v26 = vpop.f32.mrb[199].mxu0 }
 0x3f2   :  { %v17742_v20 = vpop.f32.mrb[200].mxu0 }
 0x3f3   :  { %v3385_v29 = vpop.f32.mrb[201].mxu0 }
 0x3f4   :  { %v17743_v8 = vpop.f32.mrb[202].mxu0 }
 0x3f5   :  { %v3388_v34 = vpop.f32.mrb[203].mxu0 }
 0x3fa   :  { %v17748_v5 = vpop.f32.mrb[0].mxu0 }
 0x3fb   :  { %v3666_v14 = vadd.f32 %v17748_v5, %v20006_v51  ;;  %v3478_v22 = vpop.f32.mrb[1].mxu0 }
 0x3fc   :  { %v20010_v35 = vadd.f32 %v20006_v51, %v3478_v22  ;;  %v17749_v27 = vpop.f32.mrb[2].mxu0 }
 0x3fd   :  { %v3667_v7 = vadd.f32 %v17749_v27, %v20006_v51  ;;  %v3481_v59 = vpop.f32.mrb[3].mxu0  ;;  %v3702_v18 = vmax.f32 %v3666_v14, 0.0 }
 0x3fe   :  { %v3665_v31 = vadd.f32 %v20006_v51, %v3481_v59  ;;  %v3700_v63 = vmax.f32 %v20010_v35, 0.0 }
 0x3ff   :  { %v3703_v56 = vmax.f32 %v3667_v7, 0.0 }
 0x400   :  { %v3701_v41 = vmax.f32 %v3665_v31, 0.0 }
 0x401   :  { %v20015_v45 = vpack.c.bf16 %v3703_v56, %v3702_v18 }
 0x402   :  { %v20017_v10 = vpack.c.bf16 %v3702_v18, %v3701_v41  ;;  %v20021_v60 = vpack.c.bf16 %v3701_v41, %v3700_v63  ;;  %v17752_v30 = vpop.f32.mrb[204].mxu0 }
 0x403   :  { %v3627_v19 = vadd.f32 %v17752_v30, %v3406_v38  ;;  %v3494_v49 = vpop.f32.mrb[205].mxu0 }
 0x404   :  { %v3625_v16 = vadd.f32 %v3494_v49, %v3404_v58  ;;  %v17753_v1 = vpop.f32.mrb[206].mxu0  ;;  %17791 = vmatmul.mubr.msk.bf16.gmra.mrb[4].mxu1 %vm3828_vm1, %v20021_v60 }
 0x405   :  { %v20026_v21 = vadd.f32 %v20006_v51, %v3627_v19  ;;  %v3628_v25 = vadd.f32 %v17753_v1, %v3407_v39  ;;  %v3497_v43 = vpop.f32.mrb[207].mxu0  ;;  %17794 = vmatprep.mubr.msk.bf16.mxu1 %vm3828_vm1, %v20015_v45 }
 0x406   :  { %v3668_v32 = vadd.f32 %v20006_v51, %v3625_v16 }
 0x407   :  { %v3671_v47 = vadd.f32 %v20006_v51, %v3628_v25  ;;  %v3706_v38 = vmax.f32 %v20026_v21, 0.0 }
 0x408   :  { %v3704_v13 = vmax.f32 %v3668_v32, 0.0 }
 0x409   :  { %v3707_v58 = vmax.f32 %v3671_v47, 0.0 }
 0x40a   :  { %v20033_v55 = vpack.c.bf16 %v3704_v13, %v3703_v56  ;;  %v20036_v46 = vpack.c.bf16 %v21520_v0, %v3704_v13  ;;  %v17756_v36 = vpop.f32.mrb[208].mxu0 }
 0x40b   :  { %v20040_v39 = vpack.c.bf16 %v3707_v58, %v3706_v38  ;;  %v3631_v61 = vadd.f32 %v17756_v36, %v19986_v37  ;;  %v3510_v4 = vpop.f32.mrb[209].mxu0 }
 0x40c   :  { %v3629_v12 = vadd.f32 %v3510_v4, %v19988_v40  ;;  %v17757_v53 = vpop.f32.mrb[210].mxu0  ;;  %17795 = vmatmul.mubr.msk.bf16.gmra.mrb[8].mxu1 %vm3828_vm1, %v20036_v46 }
 0x40d   :  { %v3674_v15 = vadd.f32 %v20006_v51, %v3631_v61  ;;  %v3513_v6 = vpop.f32.mrb[211].mxu0  ;;  %17798 = vmatprep.mubr.msk.bf16.mxu1 %vm3828_vm1, %v20040_v39 }
 0x40e   :  { %v3672_v50 = vadd.f32 %v20006_v51, %v3629_v12  ;;  %v3630_v23 = vadd.f32 %v3513_v6, %v19990_v3 }
 0x40f   :  { %v3710_v62 = vmax.f32 %v3674_v15, 0.0 }
 0x410   :  { %v3708_v24 = vmax.f32 %v3672_v50, 0.0  ;;  %v3673_v37 = vadd.f32 %v20006_v51, %v3630_v23 }
 0x411   :  { %v20063_v3 = vpack.c.bf16 %v21520_v0, %v3710_v62 }
 0x412   :  { %v20052_v44 = vpack.c.bf16 %v3708_v24, %v3707_v58  ;;  %v3709_v40 = vmax.f32 %v3673_v37, 0.0  ;;  %v17760_v33 = vpop.f32.mrb[12].mxu0 }
 0x413   :  { %v3678_v17 = vadd.f32 %v17760_v33, %v20006_v51  ;;  %v3526_v26 = vpop.f32.mrb[13].mxu0 }
 0x414   :  { %v20055_v20 = vpack.c.bf16 %v3710_v62, %v3709_v40  ;;  %v20057_v29 = vpack.c.bf16 %v3709_v40, %v3708_v24  ;;  %v20060_v8 = vadd.f32 %v20006_v51, %v3526_v26  ;;  %v17761_v34 = vpop.f32.mrb[14].mxu0 }
 0x415   :  { %v3679_v5 = vadd.f32 %v17761_v34, %v20006_v51  ;;  %v3529_v14 = vpop.f32.mrb[15].mxu0  ;;  %v3714_v27 = vmax.f32 %v3678_v17, 0.0 }
 0x416   :  { %v3677_v22 = vadd.f32 %v20006_v51, %v3529_v14  ;;  %17799 = vmatmul.mubr.msk.bf16.gmra.mrb[12].mxu1 %vm3828_vm1, %v20057_v29  ;;  %v3712_v59 = vmax.f32 %v20060_v8, 0.0  ;;  %v18369_v8 = vld [vmem:[%s21482_s3 + $0x48] sm:$0xff]  }
 0x417   :  { %v3715_v7 = vmax.f32 %v3679_v5, 0.0  ;;  %17802 = vmatprep.mubr.msk.bf16.mxu1 %vm3828_vm1, %v20063_v3 }
 0x418   :  { %v3713_v31 = vmax.f32 %v3677_v22, 0.0  ;;  %v20183_v35 = vpack.c.bf16 %v3712_v59, %v21520_v0 }
 0x419   :  { %v20072_v18 = vpack.c.bf16 %v3715_v7, %v3714_v27 }
 0x41a   :  { %v20074_v56 = vpack.c.bf16 %v3714_v27, %v3713_v31  ;;  %v20078_v41 = vpack.c.bf16 %v3713_v31, %v3712_v59  ;;  %v17764_v30 = vpop.f32.mrb[212].mxu0 }
 0x41b   :  { %v3639_v19 = vadd.f32 %v17764_v30, %v19992_v57  ;;  %v3542_v49 = vpop.f32.mrb[213].mxu0 }
 0x41c   :  { %v3637_v16 = vadd.f32 %v3542_v49, %v19994_v54  ;;  %v17765_v1 = vpop.f32.mrb[214].mxu0 }
 0x41d   :  { %v20083_v25 = vadd.f32 %v20006_v51, %v3639_v19  ;;  %v3640_v43 = vadd.f32 %v17765_v1, %v19996_v52  ;;  %v3545_v32 = vpop.f32.mrb[215].mxu0 }
 0x41e   :  { %v3680_v47 = vadd.f32 %v20006_v51, %v3637_v16  ;;  %17803 = vmatmul.mubr.msk.bf16.gmra.mrb[16].mxu1 %vm3828_vm1, %v20078_v41 }
 0x41f   :  { %v3683_v13 = vadd.f32 %v20006_v51, %v3640_v43  ;;  %17806 = vmatprep.mubr.msk.bf16.mxu1 %vm3828_vm1, %v20072_v18  ;;  %v3718_v54 = vmax.f32 %v20083_v25, 0.0 }
 0x420   :  { %v3716_v57 = vmax.f32 %v3680_v47, 0.0 }
 0x421   :  { %v3719_v58 = vmax.f32 %v3683_v13, 0.0 }
 0x422   :  { %v20093_v36 = vpack.c.bf16 %v3716_v57, %v3715_v7  ;;  %v17768_v61 = vpop.f32.mrb[216].mxu0  ;;  %v20101_v53 = vpack.c.bf16 %v21520_v0, %v3716_v57 }
 0x423   :  { %v20097_v52 = vpack.c.bf16 %v3719_v58, %v3718_v54  ;;  %v3643_v4 = vadd.f32 %v17768_v61, %v19998_v2  ;;  %v3558_v12 = vpop.f32.mrb[217].mxu0 }
 0x424   :  { %v3641_v15 = vadd.f32 %v3558_v12, %v20000_v48  ;;  %v17769_v6 = vpop.f32.mrb[218].mxu0 }
 0x425   :  { %v3686_v50 = vadd.f32 %v20006_v51, %v3643_v4  ;;  %v3561_v23 = vpop.f32.mrb[219].mxu0 }
 0x426   :  { %v3684_v24 = vadd.f32 %v20006_v51, %v3641_v15  ;;  %v3642_v37 = vadd.f32 %v3561_v23, %v20002_v28  ;;  %17807 = vmatmul.mubr.msk.bf16.gmra.mrb[20].mxu1 %vm3828_vm1, %v20101_v53 }
 0x427   :  { %17810 = vmatprep.mubr.msk.bf16.mxu1 %vm3828_vm1, %v20097_v52  ;;  %v3722_v40 = vmax.f32 %v3686_v50, 0.0 }
 0x428   :  { %v3720_v2 = vmax.f32 %v3684_v24, 0.0  ;;  %v3685_v62 = vadd.f32 %v20006_v51, %v3642_v37 }
 0x429   :  { %v20121_v27 = vpack.c.bf16 %v21520_v0, %v3722_v40 }
 0x42a   :  { %v20112_v33 = vpack.c.bf16 %v3720_v2, %v3719_v58  ;;  %v3721_v48 = vmax.f32 %v3685_v62, 0.0  ;;  %v17772_v17 = vpop.f32.mrb[24].mxu0  ;;  %v20161_v62 = vpack.c.bf16 %v3700_v63, %v21520_v0  ;;  %v20192_v63 = vpack.c.bf16 %v3718_v54, %v21520_v0  ;;  %v18370_v54 = vld [vmem:[%s21482_s3 + $0x50] sm:$0xff]  }
 0x42b   :  { %v3690_v26 = vadd.f32 %v17772_v17, %v20006_v51  ;;  %v3574_v34 = vpop.f32.mrb[25].mxu0 }
 0x42c   :  { %v20115_v5 = vpack.c.bf16 %v3722_v40, %v3721_v48  ;;  %v20117_v28 = vpack.c.bf16 %v3721_v48, %v3720_v2  ;;  %v3688_v14 = vadd.f32 %v20006_v51, %v3574_v34  ;;  %v17773_v22 = vpop.f32.mrb[26].mxu0  ;;  %v18366_v2 = vld [vmem:[%s21482_s3 + $0x30] sm:$0xff]  }
 0x42d   :  { %v3691_v7 = vadd.f32 %v17773_v22, %v20006_v51  ;;  %v3577_v31 = vpop.f32.mrb[27].mxu0  ;;  %v3726_v19 = vmax.f32 %v3690_v26, 0.0 }
 0x42e   :  { %v3689_v30 = vadd.f32 %v20006_v51, %v3577_v31  ;;  %17811 = vmatmul.mubr.msk.bf16.gmra.mrb[24].mxu1 %vm3828_vm1, %v20117_v28  ;;  %v3724_v16 = vmax.f32 %v3688_v14, 0.0 }
 0x42f   :  { %v3727_v49 = vmax.f32 %v3691_v7, 0.0  ;;  %17814 = vmatprep.mubr.msk.bf16.mxu1 %vm3828_vm1, %v20121_v27 }
 0x430   :  { %v3725_v1 = vmax.f32 %v3689_v30, 0.0  ;;  %v20203_v21 = vpack.c.bf16 %v3724_v16, %v21520_v0 }
 0x431   :  { %v20129_v43 = vpack.c.bf16 %v3727_v49, %v3726_v19 }
 0x432   :  { %v20131_v32 = vpack.c.bf16 %v3726_v19, %v3725_v1  ;;  %v20133_v47 = vpack.c.bf16 %v3725_v1, %v3724_v16  ;;  %v17776_v13 = vpop.f32.mrb[220].mxu0 }
 0x433   :  { %v3590_v57 = vpop.f32.mrb[221].mxu0 }
 0x434   :  { %v3649_v58 = vadd.f32 %v3590_v57, %v20004_v9  ;;  %v17777_v61 = vpop.f32.mrb[222].mxu0 }
 0x435   :  { %v3593_v4 = vpop.f32.mrb[223].mxu0 }
 0x436   :  { %v3692_v12 = vadd.f32 %v20006_v51, %v3649_v58  ;;  %17815 = vmatmul.mubr.msk.bf16.gmra.mrb[28].mxu1 %vm3828_vm1, %v20133_v47  ;;  %v18365_v51 = vld [vmem:[%s21482_s3 + $0x28] sm:$0xff]  }
 0x437   :  { %17818 = vmatprep.mubr.msk.bf16.mxu1 %vm3828_vm1, %v20129_v43 }
 0x438   :  { %v3728_v15 = vmax.f32 %v3692_v12, 0.0 }
 0x43a   :  { %v20141_v6 = vpack.c.bf16 %v3728_v15, %v3727_v49  ;;  %v17780_v50 = vpop.f32.mrb[224].mxu0  ;;  %v20144_v24 = vpack.c.bf16 %v21520_v0, %v3728_v15 }
 0x43b   :  { %v3606_v23 = vpop.f32.mrb[225].mxu0 }
 0x43c   :  { %v17781_v37 = vpop.f32.mrb[226].mxu0  ;;  %v18371_v23 = vld [vmem:[%s21482_s3 + $0x58] sm:$0xff]  }
 0x43d   :  { %v3609_v9 = vpop.f32.mrb[227].mxu0  ;;  %v18372_v37 = vld [vmem:[%s21482_s3 + $0x60] sm:$0xff]  }
 0x43e   :  { %17819 = vmatmul.mubr.msk.bf16.gmra.mrb[32].mxu1 %vm3828_vm1, %v20144_v24 }
 0x43f   :  { %17826 = vmatprep.mubr.bf16.mxu1 %v21524_v11 }
 0x446   :  { %17827 = vmatmul.mubr.bf16.vlgmr.msra.gmra.mrb[0].mxu1 %v21524_v11 }
 0x447   :  { %17863 = vmatpush3.bf16.msra.mxu1 %v19983_v42  ;;  %17830 = vmatprep.mubr.bf16.mxu1 %v21524_v11  ;;  %v20170_v42 = vpack.c.bf16 %v3706_v38, %v21520_v0  ;;  %v18367_v38 = vld [vmem:[%s21482_s3 + $0x38] sm:$0xff]   ;;  %v18368_v0 = vld [vmem:[%s21482_s3 + $0x40] sm:$0xff]  }
 0x448   :  { %17864 = vmatprep.subr.bf16.mxu1 %v18365_v51 }
 0x44b   :  { %17865 = vmatpush3.bf16.msra.mxu1 %v18365_v51 }
 0x44c   :  { %17902 = vmatprep.subr.bf16.mxu1 %v18366_v2 }
 0x44e   :  { %17831 = vmatmul.mubr.msk.bf16.gmra.mrb[36].mxu1 %vm3828_vm1, %v20161_v62 }
 0x44f   :  { %17834 = vmatprep.mubr.msk.bf16.mxu1 %vm3828_vm1, %v20017_v10 }
 0x456   :  { %17835 = vmatmul.mubr.msk.bf16.gmra.mrb[40].mxu1 %vm3828_vm1, %v20033_v55 }
 0x457   :  { %17838 = vmatprep.mubr.msk.bf16.mxu1 %vm3828_vm1, %v20170_v42 }
 0x45e   :  { %17839 = vmatmul.mubr.msk.bf16.gmra.mrb[12].mxu1 %vm3828_vm1, %v20052_v44 }
 0x45f   :  { %17842 = vmatprep.mubr.msk.bf16.mxu1 %vm3828_vm1, %v20055_v20 }
 0x466   :  { %17843 = vmatmul.mubr.msk.bf16.gmra.mrb[44].mxu1 %vm3828_vm1, %v20183_v35 }
 0x467   :  { %17846 = vmatprep.mubr.msk.bf16.mxu1 %vm3828_vm1, %v20074_v56 }
 0x46e   :  { %17847 = vmatmul.mubr.msk.bf16.gmra.mrb[48].mxu1 %vm3828_vm1, %v20093_v36 }
 0x46f   :  { %17850 = vmatprep.mubr.msk.bf16.mxu1 %vm3828_vm1, %v20192_v63 }
 0x476   :  { %17851 = vmatmul.mubr.msk.bf16.gmra.mrb[24].mxu1 %vm3828_vm1, %v20112_v33 }
 0x477   :  { %17854 = vmatprep.mubr.msk.bf16.mxu1 %vm3828_vm1, %v20115_v5 }
 0x47e   :  { %17855 = vmatmul.mubr.msk.bf16.gmra.mrb[52].mxu1 %vm3828_vm1, %v20203_v21 }
 0x47f   :  { %17858 = vmatprep.mubr.msk.bf16.mxu1 %vm3828_vm1, %v20131_v32 }
 0x486   :  { %17859 = vmatmul.mubr.msk.bf16.gmra.mrb[56].mxu1 %vm3828_vm1, %v20141_v6 }
 0x487   :  { %17866 = vmatprep.mubr.bf16.mxu1 %v21524_v11 }
 0x48e   :  { %17867 = vmatmul.mubr.bf16.vlgmr.msra.gmra.mrb[0].mxu1 %v21524_v11 }
 0x48f   :  { %17903 = vmatpush3.bf16.msra.mxu1 %v18366_v2  ;;  %17870 = vmatprep.mubr.msk.bf16.mxu1 %vm3828_vm1, %v20161_v62 }
 0x490   :  { %17904 = vmatprep.subr.bf16.mxu1 %v18367_v38 }
 0x493   :  { %17905 = vmatpush3.bf16.msra.mxu1 %v18367_v38 }
 0x494   :  { %17942 = vmatprep.subr.bf16.mxu1 %v18368_v0 }
 0x496   :  { %17871 = vmatmul.mubr.msk.bf16.gmra.mrb[60].mxu1 %vm3828_vm1, %v20017_v10 }
 0x497   :  { %17874 = vmatprep.mubr.msk.bf16.mxu1 %vm3828_vm1, %v20033_v55 }
 0x49e   :  { %17875 = vmatmul.mubr.msk.bf16.gmra.mrb[64].mxu1 %vm3828_vm1, %v20170_v42 }
 0x49f   :  { %17878 = vmatprep.mubr.msk.bf16.mxu1 %vm3828_vm1, %v20052_v44 }
 0x4a6   :  { %17879 = vmatmul.mubr.msk.bf16.gmra.mrb[12].mxu1 %vm3828_vm1, %v20055_v20 }
 0x4a7   :  { %17882 = vmatprep.mubr.msk.bf16.mxu1 %vm3828_vm1, %v20183_v35 }
 0x4ae   :  { %17883 = vmatmul.mubr.msk.bf16.gmra.mrb[68].mxu1 %vm3828_vm1, %v20074_v56 }
 0x4af   :  { %17886 = vmatprep.mubr.msk.bf16.mxu1 %vm3828_vm1, %v20093_v36 }
 0x4b6   :  { %17887 = vmatmul.mubr.msk.bf16.gmra.mrb[72].mxu1 %vm3828_vm1, %v20192_v63 }
 0x4b7   :  { %17890 = vmatprep.mubr.msk.bf16.mxu1 %vm3828_vm1, %v20112_v33 }
 0x4be   :  { %17891 = vmatmul.mubr.msk.bf16.gmra.mrb[24].mxu1 %vm3828_vm1, %v20115_v5 }
 0x4bf   :  { %17894 = vmatprep.mubr.msk.bf16.mxu1 %vm3828_vm1, %v20203_v21 }
 0x4c6   :  { %17895 = vmatmul.mubr.msk.bf16.gmra.mrb[76].mxu1 %vm3828_vm1, %v20131_v32 }
 0x4c7   :  { %17898 = vmatprep.mubr.msk.bf16.mxu1 %vm3828_vm1, %v20141_v6 }
 0x4ce   :  { %17899 = vmatmul.mubr.bf16.gmra.mrb[80].mxu1 %v21524_v11 }
 0x4cf   :  { %17906 = vmatprep.mubr.msk.bf16.mxu1 %vm3828_vm1, %v20161_v62 }
 0x4d6   :  { %17907 = vmatmul.mubr.msk.bf16.vlgmr.msra.gmra.mrb[0].mxu1 %vm3828_vm1, %v20017_v10 }
 0x4d7   :  { %17943 = vmatpush3.bf16.msra.mxu1 %v18368_v0  ;;  %v17792_v59 = vpop.f32.mrb[4].mxu1  ;;  %17910 = vmatprep.mubr.msk.bf16.mxu1 %vm3828_vm1, %v20033_v55 }
 0x4d8   :  { %v3933_v25 = vpop.f32.mrb[5].mxu1  ;;  %17944 = vmatprep.subr.bf16.mxu1 %v18369_v8 }
 0x4d9   :  { %v17793_v40 = vpop.f32.mrb[6].mxu1 }
 0x4da   :  { %v3936_v48 = vpop.f32.mrb[7].mxu1 }
 0x4db   :  { %17945 = vmatpush3.bf16.msra.mxu1 %v18369_v8 }
 0x4dc   :  { %17982 = vmatprep.subr.bf16.mxu1 %v18370_v54 }
 0x4de   :  { %17911 = vmatmul.mubr.msk.bf16.gmra.mrb[84].mxu1 %vm3828_vm1, %v20170_v42 }
 0x4df   :  { %v17796_v17 = vpop.f32.mrb[8].mxu1  ;;  %17914 = vmatprep.mubr.msk.bf16.mxu1 %vm3828_vm1, %v20052_v44 }
 0x4e0   :  { %v3948_v26 = vpop.f32.mrb[9].mxu1 }
 0x4e1   :  { %v17797_v34 = vpop.f32.mrb[10].mxu1 }
 0x4e2   :  { %v3951_v14 = vpop.f32.mrb[11].mxu1 }
 0x4e6   :  { %17915 = vmatmul.mubr.msk.bf16.gmra.mrb[88].mxu1 %vm3828_vm1, %v20055_v20 }
 0x4e7   :  { %17918 = vmatprep.mubr.msk.bf16.mxu1 %vm3828_vm1, %v20183_v35 }
 0x4ee   :  { %17919 = vmatmul.mubr.msk.bf16.gmra.mrb[12].mxu1 %vm3828_vm1, %v20074_v56 }
 0x4ef   :  { %17922 = vmatprep.mubr.msk.bf16.mxu1 %vm3828_vm1, %v20093_v36 }
 0x4f1   :  { %v17804_v22 = vpop.f32.mrb[16].mxu1 }
 0x4f2   :  { %v3979_v7 = vpop.f32.mrb[17].mxu1 }
 0x4f3   :  { %v17805_v31 = vpop.f32.mrb[18].mxu1 }
 0x4f4   :  { %v3982_v30 = vpop.f32.mrb[19].mxu1 }
 0x4f6   :  { %17923 = vmatmul.mubr.msk.bf16.gmra.mrb[92].mxu1 %vm3828_vm1, %v20192_v63 }
 0x4f7   :  { %17926 = vmatprep.mubr.msk.bf16.mxu1 %vm3828_vm1, %v20112_v33 }
 0x4f9   :  { %v17808_v19 = vpop.f32.mrb[20].mxu1 }
 0x4fa   :  { %v3994_v49 = vpop.f32.mrb[21].mxu1 }
 0x4fb   :  { %v17809_v16 = vpop.f32.mrb[22].mxu1 }
 0x4fc   :  { %v3997_v1 = vpop.f32.mrb[23].mxu1 }
 0x4fe   :  { %17927 = vmatmul.mubr.msk.bf16.gmra.mrb[96].mxu1 %vm3828_vm1, %v20115_v5 }
 0x4ff   :  { %17930 = vmatprep.mubr.msk.bf16.mxu1 %vm3828_vm1, %v20203_v21 }
 0x506   :  { %17931 = vmatmul.mubr.msk.bf16.gmra.mrb[24].mxu1 %vm3828_vm1, %v20131_v32 }
 0x507   :  { %17934 = vmatprep.mubr.msk.bf16.mxu1 %vm3828_vm1, %v20141_v6 }
 0x509   :  { %v17816_v13 = vpop.f32.mrb[28].mxu1 }
 0x50a   :  { %v4025_v57 = vpop.f32.mrb[29].mxu1 }
 0x50b   :  { %v17817_v58 = vpop.f32.mrb[30].mxu1 }
 0x50c   :  { %v4028_v61 = vpop.f32.mrb[31].mxu1 }
 0x50e   :  { %17935 = vmatmul.mubr.bf16.gmra.mrb[100].mxu1 %v21524_v11 }
 0x50f   :  { %17938 = vmatprep.mubr.bf16.mxu1 %v21524_v11 }
 0x511   :  { %v17820_v4 = vpop.f32.mrb[32].mxu1 }
 0x512   :  { %v4038_v12 = vpop.f32.mrb[33].mxu1 }
 0x513   :  { %v17821_v15 = vpop.f32.mrb[34].mxu1 }
 0x514   :  { %v4040_v50 = vpop.f32.mrb[35].mxu1 }
 0x516   :  { %17939 = vmatmul.mubr.bf16.gmra.mrb[104].mxu1 %v21524_v11 }
 0x517   :  { %17946 = vmatprep.mubr.msk.bf16.mxu1 %vm3828_vm1, %v20021_v60 }
 0x51e   :  { %17947 = vmatmul.mubr.msk.bf16.vlgmr.msra.gmra.mrb[0].mxu1 %vm3828_vm1, %v20015_v45 }
 0x51f   :  { %17983 = vmatpush3.bf16.msra.mxu1 %v18370_v54  ;;  %17950 = vmatprep.mubr.msk.bf16.mxu1 %vm3828_vm1, %v20036_v46 }
 0x520   :  { %17984 = vmatprep.subr.bf16.mxu1 %v18371_v23 }
 0x521   :  { %v17832_v9 = vpop.f32.mrb[36].mxu1 }
 0x522   :  { %v4173_v51 = vadd.f32 %v17832_v9, %v17792_v59  ;;  %v4165_v2 = vpop.f32.mrb[37].mxu1 }
 0x523   :  { %v4166_v38 = vadd.f32 %v4165_v2, %v3933_v25  ;;  %v17833_v0 = vpop.f32.mrb[38].mxu1  ;;  %17985 = vmatpush3.bf16.msra.mxu1 %v18371_v23 }
 0x524   :  { %v4176_v8 = vadd.f32 %v17833_v0, %v17793_v40  ;;  %v4168_v48 = vpop.f32.mrb[39].mxu1  ;;  %18022 = vmatprep.subr.bf16.mxu1 %v18372_v37 }
 0x526   :  { %17951 = vmatmul.mubr.msk.bf16.gmra.mrb[108].mxu1 %vm3828_vm1, %v20040_v39 }
 0x527   :  { %17954 = vmatprep.mubr.msk.bf16.mxu1 %vm3828_vm1, %v20057_v29 }
 0x529   :  { %v17836_v54 = vpop.f32.mrb[40].mxu1 }
 0x52a   :  { %v4189_v34 = vadd.f32 %v17836_v54, %v17796_v17  ;;  %v4180_v30 = vpop.f32.mrb[41].mxu1 }
 0x52b   :  { %v4181_v16 = vadd.f32 %v4180_v30, %v3948_v26  ;;  %v17837_v13 = vpop.f32.mrb[42].mxu1 }
 0x52c   :  { %v4183_v58 = vpop.f32.mrb[43].mxu1  ;;  %v18373_v13 = vld [vmem:[%s21482_s3 + $0x68] sm:$0xff]  }
 0x52d   :  { %v4184_v59 = vadd.f32 %v4183_v58, %v3951_v14 }
 0x52e   :  { %17955 = vmatmul.mubr.msk.bf16.gmra.mrb[112].mxu1 %vm3828_vm1, %v20063_v3 }
 0x52f   :  { %17958 = vmatprep.mubr.msk.bf16.mxu1 %vm3828_vm1, %v20078_v41 }
 0x536   :  { %17959 = vmatmul.mubr.msk.bf16.gmra.mrb[12].mxu1 %vm3828_vm1, %v20072_v18 }
 0x537   :  { %17962 = vmatprep.mubr.msk.bf16.mxu1 %vm3828_vm1, %v20101_v53 }
 0x539   :  { %v17844_v25 = vpop.f32.mrb[44].mxu1 }
 0x53a   :  { %v4219_v40 = vadd.f32 %v17844_v25, %v17804_v22  ;;  %v4211_v17 = vpop.f32.mrb[45].mxu1 }
 0x53b   :  { %v4212_v61 = vadd.f32 %v4211_v17, %v3979_v7  ;;  %v17845_v26 = vpop.f32.mrb[46].mxu1 }
 0x53c   :  { %v4222_v4 = vadd.f32 %v17845_v26, %v17805_v31  ;;  %v4214_v12 = vpop.f32.mrb[47].mxu1 }
 0x53e   :  { %17963 = vmatmul.mubr.msk.bf16.gmra.mrb[116].mxu1 %vm3828_vm1, %v20097_v52 }
 0x53f   :  { %17966 = vmatprep.mubr.msk.bf16.mxu1 %vm3828_vm1, %v20117_v28 }
 0x541   :  { %v17848_v14 = vpop.f32.mrb[48].mxu1 }
 0x542   :  { %v4235_v15 = vadd.f32 %v17848_v14, %v17808_v19  ;;  %v4226_v50 = vpop.f32.mrb[49].mxu1 }
 0x543   :  { %v4227_v23 = vadd.f32 %v4226_v50, %v3994_v49  ;;  %v17849_v9 = vpop.f32.mrb[50].mxu1 }
 0x544   :  { %v4229_v2 = vpop.f32.mrb[51].mxu1 }
 0x545   :  { %v4230_v0 = vadd.f32 %v4229_v2, %v3997_v1 }
 0x546   :  { %17967 = vmatmul.mubr.msk.bf16.gmra.mrb[120].mxu1 %vm3828_vm1, %v20121_v27 }
 0x547   :  { %17970 = vmatprep.mubr.msk.bf16.mxu1 %vm3828_vm1, %v20133_v47 }
 0x54e   :  { %17971 = vmatmul.mubr.msk.bf16.gmra.mrb[24].mxu1 %vm3828_vm1, %v20129_v43 }
 0x54f   :  { %17974 = vmatprep.mubr.msk.bf16.mxu1 %vm3828_vm1, %v20144_v24 }
 0x551   :  { %v17856_v22 = vpop.f32.mrb[52].mxu1 }
 0x552   :  { %v4257_v7 = vpop.f32.mrb[53].mxu1 }
 0x553   :  { %v4258_v31 = vadd.f32 %v4257_v7, %v4025_v57  ;;  %v17857_v19 = vpop.f32.mrb[54].mxu1  ;;  %v18374_v57 = vld [vmem:[%s21482_s3 + $0x70] sm:$0xff]  }
 0x554   :  { %v4260_v49 = vpop.f32.mrb[55].mxu1 }
 0x556   :  { %17975 = vmatmul.mubr.bf16.gmra.mrb[124].mxu1 %v21524_v11 }
 0x557   :  { %17978 = vmatprep.mubr.bf16.mxu1 %v21524_v11 }
 0x559   :  { %v17860_v1 = vpop.f32.mrb[56].mxu1 }
 0x55a   :  { %v4270_v48 = vpop.f32.mrb[57].mxu1 }
 0x55b   :  { %v17861_v54 = vpop.f32.mrb[58].mxu1 }
 0x55c   :  { %v4272_v30 = vpop.f32.mrb[59].mxu1 }
 0x55e   :  { %17979 = vmatmul.mubr.bf16.gmra.mrb[128].mxu1 %v21524_v11 }
 0x55f   :  { %17986 = vmatprep.mubr.msk.bf16.mxu1 %vm3828_vm1, %v20017_v10 }
 0x566   :  { %17987 = vmatmul.mubr.msk.bf16.vlgmr.msra.gmra.mrb[0].mxu1 %vm3828_vm1, %v20033_v55 }
 0x567   :  { %18023 = vmatpush3.bf16.msra.mxu1 %v18372_v37  ;;  %17990 = vmatprep.mubr.msk.bf16.mxu1 %vm3828_vm1, %v20170_v42 }
 0x568   :  { %18024 = vmatprep.subr.bf16.mxu1 %v18373_v13 }
 0x569   :  { %v17872_v58 = vpop.f32.mrb[60].mxu1 }
 0x56a   :  { %v4468_v25 = vadd.f32 %v17872_v58, %v4173_v51  ;;  %v4347_v17 = vpop.f32.mrb[61].mxu1 }
 0x56b   :  { %v4467_v26 = vadd.f32 %v4347_v17, %v4166_v38  ;;  %v17873_v12 = vpop.f32.mrb[62].mxu1  ;;  %18025 = vmatpush3.bf16.msra.mxu1 %v18373_v13 }
 0x56c   :  { %v4469_v14 = vadd.f32 %v17873_v12, %v4176_v8  ;;  %v4350_v50 = vpop.f32.mrb[63].mxu1  ;;  %18062 = vmatprep.subr.bf16.mxu1 %v18374_v57 }
 0x56e   :  { %17991 = vmatmul.mubr.msk.bf16.gmra.mrb[132].mxu1 %vm3828_vm1, %v20052_v44 }
 0x56f   :  { %17994 = vmatprep.mubr.msk.bf16.mxu1 %vm3828_vm1, %v20055_v20 }
 0x571   :  { %v17876_v37 = vpop.f32.mrb[64].mxu1 }
 0x572   :  { %v4472_v9 = vadd.f32 %v17876_v37, %v4189_v34  ;;  %v4362_v2 = vpop.f32.mrb[65].mxu1 }
 0x573   :  { %v4470_v22 = vadd.f32 %v4362_v2, %v4181_v16  ;;  %v17877_v7 = vpop.f32.mrb[66].mxu1 }
 0x574   :  { %v4365_v19 = vpop.f32.mrb[67].mxu1  ;;  %v18376_v7 = vld [vmem:[%s21482_s3 + $0x80] sm:$0xff]  }
 0x575   :  { %v4471_v51 = vadd.f32 %v4365_v19, %v4184_v59 }
 0x576   :  { %17995 = vmatmul.mubr.msk.bf16.gmra.mrb[136].mxu1 %vm3828_vm1, %v20183_v35 }
 0x577   :  { %17998 = vmatprep.mubr.msk.bf16.mxu1 %vm3828_vm1, %v20074_v56 }
 0x57e   :  { %17999 = vmatmul.mubr.msk.bf16.gmra.mrb[12].mxu1 %vm3828_vm1, %v20093_v36 }
 0x57f   :  { %18002 = vmatprep.mubr.msk.bf16.mxu1 %vm3828_vm1, %v20192_v63 }
 0x581   :  { %v17884_v38 = vpop.f32.mrb[68].mxu1 }
 0x582   :  { %v4478_v8 = vadd.f32 %v17884_v38, %v4219_v40  ;;  %v4393_v34 = vpop.f32.mrb[69].mxu1 }
 0x583   :  { %v4477_v49 = vadd.f32 %v4393_v34, %v4212_v61  ;;  %v17885_v16 = vpop.f32.mrb[70].mxu1 }
 0x584   :  { %v4479_v1 = vadd.f32 %v17885_v16, %v4222_v4  ;;  %v4396_v48 = vpop.f32.mrb[71].mxu1 }
 0x586   :  { %18003 = vmatmul.mubr.msk.bf16.gmra.mrb[140].mxu1 %vm3828_vm1, %v20112_v33 }
 0x587   :  { %18006 = vmatprep.mubr.msk.bf16.mxu1 %vm3828_vm1, %v20115_v5 }
 0x589   :  { %v17888_v59 = vpop.f32.mrb[72].mxu1 }
 0x58a   :  { %v4482_v54 = vadd.f32 %v17888_v59, %v4235_v15  ;;  %v4408_v30 = vpop.f32.mrb[73].mxu1 }
 0x58b   :  { %v4480_v13 = vadd.f32 %v4408_v30, %v4227_v23  ;;  %v17889_v58 = vpop.f32.mrb[74].mxu1 }
 0x58c   :  { %v4411_v17 = vpop.f32.mrb[75].mxu1 }
 0x58d   :  { %v4481_v12 = vadd.f32 %v4411_v17, %v4230_v0 }
 0x58e   :  { %18007 = vmatmul.mubr.msk.bf16.gmra.mrb[144].mxu1 %vm3828_vm1, %v20203_v21 }
 0x58f   :  { %18010 = vmatprep.mubr.msk.bf16.mxu1 %vm3828_vm1, %v20131_v32 }
 0x596   :  { %18011 = vmatmul.mubr.msk.bf16.gmra.mrb[24].mxu1 %vm3828_vm1, %v20141_v6 }
 0x597   :  { %18014 = vmatprep.mubr.bf16.mxu1 %v21524_v11 }
 0x599   :  { %v17896_v40 = vpop.f32.mrb[76].mxu1 }
 0x59a   :  { %v4439_v61 = vpop.f32.mrb[77].mxu1 }
 0x59b   :  { %v4487_v4 = vadd.f32 %v4439_v61, %v4258_v31  ;;  %v17897_v15 = vpop.f32.mrb[78].mxu1  ;;  %v18375_v31 = vld [vmem:[%s21482_s3 + $0x78] sm:$0xff]  }
 0x59c   :  { %v4442_v50 = vpop.f32.mrb[79].mxu1 }
 0x59e   :  { %18015 = vmatmul.mubr.bf16.gmra.mrb[148].mxu1 %v21524_v11 }
 0x59f   :  { %18018 = vmatprep.mubr.bf16.mxu1 %v21524_v11 }
 0x5a1   :  { %v17900_v23 = vpop.f32.mrb[80].mxu1 }
 0x5a2   :  { %v4452_v0 = vpop.f32.mrb[81].mxu1 }
 0x5a3   :  { %v17901_v37 = vpop.f32.mrb[82].mxu1 }
 0x5a4   :  { %v4454_v2 = vpop.f32.mrb[83].mxu1 }
 0x5a6   :  { %18019 = vmatmul.mubr.msk.bf16.gmra.mrb[152].mxu1 %vm3828_vm1, %v20161_v62 }
 0x5a7   :  { %18026 = vmatprep.mubr.msk.bf16.mxu1 %vm3828_vm1, %v20170_v42 }
 0x5ae   :  { %18027 = vmatmul.mubr.msk.bf16.vlgmr.msra.gmra.mrb[0].mxu1 %vm3828_vm1, %v20052_v44 }
 0x5af   :  { %18063 = vmatpush3.bf16.msra.mxu1 %v18374_v57  ;;  %18030 = vmatprep.mubr.msk.bf16.mxu1 %vm3828_vm1, %v20055_v20 }
 0x5b0   :  { %18064 = vmatprep.subr.bf16.mxu1 %v18375_v31 }
 0x5b1   :  { %v17912_v19 = vpop.f32.mrb[84].mxu1 }
 0x5b2   :  { %v4675_v38 = vadd.f32 %v17912_v19, %v4468_v25  ;;  %v4554_v34 = vpop.f32.mrb[85].mxu1 }
 0x5b3   :  { %v4674_v16 = vadd.f32 %v4554_v34, %v4467_v26  ;;  %v17913_v48 = vpop.f32.mrb[86].mxu1  ;;  %18065 = vmatpush3.bf16.msra.mxu1 %v18375_v31 }
 0x5b4   :  { %v4676_v59 = vadd.f32 %v17913_v48, %v4469_v14  ;;  %v4557_v30 = vpop.f32.mrb[87].mxu1  ;;  %18102 = vmatprep.subr.bf16.mxu1 %v18376_v7 }
 0x5b6   :  { %18031 = vmatmul.mubr.msk.bf16.gmra.mrb[156].mxu1 %vm3828_vm1, %v20183_v35 }
 0x5b7   :  { %18034 = vmatprep.mubr.msk.bf16.mxu1 %vm3828_vm1, %v20074_v56 }
 0x5b9   :  { %v17916_v57 = vpop.f32.mrb[88].mxu1 }
 0x5ba   :  { %v4679_v58 = vadd.f32 %v17916_v57, %v4472_v9  ;;  %v4569_v17 = vpop.f32.mrb[89].mxu1 }
 0x5bb   :  { %v4677_v40 = vadd.f32 %v4569_v17, %v4470_v22  ;;  %v17917_v61 = vpop.f32.mrb[90].mxu1 }
 0x5bc   :  { %v4572_v15 = vpop.f32.mrb[91].mxu1 }
 0x5bd   :  { %v4678_v25 = vadd.f32 %v4572_v15, %v4471_v51 }
 0x5be   :  { %18035 = vmatmul.mubr.msk.bf16.gmra.mrb[160].mxu1 %vm3828_vm1, %v20093_v36 }
 0x5bf   :  { %18038 = vmatprep.mubr.msk.bf16.mxu1 %vm3828_vm1, %v20192_v63 }
 0x5c6   :  { %18039 = vmatmul.mubr.msk.bf16.gmra.mrb[12].mxu1 %vm3828_vm1, %v20112_v33 }
 0x5c7   :  { %18042 = vmatprep.mubr.msk.bf16.mxu1 %vm3828_vm1, %v20115_v5 }
 0x5c9   :  { %v17924_v26 = vpop.f32.mrb[92].mxu1 }
 0x5ca   :  { %v4685_v14 = vadd.f32 %v17924_v26, %v4478_v8  ;;  %v4600_v9 = vpop.f32.mrb[93].mxu1 }
 0x5cb   :  { %v4684_v50 = vadd.f32 %v4600_v9, %v4477_v49  ;;  %v17925_v22 = vpop.f32.mrb[94].mxu1 }
 0x5cc   :  { %v4686_v23 = vadd.f32 %v17925_v22, %v4479_v1  ;;  %v4603_v0 = vpop.f32.mrb[95].mxu1 }
 0x5ce   :  { %18043 = vmatmul.mubr.msk.bf16.gmra.mrb[164].mxu1 %vm3828_vm1, %v20203_v21 }
 0x5cf   :  { %18046 = vmatprep.mubr.msk.bf16.mxu1 %vm3828_vm1, %v20131_v32 }
 0x5d1   :  { %v17928_v51 = vpop.f32.mrb[96].mxu1 }
 0x5d2   :  { %v4689_v37 = vadd.f32 %v17928_v51, %v4482_v54  ;;  %v4615_v2 = vpop.f32.mrb[97].mxu1 }
 0x5d3   :  { %v4687_v31 = vadd.f32 %v4615_v2, %v4480_v13  ;;  %v17929_v19 = vpop.f32.mrb[98].mxu1 }
 0x5d4   :  { %v4618_v34 = vpop.f32.mrb[99].mxu1 }
 0x5d5   :  { %v4688_v48 = vadd.f32 %v4618_v34, %v4481_v12 }
 0x5d6   :  { %18047 = vmatmul.mubr.msk.bf16.gmra.mrb[168].mxu1 %vm3828_vm1, %v20141_v6 }
 0x5d7   :  { %18050 = vmatprep.mubr.bf16.mxu1 %v21524_v11 }
 0x5de   :  { %18051 = vmatmul.mubr.bf16.gmra.mrb[24].mxu1 %v21524_v11 }
 0x5df   :  { %18054 = vmatprep.mubr.bf16.mxu1 %v21524_v11 }
 0x5e1   :  { %v17936_v8 = vpop.f32.mrb[100].mxu1 }
 0x5e2   :  { %v4646_v49 = vpop.f32.mrb[101].mxu1 }
 0x5e3   :  { %v4694_v1 = vadd.f32 %v4646_v49, %v4487_v4  ;;  %v17937_v30 = vpop.f32.mrb[102].mxu1  ;;  %v18377_v4 = vld [vmem:[%s21482_s3 + $0x88] sm:$0xff]  }
 0x5e4   :  { %v4649_v57 = vpop.f32.mrb[103].mxu1 }
 0x5e6   :  { %18055 = vmatmul.mubr.msk.bf16.gmra.mrb[172].mxu1 %vm3828_vm1, %v20161_v62 }
 0x5e7   :  { %18058 = vmatprep.mubr.msk.bf16.mxu1 %vm3828_vm1, %v20017_v10 }
 0x5e9   :  { %v17940_v54 = vpop.f32.mrb[104].mxu1 }
 0x5ea   :  { %v4659_v13 = vpop.f32.mrb[105].mxu1 }
 0x5eb   :  { %v17941_v12 = vpop.f32.mrb[106].mxu1 }
 0x5ec   :  { %v4661_v17 = vpop.f32.mrb[107].mxu1 }
 0x5ee   :  { %18059 = vmatmul.mubr.msk.bf16.gmra.mrb[176].mxu1 %vm3828_vm1, %v20033_v55 }
 0x5ef   :  { %18066 = vmatprep.mubr.msk.bf16.mxu1 %vm3828_vm1, %v20040_v39 }
 0x5f6   :  { %18067 = vmatmul.mubr.msk.bf16.vlgmr.msra.gmra.mrb[0].mxu1 %vm3828_vm1, %v20057_v29 }
 0x5f7   :  { %18103 = vmatpush3.bf16.msra.mxu1 %v18376_v7  ;;  %18070 = vmatprep.mubr.msk.bf16.mxu1 %vm3828_vm1, %v20063_v3 }
 0x5f8   :  { %18104 = vmatprep.subr.bf16.mxu1 %v18377_v4 }
 0x5f9   :  { %v17952_v61 = vpop.f32.mrb[108].mxu1 }
 0x5fa   :  { %v4882_v15 = vadd.f32 %v17952_v61, %v4675_v38  ;;  %v4761_v26 = vpop.f32.mrb[109].mxu1  ;;  %v5825_v61 = vld [vmem:[#allocation4 + $0x120] sm:$0xff] }
 0x5fb   :  { %v4881_v9 = vadd.f32 %v4761_v26, %v4674_v16  ;;  %v17953_v22 = vpop.f32.mrb[110].mxu1  ;;  %18105 = vmatpush3.bf16.msra.mxu1 %v18377_v4  ;;  %v5822_v26 = vld [vmem:[#allocation4 + $0x108] sm:$0xff] }
 0x5fc   :  { %v4883_v0 = vadd.f32 %v17953_v22, %v4676_v59  ;;  %v4764_v39 = vpop.f32.mrb[111].mxu1 }
 0x5fe   :  { %18071 = vmatmul.mubr.msk.bf16.gmra.mrb[180].mxu1 %vm3828_vm1, %v20078_v41 }
 0x5ff   :  { %18074 = vmatprep.mubr.msk.bf16.mxu1 %vm3828_vm1, %v20072_v18 }
 0x601   :  { %v17956_v29 = vpop.f32.mrb[112].mxu1 }
 0x602   :  { %v4886_v7 = vadd.f32 %v17956_v29, %v4679_v58  ;;  %v4776_v51 = vpop.f32.mrb[113].mxu1 }
 0x603   :  { %v4884_v2 = vadd.f32 %v4776_v51, %v4677_v40  ;;  %v17957_v3 = vpop.f32.mrb[114].mxu1 }
 0x604   :  { %v4779_v19 = vpop.f32.mrb[115].mxu1  ;;  %v5833_v3 = vld [vmem:[#allocation4 + $0x160] sm:$0xff] }
 0x605   :  { %v4885_v34 = vadd.f32 %v4779_v19, %v4678_v25  ;;  %v5830_v19 = vld [vmem:[#allocation4 + $0x148] sm:$0xff] }
 0x606   :  { %18075 = vmatmul.mubr.msk.bf16.gmra.mrb[184].mxu1 %vm3828_vm1, %v20101_v53 }
 0x607   :  { %18078 = vmatprep.mubr.msk.bf16.mxu1 %vm3828_vm1, %v20097_v52 }
 0x60e   :  { %18079 = vmatmul.mubr.msk.bf16.gmra.mrb[12].mxu1 %vm3828_vm1, %v20117_v28 }
 0x60f   :  { %18082 = vmatprep.mubr.msk.bf16.mxu1 %vm3828_vm1, %v20121_v27 }
 0x611   :  { %v17964_v18 = vpop.f32.mrb[116].mxu1 }
 0x612   :  { %v20427_v41 = vadd.f32 %v17964_v18, %v4685_v14  ;;  %v4807_v38 = vpop.f32.mrb[117].mxu1  ;;  %v5834_v18 = vld [vmem:[#allocation4 + $0x168] sm:$0xff] }
 0x613   :  { %v20429_v16 = vadd.f32 %v4807_v38, %v4684_v50  ;;  %v17965_v59 = vpop.f32.mrb[118].mxu1  ;;  %v16047_v38 = vcombine.high %v5830_v19, %v5834_v18 }
 0x614   :  { %v20431_v58 = vadd.f32 %v17965_v59, %v4686_v23  ;;  %v4810_v40 = vpop.f32.mrb[119].mxu1 }
 0x616   :  { %18083 = vmatmul.mubr.msk.bf16.gmra.mrb[188].mxu1 %vm3828_vm1, %v20133_v47 }
 0x617   :  { %18086 = vmatprep.mubr.msk.bf16.mxu1 %vm3828_vm1, %v20129_v43 }
 0x619   :  { %v17968_v52 = vpop.f32.mrb[120].mxu1 }
 0x61a   :  { %v20437_v53 = vadd.f32 %v17968_v52, %v4689_v37  ;;  %v4822_v28 = vpop.f32.mrb[121].mxu1 }
 0x61b   :  { %v20439_v27 = vadd.f32 %v4822_v28, %v4687_v31  ;;  %v17969_v25 = vpop.f32.mrb[122].mxu1 }
 0x61c   :  { %v4825_v14 = vpop.f32.mrb[123].mxu1 }
 0x61d   :  { %v20441_v50 = vadd.f32 %v4825_v14, %v4688_v48 }
 0x61e   :  { %18087 = vmatmul.mubr.msk.bf16.gmra.mrb[192].mxu1 %vm3828_vm1, %v20144_v24 }
 0x61f   :  { %18090 = vmatprep.mubr.bf16.mxu1 %v21524_v11 }
 0x626   :  { %18091 = vmatmul.mubr.bf16.gmra.mrb[24].mxu1 %v21524_v11 }
 0x627   :  { %18094 = vmatprep.mubr.bf16.mxu1 %v21524_v11 }
 0x629   :  { %v17976_v43 = vpop.f32.mrb[124].mxu1 }
 0x62a   :  { %v4853_v47 = vpop.f32.mrb[125].mxu1  ;;  %v5837_v43 = vld [vmem:[#allocation4 + $0x180] sm:$0xff] }
 0x62b   :  { %v20448_v23 = vadd.f32 %v4853_v47, %v4694_v1  ;;  %v17977_v37 = vpop.f32.mrb[126].mxu1  ;;  %v5841_v47 = vld [vmem:[#allocation4 + $0x1a0] sm:$0xff] }
 0x62c   :  { %v4856_v31 = vpop.f32.mrb[127].mxu1  ;;  %v16052_v37 = vcombine.low %v5837_v43, %v5841_v47 }
 0x62d   :  { %v16053_v31 = vcombine.high %v5837_v43, %v5841_v47 }
 0x62e   :  { %18095 = vmatmul.mubr.msk.bf16.gmra.mrb[196].mxu1 %vm3828_vm1, %v20021_v60 }
 0x62f   :  { %18098 = vmatprep.mubr.msk.bf16.mxu1 %vm3828_vm1, %v20015_v45 }
 0x631   :  { %v17980_v48 = vpop.f32.mrb[128].mxu1 }
 0x632   :  { %v4866_v24 = vpop.f32.mrb[129].mxu1  ;;  %v5842_v48 = vld [vmem:[#allocation4 + $0x1a8] sm:$0xff] }
 0x633   :  { %v17981_v8 = vpop.f32.mrb[130].mxu1 }
 0x634   :  { %v4868_v49 = vpop.f32.mrb[131].mxu1 }
 0x636   :  { %18099 = vmatmul.mubr.msk.bf16.gmra.mrb[200].mxu1 %vm3828_vm1, %v20036_v46 }
 0x637   :  { %18106 = vmatprep.mubr.msk.bf16.mxu1 %vm3828_vm1, %v20052_v44 }
 0x63e   :  { %18107 = vmatmul.mubr.msk.bf16.vlgmr.msra.gmra.mrb[0].mxu1 %vm3828_vm1, %v20055_v20 }
 0x63f   :  { %18110 = vmatprep.mubr.msk.bf16.mxu1 %vm3828_vm1, %v20183_v35 }
 0x641   :  { %v17992_v60 = vpop.f32.mrb[132].mxu1 }
 0x642   :  { %v20462_v1 = vadd.f32 %v17992_v60, %v4882_v15  ;;  %v4968_v45 = vpop.f32.mrb[133].mxu1  ;;  %v5849_v60 = vld [vmem:[#allocation4 + $0x1e0] sm:$0xff] }
 0x643   :  { %v20464_v30 = vadd.f32 %v4968_v45, %v4881_v9  ;;  %v17993_v57 = vpop.f32.mrb[134].mxu1  ;;  %v5826_v9 = vld [vmem:[#allocation4 + $0x128] sm:$0xff] }
 0x644   :  { %v20466_v54 = vadd.f32 %v17993_v57, %v4883_v0  ;;  %v4971_v13 = vpop.f32.mrb[135].mxu1  ;;  %v16038_v22 = vcombine.low %v5822_v26, %v5826_v9  ;;  %v16039_v0 = vcombine.high %v5822_v26, %v5826_v9 }
 0x646   :  { %18111 = vmatmul.mubr.msk.bf16.gmra.mrb[204].mxu1 %vm3828_vm1, %v20074_v56  ;;  %v5821_v56 = vld [vmem:[#allocation4 + $0x100] sm:$0xff]  ;;  %6058 = vmatprep.subr.bf16.mxu1 %v16039_v0 }
 0x647   :  { %18114 = vmatprep.mubr.msk.bf16.mxu1 %vm3828_vm1, %v20093_v36  ;;  %v16036_v15 = vcombine.low %v5821_v56, %v5825_v61  ;;  %v16037_v36 = vcombine.high %v5821_v56, %v5825_v61  ;;  %6059 = vmatpush1.bf16.msra.mxu1 %v16038_v22 }
 0x648   :  { %6060 = vmatprep.subr.bf16.mxu1 %v16047_v38 }
 0x649   :  { %v17996_v46 = vpop.f32.mrb[136].mxu1  ;;  %6017 = vmatprep.subr.bf16.mxu0 %v16037_v36 }
 0x64a   :  { %v20472_v44 = vadd.f32 %v17996_v46, %v4886_v7  ;;  %v4983_v20 = vpop.f32.mrb[137].mxu1  ;;  %6018 = vmatpush1.bf16.msra.mxu0 %v16036_v15 }
 0x64b   :  { %v20474_v35 = vadd.f32 %v4983_v20, %v4884_v2  ;;  %v17997_v12 = vpop.f32.mrb[138].mxu1  ;;  %v5846_v20 = vld [vmem:[#allocation4 + $0x1c8] sm:$0xff] }
 0x64c   :  { %v4986_v17 = vpop.f32.mrb[139].mxu1  ;;  %v5850_v12 = vld [vmem:[#allocation4 + $0x1e8] sm:$0xff] }
 0x64d   :  { %v20476_v4 = vadd.f32 %v4986_v17, %v4885_v34  ;;  %v16062_v61 = vcombine.low %v5846_v20, %v5850_v12  ;;  %v16063_v15 = vcombine.high %v5846_v20, %v5850_v12 }
 0x64e   :  { %18115 = vmatmul.mubr.msk.bf16.gmra.mrb[208].mxu1 %vm3828_vm1, %v20192_v63 }
 0x64f   :  { %18118 = vmatprep.mubr.msk.bf16.mxu1 %vm3828_vm1, %v20112_v33 }
 0x656   :  { %18119 = vmatmul.mubr.msk.bf16.gmra.mrb[12].mxu1 %vm3828_vm1, %v20115_v5  ;;  %v5829_v5 = vld [vmem:[#allocation4 + $0x140] sm:$0xff] }
 0x657   :  { %18122 = vmatprep.mubr.msk.bf16.mxu1 %vm3828_vm1, %v20203_v21  ;;  %v16044_v34 = vcombine.low %v5829_v5, %v5833_v3  ;;  %v16045_v21 = vcombine.high %v5829_v5, %v5833_v3  ;;  %v20536_v5 = vld [vmem:[#allocation4 + $0x138] sm:$0xff]  ;;  %v18662_v3 = vmov 0  }
 0x658   :  { %6049 = vmatprep.mubr.bf16.mxu0 %v18662_v3 }
 0x659   :  { %v18004_v63 = vpop.f32.mrb[140].mxu1  ;;  %6019 = vmatprep.subr.bf16.mxu0 %v16045_v21 }
 0x65a   :  { %v20487_v33 = vadd.f32 %v18004_v63, %v20427_v41  ;;  %v5014_v39 = vpop.f32.mrb[141].mxu1  ;;  %v16046_v41 = vcombine.low %v5830_v19, %v5834_v18  ;;  %6020 = vmatpush1.bf16.msra.mxu0 %v16044_v34 }
 0x65b   :  { %v20490_v29 = vadd.f32 %v5014_v39, %v20429_v16  ;;  %v18005_v7 = vpop.f32.mrb[142].mxu1  ;;  %6021 = vmatprep.subr.bf16.mxu0 %v16053_v31 }
 0x65c   :  { %v20493_v51 = vadd.f32 %v18005_v7, %v20431_v58  ;;  %v5017_v2 = vpop.f32.mrb[143].mxu1  ;;  %6061 = vmatpush1.bf16.msra.mxu1 %v16046_v41  ;;  %v20528_v7 = vld [vmem:[#allocation4 + $0x110] sm:$0xff] }
 0x65d   :  { %v20532_v2 = vld [vmem:[#allocation4 + $0x118] sm:$0xff] }
 0x65e   :  { %18123 = vmatmul.mubr.msk.bf16.gmra.mrb[212].mxu1 %vm3828_vm1, %v20131_v32  ;;  %6022 = vmatpush1.bf16.msra.mxu0 %v16052_v37 }
 0x65f   :  { %18126 = vmatprep.mubr.msk.bf16.mxu1 %vm3828_vm1, %v20141_v6 }
 0x661   :  { %v18008_v16 = vpop.f32.mrb[144].mxu1 }
 0x662   :  { %v20500_v59 = vadd.f32 %v18008_v16, %v20437_v53  ;;  %v5029_v58 = vpop.f32.mrb[145].mxu1 }
 0x663   :  { %v20503_v40 = vadd.f32 %v5029_v58, %v20439_v27  ;;  %v18009_v52 = vpop.f32.mrb[146].mxu1 }
 0x664   :  { %v5032_v28 = vpop.f32.mrb[147].mxu1 }
 0x665   :  { %v20506_v32 = vadd.f32 %v5032_v28, %v20441_v50  ;;  %v5838_v50 = vld [vmem:[#allocation4 + $0x188] sm:$0xff] }
 0x666   :  { %18127 = vmatmul.mubr.bf16.gmra.mrb[216].mxu1 %v21524_v11 }
 0x667   :  { %18130 = vmatprep.mubr.bf16.mxu1 %v21524_v11 }
 0x66e   :  { %18131 = vmatmul.mubr.bf16.gmra.mrb[24].mxu1 %v21524_v11  ;;  %v16054_v11 = vcombine.low %v5838_v50, %v5842_v48 }
 0x66f   :  { %18134 = vmatprep.mubr.msk.bf16.mxu1 %vm3828_vm1, %v20161_v62  ;;  %v16055_v62 = vcombine.high %v5838_v50, %v5842_v48 }
 0x671   :  { %v18016_v6 = vpop.f32.mrb[148].mxu1  ;;  %6062 = vmatprep.subr.bf16.mxu1 %v16055_v62 }
 0x672   :  { %v5060_v53 = vpop.f32.mrb[149].mxu1  ;;  %6063 = vmatpush1.bf16.msra.mxu1 %v16054_v11 }
 0x673   :  { %v20514_v25 = vadd.f32 %v5060_v53, %v20448_v23  ;;  %v18017_v27 = vpop.f32.mrb[150].mxu1  ;;  %6064 = vmatprep.subr.bf16.mxu1 %v16063_v15 }
 0x674   :  { %v5063_v14 = vpop.f32.mrb[151].mxu1 }
 0x676   :  { %18135 = vmatmul.mubr.msk.bf16.gmra.mrb[220].mxu1 %vm3828_vm1, %v20017_v10  ;;  %v5845_v10 = vld [vmem:[#allocation4 + $0x1c0] sm:$0xff] }
 0x677   :  { %18138 = vmatprep.mubr.msk.bf16.mxu1 %vm3828_vm1, %v20033_v55  ;;  %v16060_v45 = vcombine.low %v5845_v10, %v5849_v60  ;;  %v16061_v57 = vcombine.high %v5845_v10, %v5849_v60  ;;  %6065 = vmatpush1.bf16.msra.mxu1 %v16062_v61 }
 0x679   :  { %v18020_v24 = vpop.f32.mrb[152].mxu1  ;;  %6023 = vmatprep.subr.bf16.mxu0 %v16061_v57 }
 0x67a   :  { %v5073_v23 = vpop.f32.mrb[153].mxu1  ;;  %6024 = vmatpush1.bf16.msra.mxu0 %v16060_v45 }
 0x67b   :  { %v18021_v8 = vpop.f32.mrb[154].mxu1 }
 0x67c   :  { %v5075_v49 = vpop.f32.mrb[155].mxu1 }
 0x67e   :  { %18139 = vmatmul.mubr.msk.bf16.gmra.mrb[224].mxu1 %vm3828_vm1, %v20170_v42 }
 0x67f   :  { %6090 = vmatprep.mubr.bf16.mxu1 %v18662_v3 }
 0x689   :  { %v18032_v55 = vpop.f32.mrb[156].mxu1 }
 0x68a   :  { %v5296_v13 = vadd.f32 %v18032_v55, %v20462_v1  ;;  %v5175_v46 = vpop.f32.mrb[157].mxu1 }
 0x68b   :  { %v5295_v17 = vadd.f32 %v5175_v46, %v20464_v30  ;;  %v18033_v56 = vpop.f32.mrb[158].mxu1  ;;  %v20530_v30 = vld [vmem:[#allocation4 + $0x130] sm:$0xff] }
 0x68c   :  { %v5297_v36 = vadd.f32 %v18033_v56, %v20466_v54  ;;  %v5178_v42 = vpop.f32.mrb[159].mxu1  ;;  %v16041_v54 = vcombine.high %v20528_v7, %v20530_v30 }
 0x68e   :  { %6099 = vmatprep.subr.bf16.mxu0 %v16041_v54 }
 0x691   :  { %v18036_v26 = vpop.f32.mrb[160].mxu1 }
 0x692   :  { %v5300_v9 = vadd.f32 %v18036_v26, %v20472_v44  ;;  %v5190_v22 = vpop.f32.mrb[161].mxu1  ;;  %v16040_v44 = vcombine.low %v20528_v7, %v20530_v30  ;;  %v5848_v7 = vld [vmem:[#allocation4 + $0x1d8] sm:$0xff] }
 0x693   :  { %v5298_v0 = vadd.f32 %v5190_v22, %v20474_v35  ;;  %v18037_v1 = vpop.f32.mrb[162].mxu1  ;;  %v16042_v35 = vcombine.low %v20532_v2, %v20536_v5  ;;  %v5852_v30 = vld [vmem:[#allocation4 + $0x1f8] sm:$0xff] }
 0x694   :  { %v5193_v63 = vpop.f32.mrb[163].mxu1 }
 0x695   :  { %v5299_v39 = vadd.f32 %v5193_v63, %v20476_v4  ;;  %v16043_v4 = vcombine.high %v20532_v2, %v20536_v5 }
 0x697   :  { %6140 = vmatprep.subr.bf16.mxu1 %v16043_v4 }
 0x6a1   :  { %v18044_v19 = vpop.f32.mrb[164].mxu1 }
 0x6a2   :  { %v5306_v34 = vadd.f32 %v18044_v19, %v20487_v33  ;;  %v5221_v21 = vpop.f32.mrb[165].mxu1 }
 0x6a3   :  { %v5305_v18 = vadd.f32 %v5221_v21, %v20490_v29  ;;  %v18045_v41 = vpop.f32.mrb[166].mxu1 }
 0x6a4   :  { %v5307_v38 = vadd.f32 %v18045_v41, %v20493_v51  ;;  %v5224_v16 = vpop.f32.mrb[167].mxu1 }
 0x6a9   :  { %v18048_v58 = vpop.f32.mrb[168].mxu1 }
 0x6aa   :  { %v5236_v52 = vpop.f32.mrb[169].mxu1  ;;  %v5310_v28 = vadd.f32 %v18048_v58, %v20500_v59 }
 0x6ab   :  { %v18049_v6 = vpop.f32.mrb[170].mxu1  ;;  %v5308_v53 = vadd.f32 %v5236_v52, %v20503_v40 }
 0x6ac   :  { %v5239_v27 = vpop.f32.mrb[171].mxu1 }
 0x6ad   :  { %v5309_v14 = vadd.f32 %v5239_v27, %v20506_v32  ;;  %v5835_v27 = vld [vmem:[#allocation4 + $0x170] sm:$0xff] }
 0x6b9   :  { %v18056_v43 = vpop.f32.mrb[172].mxu1 }
 0x6ba   :  { %v5267_v47 = vpop.f32.mrb[173].mxu1  ;;  %v5836_v43 = vld [vmem:[#allocation4 + $0x178] sm:$0xff] }
 0x6bb   :  { %v18057_v33 = vpop.f32.mrb[174].mxu1  ;;  %v5315_v50 = vadd.f32 %v5267_v47, %v20514_v25 }
 0x6bc   :  { %v5270_v29 = vpop.f32.mrb[175].mxu1 }
 0x6c1   :  { %v18060_v37 = vpop.f32.mrb[176].mxu1 }
 0x6c2   :  { %v5280_v31 = vpop.f32.mrb[177].mxu1 }
 0x6c3   :  { %v18061_v51 = vpop.f32.mrb[178].mxu1  ;;  %v5839_v31 = vld [vmem:[#allocation4 + $0x190] sm:$0xff] }
 0x6c4   :  { %v5282_v48 = vpop.f32.mrb[179].mxu1 }
 0x6d1   :  { %v18072_v11 = vpop.f32.mrb[180].mxu1 }
 0x6d2   :  { %v5382_v62 = vpop.f32.mrb[181].mxu1  ;;  %v5503_v24 = vadd.f32 %v18072_v11, %v5296_v13  ;;  %v5843_v11 = vld [vmem:[#allocation4 + $0x1b0] sm:$0xff] }
 0x6d3   :  { %v18073_v59 = vpop.f32.mrb[182].mxu1  ;;  %v5502_v23 = vadd.f32 %v5382_v62, %v5295_v17  ;;  %v5840_v62 = vld [vmem:[#allocation4 + $0x198] sm:$0xff]  ;;  %v16056_v2 = vcombine.low %v5839_v31, %v5843_v11 }
 0x6d4   :  { %v5385_v8 = vpop.f32.mrb[183].mxu1  ;;  %v5504_v40 = vadd.f32 %v18073_v59, %v5297_v36  ;;  %v5844_v59 = vld [vmem:[#allocation4 + $0x1b8] sm:$0xff] }
 0x6d5   :  { %v16058_v5 = vcombine.low %v5840_v62, %v5844_v59 }
 0x6d9   :  { %v18076_v49 = vpop.f32.mrb[184].mxu1 }
 0x6da   :  { %v5397_v10 = vpop.f32.mrb[185].mxu1  ;;  %v20553_v32 = vadd.f32 %v18076_v49, %v5300_v9 }
 0x6db   :  { %v18077_v60 = vpop.f32.mrb[186].mxu1  ;;  %v20555_v45 = vadd.f32 %v5397_v10, %v5298_v0 }
 0x6dc   :  { %v5400_v25 = vpop.f32.mrb[187].mxu1 }
 0x6dd   :  { %v20557_v57 = vadd.f32 %v5400_v25, %v5299_v39 }
 0x6e9   :  { %v18084_v55 = vpop.f32.mrb[188].mxu1 }
 0x6ea   :  { %v5428_v46 = vpop.f32.mrb[189].mxu1  ;;  %v20559_v20 = vadd.f32 %v18084_v55, %v5306_v34 }
 0x6eb   :  { %v18085_v12 = vpop.f32.mrb[190].mxu1  ;;  %v20561_v13 = vadd.f32 %v5428_v46, %v5305_v18  ;;  %v20573_v18 = vld [vmem:[#allocation10] ss:$0 sm:$0xff]  ;;  %v16057_v46 = vcombine.high %v5839_v31, %v5843_v11 }
 0x6ec   :  { %v5431_v17 = vpop.f32.mrb[191].mxu1  ;;  %v20563_v56 = vadd.f32 %v18085_v12, %v5307_v38  ;;  %v16059_v12 = vcombine.high %v5840_v62, %v5844_v59  ;;  %v5808_v62 = vld [vmem:[#allocation4 + $0xa0] sm:$0xff]  ;;  %v5805_v59 = vld [vmem:[#allocation4 + $0x88] sm:$0xff] }
 0x6ed   :  { %v5847_v17 = vld [vmem:[#allocation4 + $0x1d0] sm:$0xff] }
 0x6f1   :  { %v18088_v61 = vpop.f32.mrb[192].mxu1 }
 0x6f2   :  { %v20565_v15 = vadd.f32 %v18088_v61, %v5310_v28  ;;  %v5443_v36 = vpop.f32.mrb[193].mxu1  ;;  %v5851_v61 = vld [vmem:[#allocation4 + $0x1f0] sm:$0xff] }
 0x6f3   :  { %v20567_v42 = vadd.f32 %v5443_v36, %v5308_v53  ;;  %v18089_v26 = vpop.f32.mrb[194].mxu1  ;;  %v5831_v53 = vld [vmem:[#allocation4 + $0x150] sm:$0xff]  ;;  %v16067_v36 = vcombine.high %v5848_v7, %v5852_v30 }
 0x6f4   :  { %v5446_v9 = vpop.f32.mrb[195].mxu1  ;;  %v16049_v29 = vcombine.high %v5831_v53, %v5835_v27  ;;  %v16048_v10 = vcombine.low %v5831_v53, %v5835_v27  ;;  %v5788_v26 = vld [vmem:[#allocation4] sm:$0xff] }
 0x6f5   :  { %v20569_v22 = vadd.f32 %v5446_v9, %v5309_v14  ;;  %v5832_v14 = vld [vmem:[#allocation4 + $0x158] sm:$0xff]  ;;  %v5792_v9 = vld [vmem:[#allocation4 + $0x20] sm:$0xff] }
 0x6f6   :  { %v16051_v37 = vcombine.high %v5832_v14, %v5836_v43  ;;  %v5796_v27 = vld [vmem:[#allocation4 + $0x40] sm:$0xff] }
 0x701   :  { %v18096_v0 = vpop.f32.mrb[196].mxu1 }
 0x702   :  { %v5474_v1 = vpop.f32.mrb[197].mxu1 }
 0x703   :  { %v20571_v63 = vadd.f32 %v5474_v1, %v5315_v50  ;;  %v18097_v39 = vpop.f32.mrb[198].mxu1 }
 0x704   :  { %v5477_v54 = vpop.f32.mrb[199].mxu1  ;;  %v5789_v39 = vld [vmem:[#allocation4 + $0x8] sm:$0xff] }
 0x705   :  { %v5793_v54 = vld [vmem:[#allocation4 + $0x28] sm:$0xff] }
 0x706   :  { %v16075_v53 = vcombine.high %v5789_v39, %v5793_v54 }
 0x709   :  { %v18100_v4 = vpop.f32.mrb[200].mxu1 }
 0x70a   :  { %v5487_v19 = vpop.f32.mrb[201].mxu1 }
 0x70b   :  { %v18101_v34 = vpop.f32.mrb[202].mxu1 }
 0x70c   :  { %v5489_v21 = vpop.f32.mrb[203].mxu1  ;;  %v16064_v34 = vcombine.low %v5847_v17, %v5851_v61 }
 0x711   :  { %v18108_v41 = vpop.f32.mrb[0].mxu1 }
 0x712   :  { %v20576_v38 = vadd.f32 %v18108_v41, %v20573_v18  ;;  %v20578_v16 = vpop.f32.mrb[1].mxu1 }
 0x713   :  { %v18109_v58 = vpop.f32.mrb[2].mxu1 }
 0x714   :  { %v20581_v52 = vadd.f32 %v18109_v58, %v20573_v18  ;;  %v5576_v28 = vpop.f32.mrb[3].mxu1  ;;  %v16066_v58 = vcombine.low %v5848_v7, %v5852_v30  ;;  %v5812_v7 = vld [vmem:[#allocation4 + $0xc0] sm:$0xff] }
 0x715   :  { %v5738_v6 = vadd.f32 %v20573_v18, %v5576_v28  ;;  %v16073_v28 = vcombine.high %v5788_v26, %v5792_v9  ;;  %v5816_v30 = vld [vmem:[#allocation4 + $0xe0] sm:$0xff] }
 0x717   :  { %v5763_v47 = vmax.f32 %v5738_v6, 0.0 }
 0x719   :  { %v20584_v33 = vpack.c.bf16 %v5763_v47, %v5763_v47  ;;  %v18112_v50 = vpop.f32.mrb[204].mxu1 }
 0x71a   :  { %v5710_v51 = vadd.f32 %v18112_v50, %v5503_v24  ;;  %v5589_v48 = vpop.f32.mrb[205].mxu1  ;;  %v16072_v50 = vcombine.low %v5788_v26, %v5792_v9  ;;  %v16097_v26 = vcombine.high %v5812_v7, %v5816_v30 }
 0x71b   :  { %v5709_v8 = vadd.f32 %v5589_v48, %v5502_v23  ;;  %v18113_v49 = vpop.f32.mrb[206].mxu1  ;;  %16068 = vmatmul.mubr.msk.bf16.vlgmr.msra.gmra.mrb[228].mxu0 %vm6013_vm2, %v20584_v33  ;;  %16069 = vmatmul.mubr.msk.bf16.vlgmr.msra.gmra.mrb[228].mxu1 %vm6013_vm2, %v20584_v33  ;;  %v16050_v23 = vcombine.low %v5832_v14, %v5836_v43  ;;  %v5797_v14 = vld [vmem:[#allocation4 + $0x48] sm:$0xff] }
 0x71c   :  { %v20591_v60 = vadd.f32 %v20573_v18, %v5710_v51  ;;  %v5711_v25 = vadd.f32 %v18113_v49, %v5504_v40  ;;  %6100 = vmatpush1.bf16.msra.mxu0 %v16040_v44  ;;  %6141 = vmatpush1.bf16.msra.mxu1 %v16042_v35  ;;  %v5592_v24 = vpop.f32.mrb[207].mxu1  ;;  %v16065_v35 = vcombine.high %v5847_v17, %v5851_v61  ;;  %v5801_v43 = vld [vmem:[#allocation4 + $0x68] sm:$0xff] }
 0x71d   :  { %v20600_v55 = vadd.f32 %v20573_v18, %v5709_v8  ;;  %6101 = vmatprep.subr.bf16.mxu0 %v16049_v29  ;;  %6142 = vmatprep.subr.bf16.mxu1 %v16051_v37  ;;  %v16074_v29 = vcombine.low %v5789_v39, %v5793_v54  ;;  %v16083_v51 = vcombine.high %v5797_v14, %v5801_v43  ;;  %v5809_v8 = vld [vmem:[#allocation4 + $0xa8] sm:$0xff]  ;;  %v5794_v54 = vld [vmem:[#allocation4 + $0x30] sm:$0xff] }
 0x71e   :  { %v20603_v40 = vadd.f32 %v20573_v18, %v5711_v25  ;;  %6131 = vmatprep.mubr.bf16.mxu0 %v18662_v3  ;;  %6172 = vmatprep.mubr.bf16.mxu1 %v18662_v3  ;;  %v16091_v61 = vcombine.high %v5805_v59, %v5809_v8 }
 0x720   :  { %6102 = vmatpush1.bf16.msra.mxu0 %v16048_v10  ;;  %6143 = vmatpush1.bf16.msra.mxu1 %v16050_v23 }
 0x721   :  { %v18116_v44 = vpop.f32.mrb[208].mxu1  ;;  %6103 = vmatprep.subr.bf16.mxu0 %v16057_v46  ;;  %6144 = vmatprep.subr.bf16.mxu1 %v16059_v12  ;;  %v16082_v46 = vcombine.low %v5797_v14, %v5801_v43 }
 0x722   :  { %v5714_v0 = vadd.f32 %v18116_v44, %v20553_v32  ;;  %v5604_v1 = vpop.f32.mrb[209].mxu1  ;;  %v16090_v44 = vcombine.low %v5805_v59, %v5809_v8  ;;  %v5806_v59 = vld [vmem:[#allocation4 + $0x90] sm:$0xff] }
 0x723   :  { %v5712_v4 = vadd.f32 %v5604_v1, %v20555_v45  ;;  %v18117_v19 = vpop.f32.mrb[210].mxu1  ;;  %v5800_v45 = vld [vmem:[#allocation4 + $0x60] sm:$0xff]  ;;  %v5810_v8 = vld [vmem:[#allocation4 + $0xb0] sm:$0xff] }
 0x724   :  { %v20610_v21 = vadd.f32 %v20573_v18, %v5714_v0  ;;  %6104 = vmatpush1.bf16.msra.mxu0 %v16056_v2  ;;  %6145 = vmatpush1.bf16.msra.mxu1 %v16058_v5  ;;  %v5607_v41 = vpop.f32.mrb[211].mxu1  ;;  %v16081_v31 = vcombine.high %v5796_v27, %v5800_v45  ;;  %v16080_v23 = vcombine.low %v5796_v27, %v5800_v45  ;;  %v5813_v2 = vld [vmem:[#allocation4 + $0xc8] sm:$0xff]  ;;  %v5790_v0 = vld [vmem:[#allocation4 + $0x10] sm:$0xff]  ;;  %v5795_v19 = vld [vmem:[#allocation4 + $0x38] sm:$0xff] }
 0x725   :  { %v20613_v6 = vadd.f32 %v20573_v18, %v5712_v4  ;;  %v5713_v32 = vadd.f32 %v5607_v41, %v20557_v57  ;;  %6105 = vmatprep.subr.bf16.mxu0 %v16065_v35  ;;  %6146 = vmatprep.subr.bf16.mxu1 %v16067_v36  ;;  %v5804_v57 = vld [vmem:[#allocation4 + $0x80] sm:$0xff]  ;;  %v5737_v35 = vadd.f32 %v20573_v18, %v20578_v16  ;;  %v5791_v4 = vld [vmem:[#allocation4 + $0x18] sm:$0xff] }
 0x726   :  { %v16089_v17 = vcombine.high %v5804_v57, %v5808_v62  ;;  %v16088_v5 = vcombine.low %v5804_v57, %v5808_v62  ;;  %v16077_v45 = vcombine.high %v5790_v0, %v5794_v54  ;;  %v16079_v14 = vcombine.high %v5791_v4, %v5795_v19 }
 0x727   :  { %v20617_v47 = vadd.f32 %v20573_v18, %v5713_v32  ;;  %v5762_v27 = vmax.f32 %v5737_v35, 0.0  ;;  %v5814_v35 = vld [vmem:[#allocation4 + $0xd0] sm:$0xff] }
 0x728   :  { %6106 = vmatpush1.bf16.msra.mxu0 %v16064_v34  ;;  %6147 = vmatpush1.bf16.msra.mxu1 %v16066_v58  ;;  %v16096_v58 = vcombine.low %v5812_v7, %v5816_v30 }
 0x729   :  { %v18120_v37 = vpop.f32.mrb[12].mxu1  ;;  %6344 = vmatprep.subr.bf16.mxu0 %v16073_v28  ;;  %6385 = vmatprep.subr.bf16.mxu1 %v16075_v53 }
 0x72a   :  { %v20620_v48 = vadd.f32 %v18120_v37, %v20573_v18  ;;  %v5619_v11 = vpop.f32.mrb[13].mxu1  ;;  %v5803_v37 = vld [vmem:[#allocation4 + $0x78] sm:$0xff] }
 0x72b   :  { %v20623_v49 = vadd.f32 %v20573_v18, %v5619_v11  ;;  %16070 = vmatmul.mubr.msk.bf16.vlgmr.msra.gmra.mrb[232].mxu0 %vm6013_vm2, %v20584_v33  ;;  %16071 = vmatmul.mubr.msk.bf16.vlgmr.msra.gmra.mrb[232].mxu1 %vm6013_vm2, %v20584_v33  ;;  %v18121_v10 = vpop.f32.mrb[14].mxu1  ;;  %v5817_v33 = vld [vmem:[#allocation4 + $0xe8] sm:$0xff] }
 0x72c   :  { %v20630_v25 = vadd.f32 %v18121_v10, %v20573_v18  ;;  %6345 = vmatpush1.bf16.msra.mxu0 %v16072_v50  ;;  %6386 = vmatpush1.bf16.msra.mxu1 %v16074_v29  ;;  %v5622_v24 = vpop.f32.mrb[15].mxu1  ;;  %v16099_v9 = vcombine.high %v5813_v2, %v5817_v33  ;;  %v16098_v53 = vcombine.low %v5813_v2, %v5817_v33  ;;  %v5802_v50 = vld [vmem:[#allocation4 + $0x70] sm:$0xff]  ;;  %v5799_v29 = vld [vmem:[#allocation4 + $0x58] sm:$0xff] }
 0x72d   :  { %v20633_v12 = vadd.f32 %v20573_v18, %v5622_v24  ;;  %6346 = vmatprep.subr.bf16.mxu0 %v16081_v31  ;;  %6387 = vmatprep.subr.bf16.mxu1 %v16083_v51  ;;  %v16078_v31 = vcombine.low %v5791_v4, %v5795_v19  ;;  %v20651_v51 = vpack.c.bf16 %v5762_v27, %v5762_v27  ;;  %v6509_v19 = vld [vmem:[#allocation4 + $0x200] sm:$0xff] }
 0x72e   :  { %6376 = vmatprep.mubr.bf16.mxu0 %v18662_v3  ;;  %6417 = vmatprep.mubr.bf16.mxu1 %v18662_v3  ;;  %v16087_v62 = vcombine.high %v5799_v29, %v5803_v37  ;;  %v16093_v33 = vcombine.high %v5806_v59, %v5810_v8 }
 0x730   :  { %6347 = vmatpush1.bf16.msra.mxu0 %v16080_v23  ;;  %6388 = vmatpush1.bf16.msra.mxu1 %v16082_v46  ;;  %v5807_v23 = vld [vmem:[#allocation4 + $0x98] sm:$0xff] }
 0x731   :  { %v18124_v36 = vpop.f32.mrb[212].mxu1  ;;  %6348 = vmatprep.subr.bf16.mxu0 %v16089_v17  ;;  %6389 = vmatprep.subr.bf16.mxu1 %v16091_v61  ;;  %v5811_v46 = vld [vmem:[#allocation4 + $0xb8] sm:$0xff] }
 0x732   :  { %v5720_v1 = vadd.f32 %v18124_v36, %v20559_v20  ;;  %v5635_v39 = vpop.f32.mrb[213].mxu1  ;;  %v5818_v36 = vld [vmem:[#allocation4 + $0xf0] sm:$0xff] }
 0x733   :  { %v5719_v34 = vadd.f32 %v5635_v39, %v20561_v13  ;;  %v18125_v41 = vpop.f32.mrb[214].mxu1  ;;  %v5798_v13 = vld [vmem:[#allocation4 + $0x50] sm:$0xff]  ;;  %v16094_v39 = vcombine.low %v5807_v23, %v5811_v46 }
 0x734   :  { %v20642_v28 = vadd.f32 %v20573_v18, %v5720_v1  ;;  %v5721_v16 = vadd.f32 %v18125_v41, %v20563_v56  ;;  %6349 = vmatpush1.bf16.msra.mxu0 %v16088_v5  ;;  %6390 = vmatpush1.bf16.msra.mxu1 %v16090_v44  ;;  %v5638_v32 = vpop.f32.mrb[215].mxu1  ;;  %v16076_v56 = vcombine.low %v5790_v0, %v5794_v54 }
 0x735   :  { %v20646_v20 = vadd.f32 %v20573_v18, %v5719_v34  ;;  %6350 = vmatprep.subr.bf16.mxu0 %v16097_v26  ;;  %6391 = vmatprep.subr.bf16.mxu1 %v16099_v9  ;;  %v16085_v11 = vcombine.high %v5798_v13, %v5802_v50  ;;  %v16084_v7 = vcombine.low %v5798_v13, %v5802_v50  ;;  %v5815_v26 = vld [vmem:[#allocation4 + $0xd8] sm:$0xff]  ;;  %v6514_v32 = vld [vmem:[#allocation4 + $0x228] sm:$0xff] }
 0x736   :  { %v20649_v43 = vadd.f32 %v20573_v18, %v5721_v16  ;;  %v16095_v44 = vcombine.high %v5807_v23, %v5811_v46  ;;  %v5819_v9 = vld [vmem:[#allocation4 + $0xf8] sm:$0xff]  ;;  %v16092_v1 = vcombine.low %v5806_v59, %v5810_v8  ;;  %v6510_v16 = vld [vmem:[#allocation4 + $0x208] sm:$0xff]  ;;  %v16100_v13 = vcombine.low %v5814_v35, %v5818_v36  ;;  %v6525_v46 = vld [vmem:[#allocation4 + $0x280] sm:$0xff] }
 0x737   :  { %v16103_v4 = vcombine.high %v5815_v26, %v5819_v9  ;;  %v16102_v50 = vcombine.low %v5815_v26, %v5819_v9  ;;  %v16110_v8 = vcombine.low %v6510_v16, %v6514_v32 }
 0x738   :  { %6351 = vmatpush1.bf16.msra.mxu0 %v16096_v58  ;;  %6392 = vmatpush1.bf16.msra.mxu1 %v16098_v53  ;;  %v6513_v58 = vld [vmem:[#allocation4 + $0x220] sm:$0xff] }
 0x739   :  { %v18128_v57 = vpop.f32.mrb[216].mxu1  ;;  %6426 = vmatprep.subr.bf16.mxu0 %v16077_v45  ;;  %6467 = vmatprep.subr.bf16.mxu1 %v16079_v14  ;;  %v16108_v59 = vcombine.low %v6509_v19, %v6513_v58 }
 0x73a   :  { %v5724_v10 = vadd.f32 %v18128_v57, %v20565_v15  ;;  %v5650_v24 = vpop.f32.mrb[217].mxu1  ;;  %v16086_v15 = vcombine.low %v5799_v29, %v5803_v37  ;;  %v16109_v37 = vcombine.high %v6509_v19, %v6513_v58  ;;  %v6521_v57 = vld [vmem:[#allocation4 + $0x260] sm:$0xff] }
 0x73b   :  { %v5722_v17 = vadd.f32 %v5650_v24, %v20567_v42  ;;  %16104 = vmatmul.mubr.msk.bf16.vlgmr.msra.gmra.mrb[236].mxu0 %vm6013_vm2, %v20651_v51  ;;  %16105 = vmatmul.mubr.msk.bf16.vlgmr.msra.gmra.mrb[236].mxu1 %vm6013_vm2, %v20651_v51  ;;  %v18129_v61 = vpop.f32.mrb[218].mxu1 }
 0x73c   :  { %v20660_v30 = vadd.f32 %v20573_v18, %v5724_v10  ;;  %6427 = vmatpush1.bf16.msra.mxu0 %v16076_v56  ;;  %6468 = vmatpush1.bf16.msra.mxu1 %v16078_v31  ;;  %v5653_v2 = vpop.f32.mrb[219].mxu1  ;;  %v16111_v56 = vcombine.high %v6510_v16, %v6514_v32  ;;  %v6517_v31 = vld [vmem:[#allocation4 + $0x240] sm:$0xff]  ;;  %v6515_v16 = vld [vmem:[#allocation4 + $0x230] sm:$0xff]  ;;  %v6512_v32 = vld [vmem:[#allocation4 + $0x218] sm:$0xff] }
 0x73d   :  { %v20663_v5 = vadd.f32 %v20573_v18, %v5722_v17  ;;  %v5723_v42 = vadd.f32 %v5653_v2, %v20569_v22  ;;  %6428 = vmatprep.subr.bf16.mxu0 %v16085_v11  ;;  %6469 = vmatprep.subr.bf16.mxu1 %v16087_v62  ;;  %v16101_v22 = vcombine.high %v5814_v35, %v5818_v36  ;;  %v6518_v11 = vld [vmem:[#allocation4 + $0x248] sm:$0xff]  ;;  %v6529_v61 = vld [vmem:[#allocation4 + $0x2a0] sm:$0xff] }
 0x73e   :  { %6458 = vmatprep.mubr.bf16.mxu0 %v18662_v3  ;;  %6499 = vmatprep.mubr.bf16.mxu1 %v18662_v3  ;;  %v6522_v62 = vld [vmem:[#allocation4 + $0x268] sm:$0xff]  ;;  %v16117_v24 = vcombine.high %v6517_v31, %v6521_v57  ;;  %v16125_v26 = vcombine.high %v6525_v46, %v6529_v61 }
 0x73f   :  { %v20669_v0 = vadd.f32 %v20573_v18, %v5723_v42  ;;  %v16119_v23 = vcombine.high %v6518_v11, %v6522_v62  ;;  %v6530_v2 = vld [vmem:[#allocation4 + $0x2a8] sm:$0xff]  ;;  %v16118_v35 = vcombine.low %v6518_v11, %v6522_v62  ;;  %v6519_v11 = vld [vmem:[#allocation4 + $0x250] sm:$0xff] }
 0x740   :  { %6429 = vmatpush1.bf16.msra.mxu0 %v16084_v7  ;;  %6470 = vmatpush1.bf16.msra.mxu1 %v16086_v15  ;;  %v6526_v7 = vld [vmem:[#allocation4 + $0x288] sm:$0xff]  ;;  %v6523_v62 = vld [vmem:[#allocation4 + $0x270] sm:$0xff] }
 0x741   :  { %v18132_v54 = vpop.f32.mrb[24].mxu1  ;;  %6430 = vmatprep.subr.bf16.mxu0 %v16093_v33  ;;  %6471 = vmatprep.subr.bf16.mxu1 %v16095_v44  ;;  %v16116_v44 = vcombine.low %v6517_v31, %v6521_v57  ;;  %v16127_v9 = vcombine.high %v6526_v7, %v6530_v2 }
 0x742   :  { %v20672_v34 = vadd.f32 %v18132_v54, %v20573_v18  ;;  %v5665_v41 = vpop.f32.mrb[25].mxu1  ;;  %v6538_v54 = vld [vmem:[#allocation4 + $0x2e8] sm:$0xff] }
 0x743   :  { %v20675_v53 = vadd.f32 %v20573_v18, %v5665_v41  ;;  %v18133_v27 = vpop.f32.mrb[26].mxu1  ;;  %v6511_v41 = vld [vmem:[#allocation4 + $0x210] sm:$0xff] }
 0x744   :  { %v20678_v45 = vadd.f32 %v18133_v27, %v20573_v18  ;;  %6431 = vmatpush1.bf16.msra.mxu0 %v16092_v1  ;;  %6472 = vmatpush1.bf16.msra.mxu1 %v16094_v39  ;;  %v5668_v14 = vpop.f32.mrb[27].mxu1  ;;  %v6537_v1 = vld [vmem:[#allocation4 + $0x2e0] sm:$0xff]  ;;  %v6534_v39 = vld [vmem:[#allocation4 + $0x2c8] sm:$0xff]  ;;  %v6516_v27 = vld [vmem:[#allocation4 + $0x238] sm:$0xff]  ;;  %v16113_v31 = vcombine.high %v6511_v41, %v6515_v16 }
 0x745   :  { %v20681_v29 = vadd.f32 %v20573_v18, %v5668_v14  ;;  %6432 = vmatprep.subr.bf16.mxu0 %v16101_v22  ;;  %6473 = vmatprep.subr.bf16.mxu1 %v16103_v4  ;;  %v16126_v22 = vcombine.low %v6526_v7, %v6530_v2  ;;  %v16135_v19 = vcombine.high %v6534_v39, %v6538_v54  ;;  %v6531_v7 = vld [vmem:[#allocation4 + $0x2b0] sm:$0xff]  ;;  %v6532_v2 = vld [vmem:[#allocation4 + $0x2b8] sm:$0xff] }
 0x746   :  { %v16115_v57 = vcombine.high %v6512_v32, %v6516_v27 }
 0x748   :  { %6433 = vmatpush1.bf16.msra.mxu0 %v16100_v13  ;;  %6474 = vmatpush1.bf16.msra.mxu1 %v16102_v50 }
 0x749   :  { %v18136_v10 = vpop.f32.mrb[220].mxu1  ;;  %6704 = vmatprep.subr.bf16.mxu0 %v16109_v37  ;;  %6745 = vmatprep.subr.bf16.mxu1 %v16111_v56  ;;  %v16134_v37 = vcombine.low %v6534_v39, %v6538_v54  ;;  %v5764_v56 = vmax.f32 %v20576_v38, 0.0  ;;  %v6528_v38 = vld [vmem:[#allocation4 + $0x298] sm:$0xff] }
 0x74a   :  { %v5681_v17 = vpop.f32.mrb[221].mxu1  ;;  %v16112_v10 = vcombine.low %v6511_v41, %v6515_v16  ;;  %v16130_v39 = vcombine.low %v6528_v38, %v6532_v2 }
 0x74b   :  { %v5729_v15 = vadd.f32 %v5681_v17, %v20571_v63  ;;  %16106 = vmatmul.mubr.msk.bf16.vlgmr.msra.gmra.mrb[240].mxu0 %vm6013_vm2, %v20651_v51  ;;  %16107 = vmatmul.mubr.msk.bf16.vlgmr.msra.gmra.mrb[240].mxu1 %vm6013_vm2, %v20651_v51  ;;  %v18137_v33 = vpop.f32.mrb[222].mxu1  ;;  %v6533_v63 = vld [vmem:[#allocation4 + $0x2c0] sm:$0xff]  ;;  %v16124_v51 = vcombine.low %v6525_v46, %v6529_v61  ;;  %v16121_v46 = vcombine.high %v6519_v11, %v6523_v62  ;;  %v6527_v61 = vld [vmem:[#allocation4 + $0x290] sm:$0xff] }
 0x74c   :  { %6705 = vmatpush1.bf16.msra.mxu0 %v16108_v59  ;;  %6746 = vmatpush1.bf16.msra.mxu1 %v16110_v8  ;;  %v5684_v42 = vpop.f32.mrb[223].mxu1  ;;  %v16132_v50 = vcombine.low %v6533_v63, %v6537_v1  ;;  %v6520_v59 = vld [vmem:[#allocation4 + $0x258] sm:$0xff] }
 0x74d   :  { %v20689_v36 = vadd.f32 %v20573_v18, %v5729_v15  ;;  %6706 = vmatprep.subr.bf16.mxu0 %v16117_v24  ;;  %6747 = vmatprep.subr.bf16.mxu1 %v16119_v23  ;;  %v16133_v18 = vcombine.high %v6533_v63, %v6537_v1  ;;  %v6524_v8 = vld [vmem:[#allocation4 + $0x278] sm:$0xff]  ;;  %v16114_v24 = vcombine.low %v6512_v32, %v6516_v27  ;;  %v6885_v27 = vld [vmem:[#allocation4 + $0x340] sm:$0xff] }
 0x74e   :  { %6736 = vmatprep.mubr.bf16.mxu0 %v18662_v3  ;;  %6777 = vmatprep.mubr.bf16.mxu1 %v18662_v3  ;;  %v6508_v23 = vpack.c.bf16 %v5764_v56, %v5764_v56  ;;  %v16123_v17 = vcombine.high %v6520_v59, %v6524_v8  ;;  %v16120_v15 = vcombine.low %v6519_v11, %v6523_v62  ;;  %v6540_v63 = vld [vmem:[#allocation4 + $0x2f8] sm:$0xff]  ;;  %v6893_v11 = vld [vmem:[#allocation4 + $0x380] sm:$0xff] }
 0x74f   :  { %v16122_v33 = vcombine.low %v6520_v59, %v6524_v8  ;;  %v16129_v42 = vcombine.high %v6527_v61, %v6531_v7  ;;  %v16128_v1 = vcombine.low %v6527_v61, %v6531_v7  ;;  %v6897_v62 = vld [vmem:[#allocation4 + $0x3a0] sm:$0xff]  ;;  %v6894_v59 = vld [vmem:[#allocation4 + $0x388] sm:$0xff] }
 0x750   :  { %6707 = vmatpush1.bf16.msra.mxu0 %v16116_v44  ;;  %6748 = vmatpush1.bf16.msra.mxu1 %v16118_v35  ;;  %v16131_v44 = vcombine.high %v6528_v38, %v6532_v2  ;;  %v6535_v35 = vld [vmem:[#allocation4 + $0x2d0] sm:$0xff]  ;;  %v6898_v8 = vld [vmem:[#allocation4 + $0x3a8] sm:$0xff]  ;;  %v6901_v61 = vld [vmem:[#allocation4 + $0x3c0] sm:$0xff] }
 0x751   :  { %v18140_v4 = vpop.f32.mrb[224].mxu1  ;;  %6708 = vmatprep.subr.bf16.mxu0 %v16125_v26  ;;  %6749 = vmatprep.subr.bf16.mxu1 %v16127_v9  ;;  %v6539_v26 = vld [vmem:[#allocation4 + $0x2f0] sm:$0xff]  ;;  %v6536_v9 = vld [vmem:[#allocation4 + $0x2d8] sm:$0xff]  ;;  %v6905_v7 = vld [vmem:[#allocation4 + $0x3e0] sm:$0xff] }
 0x752   :  { %v5694_v58 = vpop.f32.mrb[225].mxu1  ;;  %v16137_v54 = vcombine.high %v6535_v35, %v6539_v26  ;;  %v6881_v4 = vld [vmem:[#allocation4 + $0x320] sm:$0xff]  ;;  %v16136_v41 = vcombine.low %v6535_v35, %v6539_v26  ;;  %v6902_v38 = vld [vmem:[#allocation4 + $0x3c8] sm:$0xff]  ;;  %v6883_v35 = vld [vmem:[#allocation4 + $0x330] sm:$0xff] }
 0x753   :  { %v18141_v14 = vpop.f32.mrb[226].mxu1  ;;  %v16138_v58 = vcombine.low %v6536_v9, %v6540_v63  ;;  %v6906_v2 = vld [vmem:[#allocation4 + $0x3e8] sm:$0xff]  ;;  %v6880_v26 = vld [vmem:[#allocation4 + $0x318] sm:$0xff] }
 0x754   :  { %6709 = vmatpush1.bf16.msra.mxu0 %v16124_v51  ;;  %6750 = vmatpush1.bf16.msra.mxu1 %v16126_v22  ;;  %v5696_v13 = vpop.f32.mrb[227].mxu1  ;;  %v16139_v51 = vcombine.high %v6536_v9, %v6540_v63  ;;  %v6877_v22 = vld [vmem:[#allocation4 + $0x300] sm:$0xff]  ;;  %v6884_v9 = vld [vmem:[#allocation4 + $0x338] sm:$0xff]  ;;  %v16168_v63 = vcombine.low %v6901_v61, %v6905_v7 }
 0x755   :  { %6710 = vmatprep.subr.bf16.mxu0 %v16133_v18  ;;  %6751 = vmatprep.subr.bf16.mxu1 %v16135_v19  ;;  %v6878_v18 = vld [vmem:[#allocation4 + $0x308] sm:$0xff]  ;;  %v16145_v16 = vcombine.high %v6877_v22, %v6881_v4  ;;  %v6889_v14 = vld [vmem:[#allocation4 + $0x360] sm:$0xff] }
 0x756   :  { %v6882_v19 = vld [vmem:[#allocation4 + $0x328] sm:$0xff] }
 0x757   :  { %v16147_v32 = vcombine.high %v6878_v18, %v6882_v19  ;;  %v6886_v13 = vld [vmem:[#allocation4 + $0x348] sm:$0xff]  ;;  %v16146_v56 = vcombine.low %v6878_v18, %v6882_v19  ;;  %v6888_v18 = vld [vmem:[#allocation4 + $0x358] sm:$0xff] }
 0x758   :  { %6711 = vmatpush1.bf16.msra.mxu0 %v16132_v50  ;;  %6752 = vmatpush1.bf16.msra.mxu1 %v16134_v37  ;;  %v6890_v50 = vld [vmem:[#allocation4 + $0x368] sm:$0xff]  ;;  %v16144_v37 = vcombine.low %v6877_v22, %v6881_v4  ;;  %v6887_v22 = vld [vmem:[#allocation4 + $0x350] sm:$0xff]  ;;  %v6892_v19 = vld [vmem:[#allocation4 + $0x378] sm:$0xff] }
 0x759   :  { %6786 = vmatprep.subr.bf16.mxu0 %v16113_v31  ;;  %6827 = vmatprep.subr.bf16.mxu1 %v16115_v57  ;;  %v16153_v31 = vcombine.high %v6885_v27, %v6889_v14  ;;  %v16155_v57 = vcombine.high %v6886_v13, %v6890_v50  ;;  %v6891_v4 = vld [vmem:[#allocation4 + $0x370] sm:$0xff] }
 0x75b   :  { %16140 = vmatmul.mubr.msk.bf16.vlgmr.msra.gmra.mrb[244].mxu0 %vm6013_vm2, %v6508_v23  ;;  %16141 = vmatmul.mubr.msk.bf16.vlgmr.msra.gmra.mrb[244].mxu1 %vm6013_vm2, %v6508_v23 }
 0x75c   :  { %6787 = vmatpush1.bf16.msra.mxu0 %v16112_v10  ;;  %6828 = vmatpush1.bf16.msra.mxu1 %v16114_v24  ;;  %v16152_v10 = vcombine.low %v6885_v27, %v6889_v14  ;;  %v16154_v24 = vcombine.low %v6886_v13, %v6890_v50  ;;  %v16159_v27 = vcombine.high %v6888_v18, %v6892_v19  ;;  %v6895_v14 = vld [vmem:[#allocation4 + $0x390] sm:$0xff]  ;;  %v6900_v50 = vld [vmem:[#allocation4 + $0x3b8] sm:$0xff] }
 0x75d   :  { %6788 = vmatprep.subr.bf16.mxu0 %v16121_v46  ;;  %6829 = vmatprep.subr.bf16.mxu1 %v16123_v17  ;;  %v16161_v46 = vcombine.high %v6893_v11, %v6897_v62  ;;  %v16163_v17 = vcombine.high %v6894_v59, %v6898_v8  ;;  %v6899_v13 = vld [vmem:[#allocation4 + $0x3b0] sm:$0xff] }
 0x75e   :  { %6818 = vmatprep.mubr.bf16.mxu0 %v18662_v3  ;;  %6859 = vmatprep.mubr.bf16.mxu1 %v18662_v3 }
 0x760   :  { %6789 = vmatpush1.bf16.msra.mxu0 %v16120_v15  ;;  %6830 = vmatpush1.bf16.msra.mxu1 %v16122_v33  ;;  %v16160_v15 = vcombine.low %v6893_v11, %v6897_v62  ;;  %v16169_v33 = vcombine.high %v6901_v61, %v6905_v7  ;;  %v6903_v11 = vld [vmem:[#allocation4 + $0x3d0] sm:$0xff]  ;;  %v7245_v61 = vld [vmem:[#allocation4 + $0x400] sm:$0xff] }
 0x761   :  { %6790 = vmatprep.subr.bf16.mxu0 %v16129_v42  ;;  %6831 = vmatprep.subr.bf16.mxu1 %v16131_v44  ;;  %v16171_v42 = vcombine.high %v6902_v38, %v6906_v2  ;;  %v6879_v44 = vld [vmem:[#allocation4 + $0x310] sm:$0xff]  ;;  %v7249_v7 = vld [vmem:[#allocation4 + $0x420] sm:$0xff] }
 0x762   :  { %v6907_v62 = vld [vmem:[#allocation4 + $0x3f0] sm:$0xff] }
 0x764   :  { %6791 = vmatpush1.bf16.msra.mxu0 %v16128_v1  ;;  %6832 = vmatpush1.bf16.msra.mxu1 %v16130_v39  ;;  %v16170_v1 = vcombine.low %v6902_v38, %v6906_v2  ;;  %v5765_v39 = vmax.f32 %v20581_v52, 0.0  ;;  %v6896_v52 = vld [vmem:[#allocation4 + $0x398] sm:$0xff]  ;;  %v7246_v38 = vld [vmem:[#allocation4 + $0x408] sm:$0xff] }
 0x765   :  { %6792 = vmatprep.subr.bf16.mxu0 %v16137_v54  ;;  %6833 = vmatprep.subr.bf16.mxu1 %v16139_v51  ;;  %v16149_v54 = vcombine.high %v6879_v44, %v6883_v35  ;;  %v16151_v51 = vcombine.high %v6880_v26, %v6884_v9  ;;  %v7250_v2 = vld [vmem:[#allocation4 + $0x428] sm:$0xff] }
 0x768   :  { %6793 = vmatpush1.bf16.msra.mxu0 %v16136_v41  ;;  %6834 = vmatpush1.bf16.msra.mxu1 %v16138_v58  ;;  %v16148_v41 = vcombine.low %v6879_v44, %v6883_v35  ;;  %v16150_v58 = vcombine.low %v6880_v26, %v6884_v9  ;;  %v7253_v44 = vld [vmem:[#allocation4 + $0x440] sm:$0xff]  ;;  %v7254_v26 = vld [vmem:[#allocation4 + $0x448] sm:$0xff] }
 0x769   :  { %7072 = vmatprep.subr.bf16.mxu0 %v16145_v16  ;;  %7113 = vmatprep.subr.bf16.mxu1 %v16147_v32  ;;  %v6876_v16 = vpack.c.bf16 %v5765_v39, %v5765_v39  ;;  %v16157_v32 = vcombine.high %v6887_v22, %v6891_v4  ;;  %v7257_v35 = vld [vmem:[#allocation4 + $0x460] sm:$0xff]  ;;  %v7258_v9 = vld [vmem:[#allocation4 + $0x468] sm:$0xff] }
 0x76a   :  { %v16189_v39 = vcombine.high %v7253_v44, %v7257_v35 }
 0x76b   :  { %16142 = vmatmul.mubr.msk.bf16.vlgmr.msra.gmra.mrb[248].mxu0 %vm6013_vm2, %v6508_v23  ;;  %16143 = vmatmul.mubr.msk.bf16.vlgmr.msra.gmra.mrb[248].mxu1 %vm6013_vm2, %v6508_v23  ;;  %v16162_v23 = vcombine.low %v6894_v59, %v6898_v8  ;;  %v6904_v59 = vld [vmem:[#allocation4 + $0x3d8] sm:$0xff] }
 0x76c   :  { %7073 = vmatpush1.bf16.msra.mxu0 %v16144_v37  ;;  %7114 = vmatpush1.bf16.msra.mxu1 %v16146_v56  ;;  %v16156_v37 = vcombine.low %v6887_v22, %v6891_v4  ;;  %v16158_v56 = vcombine.low %v6888_v18, %v6892_v19  ;;  %v6908_v8 = vld [vmem:[#allocation4 + $0x3f8] sm:$0xff]  ;;  %v7265_v22 = vld [vmem:[#allocation4 + $0x4a0] sm:$0xff]  ;;  %v7262_v4 = vld [vmem:[#allocation4 + $0x488] sm:$0xff]  ;;  %v16188_v19 = vcombine.low %v7253_v44, %v7257_v35 }
 0x76d   :  { %7074 = vmatprep.subr.bf16.mxu0 %v16153_v31  ;;  %7115 = vmatprep.subr.bf16.mxu1 %v16155_v57  ;;  %v16165_v31 = vcombine.high %v6895_v14, %v6899_v13  ;;  %v16167_v57 = vcombine.high %v6896_v52, %v6900_v50  ;;  %v7266_v18 = vld [vmem:[#allocation4 + $0x4a8] sm:$0xff]  ;;  %v7263_v44 = vld [vmem:[#allocation4 + $0x490] sm:$0xff] }
 0x76e   :  { %7104 = vmatprep.mubr.bf16.mxu0 %v18662_v3  ;;  %7145 = vmatprep.mubr.bf16.mxu1 %v18662_v3  ;;  %v7267_v35 = vld [vmem:[#allocation4 + $0x4b0] sm:$0xff] }
 0x770   :  { %7075 = vmatpush1.bf16.msra.mxu0 %v16152_v10  ;;  %7116 = vmatpush1.bf16.msra.mxu1 %v16154_v24  ;;  %v16164_v10 = vcombine.low %v6895_v14, %v6899_v13  ;;  %v16166_v24 = vcombine.low %v6896_v52, %v6900_v50  ;;  %v7273_v14 = vld [vmem:[#allocation4 + $0x4e0] sm:$0xff]  ;;  %v7270_v13 = vld [vmem:[#allocation4 + $0x4c8] sm:$0xff] }
 0x771   :  { %7076 = vmatprep.subr.bf16.mxu0 %v16161_v46  ;;  %7117 = vmatprep.subr.bf16.mxu1 %v16163_v17  ;;  %v16173_v46 = vcombine.high %v6903_v11, %v6907_v62  ;;  %v16175_v17 = vcombine.high %v6904_v59, %v6908_v8  ;;  %v7274_v52 = vld [vmem:[#allocation4 + $0x4e8] sm:$0xff] }
 0x774   :  { %7077 = vmatpush1.bf16.msra.mxu0 %v16160_v15  ;;  %7118 = vmatpush1.bf16.msra.mxu1 %v16162_v23  ;;  %v16172_v15 = vcombine.low %v6903_v11, %v6907_v62  ;;  %v16174_v23 = vcombine.low %v6904_v59, %v6908_v8  ;;  %v7248_v11 = vld [vmem:[#allocation4 + $0x418] sm:$0xff]  ;;  %v16206_v8 = vcombine.low %v7270_v13, %v7274_v52 }
 0x775   :  { %7078 = vmatprep.subr.bf16.mxu0 %v16169_v33  ;;  %7119 = vmatprep.subr.bf16.mxu1 %v16171_v42  ;;  %v16181_v33 = vcombine.high %v7245_v61, %v7249_v7  ;;  %v16183_v42 = vcombine.high %v7246_v38, %v7250_v2  ;;  %v7252_v62 = vld [vmem:[#allocation4 + $0x438] sm:$0xff] }
 0x778   :  { %7079 = vmatpush1.bf16.msra.mxu0 %v16168_v63  ;;  %7120 = vmatpush1.bf16.msra.mxu1 %v16170_v1  ;;  %v16180_v63 = vcombine.low %v7245_v61, %v7249_v7  ;;  %v16182_v1 = vcombine.low %v7246_v38, %v7250_v2  ;;  %v7259_v61 = vld [vmem:[#allocation4 + $0x470] sm:$0xff]  ;;  %v7256_v7 = vld [vmem:[#allocation4 + $0x458] sm:$0xff] }
 0x779   :  { %7154 = vmatprep.subr.bf16.mxu0 %v16149_v54  ;;  %7195 = vmatprep.subr.bf16.mxu1 %v16151_v51  ;;  %v16191_v54 = vcombine.high %v7254_v26, %v7258_v9  ;;  %v7261_v51 = vld [vmem:[#allocation4 + $0x480] sm:$0xff]  ;;  %v7260_v38 = vld [vmem:[#allocation4 + $0x478] sm:$0xff] }
 0x77a   :  { %v16196_v50 = vcombine.low %v7261_v51, %v7265_v22 }
 0x77b   :  { %16176 = vmatmul.mubr.msk.bf16.vlgmr.msra.gmra.mrb[252].mxu0 %vm6013_vm2, %v6876_v16  ;;  %16177 = vmatmul.mubr.msk.bf16.vlgmr.msra.gmra.mrb[252].mxu1 %vm6013_vm2, %v6876_v16 }
 0x77c   :  { %7155 = vmatpush1.bf16.msra.mxu0 %v16148_v41  ;;  %7196 = vmatpush1.bf16.msra.mxu1 %v16150_v58  ;;  %v16190_v41 = vcombine.low %v7254_v26, %v7258_v9  ;;  %v16197_v58 = vcombine.high %v7261_v51, %v7265_v22  ;;  %v7268_v26 = vld [vmem:[#allocation4 + $0x4b8] sm:$0xff]  ;;  %v7275_v51 = vld [vmem:[#allocation4 + $0x4f0] sm:$0xff] }
 0x77d   :  { %7156 = vmatprep.subr.bf16.mxu0 %v16157_v32  ;;  %7197 = vmatprep.subr.bf16.mxu1 %v16159_v27  ;;  %v16199_v32 = vcombine.high %v7262_v4, %v7266_v18  ;;  %v7269_v27 = vld [vmem:[#allocation4 + $0x4c0] sm:$0xff]  ;;  %v7272_v22 = vld [vmem:[#allocation4 + $0x4d8] sm:$0xff] }
 0x77e   :  { %7186 = vmatprep.mubr.bf16.mxu0 %v18662_v3  ;;  %7227 = vmatprep.mubr.bf16.mxu1 %v18662_v3  ;;  %v16204_v59 = vcombine.low %v7269_v27, %v7273_v14 }
 0x780   :  { %7157 = vmatpush1.bf16.msra.mxu0 %v16156_v37  ;;  %7198 = vmatpush1.bf16.msra.mxu1 %v16158_v56  ;;  %v16205_v37 = vcombine.high %v7269_v27, %v7273_v14  ;;  %v16207_v56 = vcombine.high %v7270_v13, %v7274_v52  ;;  %v7617_v27 = vld [vmem:[#allocation4 + $0x520] sm:$0xff]  ;;  %v7614_v14 = vld [vmem:[#allocation4 + $0x508] sm:$0xff] }
 0x781   :  { %7158 = vmatprep.subr.bf16.mxu0 %v16165_v31  ;;  %7199 = vmatprep.subr.bf16.mxu1 %v16167_v57  ;;  %v7247_v31 = vld [vmem:[#allocation4 + $0x410] sm:$0xff]  ;;  %v7618_v13 = vld [vmem:[#allocation4 + $0x528] sm:$0xff] }
 0x782   :  { %v7251_v57 = vld [vmem:[#allocation4 + $0x430] sm:$0xff] }
 0x783   :  { %v16184_v2 = vcombine.low %v7247_v31, %v7251_v57 }
 0x784   :  { %7159 = vmatpush1.bf16.msra.mxu0 %v16164_v10  ;;  %7200 = vmatpush1.bf16.msra.mxu1 %v16166_v24  ;;  %v5766_v10 = vmax.f32 %v20600_v55, 0.0  ;;  %v16185_v24 = vcombine.high %v7247_v31, %v7251_v57  ;;  %v7264_v55 = vld [vmem:[#allocation4 + $0x498] sm:$0xff]  ;;  %v7625_v31 = vld [vmem:[#allocation4 + $0x560] sm:$0xff]  ;;  %v7622_v57 = vld [vmem:[#allocation4 + $0x548] sm:$0xff] }
 0x785   :  { %7160 = vmatprep.subr.bf16.mxu0 %v16173_v46  ;;  %7201 = vmatprep.subr.bf16.mxu1 %v16175_v17  ;;  %v16187_v46 = vcombine.high %v7248_v11, %v7252_v62  ;;  %v7255_v17 = vld [vmem:[#allocation4 + $0x450] sm:$0xff] }
 0x786   :  { %v16192_v9 = vcombine.low %v7255_v17, %v7259_v61 }
 0x788   :  { %7161 = vmatpush1.bf16.msra.mxu0 %v16172_v15  ;;  %7202 = vmatpush1.bf16.msra.mxu1 %v16174_v23  ;;  %v16186_v15 = vcombine.low %v7248_v11, %v7252_v62  ;;  %v7244_v23 = vpack.c.bf16 %v5766_v10, %v5766_v10  ;;  %v7626_v11 = vld [vmem:[#allocation4 + $0x568] sm:$0xff] }
 0x789   :  { %7440 = vmatprep.subr.bf16.mxu0 %v16181_v33  ;;  %7481 = vmatprep.subr.bf16.mxu1 %v16183_v42  ;;  %v16193_v33 = vcombine.high %v7255_v17, %v7259_v61  ;;  %v16195_v42 = vcombine.high %v7256_v7, %v7260_v38  ;;  %v16227_v10 = vcombine.high %v7622_v57, %v7626_v11  ;;  %v7630_v17 = vld [vmem:[#allocation4 + $0x588] sm:$0xff] }
 0x78a   :  { %v7634_v61 = vld [vmem:[#allocation4 + $0x5a8] sm:$0xff] }
 0x78b   :  { %16178 = vmatmul.mubr.msk.bf16.vlgmr.msra.gmra.mrb[4].mxu0 %vm6013_vm2, %v6876_v16  ;;  %16179 = vmatmul.mubr.msk.bf16.vlgmr.msra.gmra.mrb[4].mxu1 %vm6013_vm2, %v6876_v16  ;;  %v16198_v16 = vcombine.low %v7262_v4, %v7266_v18  ;;  %v7276_v4 = vld [vmem:[#allocation4 + $0x4f8] sm:$0xff]  ;;  %v16200_v18 = vcombine.low %v7263_v44, %v7267_v35 }
 0x78c   :  { %7441 = vmatpush1.bf16.msra.mxu0 %v16180_v63  ;;  %7482 = vmatpush1.bf16.msra.mxu1 %v16182_v1  ;;  %v16194_v63 = vcombine.low %v7256_v7, %v7260_v38  ;;  %v16201_v1 = vcombine.high %v7263_v44, %v7267_v35  ;;  %v16226_v38 = vcombine.low %v7622_v57, %v7626_v11  ;;  %v7638_v44 = vld [vmem:[#allocation4 + $0x5c8] sm:$0xff] }
 0x78d   :  { %7442 = vmatprep.subr.bf16.mxu0 %v16189_v39  ;;  %7483 = vmatprep.subr.bf16.mxu1 %v16191_v54  ;;  %v16203_v39 = vcombine.high %v7264_v55, %v7268_v26  ;;  %v7271_v54 = vld [vmem:[#allocation4 + $0x4d0] sm:$0xff]  ;;  %v7642_v35 = vld [vmem:[#allocation4 + $0x5e8] sm:$0xff] }
 0x78e   :  { %7472 = vmatprep.mubr.bf16.mxu0 %v18662_v3  ;;  %7513 = vmatprep.mubr.bf16.mxu1 %v18662_v3  ;;  %v16208_v52 = vcombine.low %v7271_v54, %v7275_v51 }
 0x790   :  { %7443 = vmatpush1.bf16.msra.mxu0 %v16188_v19  ;;  %7484 = vmatpush1.bf16.msra.mxu1 %v16190_v41  ;;  %v16202_v19 = vcombine.low %v7264_v55, %v7268_v26  ;;  %v16209_v41 = vcombine.high %v7271_v54, %v7275_v51  ;;  %v7620_v54 = vld [vmem:[#allocation4 + $0x538] sm:$0xff] }
 0x791   :  { %7444 = vmatprep.subr.bf16.mxu0 %v16197_v58  ;;  %7485 = vmatprep.subr.bf16.mxu1 %v16199_v32  ;;  %v16211_v58 = vcombine.high %v7272_v22, %v7276_v4  ;;  %v7613_v32 = vld [vmem:[#allocation4 + $0x500] sm:$0xff] }
 0x792   :  { %v16216_v62 = vcombine.low %v7613_v32, %v7617_v27 }
 0x794   :  { %7445 = vmatpush1.bf16.msra.mxu0 %v16196_v50  ;;  %7486 = vmatpush1.bf16.msra.mxu1 %v16198_v16  ;;  %v16210_v50 = vcombine.low %v7272_v22, %v7276_v4  ;;  %v16217_v16 = vcombine.high %v7613_v32, %v7617_v27  ;;  %v16242_v22 = vcombine.low %v7638_v44, %v7642_v35  ;;  %v5767_v4 = vmax.f32 %v20591_v60, 0.0  ;;  %v7624_v32 = vld [vmem:[#allocation4 + $0x558] sm:$0xff] }
 0x795   :  { %7446 = vmatprep.subr.bf16.mxu0 %v16205_v37  ;;  %7487 = vmatprep.subr.bf16.mxu1 %v16207_v56  ;;  %v16219_v37 = vcombine.high %v7614_v14, %v7618_v13  ;;  %v7621_v56 = vld [vmem:[#allocation4 + $0x540] sm:$0xff]  ;;  %v7628_v27 = vld [vmem:[#allocation4 + $0x578] sm:$0xff] }
 0x796   :  { %v16224_v7 = vcombine.low %v7621_v56, %v7625_v31  ;;  %v7632_v60 = vld [vmem:[#allocation4 + $0x598] sm:$0xff]  ;;  %v16230_v11 = vcombine.low %v7624_v32, %v7628_v27 }
 0x798   :  { %7447 = vmatpush1.bf16.msra.mxu0 %v16204_v59  ;;  %7488 = vmatpush1.bf16.msra.mxu1 %v16206_v8  ;;  %v16218_v59 = vcombine.low %v7614_v14, %v7618_v13  ;;  %v16225_v8 = vcombine.high %v7621_v56, %v7625_v31  ;;  %v7635_v56 = vld [vmem:[#allocation4 + $0x5b0] sm:$0xff]  ;;  %v7636_v31 = vld [vmem:[#allocation4 + $0x5b8] sm:$0xff] }
 0x799   :  { %7522 = vmatprep.subr.bf16.mxu0 %v16185_v24  ;;  %7563 = vmatprep.subr.bf16.mxu1 %v16187_v46  ;;  %v7629_v24 = vld [vmem:[#allocation4 + $0x580] sm:$0xff] }
 0x79a   :  { %v7633_v46 = vld [vmem:[#allocation4 + $0x5a0] sm:$0xff] }
 0x79b   :  { %16212 = vmatmul.mubr.msk.bf16.vlgmr.msra.gmra.mrb[8].mxu0 %vm6013_vm2, %v7244_v23  ;;  %16213 = vmatmul.mubr.msk.bf16.vlgmr.msra.gmra.mrb[8].mxu1 %vm6013_vm2, %v7244_v23  ;;  %v16232_v55 = vcombine.low %v7629_v24, %v7633_v46 }
 0x79c   :  { %7523 = vmatpush1.bf16.msra.mxu0 %v16184_v2  ;;  %7564 = vmatpush1.bf16.msra.mxu1 %v16186_v15  ;;  %v16233_v2 = vcombine.high %v7629_v24, %v7633_v46  ;;  %v16235_v15 = vcombine.high %v7630_v17, %v7634_v61  ;;  %v7640_v24 = vld [vmem:[#allocation4 + $0x5d8] sm:$0xff] }
 0x79d   :  { %7524 = vmatprep.subr.bf16.mxu0 %v16193_v33  ;;  %7565 = vmatprep.subr.bf16.mxu1 %v16195_v42  ;;  %v7637_v33 = vld [vmem:[#allocation4 + $0x5c0] sm:$0xff]  ;;  %v7644_v46 = vld [vmem:[#allocation4 + $0x5f8] sm:$0xff] }
 0x79e   :  { %7554 = vmatprep.mubr.bf16.mxu0 %v18662_v3  ;;  %7595 = vmatprep.mubr.bf16.mxu1 %v18662_v3  ;;  %v7641_v42 = vld [vmem:[#allocation4 + $0x5e0] sm:$0xff] }
 0x79f   :  { %v16241_v26 = vcombine.high %v7637_v33, %v7641_v42  ;;  %v16240_v51 = vcombine.low %v7637_v33, %v7641_v42  ;;  %v7982_v33 = vld [vmem:[#allocation4 + $0x608] sm:$0xff] }
 0x7a0   :  { %7525 = vmatpush1.bf16.msra.mxu0 %v16192_v9  ;;  %7566 = vmatpush1.bf16.msra.mxu1 %v16194_v63  ;;  %v16243_v9 = vcombine.high %v7638_v44, %v7642_v35  ;;  %v7615_v63 = vld [vmem:[#allocation4 + $0x510] sm:$0xff]  ;;  %v7986_v42 = vld [vmem:[#allocation4 + $0x628] sm:$0xff]  ;;  %v16246_v35 = vcombine.low %v7640_v24, %v7644_v46 }
 0x7a1   :  { %7526 = vmatprep.subr.bf16.mxu0 %v16201_v1  ;;  %7567 = vmatprep.subr.bf16.mxu1 %v16203_v39  ;;  %v7619_v1 = vld [vmem:[#allocation4 + $0x530] sm:$0xff]  ;;  %v7616_v39 = vld [vmem:[#allocation4 + $0x518] sm:$0xff] }
 0x7a2   :  { %v16220_v14 = vcombine.low %v7615_v63, %v7619_v1  ;;  %v16222_v13 = vcombine.low %v7616_v39, %v7620_v54 }
 0x7a4   :  { %7527 = vmatpush1.bf16.msra.mxu0 %v16200_v18  ;;  %7568 = vmatpush1.bf16.msra.mxu1 %v16202_v19  ;;  %v16221_v18 = vcombine.high %v7615_v63, %v7619_v1  ;;  %v16223_v19 = vcombine.high %v7616_v39, %v7620_v54  ;;  %v7990_v63 = vld [vmem:[#allocation4 + $0x648] sm:$0xff]  ;;  %v16254_v54 = vcombine.low %v7982_v33, %v7986_v42 }
 0x7a5   :  { %7528 = vmatprep.subr.bf16.mxu0 %v16209_v41  ;;  %7569 = vmatprep.subr.bf16.mxu1 %v16211_v58  ;;  %v7623_v41 = vld [vmem:[#allocation4 + $0x550] sm:$0xff]  ;;  %v7994_v1 = vld [vmem:[#allocation4 + $0x668] sm:$0xff] }
 0x7a6   :  { %v7627_v58 = vld [vmem:[#allocation4 + $0x570] sm:$0xff] }
 0x7a7   :  { %v16228_v57 = vcombine.low %v7623_v41, %v7627_v58 }
 0x7a8   :  { %7529 = vmatpush1.bf16.msra.mxu0 %v16208_v52  ;;  %7570 = vmatpush1.bf16.msra.mxu1 %v16210_v50  ;;  %v7612_v52 = vpack.c.bf16 %v5767_v4, %v5767_v4  ;;  %v16229_v50 = vcombine.high %v7623_v41, %v7627_v58  ;;  %v7997_v4 = vld [vmem:[#allocation4 + $0x680] sm:$0xff]  ;;  %v8002_v41 = vld [vmem:[#allocation4 + $0x6a8] sm:$0xff] }
 0x7a9   :  { %7808 = vmatprep.subr.bf16.mxu0 %v16217_v16  ;;  %7849 = vmatprep.subr.bf16.mxu1 %v16219_v37  ;;  %v16231_v16 = vcombine.high %v7624_v32, %v7628_v27  ;;  %v7631_v37 = vld [vmem:[#allocation4 + $0x590] sm:$0xff]  ;;  %v16262_v32 = vcombine.low %v7990_v63, %v7994_v1 }
 0x7ab   :  { %16214 = vmatmul.mubr.msk.bf16.vlgmr.msra.gmra.mrb[16].mxu0 %vm6013_vm2, %v7244_v23  ;;  %16215 = vmatmul.mubr.msk.bf16.vlgmr.msra.gmra.mrb[16].mxu1 %vm6013_vm2, %v7244_v23  ;;  %v16234_v23 = vcombine.low %v7630_v17, %v7634_v61  ;;  %v16236_v17 = vcombine.low %v7631_v37, %v7635_v56  ;;  %v16238_v61 = vcombine.low %v7632_v60, %v7636_v31 }
 0x7ac   :  { %7809 = vmatpush1.bf16.msra.mxu0 %v16216_v62  ;;  %7850 = vmatpush1.bf16.msra.mxu1 %v16218_v59  ;;  %v16237_v62 = vcombine.high %v7631_v37, %v7635_v56  ;;  %v16239_v59 = vcombine.high %v7632_v60, %v7636_v31  ;;  %v8010_v37 = vld [vmem:[#allocation4 + $0x6e8] sm:$0xff] }
 0x7ad   :  { %7810 = vmatprep.subr.bf16.mxu0 %v16225_v8  ;;  %7851 = vmatprep.subr.bf16.mxu1 %v16227_v10  ;;  %v7639_v8 = vld [vmem:[#allocation4 + $0x5d0] sm:$0xff] }
 0x7ae   :  { %7840 = vmatprep.mubr.bf16.mxu0 %v18662_v3  ;;  %7881 = vmatprep.mubr.bf16.mxu1 %v18662_v3  ;;  %v7643_v10 = vld [vmem:[#allocation4 + $0x5f0] sm:$0xff] }
 0x7af   :  { %v16244_v44 = vcombine.low %v7639_v8, %v7643_v10 }
 0x7b0   :  { %7811 = vmatpush1.bf16.msra.mxu0 %v16224_v7  ;;  %7852 = vmatpush1.bf16.msra.mxu1 %v16226_v38  ;;  %v16245_v7 = vcombine.high %v7639_v8, %v7643_v10  ;;  %v16247_v38 = vcombine.high %v7640_v24, %v7644_v46  ;;  %v5768_v24 = vmax.f32 %v20603_v40, 0.0  ;;  %v8000_v40 = vld [vmem:[#allocation4 + $0x698] sm:$0xff] }
 0x7b1   :  { %7812 = vmatprep.subr.bf16.mxu0 %v16233_v2  ;;  %7853 = vmatprep.subr.bf16.mxu1 %v16235_v15  ;;  %v7981_v2 = vld [vmem:[#allocation4 + $0x600] sm:$0xff] }
 0x7b2   :  { %v7985_v15 = vld [vmem:[#allocation4 + $0x620] sm:$0xff] }
 0x7b3   :  { %v16252_v39 = vcombine.low %v7981_v2, %v7985_v15 }
 0x7b4   :  { %7813 = vmatpush1.bf16.msra.mxu0 %v16232_v55  ;;  %7854 = vmatpush1.bf16.msra.mxu1 %v16234_v23  ;;  %v16253_v55 = vcombine.high %v7981_v2, %v7985_v15  ;;  %v16255_v23 = vcombine.high %v7982_v33, %v7986_v42  ;;  %v7996_v2 = vld [vmem:[#allocation4 + $0x678] sm:$0xff]  ;;  %v7980_v42 = vpack.c.bf16 %v5768_v24, %v5768_v24  ;;  %v8369_v24 = vld [vmem:[#allocation4 + $0x7a0] sm:$0xff] }
 0x7b5   :  { %7814 = vmatprep.subr.bf16.mxu0 %v16241_v26  ;;  %7855 = vmatprep.subr.bf16.mxu1 %v16243_v9  ;;  %v7989_v26 = vld [vmem:[#allocation4 + $0x640] sm:$0xff] }
 0x7b6   :  { %v7993_v9 = vld [vmem:[#allocation4 + $0x660] sm:$0xff] }
 0x7b7   :  { %v16260_v58 = vcombine.low %v7989_v26, %v7993_v9 }
 0x7b8   :  { %7815 = vmatpush1.bf16.msra.mxu0 %v16240_v51  ;;  %7856 = vmatpush1.bf16.msra.mxu1 %v16242_v22  ;;  %v16261_v51 = vcombine.high %v7989_v26, %v7993_v9  ;;  %v16263_v22 = vcombine.high %v7990_v63, %v7994_v1  ;;  %v8004_v26 = vld [vmem:[#allocation4 + $0x6b8] sm:$0xff] }
 0x7b9   :  { %7890 = vmatprep.subr.bf16.mxu0 %v16221_v18  ;;  %7931 = vmatprep.subr.bf16.mxu1 %v16223_v19  ;;  %v8001_v18 = vld [vmem:[#allocation4 + $0x6a0] sm:$0xff]  ;;  %v7998_v19 = vld [vmem:[#allocation4 + $0x688] sm:$0xff] }
 0x7ba   :  { %v16269_v27 = vcombine.high %v7997_v4, %v8001_v18  ;;  %v16268_v56 = vcombine.low %v7997_v4, %v8001_v18  ;;  %v8012_v4 = vld [vmem:[#allocation4 + $0x6f8] sm:$0xff] }
 0x7bb   :  { %16248 = vmatmul.mubr.msk.bf16.vlgmr.msra.gmra.mrb[20].mxu0 %vm6013_vm2, %v7612_v52  ;;  %16249 = vmatmul.mubr.msk.bf16.vlgmr.msra.gmra.mrb[20].mxu1 %vm6013_vm2, %v7612_v52 }
 0x7bc   :  { %7891 = vmatpush1.bf16.msra.mxu0 %v16220_v14  ;;  %7932 = vmatpush1.bf16.msra.mxu1 %v16222_v13  ;;  %v16271_v14 = vcombine.high %v7998_v19, %v8002_v41  ;;  %v8005_v13 = vld [vmem:[#allocation4 + $0x6c0] sm:$0xff] }
 0x7bd   :  { %7892 = vmatprep.subr.bf16.mxu0 %v16229_v50  ;;  %7933 = vmatprep.subr.bf16.mxu1 %v16231_v16  ;;  %v8009_v50 = vld [vmem:[#allocation4 + $0x6e0] sm:$0xff]  ;;  %v8006_v16 = vld [vmem:[#allocation4 + $0x6c8] sm:$0xff] }
 0x7be   :  { %7922 = vmatprep.mubr.bf16.mxu0 %v18662_v3  ;;  %7963 = vmatprep.mubr.bf16.mxu1 %v18662_v3  ;;  %v16277_v60 = vcombine.high %v8005_v13, %v8009_v50  ;;  %v16279_v31 = vcombine.high %v8006_v16, %v8010_v37  ;;  %v16276_v8 = vcombine.low %v8005_v13, %v8009_v50  ;;  %v8354_v13 = vld [vmem:[#allocation4 + $0x728] sm:$0xff] }
 0x7bf   :  { %v16278_v10 = vcombine.low %v8006_v16, %v8010_v37 }
 0x7c0   :  { %7893 = vmatpush1.bf16.msra.mxu0 %v16228_v57  ;;  %7934 = vmatpush1.bf16.msra.mxu1 %v16230_v11  ;;  %v7983_v57 = vld [vmem:[#allocation4 + $0x610] sm:$0xff] }
 0x7c1   :  { %7894 = vmatprep.subr.bf16.mxu0 %v16237_v62  ;;  %7935 = vmatprep.subr.bf16.mxu1 %v16239_v59  ;;  %v7987_v11 = vld [vmem:[#allocation4 + $0x630] sm:$0xff]  ;;  %v7984_v62 = vld [vmem:[#allocation4 + $0x618] sm:$0xff] }
 0x7c2   :  { %v7988_v59 = vld [vmem:[#allocation4 + $0x638] sm:$0xff]  ;;  %v16257_v46 = vcombine.high %v7983_v57, %v7987_v11  ;;  %v16256_v15 = vcombine.low %v7983_v57, %v7987_v11  ;;  %v8362_v57 = vld [vmem:[#allocation4 + $0x768] sm:$0xff] }
 0x7c3   :  { %v16258_v33 = vcombine.low %v7984_v62, %v7988_v59 }
 0x7c4   :  { %7895 = vmatpush1.bf16.msra.mxu0 %v16236_v17  ;;  %7936 = vmatpush1.bf16.msra.mxu1 %v16238_v61  ;;  %v16259_v17 = vcombine.high %v7984_v62, %v7988_v59  ;;  %v7991_v61 = vld [vmem:[#allocation4 + $0x650] sm:$0xff] }
 0x7c5   :  { %7896 = vmatprep.subr.bf16.mxu0 %v16245_v7  ;;  %7937 = vmatprep.subr.bf16.mxu1 %v16247_v38  ;;  %v7995_v7 = vld [vmem:[#allocation4 + $0x670] sm:$0xff]  ;;  %v7992_v38 = vld [vmem:[#allocation4 + $0x658] sm:$0xff] }
 0x7c6   :  { %v16264_v9 = vcombine.low %v7991_v61, %v7995_v7  ;;  %v16266_v63 = vcombine.low %v7992_v38, %v7996_v2 }
 0x7c8   :  { %7897 = vmatpush1.bf16.msra.mxu0 %v16244_v44  ;;  %7938 = vmatpush1.bf16.msra.mxu1 %v16246_v35  ;;  %v16265_v44 = vcombine.high %v7991_v61, %v7995_v7  ;;  %v16267_v35 = vcombine.high %v7992_v38, %v7996_v2 }
 0x7c9   :  { %8176 = vmatprep.subr.bf16.mxu0 %v16253_v55  ;;  %8217 = vmatprep.subr.bf16.mxu1 %v16255_v23  ;;  %v7999_v55 = vld [vmem:[#allocation4 + $0x690] sm:$0xff] }
 0x7ca   :  { %v8003_v23 = vld [vmem:[#allocation4 + $0x6b0] sm:$0xff] }
 0x7cb   :  { %16250 = vmatmul.mubr.msk.bf16.vlgmr.msra.gmra.mrb[28].mxu0 %vm6013_vm2, %v7612_v52  ;;  %16251 = vmatmul.mubr.msk.bf16.vlgmr.msra.gmra.mrb[28].mxu1 %vm6013_vm2, %v7612_v52  ;;  %v16270_v52 = vcombine.low %v7998_v19, %v8002_v41  ;;  %v16273_v1 = vcombine.high %v7999_v55, %v8003_v23  ;;  %v16272_v18 = vcombine.low %v7999_v55, %v8003_v23  ;;  %v8374_v55 = vld [vmem:[#allocation4 + $0x7c8] sm:$0xff] }
 0x7cc   :  { %8177 = vmatpush1.bf16.msra.mxu0 %v16252_v39  ;;  %8218 = vmatpush1.bf16.msra.mxu1 %v16254_v54  ;;  %v16275_v39 = vcombine.high %v8000_v40, %v8004_v26  ;;  %v8007_v54 = vld [vmem:[#allocation4 + $0x6d0] sm:$0xff]  ;;  %v16274_v19 = vcombine.low %v8000_v40, %v8004_v26  ;;  %v8378_v23 = vld [vmem:[#allocation4 + $0x7e8] sm:$0xff] }
 0x7cd   :  { %8178 = vmatprep.subr.bf16.mxu0 %v16261_v51  ;;  %8219 = vmatprep.subr.bf16.mxu1 %v16263_v22  ;;  %v8011_v51 = vld [vmem:[#allocation4 + $0x6f0] sm:$0xff]  ;;  %v8008_v22 = vld [vmem:[#allocation4 + $0x6d8] sm:$0xff] }
 0x7ce   :  { %8208 = vmatprep.mubr.bf16.mxu0 %v18662_v3  ;;  %8249 = vmatprep.mubr.bf16.mxu1 %v18662_v3  ;;  %v16281_v41 = vcombine.high %v8007_v54, %v8011_v51  ;;  %v16280_v50 = vcombine.low %v8007_v54, %v8011_v51  ;;  %v16282_v16 = vcombine.low %v8008_v22, %v8012_v4 }
 0x7d0   :  { %8179 = vmatpush1.bf16.msra.mxu0 %v16260_v58  ;;  %8220 = vmatpush1.bf16.msra.mxu1 %v16262_v32  ;;  %v16283_v58 = vcombine.high %v8008_v22, %v8012_v4  ;;  %v8349_v32 = vld [vmem:[#allocation4 + $0x700] sm:$0xff]  ;;  %v16315_v22 = vcombine.high %v8374_v55, %v8378_v23  ;;  %v8351_v4 = vld [vmem:[#allocation4 + $0x710] sm:$0xff] }
 0x7d1   :  { %8180 = vmatprep.subr.bf16.mxu0 %v16269_v27  ;;  %8221 = vmatprep.subr.bf16.mxu1 %v16271_v14  ;;  %v8353_v27 = vld [vmem:[#allocation4 + $0x720] sm:$0xff]  ;;  %v8350_v14 = vld [vmem:[#allocation4 + $0x708] sm:$0xff] }
 0x7d2   :  { %v16289_v37 = vcombine.high %v8349_v32, %v8353_v27  ;;  %v16288_v11 = vcombine.low %v8349_v32, %v8353_v27  ;;  %v16290_v62 = vcombine.low %v8350_v14, %v8354_v13  ;;  %v16314_v32 = vcombine.low %v8374_v55, %v8378_v23 }
 0x7d3   :  { %v5769_v27 = vmax.f32 %v20613_v6, 0.0  ;;  %v8371_v6 = vld [vmem:[#allocation4 + $0x7b0] sm:$0xff] }
 0x7d4   :  { %8181 = vmatpush1.bf16.msra.mxu0 %v16268_v56  ;;  %8222 = vmatpush1.bf16.msra.mxu1 %v16270_v52  ;;  %v16291_v56 = vcombine.high %v8350_v14, %v8354_v13  ;;  %v8357_v52 = vld [vmem:[#allocation4 + $0x740] sm:$0xff] }
 0x7d5   :  { %8182 = vmatprep.subr.bf16.mxu0 %v16277_v60  ;;  %8223 = vmatprep.subr.bf16.mxu1 %v16279_v31  ;;  %v8361_v60 = vld [vmem:[#allocation4 + $0x760] sm:$0xff]  ;;  %v8358_v31 = vld [vmem:[#allocation4 + $0x748] sm:$0xff] }
 0x7d6   :  { %v16297_v59 = vcombine.high %v8357_v52, %v8361_v60  ;;  %v16296_v61 = vcombine.low %v8357_v52, %v8361_v60  ;;  %v16298_v7 = vcombine.low %v8358_v31, %v8362_v57 }
 0x7d8   :  { %8183 = vmatpush1.bf16.msra.mxu0 %v16276_v8  ;;  %8224 = vmatpush1.bf16.msra.mxu1 %v16278_v10  ;;  %v16299_v8 = vcombine.high %v8358_v31, %v8362_v57  ;;  %v8365_v10 = vld [vmem:[#allocation4 + $0x780] sm:$0xff]  ;;  %v20747_v31 = vpack.c.bf16 %v5769_v27, %v5769_v27 }
 0x7d9   :  { %8258 = vmatprep.subr.bf16.mxu0 %v16257_v46  ;;  %8299 = vmatprep.subr.bf16.mxu1 %v16259_v17  ;;  %v8366_v46 = vld [vmem:[#allocation4 + $0x788] sm:$0xff]  ;;  %v16305_v38 = vcombine.high %v8365_v10, %v8369_v24 }
 0x7da   :  { %v8370_v17 = vld [vmem:[#allocation4 + $0x7a8] sm:$0xff] }
 0x7db   :  { %16284 = vmatmul.mubr.msk.bf16.vlgmr.msra.gmra.mrb[32].mxu0 %vm6013_vm2, %v7980_v42  ;;  %16285 = vmatmul.mubr.msk.bf16.vlgmr.msra.gmra.mrb[32].mxu1 %vm6013_vm2, %v7980_v42  ;;  %v16307_v2 = vcombine.high %v8366_v46, %v8370_v17 }
 0x7dc   :  { %8259 = vmatpush1.bf16.msra.mxu0 %v16256_v15  ;;  %8300 = vmatpush1.bf16.msra.mxu1 %v16258_v33  ;;  %v8373_v15 = vld [vmem:[#allocation4 + $0x7c0] sm:$0xff] }
 0x7dd   :  { %8260 = vmatprep.subr.bf16.mxu0 %v16265_v44  ;;  %8301 = vmatprep.subr.bf16.mxu1 %v16267_v35  ;;  %v8377_v35 = vld [vmem:[#allocation4 + $0x7e0] sm:$0xff] }
 0x7de   :  { %8290 = vmatprep.mubr.bf16.mxu0 %v18662_v3  ;;  %8331 = vmatprep.mubr.bf16.mxu1 %v18662_v3  ;;  %v16313_v51 = vcombine.high %v8373_v15, %v8377_v35 }
 0x7e0   :  { %8261 = vmatpush1.bf16.msra.mxu0 %v16264_v9  ;;  %8302 = vmatpush1.bf16.msra.mxu1 %v16266_v63  ;;  %v16304_v63 = vcombine.low %v8365_v10, %v8369_v24 }
 0x7e1   :  { %8262 = vmatprep.subr.bf16.mxu0 %v16273_v1  ;;  %8303 = vmatprep.subr.bf16.mxu1 %v16275_v39  ;;  %v16306_v1 = vcombine.low %v8366_v46, %v8370_v17 }
 0x7e4   :  { %8263 = vmatpush1.bf16.msra.mxu0 %v16272_v18  ;;  %8304 = vmatpush1.bf16.msra.mxu1 %v16274_v19  ;;  %v8355_v18 = vld [vmem:[#allocation4 + $0x730] sm:$0xff]  ;;  %v8352_v19 = vld [vmem:[#allocation4 + $0x718] sm:$0xff] }
 0x7e5   :  { %8264 = vmatprep.subr.bf16.mxu0 %v16281_v41  ;;  %8305 = vmatprep.subr.bf16.mxu1 %v16283_v58  ;;  %v8356_v41 = vld [vmem:[#allocation4 + $0x738] sm:$0xff]  ;;  %v16312_v58 = vcombine.low %v8373_v15, %v8377_v35  ;;  %v16293_v14 = vcombine.high %v8351_v4, %v8355_v18  ;;  %v16292_v52 = vcombine.low %v8351_v4, %v8355_v18  ;;  %v8717_v4 = vld [vmem:[#allocation4 + $0x800] sm:$0xff] }
 0x7e6   :  { %v16295_v13 = vcombine.high %v8352_v19, %v8356_v41  ;;  %v16294_v60 = vcombine.low %v8352_v19, %v8356_v41  ;;  %v8376_v15 = vld [vmem:[#allocation4 + $0x7d8] sm:$0xff]  ;;  %v8721_v18 = vld [vmem:[#allocation4 + $0x820] sm:$0xff]  ;;  %v8718_v19 = vld [vmem:[#allocation4 + $0x808] sm:$0xff] }
 0x7e7   :  { %v8380_v35 = vld [vmem:[#allocation4 + $0x7f8] sm:$0xff]  ;;  %v8722_v41 = vld [vmem:[#allocation4 + $0x828] sm:$0xff]  ;;  %v16325_v27 = vcombine.high %v8717_v4, %v8721_v18 }
 0x7e8   :  { %8265 = vmatpush1.bf16.msra.mxu0 %v16280_v50  ;;  %8306 = vmatpush1.bf16.msra.mxu1 %v16282_v16  ;;  %v8359_v50 = vld [vmem:[#allocation4 + $0x750] sm:$0xff] }
 0x7e9   :  { %8544 = vmatprep.subr.bf16.mxu0 %v16289_v37  ;;  %8585 = vmatprep.subr.bf16.mxu1 %v16291_v56  ;;  %v8363_v16 = vld [vmem:[#allocation4 + $0x770] sm:$0xff]  ;;  %v8360_v37 = vld [vmem:[#allocation4 + $0x758] sm:$0xff] }
 0x7ea   :  { %v8364_v56 = vld [vmem:[#allocation4 + $0x778] sm:$0xff]  ;;  %v16301_v57 = vcombine.high %v8359_v50, %v8363_v16  ;;  %v16300_v10 = vcombine.low %v8359_v50, %v8363_v16  ;;  %v8729_v50 = vld [vmem:[#allocation4 + $0x860] sm:$0xff]  ;;  %v8726_v16 = vld [vmem:[#allocation4 + $0x848] sm:$0xff] }
 0x7eb   :  { %16286 = vmatmul.mubr.msk.bf16.vlgmr.msra.gmra.mrb[36].mxu0 %vm6013_vm2, %v7980_v42  ;;  %16287 = vmatmul.mubr.msk.bf16.vlgmr.msra.gmra.mrb[36].mxu1 %vm6013_vm2, %v7980_v42  ;;  %v16302_v24 = vcombine.low %v8360_v37, %v8364_v56 }
 0x7ec   :  { %8545 = vmatpush1.bf16.msra.mxu0 %v16288_v11  ;;  %8586 = vmatpush1.bf16.msra.mxu1 %v16290_v62  ;;  %v16303_v11 = vcombine.high %v8360_v37, %v8364_v56  ;;  %v8367_v62 = vld [vmem:[#allocation4 + $0x790] sm:$0xff]  ;;  %v8730_v37 = vld [vmem:[#allocation4 + $0x868] sm:$0xff]  ;;  %v16324_v56 = vcombine.low %v8717_v4, %v8721_v18 }
 0x7ed   :  { %8546 = vmatprep.subr.bf16.mxu0 %v16297_v59  ;;  %8587 = vmatprep.subr.bf16.mxu1 %v16299_v8  ;;  %v8368_v59 = vld [vmem:[#allocation4 + $0x798] sm:$0xff]  ;;  %v16309_v46 = vcombine.high %v8367_v62, %v8371_v6 }
 0x7ee   :  { %v20736_v33 = vpop.f32.mrb[228].mxu0  ;;  %v20738_v44 = vpop.f32.mrb[228].mxu1  ;;  %8576 = vmatprep.mubr.bf16.mxu0 %v18662_v3  ;;  %8617 = vmatprep.mubr.bf16.mxu1 %v18662_v3  ;;  %v8372_v8 = vld [vmem:[#allocation4 + $0x7b8] sm:$0xff] }
 0x7ef   :  { %v20742_v42 = vpop.f32.mrb[229].mxu0  ;;  %v20744_v40 = vpop.f32.mrb[229].mxu1  ;;  %v16311_v17 = vcombine.high %v8368_v59, %v8372_v8 }
 0x7f0   :  { %8547 = vmatpush1.bf16.msra.mxu0 %v16296_v61  ;;  %8588 = vmatpush1.bf16.msra.mxu1 %v16298_v7  ;;  %v6055_v26 = vpop.f32.mrb[230].mxu0  ;;  %v6096_v9 = vpop.f32.mrb[230].mxu1  ;;  %v8375_v61 = vld [vmem:[#allocation4 + $0x7d0] sm:$0xff] }
 0x7f1   :  { %v6056_v39 = vpop.f32.mrb[231].mxu0  ;;  %v6097_v54 = vpop.f32.mrb[231].mxu1  ;;  %8548 = vmatprep.subr.bf16.mxu0 %v16305_v38  ;;  %8589 = vmatprep.subr.bf16.mxu1 %v16307_v2  ;;  %v8379_v2 = vld [vmem:[#allocation4 + $0x7f0] sm:$0xff] }
 0x7f4   :  { %8549 = vmatpush1.bf16.msra.mxu0 %v16304_v63  ;;  %8590 = vmatpush1.bf16.msra.mxu1 %v16306_v1  ;;  %v16308_v63 = vcombine.low %v8367_v62, %v8371_v6  ;;  %v16310_v1 = vcombine.low %v8368_v59, %v8372_v8  ;;  %v8737_v62 = vld [vmem:[#allocation4 + $0x8a0] sm:$0xff]  ;;  %v8734_v6 = vld [vmem:[#allocation4 + $0x888] sm:$0xff] }
 0x7f5   :  { %8550 = vmatprep.subr.bf16.mxu0 %v16313_v51  ;;  %8591 = vmatprep.subr.bf16.mxu1 %v16315_v22  ;;  %v16317_v51 = vcombine.high %v8375_v61, %v8379_v2  ;;  %v16319_v22 = vcombine.high %v8376_v15, %v8380_v35  ;;  %v8738_v59 = vld [vmem:[#allocation4 + $0x8a8] sm:$0xff] }
 0x7f6   :  { %v16342_v18 = vcombine.low %v8734_v6, %v8738_v59 }
 0x7f8   :  { %8551 = vmatpush1.bf16.msra.mxu0 %v16312_v58  ;;  %8592 = vmatpush1.bf16.msra.mxu1 %v16314_v32  ;;  %v16316_v58 = vcombine.low %v8375_v61, %v8379_v2  ;;  %v16318_v32 = vcombine.low %v8376_v15, %v8380_v35  ;;  %v8745_v15 = vld [vmem:[#allocation4 + $0x8e0] sm:$0xff]  ;;  %v8742_v35 = vld [vmem:[#allocation4 + $0x8c8] sm:$0xff] }
 0x7f9   :  { %8626 = vmatprep.subr.bf16.mxu0 %v16293_v14  ;;  %8667 = vmatprep.subr.bf16.mxu1 %v16295_v13  ;;  %v16327_v14 = vcombine.high %v8718_v19, %v8722_v41  ;;  %v8725_v13 = vld [vmem:[#allocation4 + $0x840] sm:$0xff] }
 0x7fa   :  { %v16332_v8 = vcombine.low %v8725_v13, %v8729_v50 }
 0x7fb   :  { %16320 = vmatmul.mubr.msk.bf16.vlgmr.msra.gmra.mrb[40].mxu0 %vm6013_vm2, %v20747_v31  ;;  %16321 = vmatmul.mubr.msk.bf16.vlgmr.msra.gmra.mrb[40].mxu1 %vm6013_vm2, %v20747_v31 }
 0x7fc   :  { %8627 = vmatpush1.bf16.msra.mxu0 %v16292_v52  ;;  %8668 = vmatpush1.bf16.msra.mxu1 %v16294_v60  ;;  %v16326_v52 = vcombine.low %v8718_v19, %v8722_v41  ;;  %v16333_v60 = vcombine.high %v8725_v13, %v8729_v50  ;;  %v5770_v13 = vmax.f32 %v20617_v47, 0.0  ;;  %v8739_v47 = vld [vmem:[#allocation4 + $0x8b0] sm:$0xff] }
 0x7fd   :  { %8628 = vmatprep.subr.bf16.mxu0 %v16301_v57  ;;  %8669 = vmatprep.subr.bf16.mxu1 %v16303_v11  ;;  %v16335_v57 = vcombine.high %v8726_v16, %v8730_v37  ;;  %v8733_v11 = vld [vmem:[#allocation4 + $0x880] sm:$0xff] }
 0x7fe   :  { %v20753_v7 = vpop.f32.mrb[232].mxu0  ;;  %v20755_v38 = vpop.f32.mrb[232].mxu1  ;;  %8658 = vmatprep.mubr.bf16.mxu0 %v18662_v3  ;;  %8699 = vmatprep.mubr.bf16.mxu1 %v18662_v3 }
 0x7ff   :  { %v20759_v55 = vpop.f32.mrb[233].mxu0  ;;  %v20761_v23 = vpop.f32.mrb[233].mxu1 }
 0x800   :  { %v6137_v26 = vpop.f32.mrb[234].mxu0  ;;  %v6178_v9 = vpop.f32.mrb[234].mxu1  ;;  %8629 = vmatpush1.bf16.msra.mxu0 %v16300_v10  ;;  %8670 = vmatpush1.bf16.msra.mxu1 %v16302_v24  ;;  %v16334_v10 = vcombine.low %v8726_v16, %v8730_v37  ;;  %v16341_v24 = vcombine.high %v8733_v11, %v8737_v62  ;;  %v8727_v37 = vld [vmem:[#allocation4 + $0x850] sm:$0xff] }
 0x801   :  { %v6138_v39 = vpop.f32.mrb[235].mxu0  ;;  %v6179_v54 = vpop.f32.mrb[235].mxu1  ;;  %8630 = vmatprep.subr.bf16.mxu0 %v16309_v46  ;;  %8671 = vmatprep.subr.bf16.mxu1 %v16311_v17  ;;  %v16343_v46 = vcombine.high %v8734_v6, %v8738_v59  ;;  %v8741_v17 = vld [vmem:[#allocation4 + $0x8c0] sm:$0xff]  ;;  %v8746_v26 = vld [vmem:[#allocation4 + $0x8e8] sm:$0xff] }
 0x802   :  { %v16340_v39 = vcombine.low %v8733_v11, %v8737_v62  ;;  %v16351_v41 = vcombine.high %v8742_v35, %v8746_v26  ;;  %v20782_v62 = vpack.c.bf16 %v5770_v13, %v5770_v13  ;;  %v9089_v13 = vld [vmem:[#allocation4 + $0x920] sm:$0xff] }
 0x804   :  { %8631 = vmatpush1.bf16.msra.mxu0 %v16308_v63  ;;  %8672 = vmatpush1.bf16.msra.mxu1 %v16310_v1 }
 0x805   :  { %8632 = vmatprep.subr.bf16.mxu0 %v16317_v51  ;;  %8673 = vmatprep.subr.bf16.mxu1 %v16319_v22 }
 0x808   :  { %8633 = vmatpush1.bf16.msra.mxu0 %v16316_v58  ;;  %8674 = vmatpush1.bf16.msra.mxu1 %v16318_v32  ;;  %v8719_v58 = vld [vmem:[#allocation4 + $0x810] sm:$0xff] }
 0x809   :  { %8912 = vmatprep.subr.bf16.mxu0 %v16325_v27  ;;  %8953 = vmatprep.subr.bf16.mxu1 %v16327_v14  ;;  %v8723_v32 = vld [vmem:[#allocation4 + $0x830] sm:$0xff]  ;;  %v8720_v27 = vld [vmem:[#allocation4 + $0x818] sm:$0xff] }
 0x80a   :  { %v8724_v14 = vld [vmem:[#allocation4 + $0x838] sm:$0xff]  ;;  %v16329_v50 = vcombine.high %v8719_v58, %v8723_v32 }
 0x80b   :  { %16322 = vmatmul.mubr.msk.bf16.vlgmr.msra.gmra.mrb[44].mxu0 %vm6013_vm2, %v20747_v31  ;;  %16323 = vmatmul.mubr.msk.bf16.vlgmr.msra.gmra.mrb[44].mxu1 %vm6013_vm2, %v20747_v31  ;;  %v16331_v16 = vcombine.high %v8720_v27, %v8724_v14  ;;  %v16330_v11 = vcombine.low %v8720_v27, %v8724_v14 }
 0x80c   :  { %8913 = vmatpush1.bf16.msra.mxu0 %v16324_v56  ;;  %8954 = vmatpush1.bf16.msra.mxu1 %v16326_v52  ;;  %v8731_v56 = vld [vmem:[#allocation4 + $0x870] sm:$0xff]  ;;  %v8728_v52 = vld [vmem:[#allocation4 + $0x858] sm:$0xff] }
 0x80d   :  { %8914 = vmatprep.subr.bf16.mxu0 %v16333_v60  ;;  %8955 = vmatprep.subr.bf16.mxu1 %v16335_v57  ;;  %v8732_v60 = vld [vmem:[#allocation4 + $0x878] sm:$0xff]  ;;  %v16328_v57 = vcombine.low %v8719_v58, %v8723_v32  ;;  %v16337_v6 = vcombine.high %v8727_v37, %v8731_v56 }
 0x80e   :  { %v6378_v61 = vpop.f32.mrb[236].mxu0  ;;  %v6419_v2 = vpop.f32.mrb[236].mxu1  ;;  %8944 = vmatprep.mubr.bf16.mxu0 %v18662_v3  ;;  %8985 = vmatprep.mubr.bf16.mxu1 %v18662_v3  ;;  %v16339_v59 = vcombine.high %v8728_v52, %v8732_v60 }
 0x80f   :  { %v20770_v31 = vadd.f32 %v6378_v61, %v20736_v33  ;;  %v20773_v9 = vadd.f32 %v6419_v2, %v20738_v44  ;;  %v6380_v63 = vpop.f32.mrb[237].mxu0  ;;  %v6421_v1 = vpop.f32.mrb[237].mxu1  ;;  %v16349_v44 = vcombine.high %v8741_v17, %v8745_v15 }
 0x810   :  { %v20776_v54 = vadd.f32 %v6380_v63, %v20742_v42  ;;  %v20779_v51 = vadd.f32 %v6421_v1, %v20744_v40  ;;  %v6382_v22 = vpop.f32.mrb[238].mxu0  ;;  %v6423_v4 = vpop.f32.mrb[238].mxu1  ;;  %8915 = vmatpush1.bf16.msra.mxu0 %v16332_v8  ;;  %8956 = vmatpush1.bf16.msra.mxu1 %v16334_v10  ;;  %v16348_v42 = vcombine.low %v8741_v17, %v8745_v15  ;;  %v8735_v8 = vld [vmem:[#allocation4 + $0x890] sm:$0xff]  ;;  %v8736_v10 = vld [vmem:[#allocation4 + $0x898] sm:$0xff] }
 0x811   :  { %v6383_v19 = vpop.f32.mrb[239].mxu0  ;;  %v6424_v33 = vpop.f32.mrb[239].mxu1  ;;  %8916 = vmatprep.subr.bf16.mxu0 %v16341_v24  ;;  %8957 = vmatprep.subr.bf16.mxu1 %v16343_v46  ;;  %v16350_v40 = vcombine.low %v8742_v35, %v8746_v26  ;;  %v8740_v24 = vld [vmem:[#allocation4 + $0x8b8] sm:$0xff]  ;;  %v16336_v46 = vcombine.low %v8727_v37, %v8731_v56  ;;  %v16338_v17 = vcombine.low %v8728_v52, %v8732_v60  ;;  %v8743_v15 = vld [vmem:[#allocation4 + $0x8d0] sm:$0xff]  ;;  %v9093_v52 = vld [vmem:[#allocation4 + $0x940] sm:$0xff] }
 0x812   :  { %v16345_v61 = vcombine.high %v8735_v8, %v8739_v47  ;;  %v16347_v2 = vcombine.high %v8736_v10, %v8740_v24  ;;  %v8747_v63 = vld [vmem:[#allocation4 + $0x8f0] sm:$0xff]  ;;  %v8744_v1 = vld [vmem:[#allocation4 + $0x8d8] sm:$0xff]  ;;  %v16344_v33 = vcombine.low %v8735_v8, %v8739_v47  ;;  %v16346_v27 = vcombine.low %v8736_v10, %v8740_v24  ;;  %v9097_v60 = vld [vmem:[#allocation4 + $0x960] sm:$0xff] }
 0x813   :  { %v16369_v8 = vcombine.high %v9093_v52, %v9097_v60  ;;  %v9101_v10 = vld [vmem:[#allocation4 + $0x980] sm:$0xff] }
 0x814   :  { %8917 = vmatpush1.bf16.msra.mxu0 %v16340_v39  ;;  %8958 = vmatpush1.bf16.msra.mxu1 %v16342_v18  ;;  %v8748_v39 = vld [vmem:[#allocation4 + $0x8f8] sm:$0xff]  ;;  %v9105_v24 = vld [vmem:[#allocation4 + $0x9a0] sm:$0xff] }
 0x815   :  { %8918 = vmatprep.subr.bf16.mxu0 %v16349_v44  ;;  %8959 = vmatprep.subr.bf16.mxu1 %v16351_v41 }
 0x818   :  { %8919 = vmatpush1.bf16.msra.mxu0 %v16348_v42  ;;  %8960 = vmatpush1.bf16.msra.mxu1 %v16350_v40  ;;  %v16355_v42 = vcombine.high %v8744_v1, %v8748_v39  ;;  %v9085_v40 = vld [vmem:[#allocation4 + $0x900] sm:$0xff] }
 0x819   :  { %8994 = vmatprep.subr.bf16.mxu0 %v16329_v50  ;;  %9035 = vmatprep.subr.bf16.mxu1 %v16331_v16  ;;  %v9086_v50 = vld [vmem:[#allocation4 + $0x908] sm:$0xff]  ;;  %v16361_v37 = vcombine.high %v9085_v40, %v9089_v13 }
 0x81a   :  { %v9090_v16 = vld [vmem:[#allocation4 + $0x928] sm:$0xff] }
 0x81b   :  { %16356 = vmatmul.mubr.msk.bf16.vlgmr.msra.gmra.mrb[48].mxu0 %vm6013_vm2, %v20782_v62  ;;  %16357 = vmatmul.mubr.msk.bf16.vlgmr.msra.gmra.mrb[48].mxu1 %vm6013_vm2, %v20782_v62  ;;  %v16363_v56 = vcombine.high %v9086_v50, %v9090_v16 }
 0x81c   :  { %8995 = vmatpush1.bf16.msra.mxu0 %v16328_v57  ;;  %9036 = vmatpush1.bf16.msra.mxu1 %v16330_v11  ;;  %v9094_v57 = vld [vmem:[#allocation4 + $0x948] sm:$0xff] }
 0x81d   :  { %8996 = vmatprep.subr.bf16.mxu0 %v16337_v6  ;;  %9037 = vmatprep.subr.bf16.mxu1 %v16339_v59  ;;  %v9098_v11 = vld [vmem:[#allocation4 + $0x968] sm:$0xff]  ;;  %v16360_v6 = vcombine.low %v9085_v40, %v9089_v13  ;;  %v16362_v59 = vcombine.low %v9086_v50, %v9090_v16  ;;  %v9087_v16 = vld [vmem:[#allocation4 + $0x910] sm:$0xff] }
 0x81e   :  { %v6460_v35 = vpop.f32.mrb[240].mxu0  ;;  %v6501_v26 = vpop.f32.mrb[240].mxu1  ;;  %9026 = vmatprep.mubr.bf16.mxu0 %v18662_v3  ;;  %9067 = vmatprep.mubr.bf16.mxu1 %v18662_v3  ;;  %v16371_v47 = vcombine.high %v9094_v57, %v9098_v11 }
 0x81f   :  { %v20791_v22 = vadd.f32 %v6460_v35, %v20753_v7  ;;  %v20794_v4 = vadd.f32 %v6501_v26, %v20755_v38  ;;  %v6462_v18 = vpop.f32.mrb[241].mxu0  ;;  %v6503_v19 = vpop.f32.mrb[241].mxu1  ;;  %v16353_v38 = vcombine.high %v8743_v15, %v8747_v63  ;;  %v9109_v26 = vld [vmem:[#allocation4 + $0x9c0] sm:$0xff] }
 0x820   :  { %v20797_v44 = vadd.f32 %v6462_v18, %v20759_v55  ;;  %v20800_v41 = vadd.f32 %v6503_v19, %v20761_v23  ;;  %v6464_v58 = vpop.f32.mrb[242].mxu0  ;;  %v6505_v32 = vpop.f32.mrb[242].mxu1  ;;  %8997 = vmatpush1.bf16.msra.mxu0 %v16336_v46  ;;  %9038 = vmatpush1.bf16.msra.mxu1 %v16338_v17  ;;  %v16352_v55 = vcombine.low %v8743_v15, %v8747_v63  ;;  %v9102_v46 = vld [vmem:[#allocation4 + $0x988] sm:$0xff] }
 0x821   :  { %v6465_v14 = vpop.f32.mrb[243].mxu0  ;;  %v6506_v7 = vpop.f32.mrb[243].mxu1  ;;  %8998 = vmatprep.subr.bf16.mxu0 %v16345_v61  ;;  %9039 = vmatprep.subr.bf16.mxu1 %v16347_v2  ;;  %v16354_v23 = vcombine.low %v8744_v1, %v8748_v39  ;;  %v9106_v17 = vld [vmem:[#allocation4 + $0x9a8] sm:$0xff]  ;;  %v16368_v61 = vcombine.low %v9093_v52, %v9097_v60  ;;  %v16370_v2 = vcombine.low %v9094_v57, %v9098_v11  ;;  %v9113_v39 = vld [vmem:[#allocation4 + $0x9e0] sm:$0xff]  ;;  %v9095_v57 = vld [vmem:[#allocation4 + $0x950] sm:$0xff] }
 0x822   :  { %v16377_v15 = vcombine.high %v9101_v10, %v9105_v24  ;;  %v16379_v35 = vcombine.high %v9102_v46, %v9106_v17  ;;  %v9110_v18 = vld [vmem:[#allocation4 + $0x9c8] sm:$0xff]  ;;  %v16378_v40 = vcombine.low %v9102_v46, %v9106_v17  ;;  %v9099_v11 = vld [vmem:[#allocation4 + $0x970] sm:$0xff] }
 0x823   :  { %v9114_v19 = vld [vmem:[#allocation4 + $0x9e8] sm:$0xff]  ;;  %v9103_v17 = vld [vmem:[#allocation4 + $0x990] sm:$0xff] }
 0x824   :  { %8999 = vmatpush1.bf16.msra.mxu0 %v16344_v33  ;;  %9040 = vmatpush1.bf16.msra.mxu1 %v16346_v27  ;;  %v16376_v27 = vcombine.low %v9101_v10, %v9105_v24  ;;  %v16387_v50 = vcombine.high %v9110_v18, %v9114_v19  ;;  %v16373_v24 = vcombine.high %v9095_v57, %v9099_v11 }
 0x825   :  { %9000 = vmatprep.subr.bf16.mxu0 %v16353_v38  ;;  %9041 = vmatprep.subr.bf16.mxu1 %v16355_v42 }
 0x828   :  { %9001 = vmatpush1.bf16.msra.mxu0 %v16352_v55  ;;  %9042 = vmatpush1.bf16.msra.mxu1 %v16354_v23  ;;  %v9091_v55 = vld [vmem:[#allocation4 + $0x930] sm:$0xff]  ;;  %v9088_v23 = vld [vmem:[#allocation4 + $0x918] sm:$0xff] }
 0x829   :  { %9280 = vmatprep.subr.bf16.mxu0 %v16361_v37  ;;  %9321 = vmatprep.subr.bf16.mxu1 %v16363_v56  ;;  %v9092_v37 = vld [vmem:[#allocation4 + $0x938] sm:$0xff]  ;;  %v5771_v56 = vmax.f32 %v20610_v21, 0.0  ;;  %v16365_v52 = vcombine.high %v9087_v16, %v9091_v55  ;;  %v9107_v21 = vld [vmem:[#allocation4 + $0x9b0] sm:$0xff] }
 0x82a   :  { %v16367_v60 = vcombine.high %v9088_v23, %v9092_v37 }
 0x82b   :  { %16358 = vmatmul.mubr.msk.bf16.vlgmr.msra.gmra.mrb[52].mxu0 %vm6013_vm2, %v20782_v62  ;;  %16359 = vmatmul.mubr.msk.bf16.vlgmr.msra.gmra.mrb[52].mxu1 %vm6013_vm2, %v20782_v62  ;;  %v20821_v10 = vpack.c.bf16 %v5771_v56, %v5771_v56  ;;  %v9454_v56 = vld [vmem:[#allocation4 + $0xa08] sm:$0xff] }
 0x82c   :  { %9281 = vmatpush1.bf16.msra.mxu0 %v16360_v6  ;;  %9322 = vmatpush1.bf16.msra.mxu1 %v16362_v59  ;;  %v9096_v6 = vld [vmem:[#allocation4 + $0x958] sm:$0xff] }
 0x82d   :  { %9282 = vmatprep.subr.bf16.mxu0 %v16369_v8  ;;  %9323 = vmatprep.subr.bf16.mxu1 %v16371_v47  ;;  %v9100_v59 = vld [vmem:[#allocation4 + $0x978] sm:$0xff]  ;;  %v16364_v8 = vcombine.low %v9087_v16, %v9091_v55  ;;  %v16366_v47 = vcombine.low %v9088_v23, %v9092_v37 }
 0x82e   :  { %v6738_v63 = vpop.f32.mrb[244].mxu0  ;;  %v6779_v1 = vpop.f32.mrb[244].mxu1  ;;  %9312 = vmatprep.mubr.bf16.mxu0 %v18662_v3  ;;  %9353 = vmatprep.mubr.bf16.mxu1 %v18662_v3  ;;  %v16375_v46 = vcombine.high %v9096_v6, %v9100_v59 }
 0x82f   :  { %v20809_v62 = vadd.f32 %v6738_v63, %v20770_v31  ;;  %v20812_v33 = vadd.f32 %v6779_v1, %v20773_v9  ;;  %v6740_v58 = vpop.f32.mrb[245].mxu0  ;;  %v6781_v32 = vpop.f32.mrb[245].mxu1  ;;  %v16385_v9 = vcombine.high %v9109_v26, %v9113_v39  ;;  %v9111_v1 = vld [vmem:[#allocation4 + $0x9d0] sm:$0xff] }
 0x830   :  { %v20815_v14 = vadd.f32 %v6740_v58, %v20776_v54  ;;  %v20818_v7 = vadd.f32 %v6781_v32, %v20779_v51  ;;  %v6742_v38 = vpop.f32.mrb[246].mxu0  ;;  %v6783_v42 = vpop.f32.mrb[246].mxu1  ;;  %9283 = vmatpush1.bf16.msra.mxu0 %v16368_v61  ;;  %9324 = vmatpush1.bf16.msra.mxu1 %v16370_v2  ;;  %v16384_v54 = vcombine.low %v9109_v26, %v9113_v39  ;;  %v9104_v61 = vld [vmem:[#allocation4 + $0x998] sm:$0xff] }
 0x831   :  { %v6743_v13 = vpop.f32.mrb[247].mxu0  ;;  %v6784_v31 = vpop.f32.mrb[247].mxu1  ;;  %9284 = vmatprep.subr.bf16.mxu0 %v16377_v15  ;;  %9325 = vmatprep.subr.bf16.mxu1 %v16379_v35  ;;  %v16386_v51 = vcombine.low %v9110_v18, %v9114_v19  ;;  %v9108_v2 = vld [vmem:[#allocation4 + $0x9b8] sm:$0xff]  ;;  %v16372_v15 = vcombine.low %v9095_v57, %v9099_v11  ;;  %v16374_v35 = vcombine.low %v9096_v6, %v9100_v59  ;;  %v9115_v19 = vld [vmem:[#allocation4 + $0x9f0] sm:$0xff]  ;;  %v9461_v11 = vld [vmem:[#allocation4 + $0xa40] sm:$0xff] }
 0x832   :  { %v16381_v26 = vcombine.high %v9103_v17, %v9107_v21  ;;  %v16383_v63 = vcombine.high %v9104_v61, %v9108_v2  ;;  %v9112_v58 = vld [vmem:[#allocation4 + $0x9d8] sm:$0xff]  ;;  %v16380_v13 = vcombine.low %v9103_v17, %v9107_v21  ;;  %v16382_v55 = vcombine.low %v9104_v61, %v9108_v2  ;;  %v9465_v6 = vld [vmem:[#allocation4 + $0xa60] sm:$0xff]  ;;  %v9462_v59 = vld [vmem:[#allocation4 + $0xa48] sm:$0xff] }
 0x833   :  { %v9116_v32 = vld [vmem:[#allocation4 + $0x9f8] sm:$0xff]  ;;  %v9469_v21 = vld [vmem:[#allocation4 + $0xa80] sm:$0xff]  ;;  %v9470_v2 = vld [vmem:[#allocation4 + $0xa88] sm:$0xff] }
 0x834   :  { %9285 = vmatpush1.bf16.msra.mxu0 %v16376_v27  ;;  %9326 = vmatpush1.bf16.msra.mxu1 %v16378_v40  ;;  %v16391_v37 = vcombine.high %v9112_v58, %v9116_v32  ;;  %v9473_v61 = vld [vmem:[#allocation4 + $0xaa0] sm:$0xff] }
 0x835   :  { %9286 = vmatprep.subr.bf16.mxu0 %v16385_v9  ;;  %9327 = vmatprep.subr.bf16.mxu1 %v16387_v50 }
 0x838   :  { %9287 = vmatpush1.bf16.msra.mxu0 %v16384_v54  ;;  %9328 = vmatpush1.bf16.msra.mxu1 %v16386_v51  ;;  %v9453_v54 = vld [vmem:[#allocation4 + $0xa00] sm:$0xff] }
 0x839   :  { %9362 = vmatprep.subr.bf16.mxu0 %v16365_v52  ;;  %9403 = vmatprep.subr.bf16.mxu1 %v16367_v60  ;;  %v9457_v51 = vld [vmem:[#allocation4 + $0xa20] sm:$0xff]  ;;  %v9458_v52 = vld [vmem:[#allocation4 + $0xa28] sm:$0xff] }
 0x83a   :  { %v16397_v60 = vcombine.high %v9453_v54, %v9457_v51  ;;  %v16399_v57 = vcombine.high %v9454_v56, %v9458_v52 }
 0x83b   :  { %16392 = vmatmul.mubr.msk.bf16.vlgmr.msra.gmra.mrb[56].mxu0 %vm6013_vm2, %v20821_v10  ;;  %16393 = vmatmul.mubr.msk.bf16.vlgmr.msra.gmra.mrb[56].mxu1 %vm6013_vm2, %v20821_v10 }
 0x83c   :  { %9363 = vmatpush1.bf16.msra.mxu0 %v16364_v8  ;;  %9404 = vmatpush1.bf16.msra.mxu1 %v16366_v47  ;;  %v9466_v8 = vld [vmem:[#allocation4 + $0xa68] sm:$0xff]  ;;  %v16396_v47 = vcombine.low %v9453_v54, %v9457_v51 }
 0x83d   :  { %9364 = vmatprep.subr.bf16.mxu0 %v16373_v24  ;;  %9405 = vmatprep.subr.bf16.mxu1 %v16375_v46  ;;  %v16398_v24 = vcombine.low %v9454_v56, %v9458_v52  ;;  %v16405_v46 = vcombine.high %v9461_v11, %v9465_v6  ;;  %v16407_v17 = vcombine.high %v9462_v59, %v9466_v8  ;;  %v9455_v56 = vld [vmem:[#allocation4 + $0xa10] sm:$0xff] }
 0x83e   :  { %v6820_v39 = vpop.f32.mrb[248].mxu0  ;;  %v6861_v18 = vpop.f32.mrb[248].mxu1  ;;  %9394 = vmatprep.mubr.bf16.mxu0 %v18662_v3  ;;  %9435 = vmatprep.mubr.bf16.mxu1 %v18662_v3  ;;  %v9459_v52 = vld [vmem:[#allocation4 + $0xa30] sm:$0xff] }
 0x83f   :  { %v20830_v27 = vadd.f32 %v6820_v39, %v20791_v22  ;;  %v20833_v38 = vadd.f32 %v6861_v18, %v20794_v4  ;;  %v6822_v42 = vpop.f32.mrb[249].mxu0  ;;  %v6863_v40 = vpop.f32.mrb[249].mxu1  ;;  %v16389_v4 = vcombine.high %v9111_v1, %v9115_v19  ;;  %v9477_v39 = vld [vmem:[#allocation4 + $0xac0] sm:$0xff] }
 0x840   :  { %v20836_v31 = vadd.f32 %v6822_v42, %v20797_v44  ;;  %v20839_v9 = vadd.f32 %v6863_v40, %v20800_v41  ;;  %v6824_v50 = vpop.f32.mrb[250].mxu0  ;;  %v6865_v16 = vpop.f32.mrb[250].mxu1  ;;  %9365 = vmatpush1.bf16.msra.mxu0 %v16372_v15  ;;  %9406 = vmatpush1.bf16.msra.mxu1 %v16374_v35  ;;  %v16388_v44 = vcombine.low %v9111_v1, %v9115_v19  ;;  %v9474_v15 = vld [vmem:[#allocation4 + $0xaa8] sm:$0xff] }
 0x841   :  { %v6825_v23 = vpop.f32.mrb[251].mxu0  ;;  %v6866_v22 = vpop.f32.mrb[251].mxu1  ;;  %9366 = vmatprep.subr.bf16.mxu0 %v16381_v26  ;;  %9407 = vmatprep.subr.bf16.mxu1 %v16383_v63  ;;  %v16390_v41 = vcombine.low %v9112_v58, %v9116_v32  ;;  %v16404_v35 = vcombine.low %v9461_v11, %v9465_v6  ;;  %v16406_v26 = vcombine.low %v9462_v59, %v9466_v8  ;;  %v9481_v58 = vld [vmem:[#allocation4 + $0xae0] sm:$0xff]  ;;  %v9478_v32 = vld [vmem:[#allocation4 + $0xac8] sm:$0xff]  ;;  %v9463_v6 = vld [vmem:[#allocation4 + $0xa50] sm:$0xff] }
 0x842   :  { %v16413_v63 = vcombine.high %v9469_v21, %v9473_v61  ;;  %v16415_v1 = vcombine.high %v9470_v2, %v9474_v15  ;;  %v9482_v42 = vld [vmem:[#allocation4 + $0xae8] sm:$0xff]  ;;  %v16412_v16 = vcombine.low %v9469_v21, %v9473_v61  ;;  %v9467_v59 = vld [vmem:[#allocation4 + $0xa70] sm:$0xff]  ;;  %v9464_v8 = vld [vmem:[#allocation4 + $0xa58] sm:$0xff] }
 0x843   :  { %v16423_v51 = vcombine.high %v9478_v32, %v9482_v42  ;;  %v16409_v21 = vcombine.high %v9463_v6, %v9467_v59 }
 0x844   :  { %9367 = vmatpush1.bf16.msra.mxu0 %v16380_v13  ;;  %9408 = vmatpush1.bf16.msra.mxu1 %v16382_v55 }
 0x845   :  { %9368 = vmatprep.subr.bf16.mxu0 %v16389_v4  ;;  %9409 = vmatprep.subr.bf16.mxu1 %v16391_v37  ;;  %v16414_v37 = vcombine.low %v9470_v2, %v9474_v15  ;;  %v9471_v2 = vld [vmem:[#allocation4 + $0xa90] sm:$0xff]  ;;  %v9472_v15 = vld [vmem:[#allocation4 + $0xa98] sm:$0xff] }
 0x848   :  { %9369 = vmatpush1.bf16.msra.mxu0 %v16388_v44  ;;  %9410 = vmatpush1.bf16.msra.mxu1 %v16390_v41  ;;  %v9456_v44 = vld [vmem:[#allocation4 + $0xa18] sm:$0xff] }
 0x849   :  { %9648 = vmatprep.subr.bf16.mxu0 %v16397_v60  ;;  %9689 = vmatprep.subr.bf16.mxu1 %v16399_v57  ;;  %v9460_v41 = vld [vmem:[#allocation4 + $0xa38] sm:$0xff]  ;;  %v5772_v60 = vmax.f32 %v20623_v49, 0.0  ;;  %v16401_v57 = vcombine.high %v9455_v56, %v9459_v52  ;;  %v9475_v49 = vld [vmem:[#allocation4 + $0xab0] sm:$0xff] }
 0x84a   :  { %v16403_v11 = vcombine.high %v9456_v44, %v9460_v41 }
 0x84b   :  { %16394 = vmatmul.mubr.msk.bf16.vlgmr.msra.gmra.mrb[60].mxu0 %vm6013_vm2, %v20821_v10  ;;  %16395 = vmatmul.mubr.msk.bf16.vlgmr.msra.gmra.mrb[60].mxu1 %vm6013_vm2, %v20821_v10 }
 0x84c   :  { %9649 = vmatpush1.bf16.msra.mxu0 %v16396_v47  ;;  %9690 = vmatpush1.bf16.msra.mxu1 %v16398_v24  ;;  %v9468_v47 = vld [vmem:[#allocation4 + $0xa78] sm:$0xff]  ;;  %v16400_v24 = vcombine.low %v9455_v56, %v9459_v52 }
 0x84d   :  { %9650 = vmatprep.subr.bf16.mxu0 %v16405_v46  ;;  %9691 = vmatprep.subr.bf16.mxu1 %v16407_v17  ;;  %v16402_v46 = vcombine.low %v9456_v44, %v9460_v41  ;;  %v20860_v17 = vpack.c.bf16 %v5772_v60, %v5772_v60  ;;  %v16411_v61 = vcombine.high %v9464_v8, %v9468_v47  ;;  %v9821_v41 = vld [vmem:[#allocation4 + $0xb00] sm:$0xff]  ;;  %v9826_v60 = vld [vmem:[#allocation4 + $0xb28] sm:$0xff] }
 0x84e   :  { %v7106_v18 = vpop.f32.mrb[252].mxu0  ;;  %v7147_v19 = vpop.f32.mrb[252].mxu1  ;;  %9680 = vmatprep.mubr.bf16.mxu0 %v18662_v3  ;;  %9721 = vmatprep.mubr.bf16.mxu1 %v18662_v3 }
 0x84f   :  { %v20848_v10 = vadd.f32 %v7106_v18, %v20809_v62  ;;  %v20851_v40 = vadd.f32 %v7147_v19, %v20812_v33  ;;  %v7108_v13 = vpop.f32.mrb[253].mxu0  ;;  %v7149_v50 = vpop.f32.mrb[253].mxu1  ;;  %v16421_v33 = vcombine.high %v9477_v39, %v9481_v58  ;;  %v9479_v18 = vld [vmem:[#allocation4 + $0xad0] sm:$0xff] }
 0x850   :  { %v20854_v55 = vadd.f32 %v7108_v13, %v20815_v14  ;;  %v20857_v23 = vadd.f32 %v7149_v50, %v20818_v7  ;;  %v7110_v22 = vpop.f32.mrb[254].mxu0  ;;  %v7151_v4 = vpop.f32.mrb[254].mxu1  ;;  %9651 = vmatpush1.bf16.msra.mxu0 %v16404_v35  ;;  %9692 = vmatpush1.bf16.msra.mxu1 %v16406_v26  ;;  %v16420_v14 = vcombine.low %v9477_v39, %v9481_v58  ;;  %v9476_v35 = vld [vmem:[#allocation4 + $0xab8] sm:$0xff] }
 0x851   :  { %v7111_v54 = vpop.f32.mrb[255].mxu0  ;;  %v7152_v62 = vpop.f32.mrb[255].mxu1  ;;  %9652 = vmatprep.subr.bf16.mxu0 %v16413_v63  ;;  %9693 = vmatprep.subr.bf16.mxu1 %v16415_v1  ;;  %v16422_v7 = vcombine.low %v9478_v32, %v9482_v42  ;;  %v16408_v26 = vcombine.low %v9463_v6, %v9467_v59  ;;  %v16410_v63 = vcombine.low %v9464_v8, %v9468_v47  ;;  %v9483_v32 = vld [vmem:[#allocation4 + $0xaf0] sm:$0xff]  ;;  %v9480_v42 = vld [vmem:[#allocation4 + $0xad8] sm:$0xff]  ;;  %v9829_v6 = vld [vmem:[#allocation4 + $0xb40] sm:$0xff] }
 0x852   :  { %v16417_v1 = vcombine.high %v9471_v2, %v9475_v49  ;;  %v16419_v39 = vcombine.high %v9472_v15, %v9476_v35  ;;  %v9484_v13 = vld [vmem:[#allocation4 + $0xaf8] sm:$0xff]  ;;  %v16418_v56 = vcombine.low %v9472_v15, %v9476_v35  ;;  %v9833_v59 = vld [vmem:[#allocation4 + $0xb60] sm:$0xff]  ;;  %v9830_v8 = vld [vmem:[#allocation4 + $0xb48] sm:$0xff] }
 0x853   :  { %v16427_v44 = vcombine.high %v9480_v42, %v9484_v13  ;;  %v9834_v47 = vld [vmem:[#allocation4 + $0xb68] sm:$0xff] }
 0x854   :  { %9653 = vmatpush1.bf16.msra.mxu0 %v16412_v16  ;;  %9694 = vmatpush1.bf16.msra.mxu1 %v16414_v37  ;;  %v16416_v37 = vcombine.low %v9471_v2, %v9475_v49  ;;  %v9837_v2 = vld [vmem:[#allocation4 + $0xb80] sm:$0xff]  ;;  %v9838_v15 = vld [vmem:[#allocation4 + $0xb88] sm:$0xff] }
 0x855   :  { %9654 = vmatprep.subr.bf16.mxu0 %v16421_v33  ;;  %9695 = vmatprep.subr.bf16.mxu1 %v16423_v51  ;;  %v9841_v49 = vld [vmem:[#allocation4 + $0xba0] sm:$0xff]  ;;  %v9842_v35 = vld [vmem:[#allocation4 + $0xba8] sm:$0xff] }
 0x858   :  { %9655 = vmatpush1.bf16.msra.mxu0 %v16420_v14  ;;  %9696 = vmatpush1.bf16.msra.mxu1 %v16422_v7  ;;  %v9825_v14 = vld [vmem:[#allocation4 + $0xb20] sm:$0xff]  ;;  %v9822_v7 = vld [vmem:[#allocation4 + $0xb08] sm:$0xff] }
 0x859   :  { %9730 = vmatprep.subr.bf16.mxu0 %v16401_v57  ;;  %9771 = vmatprep.subr.bf16.mxu1 %v16403_v11  ;;  %v16433_v57 = vcombine.high %v9821_v41, %v9825_v14  ;;  %v16435_v11 = vcombine.high %v9822_v7, %v9826_v60 }
 0x85b   :  { %16428 = vmatmul.mubr.msk.bf16.vlgmr.msra.gmra.mrb[64].mxu0 %vm6013_vm2, %v20860_v17  ;;  %16429 = vmatmul.mubr.msk.bf16.vlgmr.msra.gmra.mrb[64].mxu1 %vm6013_vm2, %v20860_v17 }
 0x85c   :  { %9731 = vmatpush1.bf16.msra.mxu0 %v16400_v24  ;;  %9772 = vmatpush1.bf16.msra.mxu1 %v16402_v46  ;;  %v16432_v24 = vcombine.low %v9821_v41, %v9825_v14  ;;  %v16434_v46 = vcombine.low %v9822_v7, %v9826_v60  ;;  %v9823_v14 = vld [vmem:[#allocation4 + $0xb10] sm:$0xff]  ;;  %v9824_v60 = vld [vmem:[#allocation4 + $0xb18] sm:$0xff] }
 0x85d   :  { %9732 = vmatprep.subr.bf16.mxu0 %v16409_v21  ;;  %9773 = vmatprep.subr.bf16.mxu1 %v16411_v61  ;;  %v16441_v21 = vcombine.high %v9829_v6, %v9833_v59  ;;  %v16443_v61 = vcombine.high %v9830_v8, %v9834_v47  ;;  %v9827_v7 = vld [vmem:[#allocation4 + $0xb30] sm:$0xff] }
 0x85e   :  { %v7188_v19 = vpop.f32.mrb[4].mxu0  ;;  %v7229_v58 = vpop.f32.mrb[4].mxu1  ;;  %9762 = vmatprep.mubr.bf16.mxu0 %v18662_v3  ;;  %9803 = vmatprep.mubr.bf16.mxu1 %v18662_v3 }
 0x85f   :  { %v20869_v50 = vadd.f32 %v7188_v19, %v20830_v27  ;;  %v20872_v16 = vadd.f32 %v7229_v58, %v20833_v38  ;;  %v7190_v22 = vpop.f32.mrb[5].mxu0  ;;  %v7231_v4 = vpop.f32.mrb[5].mxu1  ;;  %v16425_v38 = vcombine.high %v9479_v18, %v9483_v32 }
 0x860   :  { %v20875_v54 = vadd.f32 %v7190_v22, %v20836_v31  ;;  %v20878_v62 = vadd.f32 %v7231_v4, %v20839_v9  ;;  %v7192_v33 = vpop.f32.mrb[6].mxu0  ;;  %v7233_v51 = vpop.f32.mrb[6].mxu1  ;;  %9733 = vmatpush1.bf16.msra.mxu0 %v16408_v26  ;;  %9774 = vmatpush1.bf16.msra.mxu1 %v16410_v63  ;;  %v16424_v31 = vcombine.low %v9479_v18, %v9483_v32  ;;  %v9845_v18 = vld [vmem:[#allocation4 + $0xbc0] sm:$0xff] }
 0x861   :  { %v7193_v52 = vpop.f32.mrb[7].mxu0  ;;  %v7234_v27 = vpop.f32.mrb[7].mxu1  ;;  %9734 = vmatprep.subr.bf16.mxu0 %v16417_v1  ;;  %9775 = vmatprep.subr.bf16.mxu1 %v16419_v39  ;;  %v16426_v9 = vcombine.low %v9480_v42, %v9484_v13  ;;  %v16440_v26 = vcombine.low %v9829_v6, %v9833_v59  ;;  %v16442_v63 = vcombine.low %v9830_v8, %v9834_v47  ;;  %v9849_v32 = vld [vmem:[#allocation4 + $0xbe0] sm:$0xff]  ;;  %v9846_v42 = vld [vmem:[#allocation4 + $0xbc8] sm:$0xff]  ;;  %v9831_v6 = vld [vmem:[#allocation4 + $0xb50] sm:$0xff] }
 0x862   :  { %v16449_v1 = vcombine.high %v9837_v2, %v9841_v49  ;;  %v16451_v39 = vcombine.high %v9838_v15, %v9842_v35  ;;  %v9850_v13 = vld [vmem:[#allocation4 + $0xbe8] sm:$0xff]  ;;  %v16448_v33 = vcombine.low %v9837_v2, %v9841_v49  ;;  %v9835_v59 = vld [vmem:[#allocation4 + $0xb70] sm:$0xff]  ;;  %v9832_v8 = vld [vmem:[#allocation4 + $0xb58] sm:$0xff] }
 0x863   :  { %v16459_v41 = vcombine.high %v9846_v42, %v9850_v13  ;;  %v9836_v47 = vld [vmem:[#allocation4 + $0xb78] sm:$0xff]  ;;  %v9839_v49 = vld [vmem:[#allocation4 + $0xb90] sm:$0xff] }
 0x864   :  { %9735 = vmatpush1.bf16.msra.mxu0 %v16416_v37  ;;  %9776 = vmatpush1.bf16.msra.mxu1 %v16418_v56  ;;  %v16447_v2 = vcombine.high %v9832_v8, %v9836_v47 }
 0x865   :  { %9736 = vmatprep.subr.bf16.mxu0 %v16425_v38  ;;  %9777 = vmatprep.subr.bf16.mxu1 %v16427_v44  ;;  %v16450_v38 = vcombine.low %v9838_v15, %v9842_v35  ;;  %v9840_v15 = vld [vmem:[#allocation4 + $0xb98] sm:$0xff] }
 0x866   :  { %v9844_v35 = vld [vmem:[#allocation4 + $0xbb8] sm:$0xff] }
 0x868   :  { %9737 = vmatpush1.bf16.msra.mxu0 %v16424_v31  ;;  %9778 = vmatpush1.bf16.msra.mxu1 %v16426_v9  ;;  %v9828_v31 = vld [vmem:[#allocation4 + $0xb38] sm:$0xff]  ;;  %v5773_v9 = vmax.f32 %v20633_v12, 0.0  ;;  %v9843_v12 = vld [vmem:[#allocation4 + $0xbb0] sm:$0xff] }
 0x869   :  { %10016 = vmatprep.subr.bf16.mxu0 %v16433_v57  ;;  %10057 = vmatprep.subr.bf16.mxu1 %v16435_v11  ;;  %v16437_v57 = vcombine.high %v9823_v14, %v9827_v7  ;;  %v16439_v11 = vcombine.high %v9824_v60, %v9828_v31 }
 0x86b   :  { %16430 = vmatmul.mubr.msk.bf16.vlgmr.msra.gmra.mrb[68].mxu0 %vm6013_vm2, %v20860_v17  ;;  %16431 = vmatmul.mubr.msk.bf16.vlgmr.msra.gmra.mrb[68].mxu1 %vm6013_vm2, %v20860_v17 }
 0x86c   :  { %10017 = vmatpush1.bf16.msra.mxu0 %v16432_v24  ;;  %10058 = vmatpush1.bf16.msra.mxu1 %v16434_v46  ;;  %v16436_v24 = vcombine.low %v9823_v14, %v9827_v7  ;;  %v16438_v46 = vcombine.low %v9824_v60, %v9828_v31  ;;  %v10189_v60 = vld [vmem:[#allocation4 + $0xc00] sm:$0xff] }
 0x86d   :  { %10018 = vmatprep.subr.bf16.mxu0 %v16441_v21  ;;  %10059 = vmatprep.subr.bf16.mxu1 %v16443_v61  ;;  %v20899_v21 = vpack.c.bf16 %v5773_v9, %v5773_v9  ;;  %v16445_v61 = vcombine.high %v9831_v6, %v9835_v59  ;;  %v10193_v31 = vld [vmem:[#allocation4 + $0xc20] sm:$0xff] }
 0x86e   :  { %v7474_v19 = vpop.f32.mrb[8].mxu0  ;;  %v7515_v58 = vpop.f32.mrb[8].mxu1  ;;  %10048 = vmatprep.mubr.bf16.mxu0 %v18662_v3  ;;  %10089 = vmatprep.mubr.bf16.mxu1 %v18662_v3  ;;  %v16469_v9 = vcombine.high %v10189_v60, %v10193_v31 }
 0x86f   :  { %v20887_v17 = vadd.f32 %v7474_v19, %v20848_v10  ;;  %v20890_v22 = vadd.f32 %v7515_v58, %v20851_v40  ;;  %v7476_v4 = vpop.f32.mrb[9].mxu0  ;;  %v7517_v37 = vpop.f32.mrb[9].mxu1  ;;  %v16457_v40 = vcombine.high %v9845_v18, %v9849_v32 }
 0x870   :  { %v20893_v51 = vadd.f32 %v7476_v4, %v20854_v55  ;;  %v20896_v56 = vadd.f32 %v7517_v37, %v20857_v23  ;;  %v7478_v52 = vpop.f32.mrb[10].mxu0  ;;  %v7519_v27 = vpop.f32.mrb[10].mxu1  ;;  %10019 = vmatpush1.bf16.msra.mxu0 %v16440_v26  ;;  %10060 = vmatpush1.bf16.msra.mxu1 %v16442_v63  ;;  %v16456_v55 = vcombine.low %v9845_v18, %v9849_v32  ;;  %v9847_v18 = vld [vmem:[#allocation4 + $0xbd0] sm:$0xff] }
 0x871   :  { %v7479_v44 = vpop.f32.mrb[11].mxu0  ;;  %v7520_v10 = vpop.f32.mrb[11].mxu1  ;;  %10020 = vmatprep.subr.bf16.mxu0 %v16449_v1  ;;  %10061 = vmatprep.subr.bf16.mxu1 %v16451_v39  ;;  %v16458_v23 = vcombine.low %v9846_v42, %v9850_v13  ;;  %v16444_v26 = vcombine.low %v9831_v6, %v9835_v59  ;;  %v16446_v63 = vcombine.low %v9832_v8, %v9836_v47  ;;  %v9851_v32 = vld [vmem:[#allocation4 + $0xbf0] sm:$0xff]  ;;  %v9848_v42 = vld [vmem:[#allocation4 + $0xbd8] sm:$0xff]  ;;  %v10201_v6 = vld [vmem:[#allocation4 + $0xc60] sm:$0xff] }
 0x872   :  { %v16453_v1 = vcombine.high %v9839_v49, %v9843_v12  ;;  %v16455_v39 = vcombine.high %v9840_v15, %v9844_v35  ;;  %v9852_v13 = vld [vmem:[#allocation4 + $0xbf8] sm:$0xff]  ;;  %v16452_v27 = vcombine.low %v9839_v49, %v9843_v12  ;;  %v10198_v59 = vld [vmem:[#allocation4 + $0xc48] sm:$0xff]  ;;  %v16468_v47 = vcombine.low %v10189_v60, %v10193_v31  ;;  %v10209_v49 = vld [vmem:[#allocation4 + $0xca0] sm:$0xff] }
 0x873   :  { %v16463_v7 = vcombine.high %v9848_v42, %v9852_v13  ;;  %v10202_v8 = vld [vmem:[#allocation4 + $0xc68] sm:$0xff]  ;;  %v10191_v60 = vld [vmem:[#allocation4 + $0xc10] sm:$0xff] }
 0x874   :  { %10021 = vmatpush1.bf16.msra.mxu0 %v16448_v33  ;;  %10062 = vmatpush1.bf16.msra.mxu1 %v16450_v38  ;;  %v10206_v12 = vld [vmem:[#allocation4 + $0xc88] sm:$0xff]  ;;  %v10195_v31 = vld [vmem:[#allocation4 + $0xc30] sm:$0xff] }
 0x875   :  { %10022 = vmatprep.subr.bf16.mxu0 %v16457_v40  ;;  %10063 = vmatprep.subr.bf16.mxu1 %v16459_v41  ;;  %v16454_v41 = vcombine.low %v9840_v15, %v9844_v35  ;;  %v10210_v15 = vld [vmem:[#allocation4 + $0xca8] sm:$0xff] }
 0x878   :  { %10023 = vmatpush1.bf16.msra.mxu0 %v16456_v55  ;;  %10064 = vmatpush1.bf16.msra.mxu1 %v16458_v23  ;;  %v10190_v55 = vld [vmem:[#allocation4 + $0xc08] sm:$0xff] }
 0x879   :  { %10098 = vmatprep.subr.bf16.mxu0 %v16437_v57  ;;  %10139 = vmatprep.subr.bf16.mxu1 %v16439_v11  ;;  %v10194_v23 = vld [vmem:[#allocation4 + $0xc28] sm:$0xff]  ;;  %v10197_v11 = vld [vmem:[#allocation4 + $0xc40] sm:$0xff] }
 0x87a   :  { %v16471_v57 = vcombine.high %v10190_v55, %v10194_v23  ;;  %v16476_v35 = vcombine.low %v10197_v11, %v10201_v6 }
 0x87b   :  { %16464 = vmatmul.mubr.msk.bf16.vlgmr.msra.gmra.mrb[72].mxu0 %vm6013_vm2, %v20899_v21  ;;  %16465 = vmatmul.mubr.msk.bf16.vlgmr.msra.gmra.mrb[72].mxu1 %vm6013_vm2, %v20899_v21 }
 0x87c   :  { %10099 = vmatpush1.bf16.msra.mxu0 %v16436_v24  ;;  %10140 = vmatpush1.bf16.msra.mxu1 %v16438_v46  ;;  %v16470_v24 = vcombine.low %v10190_v55, %v10194_v23  ;;  %v16477_v46 = vcombine.high %v10197_v11, %v10201_v6  ;;  %v10192_v55 = vld [vmem:[#allocation4 + $0xc18] sm:$0xff]  ;;  %v10203_v11 = vld [vmem:[#allocation4 + $0xc70] sm:$0xff] }
 0x87d   :  { %10100 = vmatprep.subr.bf16.mxu0 %v16445_v61  ;;  %10141 = vmatprep.subr.bf16.mxu1 %v16447_v2  ;;  %v16479_v61 = vcombine.high %v10198_v59, %v10202_v8  ;;  %v10205_v2 = vld [vmem:[#allocation4 + $0xc80] sm:$0xff]  ;;  %v10196_v23 = vld [vmem:[#allocation4 + $0xc38] sm:$0xff] }
 0x87e   :  { %v7556_v19 = vpop.f32.mrb[16].mxu0  ;;  %v7597_v58 = vpop.f32.mrb[16].mxu1  ;;  %10130 = vmatprep.mubr.bf16.mxu0 %v18662_v3  ;;  %10171 = vmatprep.mubr.bf16.mxu1 %v18662_v3  ;;  %v10200_v6 = vld [vmem:[#allocation4 + $0xc58] sm:$0xff] }
 0x87f   :  { %v20908_v4 = vadd.f32 %v7556_v19, %v20869_v50  ;;  %v20911_v37 = vadd.f32 %v7597_v58, %v20872_v16  ;;  %v7558_v33 = vpop.f32.mrb[17].mxu0  ;;  %v7599_v52 = vpop.f32.mrb[17].mxu1  ;;  %v16461_v16 = vcombine.high %v9847_v18, %v9851_v32  ;;  %v10217_v58 = vld [vmem:[#allocation4 + $0xce0] sm:$0xff] }
 0x880   :  { %v20914_v38 = vadd.f32 %v7558_v33, %v20875_v54  ;;  %v20917_v44 = vadd.f32 %v7599_v52, %v20878_v62  ;;  %v7560_v10 = vpop.f32.mrb[18].mxu0  ;;  %v7601_v40 = vpop.f32.mrb[18].mxu1  ;;  %10101 = vmatpush1.bf16.msra.mxu0 %v16444_v26  ;;  %10142 = vmatpush1.bf16.msra.mxu1 %v16446_v63  ;;  %v16460_v54 = vcombine.low %v9847_v18, %v9851_v32  ;;  %v10214_v32 = vld [vmem:[#allocation4 + $0xcc8] sm:$0xff] }
 0x881   :  { %v7561_v14 = vpop.f32.mrb[19].mxu0  ;;  %v7602_v50 = vpop.f32.mrb[19].mxu1  ;;  %10102 = vmatprep.subr.bf16.mxu0 %v16453_v1  ;;  %10143 = vmatprep.subr.bf16.mxu1 %v16455_v39  ;;  %v16462_v62 = vcombine.low %v9848_v42, %v9852_v13  ;;  %v16478_v26 = vcombine.low %v10198_v59, %v10202_v8  ;;  %v16485_v63 = vcombine.high %v10205_v2, %v10209_v49  ;;  %v10213_v39 = vld [vmem:[#allocation4 + $0xcc0] sm:$0xff]  ;;  %v10218_v42 = vld [vmem:[#allocation4 + $0xce8] sm:$0xff]  ;;  %v10204_v59 = vld [vmem:[#allocation4 + $0xc78] sm:$0xff] }
 0x882   :  { %v16487_v1 = vcombine.high %v10206_v12, %v10210_v15  ;;  %v16486_v50 = vcombine.low %v10206_v12, %v10210_v15  ;;  %v16472_v8 = vcombine.low %v10191_v60, %v10195_v31  ;;  %v10212_v12 = vld [vmem:[#allocation4 + $0xcb8] sm:$0xff] }
 0x884   :  { %10103 = vmatpush1.bf16.msra.mxu0 %v16452_v27  ;;  %10144 = vmatpush1.bf16.msra.mxu1 %v16454_v41  ;;  %v16484_v27 = vcombine.low %v10205_v2, %v10209_v49  ;;  %v10207_v2 = vld [vmem:[#allocation4 + $0xc90] sm:$0xff]  ;;  %v10208_v49 = vld [vmem:[#allocation4 + $0xc98] sm:$0xff] }
 0x885   :  { %10104 = vmatprep.subr.bf16.mxu0 %v16461_v16  ;;  %10145 = vmatprep.subr.bf16.mxu1 %v16463_v7  ;;  %v16495_v7 = vcombine.high %v10214_v32, %v10218_v42 }
 0x888   :  { %10105 = vmatpush1.bf16.msra.mxu0 %v16460_v54  ;;  %10146 = vmatpush1.bf16.msra.mxu1 %v16462_v62  ;;  %v5774_v54 = vmax.f32 %v20620_v48, 0.0  ;;  %v16473_v62 = vcombine.high %v10191_v60, %v10195_v31  ;;  %v10211_v48 = vld [vmem:[#allocation4 + $0xcb0] sm:$0xff]  ;;  %v10557_v31 = vld [vmem:[#allocation4 + $0xd00] sm:$0xff] }
 0x889   :  { %10384 = vmatprep.subr.bf16.mxu0 %v16469_v9  ;;  %10425 = vmatprep.subr.bf16.mxu1 %v16471_v57  ;;  %v16475_v9 = vcombine.high %v10192_v55, %v10196_v23  ;;  %v10199_v57 = vld [vmem:[#allocation4 + $0xc50] sm:$0xff] }
 0x88a   :  { %v16480_v15 = vcombine.low %v10199_v57, %v10203_v11 }
 0x88b   :  { %16466 = vmatmul.mubr.msk.bf16.vlgmr.msra.gmra.mrb[76].mxu0 %vm6013_vm2, %v20899_v21  ;;  %16467 = vmatmul.mubr.msk.bf16.vlgmr.msra.gmra.mrb[76].mxu1 %vm6013_vm2, %v20899_v21 }
 0x88c   :  { %10385 = vmatpush1.bf16.msra.mxu0 %v16468_v47  ;;  %10426 = vmatpush1.bf16.msra.mxu1 %v16470_v24  ;;  %v16474_v47 = vcombine.low %v10192_v55, %v10196_v23  ;;  %v20938_v24 = vpack.c.bf16 %v5774_v54, %v5774_v54  ;;  %v10561_v55 = vld [vmem:[#allocation4 + $0xd20] sm:$0xff]  ;;  %v10558_v23 = vld [vmem:[#allocation4 + $0xd08] sm:$0xff] }
 0x88d   :  { %10386 = vmatprep.subr.bf16.mxu0 %v16477_v46  ;;  %10427 = vmatprep.subr.bf16.mxu1 %v16479_v61  ;;  %v16481_v46 = vcombine.high %v10199_v57, %v10203_v11  ;;  %v16483_v61 = vcombine.high %v10200_v6, %v10204_v59  ;;  %v10566_v57 = vld [vmem:[#allocation4 + $0xd48] sm:$0xff] }
 0x88e   :  { %v7842_v18 = vpop.f32.mrb[20].mxu0  ;;  %v7883_v19 = vpop.f32.mrb[20].mxu1  ;;  %10416 = vmatprep.mubr.bf16.mxu0 %v18662_v3  ;;  %10457 = vmatprep.mubr.bf16.mxu1 %v18662_v3  ;;  %v10570_v11 = vld [vmem:[#allocation4 + $0xd68] sm:$0xff] }
 0x88f   :  { %v20926_v21 = vadd.f32 %v7842_v18, %v20887_v17  ;;  %v20929_v13 = vadd.f32 %v7883_v19, %v20890_v22  ;;  %v7844_v33 = vpop.f32.mrb[21].mxu0  ;;  %v7885_v52 = vpop.f32.mrb[21].mxu1  ;;  %v16493_v22 = vcombine.high %v10213_v39, %v10217_v58  ;;  %v10219_v19 = vld [vmem:[#allocation4 + $0xcf0] sm:$0xff] }
 0x890   :  { %v20932_v10 = vadd.f32 %v7844_v33, %v20893_v51  ;;  %v20935_v40 = vadd.f32 %v7885_v52, %v20896_v56  ;;  %v7846_v41 = vpop.f32.mrb[22].mxu0  ;;  %v7887_v14 = vpop.f32.mrb[22].mxu1  ;;  %10387 = vmatpush1.bf16.msra.mxu0 %v16476_v35  ;;  %10428 = vmatpush1.bf16.msra.mxu1 %v16478_v26  ;;  %v16492_v51 = vcombine.low %v10213_v39, %v10217_v58  ;;  %v10216_v58 = vld [vmem:[#allocation4 + $0xcd8] sm:$0xff] }
 0x891   :  { %v7847_v16 = vpop.f32.mrb[23].mxu0  ;;  %v7888_v17 = vpop.f32.mrb[23].mxu1  ;;  %10388 = vmatprep.subr.bf16.mxu0 %v16485_v63  ;;  %10429 = vmatprep.subr.bf16.mxu1 %v16487_v1  ;;  %v16494_v56 = vcombine.low %v10214_v32, %v10218_v42  ;;  %v16482_v35 = vcombine.low %v10200_v6, %v10204_v59  ;;  %v16489_v26 = vcombine.high %v10207_v2, %v10211_v48  ;;  %v10215_v1 = vld [vmem:[#allocation4 + $0xcd0] sm:$0xff]  ;;  %v10220_v32 = vld [vmem:[#allocation4 + $0xcf8] sm:$0xff] }
 0x892   :  { %v16491_v63 = vcombine.high %v10208_v49, %v10212_v12  ;;  %v16488_v41 = vcombine.low %v10207_v2, %v10211_v48  ;;  %v16499_v60 = vcombine.high %v10216_v58, %v10220_v32  ;;  %v16504_v6 = vcombine.low %v10557_v31, %v10561_v55  ;;  %v10574_v2 = vld [vmem:[#allocation4 + $0xd88] sm:$0xff] }
 0x893   :  { %v10578_v48 = vld [vmem:[#allocation4 + $0xda8] sm:$0xff] }
 0x894   :  { %10389 = vmatpush1.bf16.msra.mxu0 %v16484_v27  ;;  %10430 = vmatpush1.bf16.msra.mxu1 %v16486_v50 }
 0x895   :  { %10390 = vmatprep.subr.bf16.mxu0 %v16493_v22  ;;  %10431 = vmatprep.subr.bf16.mxu1 %v16495_v7  ;;  %v16490_v22 = vcombine.low %v10208_v49, %v10212_v12  ;;  %v16514_v12 = vcombine.low %v10566_v57, %v10570_v11 }
 0x898   :  { %10391 = vmatpush1.bf16.msra.mxu0 %v16492_v51  ;;  %10432 = vmatpush1.bf16.msra.mxu1 %v16494_v56  ;;  %v10562_v51 = vld [vmem:[#allocation4 + $0xd28] sm:$0xff]  ;;  %v16505_v56 = vcombine.high %v10557_v31, %v10561_v55  ;;  %v10563_v31 = vld [vmem:[#allocation4 + $0xd30] sm:$0xff]  ;;  %v10560_v55 = vld [vmem:[#allocation4 + $0xd18] sm:$0xff] }
 0x899   :  { %10466 = vmatprep.subr.bf16.mxu0 %v16473_v62  ;;  %10507 = vmatprep.subr.bf16.mxu1 %v16475_v9  ;;  %v16507_v54 = vcombine.high %v10558_v23, %v10562_v51  ;;  %v10565_v62 = vld [vmem:[#allocation4 + $0xd40] sm:$0xff]  ;;  %v16506_v59 = vcombine.low %v10558_v23, %v10562_v51  ;;  %v10564_v23 = vld [vmem:[#allocation4 + $0xd38] sm:$0xff]  ;;  %v5775_v51 = vmax.f32 %v20630_v25, 0.0  ;;  %v10579_v25 = vld [vmem:[#allocation4 + $0xdb0] sm:$0xff] }
 0x89a   :  { %v10569_v9 = vld [vmem:[#allocation4 + $0xd60] sm:$0xff] }
 0x89b   :  { %16500 = vmatmul.mubr.msk.bf16.vlgmr.msra.gmra.mrb[80].mxu0 %vm6013_vm2, %v20938_v24  ;;  %16501 = vmatmul.mubr.msk.bf16.vlgmr.msra.gmra.mrb[80].mxu1 %vm6013_vm2, %v20938_v24  ;;  %v16512_v49 = vcombine.low %v10565_v62, %v10569_v9 }
 0x89c   :  { %10467 = vmatpush1.bf16.msra.mxu0 %v16472_v8  ;;  %10508 = vmatpush1.bf16.msra.mxu1 %v16474_v47  ;;  %v16513_v8 = vcombine.high %v10565_v62, %v10569_v9  ;;  %v16515_v47 = vcombine.high %v10566_v57, %v10570_v11  ;;  %v10568_v62 = vld [vmem:[#allocation4 + $0xd58] sm:$0xff]  ;;  %v16510_v11 = vcombine.low %v10560_v55, %v10564_v23 }
 0x89d   :  { %10468 = vmatprep.subr.bf16.mxu0 %v16481_v46  ;;  %10509 = vmatprep.subr.bf16.mxu1 %v16483_v61  ;;  %v10573_v46 = vld [vmem:[#allocation4 + $0xd80] sm:$0xff]  ;;  %v10572_v9 = vld [vmem:[#allocation4 + $0xd78] sm:$0xff] }
 0x89e   :  { %v7924_v39 = vpop.f32.mrb[28].mxu0  ;;  %v7965_v18 = vpop.f32.mrb[28].mxu1  ;;  %10498 = vmatprep.mubr.bf16.mxu0 %v18662_v3  ;;  %10539 = vmatprep.mubr.bf16.mxu1 %v18662_v3  ;;  %v10577_v61 = vld [vmem:[#allocation4 + $0xda0] sm:$0xff] }
 0x89f   :  { %v20947_v42 = vadd.f32 %v7924_v39, %v20908_v4  ;;  %v20950_v33 = vadd.f32 %v7965_v18, %v20911_v37  ;;  %v7926_v52 = vpop.f32.mrb[29].mxu0  ;;  %v7967_v27 = vpop.f32.mrb[29].mxu1  ;;  %v16497_v37 = vcombine.high %v10215_v1, %v10219_v19  ;;  %v10585_v39 = vld [vmem:[#allocation4 + $0xde0] sm:$0xff]  ;;  %v10582_v18 = vld [vmem:[#allocation4 + $0xdc8] sm:$0xff] }
 0x8a0   :  { %v20953_v14 = vadd.f32 %v7926_v52, %v20914_v38  ;;  %v20956_v50 = vadd.f32 %v7967_v27, %v20917_v44  ;;  %v7928_v16 = vpop.f32.mrb[30].mxu0  ;;  %v7969_v17 = vpop.f32.mrb[30].mxu1  ;;  %10469 = vmatpush1.bf16.msra.mxu0 %v16480_v15  ;;  %10510 = vmatpush1.bf16.msra.mxu1 %v16482_v35  ;;  %v16496_v38 = vcombine.low %v10215_v1, %v10219_v19  ;;  %v10586_v19 = vld [vmem:[#allocation4 + $0xde8] sm:$0xff] }
 0x8a1   :  { %v7929_v7 = vpop.f32.mrb[31].mxu0  ;;  %v7970_v4 = vpop.f32.mrb[31].mxu1  ;;  %10470 = vmatprep.subr.bf16.mxu0 %v16489_v26  ;;  %10511 = vmatprep.subr.bf16.mxu1 %v16491_v63  ;;  %v16498_v44 = vcombine.low %v10216_v58, %v10220_v32  ;;  %v16521_v15 = vcombine.high %v10573_v46, %v10577_v61  ;;  %v16523_v35 = vcombine.high %v10574_v2, %v10578_v48  ;;  %v10581_v26 = vld [vmem:[#allocation4 + $0xdc0] sm:$0xff] }
 0x8a2   :  { %v16520_v27 = vcombine.low %v10573_v46, %v10577_v61  ;;  %v16522_v7 = vcombine.low %v10574_v2, %v10578_v48  ;;  %v10576_v46 = vld [vmem:[#allocation4 + $0xd98] sm:$0xff]  ;;  %v16518_v48 = vcombine.low %v10568_v62, %v10572_v9 }
 0x8a3   :  { %v10580_v61 = vld [vmem:[#allocation4 + $0xdb8] sm:$0xff] }
 0x8a4   :  { %10471 = vmatpush1.bf16.msra.mxu0 %v16488_v41  ;;  %10512 = vmatpush1.bf16.msra.mxu1 %v16490_v22 }
 0x8a5   :  { %10472 = vmatprep.subr.bf16.mxu0 %v16497_v37  ;;  %10513 = vmatprep.subr.bf16.mxu1 %v16499_v60  ;;  %v16531_v37 = vcombine.high %v10582_v18, %v10586_v19  ;;  %v10559_v60 = vld [vmem:[#allocation4 + $0xd10] sm:$0xff] }
 0x8a6   :  { %v16508_v57 = vcombine.low %v10559_v60, %v10563_v31 }
 0x8a8   :  { %10473 = vmatpush1.bf16.msra.mxu0 %v16496_v38  ;;  %10514 = vmatpush1.bf16.msra.mxu1 %v16498_v44  ;;  %v16509_v38 = vcombine.high %v10559_v60, %v10563_v31  ;;  %v16511_v44 = vcombine.high %v10560_v55, %v10564_v23  ;;  %v10925_v60 = vld [vmem:[#allocation4 + $0xe00] sm:$0xff]  ;;  %v10926_v55 = vld [vmem:[#allocation4 + $0xe08] sm:$0xff] }
 0x8a9   :  { %10752 = vmatprep.subr.bf16.mxu0 %v16505_v56  ;;  %10793 = vmatprep.subr.bf16.mxu1 %v16507_v54  ;;  %v10567_v56 = vld [vmem:[#allocation4 + $0xd50] sm:$0xff]  ;;  %v10929_v31 = vld [vmem:[#allocation4 + $0xe20] sm:$0xff]  ;;  %v10930_v23 = vld [vmem:[#allocation4 + $0xe28] sm:$0xff] }
 0x8aa   :  { %v10571_v54 = vld [vmem:[#allocation4 + $0xd70] sm:$0xff] }
 0x8ab   :  { %16502 = vmatmul.mubr.msk.bf16.vlgmr.msra.gmra.mrb[84].mxu0 %vm6013_vm2, %v20938_v24  ;;  %16503 = vmatmul.mubr.msk.bf16.vlgmr.msra.gmra.mrb[84].mxu1 %vm6013_vm2, %v20938_v24  ;;  %v16516_v2 = vcombine.low %v10567_v56, %v10571_v54 }
 0x8ac   :  { %10753 = vmatpush1.bf16.msra.mxu0 %v16504_v6  ;;  %10794 = vmatpush1.bf16.msra.mxu1 %v16506_v59  ;;  %v20977_v6 = vpack.c.bf16 %v5775_v51, %v5775_v51  ;;  %v16517_v59 = vcombine.high %v10567_v56, %v10571_v54  ;;  %v10933_v51 = vld [vmem:[#allocation4 + $0xe40] sm:$0xff]  ;;  %v10938_v56 = vld [vmem:[#allocation4 + $0xe68] sm:$0xff]  ;;  %v16540_v54 = vcombine.low %v10925_v60, %v10929_v31 }
 0x8ad   :  { %10754 = vmatprep.subr.bf16.mxu0 %v16513_v8  ;;  %10795 = vmatprep.subr.bf16.mxu1 %v16515_v47  ;;  %v16519_v8 = vcombine.high %v10568_v62, %v10572_v9  ;;  %v10575_v47 = vld [vmem:[#allocation4 + $0xd90] sm:$0xff]  ;;  %v16542_v62 = vcombine.low %v10926_v55, %v10930_v23 }
 0x8ae   :  { %v8210_v63 = vpop.f32.mrb[32].mxu0  ;;  %v8251_v1 = vpop.f32.mrb[32].mxu1  ;;  %10784 = vmatprep.mubr.bf16.mxu0 %v18662_v3  ;;  %10825 = vmatprep.mubr.bf16.mxu1 %v18662_v3 }
 0x8af   :  { %v20965_v24 = vadd.f32 %v8210_v63, %v20926_v21  ;;  %v20968_v58 = vadd.f32 %v8251_v1, %v20929_v13  ;;  %v8212_v32 = vpop.f32.mrb[33].mxu0  ;;  %v8253_v52 = vpop.f32.mrb[33].mxu1  ;;  %v16529_v13 = vcombine.high %v10581_v26, %v10585_v39  ;;  %v10587_v63 = vld [vmem:[#allocation4 + $0xdf0] sm:$0xff]  ;;  %v10584_v1 = vld [vmem:[#allocation4 + $0xdd8] sm:$0xff] }
 0x8b0   :  { %v20971_v41 = vadd.f32 %v8212_v32, %v20932_v10  ;;  %v20974_v16 = vadd.f32 %v8253_v52, %v20935_v40  ;;  %v8214_v17 = vpop.f32.mrb[34].mxu0  ;;  %v8255_v22 = vpop.f32.mrb[34].mxu1  ;;  %10755 = vmatpush1.bf16.msra.mxu0 %v16512_v49  ;;  %10796 = vmatpush1.bf16.msra.mxu1 %v16514_v12  ;;  %v16528_v10 = vcombine.low %v10581_v26, %v10585_v39  ;;  %v10588_v39 = vld [vmem:[#allocation4 + $0xdf8] sm:$0xff] }
 0x8b1   :  { %v8215_v4 = vpop.f32.mrb[35].mxu0  ;;  %v8256_v21 = vpop.f32.mrb[35].mxu1  ;;  %10756 = vmatprep.subr.bf16.mxu0 %v16521_v15  ;;  %10797 = vmatprep.subr.bf16.mxu1 %v16523_v35  ;;  %v16530_v40 = vcombine.low %v10582_v18, %v10586_v19  ;;  %v16525_v49 = vcombine.high %v10575_v47, %v10579_v25  ;;  %v16527_v12 = vcombine.high %v10576_v46, %v10580_v61  ;;  %v10583_v15 = vld [vmem:[#allocation4 + $0xdd0] sm:$0xff] }
 0x8b2   :  { %v16526_v21 = vcombine.low %v10576_v46, %v10580_v61 }
 0x8b4   :  { %10757 = vmatpush1.bf16.msra.mxu0 %v16520_v27  ;;  %10798 = vmatpush1.bf16.msra.mxu1 %v16522_v7  ;;  %v16524_v27 = vcombine.low %v10575_v47, %v10579_v25  ;;  %v10946_v47 = vld [vmem:[#allocation4 + $0xea8] sm:$0xff] }
 0x8b5   :  { %10758 = vmatprep.subr.bf16.mxu0 %v16529_v13  ;;  %10799 = vmatprep.subr.bf16.mxu1 %v16531_v37  ;;  %v16535_v37 = vcombine.high %v10584_v1, %v10588_v39 }
 0x8b8   :  { %10759 = vmatpush1.bf16.msra.mxu0 %v16528_v10  ;;  %10800 = vmatpush1.bf16.msra.mxu1 %v16530_v40  ;;  %v16541_v10 = vcombine.high %v10925_v60, %v10929_v31  ;;  %v16543_v40 = vcombine.high %v10926_v55, %v10930_v23  ;;  %v10928_v60 = vld [vmem:[#allocation4 + $0xe18] sm:$0xff]  ;;  %v5776_v55 = vmax.f32 %v20646_v20, 0.0  ;;  %v10947_v20 = vld [vmem:[#allocation4 + $0xeb0] sm:$0xff] }
 0x8b9   :  { %10834 = vmatprep.subr.bf16.mxu0 %v16509_v38  ;;  %10875 = vmatprep.subr.bf16.mxu1 %v16511_v44  ;;  %v10937_v38 = vld [vmem:[#allocation4 + $0xe60] sm:$0xff]  ;;  %v10934_v44 = vld [vmem:[#allocation4 + $0xe48] sm:$0xff]  ;;  %v10932_v31 = vld [vmem:[#allocation4 + $0xe38] sm:$0xff] }
 0x8ba   :  { %v16549_v9 = vcombine.high %v10933_v51, %v10937_v38  ;;  %v16548_v25 = vcombine.low %v10933_v51, %v10937_v38  ;;  %v16550_v46 = vcombine.low %v10934_v44, %v10938_v56  ;;  %v10940_v51 = vld [vmem:[#allocation4 + $0xe78] sm:$0xff] }
 0x8bb   :  { %16536 = vmatmul.mubr.msk.bf16.vlgmr.msra.gmra.mrb[88].mxu0 %vm6013_vm2, %v20977_v6  ;;  %16537 = vmatmul.mubr.msk.bf16.vlgmr.msra.gmra.mrb[88].mxu1 %vm6013_vm2, %v20977_v6 }
 0x8bc   :  { %10835 = vmatpush1.bf16.msra.mxu0 %v16508_v57  ;;  %10876 = vmatpush1.bf16.msra.mxu1 %v16510_v11  ;;  %v16551_v57 = vcombine.high %v10934_v44, %v10938_v56  ;;  %v10941_v11 = vld [vmem:[#allocation4 + $0xe80] sm:$0xff]  ;;  %v16546_v44 = vcombine.low %v10928_v60, %v10932_v31  ;;  %v21016_v56 = vpack.c.bf16 %v5776_v55, %v5776_v55 }
 0x8bd   :  { %10836 = vmatprep.subr.bf16.mxu0 %v16517_v59  ;;  %10877 = vmatprep.subr.bf16.mxu1 %v16519_v8  ;;  %v10945_v59 = vld [vmem:[#allocation4 + $0xea0] sm:$0xff]  ;;  %v10942_v8 = vld [vmem:[#allocation4 + $0xe88] sm:$0xff] }
 0x8be   :  { %v8292_v35 = vpop.f32.mrb[36].mxu0  ;;  %v8333_v26 = vpop.f32.mrb[36].mxu1  ;;  %10866 = vmatprep.mubr.bf16.mxu0 %v18662_v3  ;;  %10907 = vmatprep.mubr.bf16.mxu1 %v18662_v3  ;;  %v16557_v61 = vcombine.high %v10941_v11, %v10945_v59  ;;  %v11305_v55 = vld [vmem:[#allocation4 + $0xf60] sm:$0xff] }
 0x8bf   :  { %v20986_v18 = vadd.f32 %v8292_v35, %v20947_v42  ;;  %v20989_v19 = vadd.f32 %v8333_v26, %v20950_v33  ;;  %v8294_v32 = vpop.f32.mrb[37].mxu0  ;;  %v8335_v52 = vpop.f32.mrb[37].mxu1  ;;  %v16533_v33 = vcombine.high %v10583_v15, %v10587_v63  ;;  %v10950_v35 = vld [vmem:[#allocation4 + $0xec8] sm:$0xff] }
 0x8c0   :  { %v20992_v17 = vadd.f32 %v8294_v32, %v20953_v14  ;;  %v20995_v22 = vadd.f32 %v8335_v52, %v20956_v50  ;;  %v8296_v7 = vpop.f32.mrb[38].mxu0  ;;  %v8337_v4 = vpop.f32.mrb[38].mxu1  ;;  %10837 = vmatpush1.bf16.msra.mxu0 %v16516_v2  ;;  %10878 = vmatpush1.bf16.msra.mxu1 %v16518_v48  ;;  %v16532_v14 = vcombine.low %v10583_v15, %v10587_v63  ;;  %v10949_v48 = vld [vmem:[#allocation4 + $0xec0] sm:$0xff]  ;;  %v10954_v26 = vld [vmem:[#allocation4 + $0xee8] sm:$0xff] }
 0x8c1   :  { %v8297_v13 = vpop.f32.mrb[39].mxu0  ;;  %v8338_v42 = vpop.f32.mrb[39].mxu1  ;;  %10838 = vmatprep.subr.bf16.mxu0 %v16525_v49  ;;  %10879 = vmatprep.subr.bf16.mxu1 %v16527_v12  ;;  %v16534_v50 = vcombine.low %v10584_v1, %v10588_v39  ;;  %v16559_v2 = vcombine.high %v10942_v8, %v10946_v47  ;;  %v10953_v15 = vld [vmem:[#allocation4 + $0xee0] sm:$0xff]  ;;  %v16556_v32 = vcombine.low %v10941_v11, %v10945_v59  ;;  %v10948_v11 = vld [vmem:[#allocation4 + $0xeb8] sm:$0xff] }
 0x8c2   :  { %v16567_v42 = vcombine.high %v10950_v35, %v10954_v26 }
 0x8c4   :  { %10839 = vmatpush1.bf16.msra.mxu0 %v16524_v27  ;;  %10880 = vmatpush1.bf16.msra.mxu1 %v16526_v21  ;;  %v16558_v21 = vcombine.low %v10942_v8, %v10946_v47 }
 0x8c5   :  { %10840 = vmatprep.subr.bf16.mxu0 %v16533_v33  ;;  %10881 = vmatprep.subr.bf16.mxu1 %v16535_v37  ;;  %v10927_v33 = vld [vmem:[#allocation4 + $0xe10] sm:$0xff] }
 0x8c6   :  { %v10931_v37 = vld [vmem:[#allocation4 + $0xe30] sm:$0xff] }
 0x8c7   :  { %v16545_v23 = vcombine.high %v10927_v33, %v10931_v37  ;;  %v16544_v38 = vcombine.low %v10927_v33, %v10931_v37  ;;  %v11297_v33 = vld [vmem:[#allocation4 + $0xf20] sm:$0xff]  ;;  %v11294_v37 = vld [vmem:[#allocation4 + $0xf08] sm:$0xff] }
 0x8c8   :  { %10841 = vmatpush1.bf16.msra.mxu0 %v16532_v14  ;;  %10882 = vmatpush1.bf16.msra.mxu1 %v16534_v50  ;;  %v16547_v14 = vcombine.high %v10928_v60, %v10932_v31  ;;  %v10935_v50 = vld [vmem:[#allocation4 + $0xe50] sm:$0xff]  ;;  %v11298_v60 = vld [vmem:[#allocation4 + $0xf28] sm:$0xff] }
 0x8c9   :  { %11120 = vmatprep.subr.bf16.mxu0 %v16541_v10  ;;  %11161 = vmatprep.subr.bf16.mxu1 %v16543_v40  ;;  %v10939_v10 = vld [vmem:[#allocation4 + $0xe70] sm:$0xff]  ;;  %v10936_v40 = vld [vmem:[#allocation4 + $0xe58] sm:$0xff] }
 0x8ca   :  { %v16552_v59 = vcombine.low %v10935_v50, %v10939_v10  ;;  %v16554_v8 = vcombine.low %v10936_v40, %v10940_v51 }
 0x8cb   :  { %16538 = vmatmul.mubr.msk.bf16.vlgmr.msra.gmra.mrb[92].mxu0 %vm6013_vm2, %v20977_v6  ;;  %16539 = vmatmul.mubr.msk.bf16.vlgmr.msra.gmra.mrb[92].mxu1 %vm6013_vm2, %v20977_v6 }
 0x8cc   :  { %11121 = vmatpush1.bf16.msra.mxu0 %v16540_v54  ;;  %11162 = vmatpush1.bf16.msra.mxu1 %v16542_v62  ;;  %v16553_v54 = vcombine.high %v10935_v50, %v10939_v10  ;;  %v16555_v62 = vcombine.high %v10936_v40, %v10940_v51  ;;  %v16578_v10 = vcombine.low %v11294_v37, %v11298_v60 }
 0x8cd   :  { %11122 = vmatprep.subr.bf16.mxu0 %v16549_v9  ;;  %11163 = vmatprep.subr.bf16.mxu1 %v16551_v57  ;;  %v10943_v9 = vld [vmem:[#allocation4 + $0xe90] sm:$0xff]  ;;  %v10944_v57 = vld [vmem:[#allocation4 + $0xe98] sm:$0xff] }
 0x8ce   :  { %v8578_v49 = vpop.f32.mrb[40].mxu0  ;;  %v8619_v12 = vpop.f32.mrb[40].mxu1  ;;  %11152 = vmatprep.mubr.bf16.mxu0 %v18662_v3  ;;  %11193 = vmatprep.mubr.bf16.mxu1 %v18662_v3  ;;  %v16561_v47 = vcombine.high %v10943_v9, %v10947_v20 }
 0x8cf   :  { %v21004_v6 = vadd.f32 %v8578_v49, %v20965_v24  ;;  %v21007_v63 = vadd.f32 %v8619_v12, %v20968_v58  ;;  %v8580_v1 = vpop.f32.mrb[41].mxu0  ;;  %v8621_v39 = vpop.f32.mrb[41].mxu1  ;;  %v16565_v58 = vcombine.high %v10949_v48, %v10953_v15  ;;  %v10952_v49 = vld [vmem:[#allocation4 + $0xed8] sm:$0xff] }
 0x8d0   :  { %v21010_v52 = vadd.f32 %v8580_v1, %v20971_v41  ;;  %v21013_v27 = vadd.f32 %v8621_v39, %v20974_v16  ;;  %v8582_v7 = vpop.f32.mrb[42].mxu0  ;;  %v8623_v4 = vpop.f32.mrb[42].mxu1  ;;  %11123 = vmatpush1.bf16.msra.mxu0 %v16548_v25  ;;  %11164 = vmatpush1.bf16.msra.mxu1 %v16550_v46  ;;  %v16564_v41 = vcombine.low %v10949_v48, %v10953_v15  ;;  %v10951_v46 = vld [vmem:[#allocation4 + $0xed0] sm:$0xff]  ;;  %v10956_v12 = vld [vmem:[#allocation4 + $0xef8] sm:$0xff] }
 0x8d1   :  { %v8583_v13 = vpop.f32.mrb[43].mxu0  ;;  %v8624_v24 = vpop.f32.mrb[43].mxu1  ;;  %11124 = vmatprep.subr.bf16.mxu0 %v16557_v61  ;;  %11165 = vmatprep.subr.bf16.mxu1 %v16559_v2  ;;  %v16566_v16 = vcombine.low %v10950_v35, %v10954_v26  ;;  %v16563_v25 = vcombine.high %v10944_v57, %v10948_v11  ;;  %v10955_v48 = vld [vmem:[#allocation4 + $0xef0] sm:$0xff]  ;;  %v16560_v39 = vcombine.low %v10943_v9, %v10947_v20 }
 0x8d2   :  { %v16562_v13 = vcombine.low %v10944_v57, %v10948_v11 }
 0x8d4   :  { %11125 = vmatpush1.bf16.msra.mxu0 %v16556_v32  ;;  %11166 = vmatpush1.bf16.msra.mxu1 %v16558_v21 }
 0x8d5   :  { %11126 = vmatprep.subr.bf16.mxu0 %v16565_v58  ;;  %11167 = vmatprep.subr.bf16.mxu1 %v16567_v42  ;;  %v16571_v58 = vcombine.high %v10952_v49, %v10956_v12  ;;  %v11293_v42 = vld [vmem:[#allocation4 + $0xf00] sm:$0xff] }
 0x8d6   :  { %v16577_v31 = vcombine.high %v11293_v42, %v11297_v33  ;;  %v16576_v50 = vcombine.low %v11293_v42, %v11297_v33  ;;  %v11300_v42 = vld [vmem:[#allocation4 + $0xf38] sm:$0xff]  ;;  %v5777_v33 = vmax.f32 %v20642_v28, 0.0  ;;  %v11315_v28 = vld [vmem:[#allocation4 + $0xfb0] sm:$0xff] }
 0x8d8   :  { %11127 = vmatpush1.bf16.msra.mxu0 %v16564_v41  ;;  %11168 = vmatpush1.bf16.msra.mxu1 %v16566_v16  ;;  %v16579_v41 = vcombine.high %v11294_v37, %v11298_v60  ;;  %v11301_v16 = vld [vmem:[#allocation4 + $0xf40] sm:$0xff] }
 0x8d9   :  { %11202 = vmatprep.subr.bf16.mxu0 %v16545_v23  ;;  %11243 = vmatprep.subr.bf16.mxu1 %v16547_v14  ;;  %v11302_v23 = vld [vmem:[#allocation4 + $0xf48] sm:$0xff]  ;;  %v16585_v40 = vcombine.high %v11301_v16, %v11305_v55  ;;  %v16584_v9 = vcombine.low %v11301_v16, %v11305_v55 }
 0x8da   :  { %v11306_v14 = vld [vmem:[#allocation4 + $0xf68] sm:$0xff] }
 0x8db   :  { %16572 = vmatmul.mubr.msk.bf16.vlgmr.msra.gmra.mrb[96].mxu0 %vm6013_vm2, %v21016_v56  ;;  %16573 = vmatmul.mubr.msk.bf16.vlgmr.msra.gmra.mrb[96].mxu1 %vm6013_vm2, %v21016_v56  ;;  %v16587_v51 = vcombine.high %v11302_v23, %v11306_v14  ;;  %v16586_v20 = vcombine.low %v11302_v23, %v11306_v14  ;;  %v21055_v23 = vpack.c.bf16 %v5777_v33, %v5777_v33  ;;  %v11670_v33 = vld [vmem:[#allocation4 + $0x1048] sm:$0xff] }
 0x8dc   :  { %11203 = vmatpush1.bf16.msra.mxu0 %v16544_v38  ;;  %11244 = vmatpush1.bf16.msra.mxu1 %v16546_v44  ;;  %v11309_v38 = vld [vmem:[#allocation4 + $0xf80] sm:$0xff] }
 0x8dd   :  { %11204 = vmatprep.subr.bf16.mxu0 %v16553_v54  ;;  %11245 = vmatprep.subr.bf16.mxu1 %v16555_v62  ;;  %v11313_v44 = vld [vmem:[#allocation4 + $0xfa0] sm:$0xff]  ;;  %v11310_v54 = vld [vmem:[#allocation4 + $0xf88] sm:$0xff] }
 0x8de   :  { %v8660_v61 = vpop.f32.mrb[44].mxu0  ;;  %v8701_v2 = vpop.f32.mrb[44].mxu1  ;;  %11234 = vmatprep.mubr.bf16.mxu0 %v18662_v3  ;;  %11275 = vmatprep.mubr.bf16.mxu1 %v18662_v3  ;;  %v11314_v62 = vld [vmem:[#allocation4 + $0xfa8] sm:$0xff]  ;;  %v16593_v57 = vcombine.high %v11309_v38, %v11313_v44 }
 0x8df   :  { %v21025_v15 = vadd.f32 %v8660_v61, %v20986_v18  ;;  %v21028_v35 = vadd.f32 %v8701_v2, %v20989_v19  ;;  %v8662_v26 = vpop.f32.mrb[45].mxu0  ;;  %v8703_v1 = vpop.f32.mrb[45].mxu1  ;;  %v16569_v19 = vcombine.high %v10951_v46, %v10955_v48  ;;  %v16595_v11 = vcombine.high %v11310_v54, %v11314_v62  ;;  %v11322_v61 = vld [vmem:[#allocation4 + $0xfe8] sm:$0xff] }
 0x8e0   :  { %v21031_v32 = vadd.f32 %v8662_v26, %v20992_v17  ;;  %v21034_v7 = vadd.f32 %v8703_v1, %v20995_v22  ;;  %v8664_v4 = vpop.f32.mrb[46].mxu0  ;;  %v8705_v21 = vpop.f32.mrb[46].mxu1  ;;  %11205 = vmatpush1.bf16.msra.mxu0 %v16552_v59  ;;  %11246 = vmatpush1.bf16.msra.mxu1 %v16554_v8  ;;  %v16568_v17 = vcombine.low %v10951_v46, %v10955_v48  ;;  %v11317_v59 = vld [vmem:[#allocation4 + $0xfc0] sm:$0xff]  ;;  %v11318_v46 = vld [vmem:[#allocation4 + $0xfc8] sm:$0xff] }
 0x8e1   :  { %v8665_v24 = vpop.f32.mrb[47].mxu0  ;;  %v8706_v18 = vpop.f32.mrb[47].mxu1  ;;  %11206 = vmatprep.subr.bf16.mxu0 %v16561_v47  ;;  %11247 = vmatprep.subr.bf16.mxu1 %v16563_v25  ;;  %v16570_v22 = vcombine.low %v10952_v49, %v10956_v12  ;;  %v11321_v25 = vld [vmem:[#allocation4 + $0xfe0] sm:$0xff]  ;;  %v16592_v12 = vcombine.low %v11309_v38, %v11313_v44  ;;  %v16594_v21 = vcombine.low %v11310_v54, %v11314_v62 }
 0x8e2   :  { %v16603_v24 = vcombine.high %v11318_v46, %v11322_v61  ;;  %v11295_v18 = vld [vmem:[#allocation4 + $0xf10] sm:$0xff] }
 0x8e4   :  { %11207 = vmatpush1.bf16.msra.mxu0 %v16560_v39  ;;  %11248 = vmatpush1.bf16.msra.mxu1 %v16562_v13 }
 0x8e5   :  { %11208 = vmatprep.subr.bf16.mxu0 %v16569_v19  ;;  %11249 = vmatprep.subr.bf16.mxu1 %v16571_v58  ;;  %v11299_v19 = vld [vmem:[#allocation4 + $0xf30] sm:$0xff]  ;;  %v11296_v58 = vld [vmem:[#allocation4 + $0xf18] sm:$0xff] }
 0x8e6   :  { %v16581_v37 = vcombine.high %v11295_v18, %v11299_v19  ;;  %v16583_v60 = vcombine.high %v11296_v58, %v11300_v42  ;;  %v16580_v16 = vcombine.low %v11295_v18, %v11299_v19  ;;  %v16582_v55 = vcombine.low %v11296_v58, %v11300_v42  ;;  %v11662_v18 = vld [vmem:[#allocation4 + $0x1008] sm:$0xff] }
 0x8e7   :  { %v11666_v19 = vld [vmem:[#allocation4 + $0x1028] sm:$0xff] }
 0x8e8   :  { %11209 = vmatpush1.bf16.msra.mxu0 %v16568_v17  ;;  %11250 = vmatpush1.bf16.msra.mxu1 %v16570_v22  ;;  %v11303_v17 = vld [vmem:[#allocation4 + $0xf50] sm:$0xff]  ;;  %v16615_v42 = vcombine.high %v11662_v18, %v11666_v19 }
 0x8e9   :  { %11488 = vmatprep.subr.bf16.mxu0 %v16577_v31  ;;  %11529 = vmatprep.subr.bf16.mxu1 %v16579_v41  ;;  %v11307_v22 = vld [vmem:[#allocation4 + $0xf70] sm:$0xff]  ;;  %v11304_v31 = vld [vmem:[#allocation4 + $0xf58] sm:$0xff] }
 0x8ea   :  { %v11308_v41 = vld [vmem:[#allocation4 + $0xf78] sm:$0xff]  ;;  %v16589_v14 = vcombine.high %v11303_v17, %v11307_v22  ;;  %v16588_v38 = vcombine.low %v11303_v17, %v11307_v22  ;;  %v16614_v17 = vcombine.low %v11662_v18, %v11666_v19  ;;  %v11671_v19 = vld [vmem:[#allocation4 + $0x1050] sm:$0xff] }
 0x8eb   :  { %16574 = vmatmul.mubr.msk.bf16.vlgmr.msra.gmra.mrb[100].mxu0 %vm6013_vm2, %v21016_v56  ;;  %16575 = vmatmul.mubr.msk.bf16.vlgmr.msra.gmra.mrb[100].mxu1 %vm6013_vm2, %v21016_v56  ;;  %v16590_v44 = vcombine.low %v11304_v31, %v11308_v41 }
 0x8ec   :  { %11489 = vmatpush1.bf16.msra.mxu0 %v16576_v50  ;;  %11530 = vmatpush1.bf16.msra.mxu1 %v16578_v10  ;;  %v16591_v50 = vcombine.high %v11304_v31, %v11308_v41  ;;  %v11311_v10 = vld [vmem:[#allocation4 + $0xf90] sm:$0xff]  ;;  %v11677_v41 = vld [vmem:[#allocation4 + $0x1080] sm:$0xff] }
 0x8ed   :  { %11490 = vmatprep.subr.bf16.mxu0 %v16585_v40  ;;  %11531 = vmatprep.subr.bf16.mxu1 %v16587_v51  ;;  %v11312_v40 = vld [vmem:[#allocation4 + $0xf98] sm:$0xff]  ;;  %v16597_v54 = vcombine.high %v11311_v10, %v11315_v28 }
 0x8ee   :  { %v8946_v8 = vpop.f32.mrb[48].mxu0  ;;  %v8987_v47 = vpop.f32.mrb[48].mxu1  ;;  %11520 = vmatprep.mubr.bf16.mxu0 %v18662_v3  ;;  %11561 = vmatprep.mubr.bf16.mxu1 %v18662_v3  ;;  %v11316_v51 = vld [vmem:[#allocation4 + $0xfb8] sm:$0xff] }
 0x8ef   :  { %v21043_v56 = vadd.f32 %v8946_v8, %v21004_v6  ;;  %v21046_v2 = vadd.f32 %v8987_v47, %v21007_v63  ;;  %v8948_v48 = vpop.f32.mrb[49].mxu0  ;;  %v8989_v49 = vpop.f32.mrb[49].mxu1  ;;  %v16601_v63 = vcombine.high %v11317_v59, %v11321_v25  ;;  %v16599_v62 = vcombine.high %v11312_v40, %v11316_v51  ;;  %v11324_v8 = vld [vmem:[#allocation4 + $0xff8] sm:$0xff] }
 0x8f0   :  { %v21049_v26 = vadd.f32 %v8948_v48, %v21010_v52  ;;  %v21052_v1 = vadd.f32 %v8989_v49, %v21013_v27  ;;  %v8950_v39 = vpop.f32.mrb[50].mxu0  ;;  %v8991_v4 = vpop.f32.mrb[50].mxu1  ;;  %11491 = vmatpush1.bf16.msra.mxu0 %v16584_v9  ;;  %11532 = vmatpush1.bf16.msra.mxu1 %v16586_v20  ;;  %v16600_v52 = vcombine.low %v11317_v59, %v11321_v25  ;;  %v11319_v9 = vld [vmem:[#allocation4 + $0xfd0] sm:$0xff]  ;;  %v11320_v59 = vld [vmem:[#allocation4 + $0xfd8] sm:$0xff] }
 0x8f1   :  { %v8951_v13 = vpop.f32.mrb[51].mxu0  ;;  %v8992_v6 = vpop.f32.mrb[51].mxu1  ;;  %11492 = vmatprep.subr.bf16.mxu0 %v16593_v57  ;;  %11533 = vmatprep.subr.bf16.mxu1 %v16595_v11  ;;  %v16602_v27 = vcombine.low %v11318_v46, %v11322_v61  ;;  %v11323_v11 = vld [vmem:[#allocation4 + $0xff0] sm:$0xff]  ;;  %v16596_v48 = vcombine.low %v11311_v10, %v11315_v28 }
 0x8f2   :  { %v16607_v6 = vcombine.high %v11320_v59, %v11324_v8 }
 0x8f4   :  { %11493 = vmatpush1.bf16.msra.mxu0 %v16592_v12  ;;  %11534 = vmatpush1.bf16.msra.mxu1 %v16594_v21  ;;  %v16598_v21 = vcombine.low %v11312_v40, %v11316_v51  ;;  %v11685_v51 = vld [vmem:[#allocation4 + $0x10c0] sm:$0xff] }
 0x8f5   :  { %11494 = vmatprep.subr.bf16.mxu0 %v16601_v63  ;;  %11535 = vmatprep.subr.bf16.mxu1 %v16603_v24  ;;  %v11661_v63 = vld [vmem:[#allocation4 + $0x1000] sm:$0xff] }
 0x8f6   :  { %v11665_v24 = vld [vmem:[#allocation4 + $0x1020] sm:$0xff] }
 0x8f7   :  { %v16613_v58 = vcombine.high %v11661_v63, %v11665_v24 }
 0x8f8   :  { %11495 = vmatpush1.bf16.msra.mxu0 %v16600_v52  ;;  %11536 = vmatpush1.bf16.msra.mxu1 %v16602_v27  ;;  %v11669_v52 = vld [vmem:[#allocation4 + $0x1040] sm:$0xff] }
 0x8f9   :  { %11570 = vmatprep.subr.bf16.mxu0 %v16581_v37  ;;  %11611 = vmatprep.subr.bf16.mxu1 %v16583_v60  ;;  %v11673_v27 = vld [vmem:[#allocation4 + $0x1060] sm:$0xff]  ;;  %v11674_v37 = vld [vmem:[#allocation4 + $0x1068] sm:$0xff]  ;;  %v16612_v60 = vcombine.low %v11661_v63, %v11665_v24  ;;  %v5778_v63 = vmax.f32 %v20649_v43, 0.0  ;;  %v11683_v43 = vld [vmem:[#allocation4 + $0x10b0] sm:$0xff] }
 0x8fa   :  { %v16621_v22 = vcombine.high %v11669_v52, %v11673_v27  ;;  %v16623_v31 = vcombine.high %v11670_v33, %v11674_v37  ;;  %v16622_v10 = vcombine.low %v11670_v33, %v11674_v37 }
 0x8fb   :  { %16608 = vmatmul.mubr.msk.bf16.vlgmr.msra.gmra.mrb[104].mxu0 %vm6013_vm2, %v21055_v23  ;;  %16609 = vmatmul.mubr.msk.bf16.vlgmr.msra.gmra.mrb[104].mxu1 %vm6013_vm2, %v21055_v23 }
 0x8fc   :  { %11571 = vmatpush1.bf16.msra.mxu0 %v16580_v16  ;;  %11612 = vmatpush1.bf16.msra.mxu1 %v16582_v55  ;;  %v11681_v16 = vld [vmem:[#allocation4 + $0x10a0] sm:$0xff]  ;;  %v11678_v55 = vld [vmem:[#allocation4 + $0x1088] sm:$0xff] }
 0x8fd   :  { %11572 = vmatprep.subr.bf16.mxu0 %v16589_v14  ;;  %11613 = vmatprep.subr.bf16.mxu1 %v16591_v50  ;;  %v11682_v14 = vld [vmem:[#allocation4 + $0x10a8] sm:$0xff]  ;;  %v16620_v50 = vcombine.low %v11669_v52, %v11673_v27  ;;  %v16629_v28 = vcombine.high %v11677_v41, %v11681_v16  ;;  %v21094_v27 = vpack.c.bf16 %v5778_v63, %v5778_v63 }
 0x8fe   :  { %v9028_v20 = vpop.f32.mrb[52].mxu0  ;;  %v9069_v57 = vpop.f32.mrb[52].mxu1  ;;  %11602 = vmatprep.mubr.bf16.mxu0 %v18662_v3  ;;  %11643 = vmatprep.mubr.bf16.mxu1 %v18662_v3  ;;  %v16631_v40 = vcombine.high %v11678_v55, %v11682_v14  ;;  %v12042_v63 = vld [vmem:[#allocation4 + $0x1168] sm:$0xff] }
 0x8ff   :  { %v21064_v47 = vadd.f32 %v9028_v20, %v21025_v15  ;;  %v21067_v25 = vadd.f32 %v9069_v57, %v21028_v35  ;;  %v9030_v46 = vpop.f32.mrb[53].mxu0  ;;  %v9071_v61 = vpop.f32.mrb[53].mxu1  ;;  %v16605_v35 = vcombine.high %v11319_v9, %v11323_v11 }
 0x900   :  { %v21070_v49 = vadd.f32 %v9030_v46, %v21031_v32  ;;  %v21073_v12 = vadd.f32 %v9071_v61, %v21034_v7  ;;  %v9032_v39 = vpop.f32.mrb[54].mxu0  ;;  %v9073_v4 = vpop.f32.mrb[54].mxu1  ;;  %11573 = vmatpush1.bf16.msra.mxu0 %v16588_v38  ;;  %11614 = vmatpush1.bf16.msra.mxu1 %v16590_v44  ;;  %v16604_v32 = vcombine.low %v11319_v9, %v11323_v11  ;;  %v11690_v9 = vld [vmem:[#allocation4 + $0x10e8] sm:$0xff] }
 0x901   :  { %v9033_v13 = vpop.f32.mrb[55].mxu0  ;;  %v9074_v15 = vpop.f32.mrb[55].mxu1  ;;  %11574 = vmatprep.subr.bf16.mxu0 %v16597_v54  ;;  %11615 = vmatprep.subr.bf16.mxu1 %v16599_v62  ;;  %v16606_v7 = vcombine.low %v11320_v59, %v11324_v8  ;;  %v11689_v54 = vld [vmem:[#allocation4 + $0x10e0] sm:$0xff]  ;;  %v11686_v62 = vld [vmem:[#allocation4 + $0x10c8] sm:$0xff]  ;;  %v16628_v59 = vcombine.low %v11677_v41, %v11681_v16  ;;  %v16630_v39 = vcombine.low %v11678_v55, %v11682_v14  ;;  %v11687_v14 = vld [vmem:[#allocation4 + $0x10d0] sm:$0xff] }
 0x902   :  { %v11663_v13 = vld [vmem:[#allocation4 + $0x1010] sm:$0xff] }
 0x903   :  { %v11667_v15 = vld [vmem:[#allocation4 + $0x1030] sm:$0xff] }
 0x904   :  { %11575 = vmatpush1.bf16.msra.mxu0 %v16596_v48  ;;  %11616 = vmatpush1.bf16.msra.mxu1 %v16598_v21  ;;  %v16639_v21 = vcombine.high %v11686_v62, %v11690_v9  ;;  %v16617_v24 = vcombine.high %v11663_v13, %v11667_v15 }
 0x905   :  { %11576 = vmatprep.subr.bf16.mxu0 %v16605_v35  ;;  %11617 = vmatprep.subr.bf16.mxu1 %v16607_v6  ;;  %v11664_v35 = vld [vmem:[#allocation4 + $0x1018] sm:$0xff] }
 0x906   :  { %v11668_v6 = vld [vmem:[#allocation4 + $0x1038] sm:$0xff] }
 0x907   :  { %v16619_v18 = vcombine.high %v11664_v35, %v11668_v6  ;;  %v16618_v52 = vcombine.low %v11664_v35, %v11668_v6  ;;  %v12037_v6 = vld [vmem:[#allocation4 + $0x1140] sm:$0xff] }
 0x908   :  { %11577 = vmatpush1.bf16.msra.mxu0 %v16604_v32  ;;  %11618 = vmatpush1.bf16.msra.mxu1 %v16606_v7  ;;  %v11675_v32 = vld [vmem:[#allocation4 + $0x1070] sm:$0xff]  ;;  %v11672_v7 = vld [vmem:[#allocation4 + $0x1058] sm:$0xff] }
 0x909   :  { %11856 = vmatprep.subr.bf16.mxu0 %v16613_v58  ;;  %11897 = vmatprep.subr.bf16.mxu1 %v16615_v42  ;;  %v11676_v58 = vld [vmem:[#allocation4 + $0x1078] sm:$0xff]  ;;  %v16616_v42 = vcombine.low %v11663_v13, %v11667_v15  ;;  %v16625_v33 = vcombine.high %v11671_v19, %v11675_v32  ;;  %v12034_v13 = vld [vmem:[#allocation4 + $0x1128] sm:$0xff] }
 0x90a   :  { %v16627_v37 = vcombine.high %v11672_v7, %v11676_v58  ;;  %v16626_v41 = vcombine.low %v11672_v7, %v11676_v58  ;;  %v12045_v7 = vld [vmem:[#allocation4 + $0x1180] sm:$0xff] }
 0x90b   :  { %16610 = vmatmul.mubr.msk.bf16.vlgmr.msra.gmra.mrb[108].mxu0 %vm6013_vm2, %v21055_v23  ;;  %16611 = vmatmul.mubr.msk.bf16.vlgmr.msra.gmra.mrb[108].mxu1 %vm6013_vm2, %v21055_v23  ;;  %v12049_v58 = vld [vmem:[#allocation4 + $0x11a0] sm:$0xff] }
 0x90c   :  { %11857 = vmatpush1.bf16.msra.mxu0 %v16612_v60  ;;  %11898 = vmatpush1.bf16.msra.mxu1 %v16614_v17  ;;  %v11679_v60 = vld [vmem:[#allocation4 + $0x1090] sm:$0xff]  ;;  %v11680_v17 = vld [vmem:[#allocation4 + $0x1098] sm:$0xff] }
 0x90d   :  { %11858 = vmatprep.subr.bf16.mxu0 %v16621_v22  ;;  %11899 = vmatprep.subr.bf16.mxu1 %v16623_v31  ;;  %v11684_v22 = vld [vmem:[#allocation4 + $0x10b8] sm:$0xff]  ;;  %v16624_v31 = vcombine.low %v11671_v19, %v11675_v32  ;;  %v16633_v16 = vcombine.high %v11679_v60, %v11683_v43 }
 0x90e   :  { %v9314_v38 = vpop.f32.mrb[56].mxu0  ;;  %v9355_v44 = vpop.f32.mrb[56].mxu1  ;;  %11888 = vmatprep.mubr.bf16.mxu0 %v18662_v3  ;;  %11929 = vmatprep.mubr.bf16.mxu1 %v18662_v3  ;;  %v16635_v55 = vcombine.high %v11680_v17, %v11684_v22 }
 0x90f   :  { %v21082_v23 = vadd.f32 %v9314_v38, %v21043_v56  ;;  %v21085_v20 = vadd.f32 %v9355_v44, %v21046_v2  ;;  %v9316_v57 = vpop.f32.mrb[57].mxu0  ;;  %v9357_v11 = vpop.f32.mrb[57].mxu1  ;;  %v16637_v2 = vcombine.high %v11685_v51, %v11689_v54 }
 0x910   :  { %v21088_v8 = vadd.f32 %v9316_v57, %v21049_v26  ;;  %v21091_v46 = vadd.f32 %v9357_v11, %v21052_v1  ;;  %v9318_v61 = vpop.f32.mrb[58].mxu0  ;;  %v9359_v48 = vpop.f32.mrb[58].mxu1  ;;  %11859 = vmatpush1.bf16.msra.mxu0 %v16620_v50  ;;  %11900 = vmatpush1.bf16.msra.mxu1 %v16622_v10  ;;  %v16636_v26 = vcombine.low %v11685_v51, %v11689_v54  ;;  %v11692_v51 = vld [vmem:[#allocation4 + $0x10f8] sm:$0xff] }
 0x911   :  { %v9319_v4 = vpop.f32.mrb[59].mxu0  ;;  %v9360_v56 = vpop.f32.mrb[59].mxu1  ;;  %11860 = vmatprep.subr.bf16.mxu0 %v16629_v28  ;;  %11901 = vmatprep.subr.bf16.mxu1 %v16631_v40  ;;  %v16638_v1 = vcombine.low %v11686_v62, %v11690_v9  ;;  %v11691_v28 = vld [vmem:[#allocation4 + $0x10f0] sm:$0xff]  ;;  %v11688_v40 = vld [vmem:[#allocation4 + $0x10d8] sm:$0xff]  ;;  %v16632_v9 = vcombine.low %v11679_v60, %v11683_v43  ;;  %v16634_v48 = vcombine.low %v11680_v17, %v11684_v22  ;;  %v12053_v17 = vld [vmem:[#allocation4 + $0x11c0] sm:$0xff] }
 0x912   :  { %v16643_v4 = vcombine.high %v11688_v40, %v11692_v51  ;;  %v12029_v56 = vld [vmem:[#allocation4 + $0x1100] sm:$0xff]  ;;  %v16665_v60 = vcombine.high %v12045_v7, %v12049_v58 }
 0x914   :  { %11861 = vmatpush1.bf16.msra.mxu0 %v16628_v59  ;;  %11902 = vmatpush1.bf16.msra.mxu1 %v16630_v39 }
 0x915   :  { %11862 = vmatprep.subr.bf16.mxu0 %v16637_v2  ;;  %11903 = vmatprep.subr.bf16.mxu1 %v16639_v21  ;;  %v12033_v2 = vld [vmem:[#allocation4 + $0x1120] sm:$0xff]  ;;  %v12030_v21 = vld [vmem:[#allocation4 + $0x1108] sm:$0xff] }
 0x916   :  { %v16649_v15 = vcombine.high %v12029_v56, %v12033_v2  ;;  %v16651_v35 = vcombine.high %v12030_v21, %v12034_v13 }
 0x918   :  { %11863 = vmatpush1.bf16.msra.mxu0 %v16636_v26  ;;  %11904 = vmatpush1.bf16.msra.mxu1 %v16638_v1  ;;  %v12041_v26 = vld [vmem:[#allocation4 + $0x1160] sm:$0xff]  ;;  %v12038_v1 = vld [vmem:[#allocation4 + $0x1148] sm:$0xff] }
 0x919   :  { %11938 = vmatprep.subr.bf16.mxu0 %v16617_v24  ;;  %11979 = vmatprep.subr.bf16.mxu1 %v16619_v18  ;;  %v16648_v24 = vcombine.low %v12029_v56, %v12033_v2  ;;  %v16650_v18 = vcombine.low %v12030_v21, %v12034_v13  ;;  %v16657_v19 = vcombine.high %v12037_v6, %v12041_v26  ;;  %v12039_v21 = vld [vmem:[#allocation4 + $0x1150] sm:$0xff] }
 0x91a   :  { %v16659_v32 = vcombine.high %v12038_v1, %v12042_v63  ;;  %v12043_v13 = vld [vmem:[#allocation4 + $0x1170] sm:$0xff] }
 0x91b   :  { %16644 = vmatmul.mubr.msk.bf16.vlgmr.msra.gmra.mrb[112].mxu0 %vm6013_vm2, %v21094_v27  ;;  %16645 = vmatmul.mubr.msk.bf16.vlgmr.msra.gmra.mrb[112].mxu1 %vm6013_vm2, %v21094_v27 }
 0x91c   :  { %11939 = vmatpush1.bf16.msra.mxu0 %v16616_v42  ;;  %11980 = vmatpush1.bf16.msra.mxu1 %v16618_v52  ;;  %v12046_v42 = vld [vmem:[#allocation4 + $0x1188] sm:$0xff] }
 0x91d   :  { %11940 = vmatprep.subr.bf16.mxu0 %v16625_v33  ;;  %11981 = vmatprep.subr.bf16.mxu1 %v16627_v37  ;;  %v12050_v52 = vld [vmem:[#allocation4 + $0x11a8] sm:$0xff]  ;;  %v16656_v33 = vcombine.low %v12037_v6, %v12041_v26  ;;  %v16658_v37 = vcombine.low %v12038_v1, %v12042_v63  ;;  %v16661_v26 = vcombine.high %v12039_v21, %v12043_v13  ;;  %v12047_v63 = vld [vmem:[#allocation4 + $0x1190] sm:$0xff] }
 0x91e   :  { %v9396_v50 = vpop.f32.mrb[60].mxu0  ;;  %v9437_v10 = vpop.f32.mrb[60].mxu1  ;;  %11970 = vmatprep.mubr.bf16.mxu0 %v18662_v3  ;;  %12011 = vmatprep.mubr.bf16.mxu1 %v18662_v3  ;;  %v16667_v43 = vcombine.high %v12046_v42, %v12050_v52 }
 0x91f   :  { %v21103_v38 = vadd.f32 %v9396_v50, %v21064_v47  ;;  %v21106_v44 = vadd.f32 %v9437_v10, %v21067_v25  ;;  %v9398_v54 = vpop.f32.mrb[61].mxu0  ;;  %v9439_v62 = vpop.f32.mrb[61].mxu1  ;;  %v16641_v25 = vcombine.high %v11687_v14, %v11691_v28 }
 0x920   :  { %v21109_v57 = vadd.f32 %v9398_v54, %v21070_v49  ;;  %v21112_v11 = vadd.f32 %v9439_v62, %v21073_v12  ;;  %v9400_v59 = vpop.f32.mrb[62].mxu0  ;;  %v9441_v61 = vpop.f32.mrb[62].mxu1  ;;  %11941 = vmatpush1.bf16.msra.mxu0 %v16624_v31  ;;  %11982 = vmatpush1.bf16.msra.mxu1 %v16626_v41  ;;  %v16640_v49 = vcombine.low %v11687_v14, %v11691_v28  ;;  %v12057_v41 = vld [vmem:[#allocation4 + $0x11e0] sm:$0xff] }
 0x921   :  { %v9401_v39 = vpop.f32.mrb[63].mxu0  ;;  %v9442_v47 = vpop.f32.mrb[63].mxu1  ;;  %11942 = vmatprep.subr.bf16.mxu0 %v16633_v16  ;;  %11983 = vmatprep.subr.bf16.mxu1 %v16635_v55  ;;  %v16642_v12 = vcombine.low %v11688_v40, %v11692_v51  ;;  %v12054_v16 = vld [vmem:[#allocation4 + $0x11c8] sm:$0xff]  ;;  %v16664_v28 = vcombine.low %v12045_v7, %v12049_v58 }
 0x922   :  { %v12058_v55 = vld [vmem:[#allocation4 + $0x11e8] sm:$0xff]  ;;  %v12035_v39 = vld [vmem:[#allocation4 + $0x1130] sm:$0xff]  ;;  %v12032_v47 = vld [vmem:[#allocation4 + $0x1118] sm:$0xff] }
 0x923   :  { %v16675_v61 = vcombine.high %v12054_v16, %v12058_v55 }
 0x924   :  { %11943 = vmatpush1.bf16.msra.mxu0 %v16632_v9  ;;  %11984 = vmatpush1.bf16.msra.mxu1 %v16634_v48  ;;  %v16666_v9 = vcombine.low %v12046_v42, %v12050_v52  ;;  %v12031_v48 = vld [vmem:[#allocation4 + $0x1110] sm:$0xff] }
 0x925   :  { %11944 = vmatprep.subr.bf16.mxu0 %v16641_v25  ;;  %11985 = vmatprep.subr.bf16.mxu1 %v16643_v4  ;;  %v12036_v25 = vld [vmem:[#allocation4 + $0x1138] sm:$0xff]  ;;  %v5779_v4 = vmax.f32 %v20663_v5, 0.0  ;;  %v16653_v56 = vcombine.high %v12031_v48, %v12035_v39  ;;  %v12051_v5 = vld [vmem:[#allocation4 + $0x11b0] sm:$0xff] }
 0x926   :  { %v16655_v2 = vcombine.high %v12032_v47, %v12036_v25  ;;  %v16669_v7 = vcombine.high %v12047_v63, %v12051_v5  ;;  %v12055_v42 = vld [vmem:[#allocation4 + $0x11d0] sm:$0xff] }
 0x927   :  { %v21133_v6 = vpack.c.bf16 %v5779_v4, %v5779_v4 }
 0x928   :  { %11945 = vmatpush1.bf16.msra.mxu0 %v16640_v49  ;;  %11986 = vmatpush1.bf16.msra.mxu1 %v16642_v12  ;;  %v12040_v49 = vld [vmem:[#allocation4 + $0x1158] sm:$0xff] }
 0x929   :  { %12224 = vmatprep.subr.bf16.mxu0 %v16649_v15  ;;  %12265 = vmatprep.subr.bf16.mxu1 %v16651_v35  ;;  %v12044_v12 = vld [vmem:[#allocation4 + $0x1178] sm:$0xff]  ;;  %v16652_v15 = vcombine.low %v12031_v48, %v12035_v39  ;;  %v16654_v35 = vcombine.low %v12032_v47, %v12036_v25  ;;  %v12405_v47 = vld [vmem:[#allocation4 + $0x1240] sm:$0xff] }
 0x92a   :  { %v16663_v1 = vcombine.high %v12040_v49, %v12044_v12  ;;  %v12409_v25 = vld [vmem:[#allocation4 + $0x1260] sm:$0xff] }
 0x92b   :  { %16646 = vmatmul.mubr.msk.bf16.vlgmr.msra.gmra.mrb[116].mxu0 %vm6013_vm2, %v21094_v27  ;;  %16647 = vmatmul.mubr.msk.bf16.vlgmr.msra.gmra.mrb[116].mxu1 %vm6013_vm2, %v21094_v27 }
 0x92c   :  { %12225 = vmatpush1.bf16.msra.mxu0 %v16648_v24  ;;  %12266 = vmatpush1.bf16.msra.mxu1 %v16650_v18  ;;  %v12048_v24 = vld [vmem:[#allocation4 + $0x1198] sm:$0xff] }
 0x92d   :  { %12226 = vmatprep.subr.bf16.mxu0 %v16657_v19  ;;  %12267 = vmatprep.subr.bf16.mxu1 %v16659_v32  ;;  %v12052_v18 = vld [vmem:[#allocation4 + $0x11b8] sm:$0xff]  ;;  %v16660_v19 = vcombine.low %v12039_v21, %v12043_v13  ;;  %v16662_v32 = vcombine.low %v12040_v49, %v12044_v12  ;;  %v12413_v13 = vld [vmem:[#allocation4 + $0x1280] sm:$0xff]  ;;  %v12414_v12 = vld [vmem:[#allocation4 + $0x1288] sm:$0xff] }
 0x92e   :  { %v9682_v22 = vpop.f32.mrb[64].mxu0  ;;  %v9723_v31 = vpop.f32.mrb[64].mxu1  ;;  %12256 = vmatprep.mubr.bf16.mxu0 %v18662_v3  ;;  %12297 = vmatprep.mubr.bf16.mxu1 %v18662_v3  ;;  %v16671_v58 = vcombine.high %v12048_v24, %v12052_v18  ;;  %v12417_v49 = vld [vmem:[#allocation4 + $0x12a0] sm:$0xff] }
 0x92f   :  { %v21121_v27 = vadd.f32 %v9682_v22, %v21082_v23  ;;  %v21124_v14 = vadd.f32 %v9723_v31, %v21085_v20  ;;  %v9684_v50 = vpop.f32.mrb[65].mxu0  ;;  %v9725_v10 = vpop.f32.mrb[65].mxu1  ;;  %v16673_v20 = vcombine.high %v12053_v17, %v12057_v41 }
 0x930   :  { %v21127_v40 = vadd.f32 %v9684_v50, %v21088_v8  ;;  %v21130_v51 = vadd.f32 %v9725_v10, %v21091_v46  ;;  %v9686_v54 = vpop.f32.mrb[66].mxu0  ;;  %v9727_v62 = vpop.f32.mrb[66].mxu1  ;;  %12227 = vmatpush1.bf16.msra.mxu0 %v16656_v33  ;;  %12268 = vmatpush1.bf16.msra.mxu1 %v16658_v37  ;;  %v16672_v8 = vcombine.low %v12053_v17, %v12057_v41  ;;  %v12059_v37 = vld [vmem:[#allocation4 + $0x11f0] sm:$0xff] }
 0x931   :  { %v9687_v59 = vpop.f32.mrb[67].mxu0  ;;  %v9728_v23 = vpop.f32.mrb[67].mxu1  ;;  %12228 = vmatprep.subr.bf16.mxu0 %v16665_v60  ;;  %12269 = vmatprep.subr.bf16.mxu1 %v16667_v43  ;;  %v16674_v46 = vcombine.low %v12054_v16, %v12058_v55  ;;  %v12056_v60 = vld [vmem:[#allocation4 + $0x11d8] sm:$0xff]  ;;  %v16668_v16 = vcombine.low %v12047_v63, %v12051_v5  ;;  %v16670_v54 = vcombine.low %v12048_v24, %v12052_v18  ;;  %v12421_v5 = vld [vmem:[#allocation4 + $0x12c0] sm:$0xff] }
 0x932   :  { %v12060_v43 = vld [vmem:[#allocation4 + $0x11f8] sm:$0xff]  ;;  %v12397_v59 = vld [vmem:[#allocation4 + $0x1200] sm:$0xff] }
 0x933   :  { %v12401_v23 = vld [vmem:[#allocation4 + $0x1220] sm:$0xff] }
 0x934   :  { %12229 = vmatpush1.bf16.msra.mxu0 %v16664_v28  ;;  %12270 = vmatpush1.bf16.msra.mxu1 %v16666_v9  ;;  %v16679_v9 = vcombine.high %v12056_v60, %v12060_v43  ;;  %v16685_v48 = vcombine.high %v12397_v59, %v12401_v23  ;;  %v16684_v4 = vcombine.low %v12397_v59, %v12401_v23  ;;  %v12407_v23 = vld [vmem:[#allocation4 + $0x1250] sm:$0xff] }
 0x935   :  { %12230 = vmatprep.subr.bf16.mxu0 %v16673_v20  ;;  %12271 = vmatprep.subr.bf16.mxu1 %v16675_v61  ;;  %v12398_v20 = vld [vmem:[#allocation4 + $0x1208] sm:$0xff] }
 0x936   :  { %v12402_v61 = vld [vmem:[#allocation4 + $0x1228] sm:$0xff] }
 0x937   :  { %v16687_v39 = vcombine.high %v12398_v20, %v12402_v61 }
 0x938   :  { %12231 = vmatpush1.bf16.msra.mxu0 %v16672_v8  ;;  %12272 = vmatpush1.bf16.msra.mxu1 %v16674_v46  ;;  %v12406_v8 = vld [vmem:[#allocation4 + $0x1248] sm:$0xff] }
 0x939   :  { %12306 = vmatprep.subr.bf16.mxu0 %v16653_v56  ;;  %12347 = vmatprep.subr.bf16.mxu1 %v16655_v2  ;;  %v12410_v46 = vld [vmem:[#allocation4 + $0x1268] sm:$0xff]  ;;  %v16686_v56 = vcombine.low %v12398_v20, %v12402_v61  ;;  %v16693_v2 = vcombine.high %v12405_v47, %v12409_v25  ;;  %v12411_v20 = vld [vmem:[#allocation4 + $0x1270] sm:$0xff]  ;;  %v12408_v61 = vld [vmem:[#allocation4 + $0x1258] sm:$0xff] }
 0x93a   :  { %v16695_v21 = vcombine.high %v12406_v8, %v12410_v46 }
 0x93b   :  { %16680 = vmatmul.mubr.msk.bf16.vlgmr.msra.gmra.mrb[120].mxu0 %vm6013_vm2, %v21133_v6  ;;  %16681 = vmatmul.mubr.msk.bf16.vlgmr.msra.gmra.mrb[120].mxu1 %vm6013_vm2, %v21133_v6 }
 0x93c   :  { %12307 = vmatpush1.bf16.msra.mxu0 %v16652_v15  ;;  %12348 = vmatpush1.bf16.msra.mxu1 %v16654_v35  ;;  %v12418_v15 = vld [vmem:[#allocation4 + $0x12a8] sm:$0xff]  ;;  %v16692_v35 = vcombine.low %v12405_v47, %v12409_v25  ;;  %v16697_v47 = vcombine.high %v12407_v23, %v12411_v20 }
 0x93d   :  { %12308 = vmatprep.subr.bf16.mxu0 %v16661_v26  ;;  %12349 = vmatprep.subr.bf16.mxu1 %v16663_v1  ;;  %v16694_v26 = vcombine.low %v12406_v8, %v12410_v46  ;;  %v16701_v1 = vcombine.high %v12413_v13, %v12417_v49  ;;  %v16703_v63 = vcombine.high %v12414_v12, %v12418_v15  ;;  %v12415_v8 = vld [vmem:[#allocation4 + $0x1290] sm:$0xff]  ;;  %v12416_v46 = vld [vmem:[#allocation4 + $0x1298] sm:$0xff] }
 0x93e   :  { %v9764_v52 = vpop.f32.mrb[68].mxu0  ;;  %v9805_v33 = vpop.f32.mrb[68].mxu1  ;;  %12338 = vmatprep.mubr.bf16.mxu0 %v18662_v3  ;;  %12379 = vmatprep.mubr.bf16.mxu1 %v18662_v3 }
 0x93f   :  { %v21142_v17 = vadd.f32 %v9764_v52, %v21103_v38  ;;  %v21145_v22 = vadd.f32 %v9805_v33, %v21106_v44  ;;  %v9766_v31 = vpop.f32.mrb[69].mxu0  ;;  %v9807_v41 = vpop.f32.mrb[69].mxu1  ;;  %v16677_v44 = vcombine.high %v12055_v42, %v12059_v37  ;;  %v16700_v33 = vcombine.low %v12413_v13, %v12417_v49  ;;  %v12423_v49 = vld [vmem:[#allocation4 + $0x12d0] sm:$0xff] }
 0x940   :  { %v21148_v55 = vadd.f32 %v9766_v31, %v21109_v57  ;;  %v21151_v50 = vadd.f32 %v9807_v41, %v21112_v11  ;;  %v9768_v10 = vpop.f32.mrb[70].mxu0  ;;  %v9809_v28 = vpop.f32.mrb[70].mxu1  ;;  %12309 = vmatpush1.bf16.msra.mxu0 %v16660_v19  ;;  %12350 = vmatpush1.bf16.msra.mxu1 %v16662_v32  ;;  %v16676_v57 = vcombine.low %v12055_v42, %v12059_v37  ;;  %v12425_v19 = vld [vmem:[#allocation4 + $0x12e0] sm:$0xff]  ;;  %v12422_v32 = vld [vmem:[#allocation4 + $0x12c8] sm:$0xff] }
 0x941   :  { %v9769_v62 = vpop.f32.mrb[71].mxu0  ;;  %v9810_v38 = vpop.f32.mrb[71].mxu1  ;;  %12310 = vmatprep.subr.bf16.mxu0 %v16669_v7  ;;  %12351 = vmatprep.subr.bf16.mxu1 %v16671_v58  ;;  %v16678_v11 = vcombine.low %v12056_v60, %v12060_v43  ;;  %v12426_v7 = vld [vmem:[#allocation4 + $0x12e8] sm:$0xff]  ;;  %v16702_v41 = vcombine.low %v12414_v12, %v12418_v15  ;;  %v12399_v28 = vld [vmem:[#allocation4 + $0x1210] sm:$0xff] }
 0x942   :  { %v16711_v10 = vcombine.high %v12422_v32, %v12426_v7  ;;  %v12400_v62 = vld [vmem:[#allocation4 + $0x1218] sm:$0xff] }
 0x943   :  { %v12404_v38 = vld [vmem:[#allocation4 + $0x1238] sm:$0xff] }
 0x944   :  { %12311 = vmatpush1.bf16.msra.mxu0 %v16668_v16  ;;  %12352 = vmatpush1.bf16.msra.mxu1 %v16670_v54  ;;  %v12403_v54 = vld [vmem:[#allocation4 + $0x1230] sm:$0xff]  ;;  %v16691_v59 = vcombine.high %v12400_v62, %v12404_v38 }
 0x945   :  { %12312 = vmatprep.subr.bf16.mxu0 %v16677_v44  ;;  %12353 = vmatprep.subr.bf16.mxu1 %v16679_v9  ;;  %v5780_v44 = vmax.f32 %v20669_v0, 0.0  ;;  %v16689_v9 = vcombine.high %v12399_v28, %v12403_v54  ;;  %v12419_v0 = vld [vmem:[#allocation4 + $0x12b0] sm:$0xff] }
 0x948   :  { %12313 = vmatpush1.bf16.msra.mxu0 %v16676_v57  ;;  %12354 = vmatpush1.bf16.msra.mxu1 %v16678_v11  ;;  %v12412_v57 = vld [vmem:[#allocation4 + $0x1278] sm:$0xff]  ;;  %v16688_v11 = vcombine.low %v12399_v28, %v12403_v54  ;;  %v12773_v54 = vld [vmem:[#allocation4 + $0x1340] sm:$0xff] }
 0x949   :  { %12592 = vmatprep.subr.bf16.mxu0 %v16685_v48  ;;  %12633 = vmatprep.subr.bf16.mxu1 %v16687_v39  ;;  %v16690_v48 = vcombine.low %v12400_v62, %v12404_v38  ;;  %v21172_v39 = vpack.c.bf16 %v5780_v44, %v5780_v44  ;;  %v16699_v25 = vcombine.high %v12408_v61, %v12412_v57  ;;  %v12777_v62 = vld [vmem:[#allocation4 + $0x1360] sm:$0xff]  ;;  %v12774_v38 = vld [vmem:[#allocation4 + $0x1348] sm:$0xff] }
 0x94b   :  { %16682 = vmatmul.mubr.msk.bf16.vlgmr.msra.gmra.mrb[124].mxu0 %vm6013_vm2, %v21133_v6  ;;  %16683 = vmatmul.mubr.msk.bf16.vlgmr.msra.gmra.mrb[124].mxu1 %vm6013_vm2, %v21133_v6 }
 0x94c   :  { %12593 = vmatpush1.bf16.msra.mxu0 %v16684_v4  ;;  %12634 = vmatpush1.bf16.msra.mxu1 %v16686_v56  ;;  %v12420_v4 = vld [vmem:[#allocation4 + $0x12b8] sm:$0xff]  ;;  %v16696_v56 = vcombine.low %v12407_v23, %v12411_v20  ;;  %v12781_v23 = vld [vmem:[#allocation4 + $0x1380] sm:$0xff] }
 0x94d   :  { %12594 = vmatprep.subr.bf16.mxu0 %v16693_v2  ;;  %12635 = vmatprep.subr.bf16.mxu1 %v16695_v21  ;;  %v16698_v2 = vcombine.low %v12408_v61, %v12412_v57  ;;  %v16705_v21 = vcombine.high %v12415_v8, %v12419_v0  ;;  %v16707_v13 = vcombine.high %v12416_v46, %v12420_v4  ;;  %v12785_v20 = vld [vmem:[#allocation4 + $0x13a0] sm:$0xff]  ;;  %v12782_v61 = vld [vmem:[#allocation4 + $0x1388] sm:$0xff] }
 0x94e   :  { %v10050_v24 = vpop.f32.mrb[72].mxu0  ;;  %v10091_v18 = vpop.f32.mrb[72].mxu1  ;;  %12624 = vmatprep.mubr.bf16.mxu0 %v18662_v3  ;;  %12665 = vmatprep.mubr.bf16.mxu1 %v18662_v3  ;;  %v12786_v57 = vld [vmem:[#allocation4 + $0x13a8] sm:$0xff] }
 0x94f   :  { %v21160_v6 = vadd.f32 %v10050_v24, %v21121_v27  ;;  %v21163_v58 = vadd.f32 %v10091_v18, %v21124_v14  ;;  %v10052_v42 = vpop.f32.mrb[73].mxu0  ;;  %v10093_v52 = vpop.f32.mrb[73].mxu1  ;;  %v16709_v14 = vcombine.high %v12421_v5, %v12425_v19 }
 0x950   :  { %v21166_v37 = vadd.f32 %v10052_v42, %v21127_v40  ;;  %v21169_v60 = vadd.f32 %v10093_v52, %v21130_v51  ;;  %v10054_v43 = vpop.f32.mrb[74].mxu0  ;;  %v10095_v31 = vpop.f32.mrb[74].mxu1  ;;  %12595 = vmatpush1.bf16.msra.mxu0 %v16692_v35  ;;  %12636 = vmatpush1.bf16.msra.mxu1 %v16694_v26  ;;  %v16708_v40 = vcombine.low %v12421_v5, %v12425_v19  ;;  %v12427_v35 = vld [vmem:[#allocation4 + $0x12f0] sm:$0xff]  ;;  %v12424_v26 = vld [vmem:[#allocation4 + $0x12d8] sm:$0xff] }
 0x951   :  { %v10055_v16 = vpop.f32.mrb[75].mxu0  ;;  %v10096_v27 = vpop.f32.mrb[75].mxu1  ;;  %12596 = vmatprep.subr.bf16.mxu0 %v16701_v1  ;;  %12637 = vmatprep.subr.bf16.mxu1 %v16703_v63  ;;  %v16710_v51 = vcombine.low %v12422_v32, %v12426_v7  ;;  %v12428_v1 = vld [vmem:[#allocation4 + $0x12f8] sm:$0xff]  ;;  %v16704_v19 = vcombine.low %v12415_v8, %v12419_v0  ;;  %v12789_v8 = vld [vmem:[#allocation4 + $0x13c0] sm:$0xff] }
 0x952   :  { %v16715_v31 = vcombine.high %v12424_v26, %v12428_v1  ;;  %v12769_v16 = vld [vmem:[#allocation4 + $0x1320] sm:$0xff]  ;;  %v12766_v27 = vld [vmem:[#allocation4 + $0x1308] sm:$0xff] }
 0x954   :  { %12597 = vmatpush1.bf16.msra.mxu0 %v16700_v33  ;;  %12638 = vmatpush1.bf16.msra.mxu1 %v16702_v41  ;;  %v16706_v33 = vcombine.low %v12416_v46, %v12420_v4  ;;  %v12765_v41 = vld [vmem:[#allocation4 + $0x1300] sm:$0xff] }
 0x955   :  { %12598 = vmatprep.subr.bf16.mxu0 %v16709_v14  ;;  %12639 = vmatprep.subr.bf16.mxu1 %v16711_v10  ;;  %v12770_v14 = vld [vmem:[#allocation4 + $0x1328] sm:$0xff]  ;;  %v16721_v10 = vcombine.high %v12765_v41, %v12769_v16  ;;  %v12793_v4 = vld [vmem:[#allocation4 + $0x13e0] sm:$0xff] }
 0x956   :  { %v16723_v28 = vcombine.high %v12766_v27, %v12770_v14  ;;  %v16722_v44 = vcombine.low %v12766_v27, %v12770_v14  ;;  %v12776_v27 = vld [vmem:[#allocation4 + $0x1358] sm:$0xff] }
 0x957   :  { %v12780_v14 = vld [vmem:[#allocation4 + $0x1378] sm:$0xff] }
 0x958   :  { %12599 = vmatpush1.bf16.msra.mxu0 %v16708_v40  ;;  %12640 = vmatpush1.bf16.msra.mxu1 %v16710_v51  ;;  %v12778_v40 = vld [vmem:[#allocation4 + $0x1368] sm:$0xff]  ;;  %v16720_v51 = vcombine.low %v12765_v41, %v12769_v16  ;;  %v12775_v41 = vld [vmem:[#allocation4 + $0x1350] sm:$0xff] }
 0x959   :  { %12674 = vmatprep.subr.bf16.mxu0 %v16689_v9  ;;  %12715 = vmatprep.subr.bf16.mxu1 %v16691_v59  ;;  %v16729_v9 = vcombine.high %v12773_v54, %v12777_v62  ;;  %v16731_v59 = vcombine.high %v12774_v38, %v12778_v40  ;;  %v12779_v16 = vld [vmem:[#allocation4 + $0x1370] sm:$0xff] }
 0x95b   :  { %16716 = vmatmul.mubr.msk.bf16.vlgmr.msra.gmra.mrb[128].mxu0 %vm6013_vm2, %v21172_v39  ;;  %16717 = vmatmul.mubr.msk.bf16.vlgmr.msra.gmra.mrb[128].mxu1 %vm6013_vm2, %v21172_v39 }
 0x95c   :  { %12675 = vmatpush1.bf16.msra.mxu0 %v16688_v11  ;;  %12716 = vmatpush1.bf16.msra.mxu1 %v16690_v48  ;;  %v16728_v11 = vcombine.low %v12773_v54, %v12777_v62  ;;  %v16730_v48 = vcombine.low %v12774_v38, %v12778_v40  ;;  %v16735_v54 = vcombine.high %v12776_v27, %v12780_v14  ;;  %v12783_v62 = vld [vmem:[#allocation4 + $0x1390] sm:$0xff]  ;;  %v12784_v38 = vld [vmem:[#allocation4 + $0x1398] sm:$0xff] }
 0x95d   :  { %12676 = vmatprep.subr.bf16.mxu0 %v16697_v47  ;;  %12717 = vmatprep.subr.bf16.mxu1 %v16699_v25  ;;  %v16737_v47 = vcombine.high %v12781_v23, %v12785_v20  ;;  %v16739_v25 = vcombine.high %v12782_v61, %v12786_v57  ;;  %v12788_v40 = vld [vmem:[#allocation4 + $0x13b8] sm:$0xff] }
 0x95e   :  { %v10132_v12 = vpop.f32.mrb[76].mxu0  ;;  %v10173_v15 = vpop.f32.mrb[76].mxu1  ;;  %12706 = vmatprep.mubr.bf16.mxu0 %v18662_v3  ;;  %12747 = vmatprep.mubr.bf16.mxu1 %v18662_v3 }
 0x95f   :  { %v21181_v63 = vadd.f32 %v10132_v12, %v21142_v17  ;;  %v21184_v5 = vadd.f32 %v10173_v15, %v21145_v22  ;;  %v10134_v24 = vpop.f32.mrb[77].mxu0  ;;  %v10175_v18 = vpop.f32.mrb[77].mxu1  ;;  %v16713_v22 = vcombine.high %v12423_v49, %v12427_v35  ;;  %v16736_v12 = vcombine.low %v12781_v23, %v12785_v20  ;;  %v12791_v23 = vld [vmem:[#allocation4 + $0x13d0] sm:$0xff] }
 0x960   :  { %v21187_v32 = vadd.f32 %v10134_v24, %v21148_v55  ;;  %v21190_v7 = vadd.f32 %v10175_v18, %v21151_v50  ;;  %v10136_v42 = vpop.f32.mrb[78].mxu0  ;;  %v10177_v52 = vpop.f32.mrb[78].mxu1  ;;  %12677 = vmatpush1.bf16.msra.mxu0 %v16696_v56  ;;  %12718 = vmatpush1.bf16.msra.mxu1 %v16698_v2  ;;  %v16712_v55 = vcombine.low %v12423_v49, %v12427_v35  ;;  %v12790_v56 = vld [vmem:[#allocation4 + $0x13c8] sm:$0xff] }
 0x961   :  { %v10137_v43 = vpop.f32.mrb[79].mxu0  ;;  %v10178_v17 = vpop.f32.mrb[79].mxu1  ;;  %12678 = vmatprep.subr.bf16.mxu0 %v16705_v21  ;;  %12719 = vmatprep.subr.bf16.mxu1 %v16707_v13  ;;  %v16714_v50 = vcombine.low %v12424_v26, %v12428_v1  ;;  %v12794_v2 = vld [vmem:[#allocation4 + $0x13e8] sm:$0xff]  ;;  %v16738_v24 = vcombine.low %v12782_v61, %v12786_v57  ;;  %v12767_v42 = vld [vmem:[#allocation4 + $0x1310] sm:$0xff] }
 0x962   :  { %v12771_v52 = vld [vmem:[#allocation4 + $0x1330] sm:$0xff]  ;;  %v12772_v43 = vld [vmem:[#allocation4 + $0x1338] sm:$0xff]  ;;  %v5781_v17 = vmax.f32 %v20660_v30, 0.0 }
 0x963   :  { %v12787_v30 = vld [vmem:[#allocation4 + $0x13b0] sm:$0xff] }
 0x964   :  { %12679 = vmatpush1.bf16.msra.mxu0 %v16704_v19  ;;  %12720 = vmatpush1.bf16.msra.mxu1 %v16706_v33  ;;  %v16747_v19 = vcombine.high %v12790_v56, %v12794_v2  ;;  %v12768_v33 = vld [vmem:[#allocation4 + $0x1318] sm:$0xff]  ;;  %v12795_v57 = vld [vmem:[#allocation4 + $0x13f0] sm:$0xff] }
 0x965   :  { %12680 = vmatprep.subr.bf16.mxu0 %v16713_v22  ;;  %12721 = vmatprep.subr.bf16.mxu1 %v16715_v31  ;;  %v16725_v22 = vcombine.high %v12767_v42, %v12771_v52  ;;  %v16727_v31 = vcombine.high %v12768_v33, %v12772_v43 }
 0x968   :  { %12681 = vmatpush1.bf16.msra.mxu0 %v16712_v55  ;;  %12722 = vmatpush1.bf16.msra.mxu1 %v16714_v50  ;;  %v16724_v55 = vcombine.low %v12767_v42, %v12771_v52  ;;  %v16726_v50 = vcombine.low %v12768_v33, %v12772_v43  ;;  %v13141_v42 = vld [vmem:[#allocation4 + $0x1440] sm:$0xff]  ;;  %v13142_v33 = vld [vmem:[#allocation4 + $0x1448] sm:$0xff] }
 0x969   :  { %12960 = vmatprep.subr.bf16.mxu0 %v16721_v10  ;;  %13001 = vmatprep.subr.bf16.mxu1 %v16723_v28  ;;  %v21211_v10 = vpack.c.bf16 %v5781_v17, %v5781_v17  ;;  %v16733_v28 = vcombine.high %v12775_v41, %v12779_v16  ;;  %v13145_v52 = vld [vmem:[#allocation4 + $0x1460] sm:$0xff]  ;;  %v13146_v43 = vld [vmem:[#allocation4 + $0x1468] sm:$0xff] }
 0x96a   :  { %v16765_v17 = vcombine.high %v13141_v42, %v13145_v52 }
 0x96b   :  { %16718 = vmatmul.mubr.msk.bf16.vlgmr.msra.gmra.mrb[132].mxu0 %vm6013_vm2, %v21172_v39  ;;  %16719 = vmatmul.mubr.msk.bf16.vlgmr.msra.gmra.mrb[132].mxu1 %vm6013_vm2, %v21172_v39 }
 0x96c   :  { %12961 = vmatpush1.bf16.msra.mxu0 %v16720_v51  ;;  %13002 = vmatpush1.bf16.msra.mxu1 %v16722_v44  ;;  %v16732_v51 = vcombine.low %v12775_v41, %v12779_v16  ;;  %v16734_v44 = vcombine.low %v12776_v27, %v12780_v14  ;;  %v13153_v41 = vld [vmem:[#allocation4 + $0x14a0] sm:$0xff]  ;;  %v13150_v16 = vld [vmem:[#allocation4 + $0x1488] sm:$0xff]  ;;  %v16764_v14 = vcombine.low %v13141_v42, %v13145_v52  ;;  %v13151_v42 = vld [vmem:[#allocation4 + $0x1490] sm:$0xff] }
 0x96d   :  { %12962 = vmatprep.subr.bf16.mxu0 %v16729_v9  ;;  %13003 = vmatprep.subr.bf16.mxu1 %v16731_v59  ;;  %v16741_v9 = vcombine.high %v12783_v62, %v12787_v30  ;;  %v16743_v59 = vcombine.high %v12784_v38, %v12788_v40  ;;  %v13154_v27 = vld [vmem:[#allocation4 + $0x14a8] sm:$0xff]  ;;  %v13152_v52 = vld [vmem:[#allocation4 + $0x1498] sm:$0xff] }
 0x96e   :  { %v10418_v0 = vpop.f32.mrb[80].mxu0  ;;  %v10459_v46 = vpop.f32.mrb[80].mxu1  ;;  %12992 = vmatprep.mubr.bf16.mxu0 %v18662_v3  ;;  %13033 = vmatprep.mubr.bf16.mxu1 %v18662_v3 }
 0x96f   :  { %v21199_v39 = vadd.f32 %v10418_v0, %v21160_v6  ;;  %v21202_v21 = vadd.f32 %v10459_v46, %v21163_v58  ;;  %v10420_v13 = vpop.f32.mrb[81].mxu0  ;;  %v10461_v49 = vpop.f32.mrb[81].mxu1  ;;  %v16745_v58 = vcombine.high %v12789_v8, %v12793_v4  ;;  %v16740_v46 = vcombine.low %v12783_v62, %v12787_v30 }
 0x970   :  { %v21205_v15 = vadd.f32 %v10420_v13, %v21166_v37  ;;  %v21208_v35 = vadd.f32 %v10461_v49, %v21169_v60  ;;  %v10422_v26 = vpop.f32.mrb[82].mxu0  ;;  %v10463_v1 = vpop.f32.mrb[82].mxu1  ;;  %12963 = vmatpush1.bf16.msra.mxu0 %v16728_v11  ;;  %13004 = vmatpush1.bf16.msra.mxu1 %v16730_v48  ;;  %v16744_v37 = vcombine.low %v12789_v8, %v12793_v4  ;;  %v12792_v11 = vld [vmem:[#allocation4 + $0x13d8] sm:$0xff] }
 0x971   :  { %v10423_v18 = vpop.f32.mrb[83].mxu0  ;;  %v10464_v6 = vpop.f32.mrb[83].mxu1  ;;  %12964 = vmatprep.subr.bf16.mxu0 %v16737_v47  ;;  %13005 = vmatprep.subr.bf16.mxu1 %v16739_v25  ;;  %v16746_v60 = vcombine.low %v12790_v56, %v12794_v2  ;;  %v12796_v48 = vld [vmem:[#allocation4 + $0x13f8] sm:$0xff]  ;;  %v16742_v49 = vcombine.low %v12784_v38, %v12788_v40  ;;  %v13133_v1 = vld [vmem:[#allocation4 + $0x1400] sm:$0xff]  ;;  %v13158_v40 = vld [vmem:[#allocation4 + $0x14c8] sm:$0xff] }
 0x972   :  { %v16751_v26 = vcombine.high %v12792_v11, %v12796_v48  ;;  %v13134_v18 = vld [vmem:[#allocation4 + $0x1408] sm:$0xff]  ;;  %v13161_v38 = vld [vmem:[#allocation4 + $0x14e0] sm:$0xff] }
 0x973   :  { %v13138_v6 = vld [vmem:[#allocation4 + $0x1428] sm:$0xff] }
 0x974   :  { %12965 = vmatpush1.bf16.msra.mxu0 %v16736_v12  ;;  %13006 = vmatpush1.bf16.msra.mxu1 %v16738_v24  ;;  %v13137_v24 = vld [vmem:[#allocation4 + $0x1420] sm:$0xff] }
 0x975   :  { %12966 = vmatprep.subr.bf16.mxu0 %v16745_v58  ;;  %13007 = vmatprep.subr.bf16.mxu1 %v16747_v19  ;;  %v16757_v58 = vcombine.high %v13133_v1, %v13137_v24  ;;  %v16759_v19 = vcombine.high %v13134_v18, %v13138_v6 }
 0x978   :  { %12967 = vmatpush1.bf16.msra.mxu0 %v16744_v37  ;;  %13008 = vmatpush1.bf16.msra.mxu1 %v16746_v60  ;;  %v16756_v37 = vcombine.low %v13133_v1, %v13137_v24  ;;  %v16758_v60 = vcombine.low %v13134_v18, %v13138_v6  ;;  %v13147_v1 = vld [vmem:[#allocation4 + $0x1470] sm:$0xff]  ;;  %v13144_v24 = vld [vmem:[#allocation4 + $0x1458] sm:$0xff] }
 0x979   :  { %13042 = vmatprep.subr.bf16.mxu0 %v16725_v22  ;;  %13083 = vmatprep.subr.bf16.mxu1 %v16727_v31  ;;  %v16767_v22 = vcombine.high %v13142_v33, %v13146_v43  ;;  %v13149_v31 = vld [vmem:[#allocation4 + $0x1480] sm:$0xff]  ;;  %v13148_v18 = vld [vmem:[#allocation4 + $0x1478] sm:$0xff] }
 0x97b   :  { %16752 = vmatmul.mubr.msk.bf16.vlgmr.msra.gmra.mrb[136].mxu0 %vm6013_vm2, %v21211_v10  ;;  %16753 = vmatmul.mubr.msk.bf16.vlgmr.msra.gmra.mrb[136].mxu1 %vm6013_vm2, %v21211_v10 }
 0x97c   :  { %13043 = vmatpush1.bf16.msra.mxu0 %v16724_v55  ;;  %13084 = vmatpush1.bf16.msra.mxu1 %v16726_v50  ;;  %v16766_v55 = vcombine.low %v13142_v33, %v13146_v43  ;;  %v16773_v50 = vcombine.high %v13149_v31, %v13153_v41  ;;  %v13156_v33 = vld [vmem:[#allocation4 + $0x14b8] sm:$0xff] }
 0x97d   :  { %13044 = vmatprep.subr.bf16.mxu0 %v16733_v28  ;;  %13085 = vmatprep.subr.bf16.mxu1 %v16735_v54  ;;  %v16775_v28 = vcombine.high %v13150_v16, %v13154_v27  ;;  %v13157_v54 = vld [vmem:[#allocation4 + $0x14c0] sm:$0xff] }
 0x97e   :  { %v10500_v20 = vpop.f32.mrb[84].mxu0  ;;  %v10541_v61 = vpop.f32.mrb[84].mxu1  ;;  %13074 = vmatprep.mubr.bf16.mxu0 %v18662_v3  ;;  %13115 = vmatprep.mubr.bf16.mxu1 %v18662_v3 }
 0x97f   :  { %v21220_v47 = vadd.f32 %v10500_v20, %v21181_v63  ;;  %v21223_v25 = vadd.f32 %v10541_v61, %v21184_v5  ;;  %v10502_v8 = vpop.f32.mrb[85].mxu0  ;;  %v10543_v0 = vpop.f32.mrb[85].mxu1  ;;  %v16749_v5 = vcombine.high %v12791_v23, %v12795_v57 }
 0x980   :  { %v21226_v4 = vadd.f32 %v10502_v8, %v21187_v32  ;;  %v21229_v56 = vadd.f32 %v10543_v0, %v21190_v7  ;;  %v10504_v2 = vpop.f32.mrb[86].mxu0  ;;  %v10545_v13 = vpop.f32.mrb[86].mxu1  ;;  %13045 = vmatpush1.bf16.msra.mxu0 %v16732_v51  ;;  %13086 = vmatpush1.bf16.msra.mxu1 %v16734_v44  ;;  %v16748_v32 = vcombine.low %v12791_v23, %v12795_v57  ;;  %v13162_v51 = vld [vmem:[#allocation4 + $0x14e8] sm:$0xff] }
 0x981   :  { %v10505_v12 = vpop.f32.mrb[87].mxu0  ;;  %v10546_v63 = vpop.f32.mrb[87].mxu1  ;;  %13046 = vmatprep.subr.bf16.mxu0 %v16741_v9  ;;  %13087 = vmatprep.subr.bf16.mxu1 %v16743_v59  ;;  %v16750_v7 = vcombine.low %v12792_v11, %v12796_v48  ;;  %v16772_v23 = vcombine.low %v13149_v31, %v13153_v41  ;;  %v16774_v48 = vcombine.low %v13150_v16, %v13154_v27  ;;  %v13139_v2 = vld [vmem:[#allocation4 + $0x1430] sm:$0xff]  ;;  %v13136_v13 = vld [vmem:[#allocation4 + $0x1418] sm:$0xff] }
 0x982   :  { %v16783_v0 = vcombine.high %v13158_v40, %v13162_v51  ;;  %v5782_v12 = vmax.f32 %v20675_v53, 0.0  ;;  %v13155_v53 = vld [vmem:[#allocation4 + $0x14b0] sm:$0xff]  ;;  %v13160_v27 = vld [vmem:[#allocation4 + $0x14d8] sm:$0xff] }
 0x983   :  { %v13163_v16 = vld [vmem:[#allocation4 + $0x14f0] sm:$0xff] }
 0x984   :  { %13047 = vmatpush1.bf16.msra.mxu0 %v16740_v46  ;;  %13088 = vmatpush1.bf16.msra.mxu1 %v16742_v49  ;;  %v13135_v46 = vld [vmem:[#allocation4 + $0x1410] sm:$0xff]  ;;  %v13140_v49 = vld [vmem:[#allocation4 + $0x1438] sm:$0xff] }
 0x985   :  { %13048 = vmatprep.subr.bf16.mxu0 %v16749_v5  ;;  %13089 = vmatprep.subr.bf16.mxu1 %v16751_v26  ;;  %v16761_v63 = vcombine.high %v13135_v46, %v13139_v2  ;;  %v16763_v5 = vcombine.high %v13136_v13, %v13140_v49  ;;  %v13143_v26 = vld [vmem:[#allocation4 + $0x1450] sm:$0xff]  ;;  %v16760_v6 = vcombine.low %v13135_v46, %v13139_v2  ;;  %v13513_v46 = vld [vmem:[#allocation4 + $0x1560] sm:$0xff]  ;;  %v13510_v2 = vld [vmem:[#allocation4 + $0x1548] sm:$0xff] }
 0x986   :  { %v16768_v43 = vcombine.low %v13143_v26, %v13147_v1 }
 0x988   :  { %13049 = vmatpush1.bf16.msra.mxu0 %v16748_v32  ;;  %13090 = vmatpush1.bf16.msra.mxu1 %v16750_v7  ;;  %v16762_v32 = vcombine.low %v13136_v13, %v13140_v49  ;;  %v21250_v7 = vpack.c.bf16 %v5782_v12, %v5782_v12  ;;  %v13514_v13 = vld [vmem:[#allocation4 + $0x1568] sm:$0xff] }
 0x989   :  { %13328 = vmatprep.subr.bf16.mxu0 %v16757_v58  ;;  %13369 = vmatprep.subr.bf16.mxu1 %v16759_v19  ;;  %v16769_v58 = vcombine.high %v13143_v26, %v13147_v1  ;;  %v16771_v19 = vcombine.high %v13144_v24, %v13148_v18  ;;  %v16803_v12 = vcombine.high %v13510_v2, %v13514_v13  ;;  %v13518_v26 = vld [vmem:[#allocation4 + $0x1588] sm:$0xff] }
 0x98a   :  { %v13522_v1 = vld [vmem:[#allocation4 + $0x15a8] sm:$0xff] }
 0x98b   :  { %16754 = vmatmul.mubr.msk.bf16.vlgmr.msra.gmra.mrb[140].mxu0 %vm6013_vm2, %v21211_v10  ;;  %16755 = vmatmul.mubr.msk.bf16.vlgmr.msra.gmra.mrb[140].mxu1 %vm6013_vm2, %v21211_v10 }
 0x98c   :  { %13329 = vmatpush1.bf16.msra.mxu0 %v16756_v37  ;;  %13370 = vmatpush1.bf16.msra.mxu1 %v16758_v60  ;;  %v16770_v37 = vcombine.low %v13144_v24, %v13148_v18  ;;  %v16777_v60 = vcombine.high %v13151_v42, %v13155_v53  ;;  %v16802_v18 = vcombine.low %v13510_v2, %v13514_v13 }
 0x98d   :  { %13330 = vmatprep.subr.bf16.mxu0 %v16765_v17  ;;  %13371 = vmatprep.subr.bf16.mxu1 %v16767_v22  ;;  %v16779_v17 = vcombine.high %v13152_v52, %v13156_v33  ;;  %v13159_v22 = vld [vmem:[#allocation4 + $0x14d0] sm:$0xff] }
 0x98e   :  { %v10786_v62 = vpop.f32.mrb[88].mxu0  ;;  %v10827_v30 = vpop.f32.mrb[88].mxu1  ;;  %13360 = vmatprep.mubr.bf16.mxu0 %v18662_v3  ;;  %13401 = vmatprep.mubr.bf16.mxu1 %v18662_v3 }
 0x98f   :  { %v21238_v10 = vadd.f32 %v10786_v62, %v21199_v39  ;;  %v21241_v44 = vadd.f32 %v10827_v30, %v21202_v21  ;;  %v10788_v9 = vpop.f32.mrb[89].mxu0  ;;  %v10829_v59 = vpop.f32.mrb[89].mxu1  ;;  %v16781_v21 = vcombine.high %v13157_v54, %v13161_v38  ;;  %v16776_v62 = vcombine.low %v13151_v42, %v13155_v53  ;;  %v13529_v53 = vld [vmem:[#allocation4 + $0x15e0] sm:$0xff] }
 0x990   :  { %v21244_v20 = vadd.f32 %v10788_v9, %v21205_v15  ;;  %v21247_v61 = vadd.f32 %v10829_v59, %v21208_v35  ;;  %v10790_v57 = vpop.f32.mrb[90].mxu0  ;;  %v10831_v11 = vpop.f32.mrb[90].mxu1  ;;  %13331 = vmatpush1.bf16.msra.mxu0 %v16764_v14  ;;  %13372 = vmatpush1.bf16.msra.mxu1 %v16766_v55  ;;  %v16780_v15 = vcombine.low %v13157_v54, %v13161_v38  ;;  %v13164_v14 = vld [vmem:[#allocation4 + $0x14f8] sm:$0xff] }
 0x991   :  { %v10791_v8 = vpop.f32.mrb[91].mxu0  ;;  %v10832_v39 = vpop.f32.mrb[91].mxu1  ;;  %13332 = vmatprep.subr.bf16.mxu0 %v16773_v50  ;;  %13373 = vmatprep.subr.bf16.mxu1 %v16775_v28  ;;  %v16782_v35 = vcombine.low %v13158_v40, %v13162_v51  ;;  %v16778_v9 = vcombine.low %v13152_v52, %v13156_v33  ;;  %v13501_v57 = vld [vmem:[#allocation4 + $0x1500] sm:$0xff]  ;;  %v13526_v52 = vld [vmem:[#allocation4 + $0x15c8] sm:$0xff] }
 0x992   :  { %v13505_v11 = vld [vmem:[#allocation4 + $0x1520] sm:$0xff]  ;;  %v13506_v8 = vld [vmem:[#allocation4 + $0x1528] sm:$0xff] }
 0x993   :  { %v16793_v39 = vcombine.high %v13501_v57, %v13505_v11  ;;  %v16792_v49 = vcombine.low %v13501_v57, %v13505_v11  ;;  %v13530_v33 = vld [vmem:[#allocation4 + $0x15e8] sm:$0xff]  ;;  %v13512_v57 = vld [vmem:[#allocation4 + $0x1558] sm:$0xff] }
 0x994   :  { %13333 = vmatpush1.bf16.msra.mxu0 %v16772_v23  ;;  %13374 = vmatpush1.bf16.msra.mxu1 %v16774_v48  ;;  %v16787_v23 = vcombine.high %v13160_v27, %v13164_v14  ;;  %v13502_v48 = vld [vmem:[#allocation4 + $0x1508] sm:$0xff]  ;;  %v13516_v11 = vld [vmem:[#allocation4 + $0x1578] sm:$0xff] }
 0x995   :  { %13334 = vmatprep.subr.bf16.mxu0 %v16781_v21  ;;  %13375 = vmatprep.subr.bf16.mxu1 %v16783_v0  ;;  %v16795_v21 = vcombine.high %v13502_v48, %v13506_v8  ;;  %v13509_v0 = vld [vmem:[#allocation4 + $0x1540] sm:$0xff]  ;;  %v16806_v13 = vcombine.low %v13512_v57, %v13516_v11 }
 0x996   :  { %v16800_v24 = vcombine.low %v13509_v0, %v13513_v46 }
 0x998   :  { %13335 = vmatpush1.bf16.msra.mxu0 %v16780_v15  ;;  %13376 = vmatpush1.bf16.msra.mxu1 %v16782_v35  ;;  %v16794_v15 = vcombine.low %v13502_v48, %v13506_v8  ;;  %v16801_v35 = vcombine.high %v13509_v0, %v13513_v46  ;;  %v13520_v0 = vld [vmem:[#allocation4 + $0x1598] sm:$0xff] }
 0x999   :  { %13410 = vmatprep.subr.bf16.mxu0 %v16761_v63  ;;  %13451 = vmatprep.subr.bf16.mxu1 %v16763_v5  ;;  %v13517_v63 = vld [vmem:[#allocation4 + $0x1580] sm:$0xff]  ;;  %v13524_v46 = vld [vmem:[#allocation4 + $0x15b8] sm:$0xff] }
 0x99a   :  { %v13521_v5 = vld [vmem:[#allocation4 + $0x15a0] sm:$0xff] }
 0x99b   :  { %16788 = vmatmul.mubr.msk.bf16.vlgmr.msra.gmra.mrb[144].mxu0 %vm6013_vm2, %v21250_v7  ;;  %16789 = vmatmul.mubr.msk.bf16.vlgmr.msra.gmra.mrb[144].mxu1 %vm6013_vm2, %v21250_v7 }
 0x99c   :  { %13411 = vmatpush1.bf16.msra.mxu0 %v16760_v6  ;;  %13452 = vmatpush1.bf16.msra.mxu1 %v16762_v32  ;;  %v16809_v6 = vcombine.high %v13517_v63, %v13521_v5  ;;  %v16811_v32 = vcombine.high %v13518_v26, %v13522_v1 }
 0x99d   :  { %13412 = vmatprep.subr.bf16.mxu0 %v16769_v58  ;;  %13453 = vmatprep.subr.bf16.mxu1 %v16771_v19  ;;  %v13525_v58 = vld [vmem:[#allocation4 + $0x15c0] sm:$0xff] }
 0x99e   :  { %v10868_v31 = vpop.f32.mrb[92].mxu0  ;;  %v10909_v41 = vpop.f32.mrb[92].mxu1  ;;  %13442 = vmatprep.mubr.bf16.mxu0 %v18662_v3  ;;  %13483 = vmatprep.mubr.bf16.mxu1 %v18662_v3 }
 0x99f   :  { %v21259_v55 = vadd.f32 %v10868_v31, %v21220_v47  ;;  %v21262_v50 = vadd.f32 %v10909_v41, %v21223_v25  ;;  %v10870_v28 = vpop.f32.mrb[93].mxu0  ;;  %v10911_v54 = vpop.f32.mrb[93].mxu1  ;;  %v16785_v25 = vcombine.high %v13159_v22, %v13163_v16 }
 0x9a0   :  { %v21265_v30 = vadd.f32 %v10870_v28, %v21226_v4  ;;  %v21268_v38 = vadd.f32 %v10911_v54, %v21229_v56  ;;  %v10872_v40 = vpop.f32.mrb[94].mxu0  ;;  %v10913_v51 = vpop.f32.mrb[94].mxu1  ;;  %13413 = vmatpush1.bf16.msra.mxu0 %v16768_v43  ;;  %13454 = vmatpush1.bf16.msra.mxu1 %v16770_v37  ;;  %v16784_v4 = vcombine.low %v13159_v22, %v13163_v16  ;;  %v13503_v54 = vld [vmem:[#allocation4 + $0x1510] sm:$0xff] }
 0x9a1   :  { %v10873_v59 = vpop.f32.mrb[95].mxu0  ;;  %v10914_v47 = vpop.f32.mrb[95].mxu1  ;;  %13414 = vmatprep.subr.bf16.mxu0 %v16777_v60  ;;  %13455 = vmatprep.subr.bf16.mxu1 %v16779_v17  ;;  %v16786_v56 = vcombine.low %v13160_v27, %v13164_v14  ;;  %v16808_v17 = vcombine.low %v13517_v63, %v13521_v5  ;;  %v16810_v27 = vcombine.low %v13518_v26, %v13522_v1  ;;  %v13504_v40 = vld [vmem:[#allocation4 + $0x1518] sm:$0xff]  ;;  %v13531_v5 = vld [vmem:[#allocation4 + $0x15f0] sm:$0xff] }
 0x9a2   :  { %v16819_v28 = vcombine.high %v13526_v52, %v13530_v33  ;;  %v13508_v51 = vld [vmem:[#allocation4 + $0x1538] sm:$0xff] }
 0x9a3   :  { %v16799_v47 = vcombine.high %v13504_v40, %v13508_v51  ;;  %v16798_v8 = vcombine.low %v13504_v40, %v13508_v51  ;;  %v13528_v26 = vld [vmem:[#allocation4 + $0x15d8] sm:$0xff] }
 0x9a4   :  { %13415 = vmatpush1.bf16.msra.mxu0 %v16776_v62  ;;  %13456 = vmatpush1.bf16.msra.mxu1 %v16778_v9  ;;  %v13507_v62 = vld [vmem:[#allocation4 + $0x1530] sm:$0xff]  ;;  %v5783_v9 = vmax.f32 %v20681_v29, 0.0  ;;  %v13532_v1 = vld [vmem:[#allocation4 + $0x15f8] sm:$0xff] }
 0x9a5   :  { %13416 = vmatprep.subr.bf16.mxu0 %v16785_v25  ;;  %13457 = vmatprep.subr.bf16.mxu1 %v16787_v23  ;;  %v16797_v59 = vcombine.high %v13503_v54, %v13507_v62  ;;  %v13511_v25 = vld [vmem:[#allocation4 + $0x1550] sm:$0xff]  ;;  %v16796_v48 = vcombine.low %v13503_v54, %v13507_v62  ;;  %v13878_v54 = vld [vmem:[#allocation4 + $0x1648] sm:$0xff] }
 0x9a6   :  { %v13515_v23 = vld [vmem:[#allocation4 + $0x1570] sm:$0xff]  ;;  %v13882_v62 = vld [vmem:[#allocation4 + $0x1668] sm:$0xff] }
 0x9a7   :  { %v13523_v29 = vld [vmem:[#allocation4 + $0x15b0] sm:$0xff]  ;;  %v16804_v2 = vcombine.low %v13511_v25, %v13515_v23 }
 0x9a8   :  { %13417 = vmatpush1.bf16.msra.mxu0 %v16784_v4  ;;  %13458 = vmatpush1.bf16.msra.mxu1 %v16786_v56  ;;  %v21289_v4 = vpack.c.bf16 %v5783_v9, %v5783_v9  ;;  %v16805_v56 = vcombine.high %v13511_v25, %v13515_v23  ;;  %v13885_v9 = vld [vmem:[#allocation4 + $0x1680] sm:$0xff]  ;;  %v13890_v25 = vld [vmem:[#allocation4 + $0x16a8] sm:$0xff] }
 0x9a9   :  { %13696 = vmatprep.subr.bf16.mxu0 %v16793_v39  ;;  %13737 = vmatprep.subr.bf16.mxu1 %v16795_v21  ;;  %v16807_v39 = vcombine.high %v13512_v57, %v13516_v11  ;;  %v13519_v21 = vld [vmem:[#allocation4 + $0x1590] sm:$0xff]  ;;  %v16838_v57 = vcombine.low %v13878_v54, %v13882_v62 }
 0x9ab   :  { %16790 = vmatmul.mubr.msk.bf16.vlgmr.msra.gmra.mrb[148].mxu0 %vm6013_vm2, %v21250_v7  ;;  %16791 = vmatmul.mubr.msk.bf16.vlgmr.msra.gmra.mrb[148].mxu1 %vm6013_vm2, %v21250_v7 }
 0x9ac   :  { %13697 = vmatpush1.bf16.msra.mxu0 %v16792_v49  ;;  %13738 = vmatpush1.bf16.msra.mxu1 %v16794_v15  ;;  %v16813_v49 = vcombine.high %v13519_v21, %v13523_v29  ;;  %v16815_v15 = vcombine.high %v13520_v0, %v13524_v46 }
 0x9ad   :  { %13698 = vmatprep.subr.bf16.mxu0 %v16801_v35  ;;  %13739 = vmatprep.subr.bf16.mxu1 %v16803_v12  ;;  %v13527_v35 = vld [vmem:[#allocation4 + $0x15d0] sm:$0xff] }
 0x9ae   :  { %v11154_v19 = vpop.f32.mrb[96].mxu0  ;;  %v11195_v42 = vpop.f32.mrb[96].mxu1  ;;  %13728 = vmatprep.mubr.bf16.mxu0 %v18662_v3  ;;  %13769 = vmatprep.mubr.bf16.mxu1 %v18662_v3 }
 0x9af   :  { %v21277_v7 = vadd.f32 %v11154_v19, %v21238_v10  ;;  %v21280_v43 = vadd.f32 %v11195_v42, %v21241_v44  ;;  %v11156_v37 = vpop.f32.mrb[97].mxu0  ;;  %v11197_v60 = vpop.f32.mrb[97].mxu1  ;;  %v16817_v44 = vcombine.high %v13525_v58, %v13529_v53 }
 0x9b0   :  { %v21283_v22 = vadd.f32 %v11156_v37, %v21244_v20  ;;  %v21286_v31 = vadd.f32 %v11197_v60, %v21247_v61  ;;  %v11158_v41 = vpop.f32.mrb[98].mxu0  ;;  %v11199_v16 = vpop.f32.mrb[98].mxu1  ;;  %13699 = vmatpush1.bf16.msra.mxu0 %v16800_v24  ;;  %13740 = vmatpush1.bf16.msra.mxu1 %v16802_v18  ;;  %v16816_v20 = vcombine.low %v13525_v58, %v13529_v53 }
 0x9b1   :  { %v11159_v14 = vpop.f32.mrb[99].mxu0  ;;  %v11200_v10 = vpop.f32.mrb[99].mxu1  ;;  %13700 = vmatprep.subr.bf16.mxu0 %v16809_v6  ;;  %13741 = vmatprep.subr.bf16.mxu1 %v16811_v32  ;;  %v16818_v61 = vcombine.low %v13526_v52, %v13530_v33  ;;  %v16812_v58 = vcombine.low %v13519_v21, %v13523_v29  ;;  %v16814_v33 = vcombine.low %v13520_v0, %v13524_v46  ;;  %v13873_v41 = vld [vmem:[#allocation4 + $0x1620] sm:$0xff]  ;;  %v13870_v16 = vld [vmem:[#allocation4 + $0x1608] sm:$0xff] }
 0x9b2   :  { %v16823_v60 = vcombine.high %v13528_v26, %v13532_v1  ;;  %v13897_v21 = vld [vmem:[#allocation4 + $0x16e0] sm:$0xff]  ;;  %v13894_v29 = vld [vmem:[#allocation4 + $0x16c8] sm:$0xff] }
 0x9b3   :  { %v13898_v0 = vld [vmem:[#allocation4 + $0x16e8] sm:$0xff] }
 0x9b4   :  { %13701 = vmatpush1.bf16.msra.mxu0 %v16808_v17  ;;  %13742 = vmatpush1.bf16.msra.mxu1 %v16810_v27  ;;  %v13869_v17 = vld [vmem:[#allocation4 + $0x1600] sm:$0xff]  ;;  %v13874_v27 = vld [vmem:[#allocation4 + $0x1628] sm:$0xff] }
 0x9b5   :  { %13702 = vmatprep.subr.bf16.mxu0 %v16817_v44  ;;  %13743 = vmatprep.subr.bf16.mxu1 %v16819_v28  ;;  %v16829_v14 = vcombine.high %v13869_v17, %v13873_v41  ;;  %v16831_v10 = vcombine.high %v13870_v16, %v13874_v27  ;;  %v13877_v44 = vld [vmem:[#allocation4 + $0x1640] sm:$0xff]  ;;  %v16828_v40 = vcombine.low %v13869_v17, %v13873_v41  ;;  %v13884_v17 = vld [vmem:[#allocation4 + $0x1678] sm:$0xff] }
 0x9b6   :  { %v13881_v28 = vld [vmem:[#allocation4 + $0x1660] sm:$0xff]  ;;  %v16830_v51 = vcombine.low %v13870_v16, %v13874_v27 }
 0x9b7   :  { %v16836_v23 = vcombine.low %v13877_v44, %v13881_v28 }
 0x9b8   :  { %13703 = vmatpush1.bf16.msra.mxu0 %v16816_v20  ;;  %13744 = vmatpush1.bf16.msra.mxu1 %v16818_v61  ;;  %v16837_v20 = vcombine.high %v13877_v44, %v13881_v28  ;;  %v16839_v61 = vcombine.high %v13878_v54, %v13882_v62  ;;  %v13892_v44 = vld [vmem:[#allocation4 + $0x16b8] sm:$0xff] }
 0x9b9   :  { %13778 = vmatprep.subr.bf16.mxu0 %v16797_v59  ;;  %13819 = vmatprep.subr.bf16.mxu1 %v16799_v47  ;;  %v13889_v59 = vld [vmem:[#allocation4 + $0x16a0] sm:$0xff]  ;;  %v13886_v47 = vld [vmem:[#allocation4 + $0x1688] sm:$0xff] }
 0x9ba   :  { %v16845_v11 = vcombine.high %v13885_v9, %v13889_v59 }
 0x9bb   :  { %16824 = vmatmul.mubr.msk.bf16.vlgmr.msra.gmra.mrb[152].mxu0 %vm6013_vm2, %v21289_v4  ;;  %16825 = vmatmul.mubr.msk.bf16.vlgmr.msra.gmra.mrb[152].mxu1 %vm6013_vm2, %v21289_v4 }
 0x9bc   :  { %13779 = vmatpush1.bf16.msra.mxu0 %v16796_v48  ;;  %13820 = vmatpush1.bf16.msra.mxu1 %v16798_v8  ;;  %v16847_v48 = vcombine.high %v13886_v47, %v13890_v25  ;;  %v13893_v8 = vld [vmem:[#allocation4 + $0x16c0] sm:$0xff] }
 0x9bd   :  { %13780 = vmatprep.subr.bf16.mxu0 %v16805_v56  ;;  %13821 = vmatprep.subr.bf16.mxu1 %v16807_v39 }
 0x9be   :  { %v11236_v12 = vpop.f32.mrb[100].mxu0  ;;  %v11277_v63 = vpop.f32.mrb[100].mxu1  ;;  %13810 = vmatprep.mubr.bf16.mxu0 %v18662_v3  ;;  %13851 = vmatprep.mubr.bf16.mxu1 %v18662_v3 }
 0x9bf   :  { %v21298_v24 = vadd.f32 %v11236_v12, %v21259_v55  ;;  %v21301_v18 = vadd.f32 %v11277_v63, %v21262_v50  ;;  %v11238_v6 = vpop.f32.mrb[101].mxu0  ;;  %v11279_v32 = vpop.f32.mrb[101].mxu1  ;;  %v16821_v50 = vcombine.high %v13527_v35, %v13531_v5 }
 0x9c0   :  { %v21304_v19 = vadd.f32 %v11238_v6, %v21265_v30  ;;  %v21307_v42 = vadd.f32 %v11279_v32, %v21268_v38  ;;  %v11240_v53 = vpop.f32.mrb[102].mxu0  ;;  %v11281_v52 = vpop.f32.mrb[102].mxu1  ;;  %13781 = vmatpush1.bf16.msra.mxu0 %v16804_v2  ;;  %13822 = vmatpush1.bf16.msra.mxu1 %v16806_v13  ;;  %v16820_v30 = vcombine.low %v13527_v35, %v13531_v5  ;;  %v13871_v6 = vld [vmem:[#allocation4 + $0x1610] sm:$0xff] }
 0x9c1   :  { %v11241_v37 = vpop.f32.mrb[103].mxu0  ;;  %v11282_v55 = vpop.f32.mrb[103].mxu1  ;;  %13782 = vmatprep.subr.bf16.mxu0 %v16813_v49  ;;  %13823 = vmatprep.subr.bf16.mxu1 %v16815_v15  ;;  %v16822_v38 = vcombine.low %v13528_v26, %v13532_v1  ;;  %v16844_v49 = vcombine.low %v13885_v9, %v13889_v59  ;;  %v16846_v5 = vcombine.low %v13886_v47, %v13890_v25  ;;  %v13875_v32 = vld [vmem:[#allocation4 + $0x1630] sm:$0xff]  ;;  %v13876_v53 = vld [vmem:[#allocation4 + $0x1638] sm:$0xff]  ;;  %v5784_v52 = vmax.f32 %v20672_v34, 0.0 }
 0x9c2   :  { %v16855_v1 = vcombine.high %v13894_v29, %v13898_v0  ;;  %v13879_v55 = vld [vmem:[#allocation4 + $0x1650] sm:$0xff]  ;;  %v16832_v41 = vcombine.low %v13871_v6, %v13875_v32  ;;  %v13896_v59 = vld [vmem:[#allocation4 + $0x16d8] sm:$0xff] }
 0x9c3   :  { %v21328_v27 = vpack.c.bf16 %v5784_v52, %v5784_v52  ;;  %v13891_v34 = vld [vmem:[#allocation4 + $0x16b0] sm:$0xff]  ;;  %v13900_v47 = vld [vmem:[#allocation4 + $0x16f8] sm:$0xff]  ;;  %v14257_v52 = vld [vmem:[#allocation4 + $0x17a0] sm:$0xff] }
 0x9c4   :  { %13783 = vmatpush1.bf16.msra.mxu0 %v16812_v58  ;;  %13824 = vmatpush1.bf16.msra.mxu1 %v16814_v33  ;;  %v13872_v58 = vld [vmem:[#allocation4 + $0x1618] sm:$0xff]  ;;  %v16833_v33 = vcombine.high %v13871_v6, %v13875_v32  ;;  %v13899_v9 = vld [vmem:[#allocation4 + $0x16f0] sm:$0xff]  ;;  %v14250_v6 = vld [vmem:[#allocation4 + $0x1768] sm:$0xff] }
 0x9c5   :  { %13784 = vmatprep.subr.bf16.mxu0 %v16821_v50  ;;  %13825 = vmatprep.subr.bf16.mxu1 %v16823_v60  ;;  %v16835_v37 = vcombine.high %v13872_v58, %v13876_v53  ;;  %v13883_v50 = vld [vmem:[#allocation4 + $0x1670] sm:$0xff]  ;;  %v13880_v60 = vld [vmem:[#allocation4 + $0x1658] sm:$0xff]  ;;  %v16834_v16 = vcombine.low %v13872_v58, %v13876_v53 }
 0x9c6   :  { %v16840_v28 = vcombine.low %v13879_v55, %v13883_v50  ;;  %v16842_v54 = vcombine.low %v13880_v60, %v13884_v17 }
 0x9c8   :  { %13785 = vmatpush1.bf16.msra.mxu0 %v16820_v30  ;;  %13826 = vmatpush1.bf16.msra.mxu1 %v16822_v38  ;;  %v16841_v30 = vcombine.high %v13879_v55, %v13883_v50  ;;  %v16843_v38 = vcombine.high %v13880_v60, %v13884_v17 }
 0x9c9   :  { %14064 = vmatprep.subr.bf16.mxu0 %v16829_v14  ;;  %14105 = vmatprep.subr.bf16.mxu1 %v16831_v10  ;;  %v13887_v14 = vld [vmem:[#allocation4 + $0x1690] sm:$0xff]  ;;  %v13888_v10 = vld [vmem:[#allocation4 + $0x1698] sm:$0xff] }
 0x9ca   :  { %v16849_v62 = vcombine.high %v13887_v14, %v13891_v34 }
 0x9cb   :  { %16826 = vmatmul.mubr.msk.bf16.vlgmr.msra.gmra.mrb[156].mxu0 %vm6013_vm2, %v21289_v4  ;;  %16827 = vmatmul.mubr.msk.bf16.vlgmr.msra.gmra.mrb[156].mxu1 %vm6013_vm2, %v21289_v4 }
 0x9cc   :  { %14065 = vmatpush1.bf16.msra.mxu0 %v16828_v40  ;;  %14106 = vmatpush1.bf16.msra.mxu1 %v16830_v51  ;;  %v16851_v40 = vcombine.high %v13888_v10, %v13892_v44  ;;  %v13895_v51 = vld [vmem:[#allocation4 + $0x16d0] sm:$0xff] }
 0x9cd   :  { %14066 = vmatprep.subr.bf16.mxu0 %v16837_v20  ;;  %14107 = vmatprep.subr.bf16.mxu1 %v16839_v61 }
 0x9ce   :  { %v11522_v56 = vpop.f32.mrb[104].mxu0  ;;  %v11563_v39 = vpop.f32.mrb[104].mxu1  ;;  %14096 = vmatprep.mubr.bf16.mxu0 %v18662_v3  ;;  %14137 = vmatprep.mubr.bf16.mxu1 %v18662_v3 }
 0x9cf   :  { %v21316_v4 = vadd.f32 %v11522_v56, %v21277_v7  ;;  %v21319_v46 = vadd.f32 %v11563_v39, %v21280_v43  ;;  %v11524_v2 = vpop.f32.mrb[105].mxu0  ;;  %v11565_v13 = vpop.f32.mrb[105].mxu1  ;;  %v16853_v43 = vcombine.high %v13893_v8, %v13897_v21 }
 0x9d0   :  { %v21322_v15 = vadd.f32 %v11524_v2, %v21283_v22  ;;  %v21325_v35 = vadd.f32 %v11565_v13, %v21286_v31  ;;  %v11526_v12 = vpop.f32.mrb[106].mxu0  ;;  %v11567_v63 = vpop.f32.mrb[106].mxu1  ;;  %14067 = vmatpush1.bf16.msra.mxu0 %v16836_v23  ;;  %14108 = vmatpush1.bf16.msra.mxu1 %v16838_v57  ;;  %v16852_v22 = vcombine.low %v13893_v8, %v13897_v21  ;;  %v14237_v13 = vld [vmem:[#allocation4 + $0x1700] sm:$0xff] }
 0x9d1   :  { %v11527_v26 = vpop.f32.mrb[107].mxu0  ;;  %v11568_v7 = vpop.f32.mrb[107].mxu1  ;;  %14068 = vmatprep.subr.bf16.mxu0 %v16845_v11  ;;  %14109 = vmatprep.subr.bf16.mxu1 %v16847_v48  ;;  %v16854_v31 = vcombine.low %v13894_v29, %v13898_v0  ;;  %v16848_v48 = vcombine.low %v13887_v14, %v13891_v34  ;;  %v16850_v29 = vcombine.low %v13888_v10, %v13892_v44  ;;  %v14238_v12 = vld [vmem:[#allocation4 + $0x1708] sm:$0xff] }
 0x9d2   :  { %v16859_v2 = vcombine.high %v13896_v59, %v13900_v47  ;;  %v14242_v63 = vld [vmem:[#allocation4 + $0x1728] sm:$0xff]  ;;  %v14245_v7 = vld [vmem:[#allocation4 + $0x1740] sm:$0xff] }
 0x9d3   :  { %v16867_v26 = vcombine.high %v14238_v12, %v14242_v63  ;;  %v16866_v58 = vcombine.low %v14238_v12, %v14242_v63  ;;  %v14262_v14 = vld [vmem:[#allocation4 + $0x17c8] sm:$0xff] }
 0x9d4   :  { %14069 = vmatpush1.bf16.msra.mxu0 %v16844_v49  ;;  %14110 = vmatpush1.bf16.msra.mxu1 %v16846_v5  ;;  %v14241_v49 = vld [vmem:[#allocation4 + $0x1720] sm:$0xff]  ;;  %v14266_v34 = vld [vmem:[#allocation4 + $0x17e8] sm:$0xff] }
 0x9d5   :  { %14070 = vmatprep.subr.bf16.mxu0 %v16853_v43  ;;  %14111 = vmatprep.subr.bf16.mxu1 %v16855_v1  ;;  %v16865_v5 = vcombine.high %v14237_v13, %v14241_v49  ;;  %v14249_v43 = vld [vmem:[#allocation4 + $0x1760] sm:$0xff]  ;;  %v14246_v1 = vld [vmem:[#allocation4 + $0x1748] sm:$0xff]  ;;  %v16864_v32 = vcombine.low %v14237_v13, %v14241_v49 }
 0x9d6   :  { %v16873_v53 = vcombine.high %v14245_v7, %v14249_v43  ;;  %v16872_v55 = vcombine.low %v14245_v7, %v14249_v43  ;;  %v16874_v50 = vcombine.low %v14246_v1, %v14250_v6 }
 0x9d8   :  { %14071 = vmatpush1.bf16.msra.mxu0 %v16852_v22  ;;  %14112 = vmatpush1.bf16.msra.mxu1 %v16854_v31  ;;  %v16875_v22 = vcombine.high %v14246_v1, %v14250_v6  ;;  %v14253_v31 = vld [vmem:[#allocation4 + $0x1780] sm:$0xff] }
 0x9d9   :  { %14146 = vmatprep.subr.bf16.mxu0 %v16833_v33  ;;  %14187 = vmatprep.subr.bf16.mxu1 %v16835_v37  ;;  %v14254_v33 = vld [vmem:[#allocation4 + $0x1788] sm:$0xff]  ;;  %v16881_v60 = vcombine.high %v14253_v31, %v14257_v52 }
 0x9da   :  { %v14258_v37 = vld [vmem:[#allocation4 + $0x17a8] sm:$0xff] }
 0x9db   :  { %16860 = vmatmul.mubr.msk.bf16.vlgmr.msra.gmra.mrb[160].mxu0 %vm6013_vm2, %v21328_v27  ;;  %16861 = vmatmul.mubr.msk.bf16.vlgmr.msra.gmra.mrb[160].mxu1 %vm6013_vm2, %v21328_v27  ;;  %v16883_v17 = vcombine.high %v14254_v33, %v14258_v37 }
 0x9dc   :  { %14147 = vmatpush1.bf16.msra.mxu0 %v16832_v41  ;;  %14188 = vmatpush1.bf16.msra.mxu1 %v16834_v16  ;;  %v14261_v41 = vld [vmem:[#allocation4 + $0x17c0] sm:$0xff] }
 0x9dd   :  { %14148 = vmatprep.subr.bf16.mxu0 %v16841_v30  ;;  %14189 = vmatprep.subr.bf16.mxu1 %v16843_v38  ;;  %v14265_v38 = vld [vmem:[#allocation4 + $0x17e0] sm:$0xff] }
 0x9de   :  { %v11604_v20 = vpop.f32.mrb[108].mxu0  ;;  %v11645_v61 = vpop.f32.mrb[108].mxu1  ;;  %14178 = vmatprep.mubr.bf16.mxu0 %v18662_v3  ;;  %14219 = vmatprep.mubr.bf16.mxu1 %v18662_v3 }
 0x9df   :  { %v21337_v25 = vadd.f32 %v11604_v20, %v21298_v24  ;;  %v21340_v23 = vadd.f32 %v11645_v61, %v21301_v18  ;;  %v11606_v57 = vpop.f32.mrb[109].mxu0  ;;  %v11647_v11 = vpop.f32.mrb[109].mxu1  ;;  %v16857_v18 = vcombine.high %v13895_v51, %v13899_v9  ;;  %v16882_v61 = vcombine.low %v14254_v33, %v14258_v37 }
 0x9e0   :  { %v21343_v8 = vadd.f32 %v11606_v57, %v21304_v19  ;;  %v21346_v56 = vadd.f32 %v11647_v11, %v21307_v42  ;;  %v11608_v39 = vpop.f32.mrb[110].mxu0  ;;  %v11649_v21 = vpop.f32.mrb[110].mxu1  ;;  %14149 = vmatpush1.bf16.msra.mxu0 %v16840_v28  ;;  %14190 = vmatpush1.bf16.msra.mxu1 %v16842_v54  ;;  %v16856_v19 = vcombine.low %v13895_v51, %v13899_v9  ;;  %v14243_v57 = vld [vmem:[#allocation4 + $0x1730] sm:$0xff]  ;;  %v14240_v11 = vld [vmem:[#allocation4 + $0x1718] sm:$0xff] }
 0x9e1   :  { %v11609_v0 = vpop.f32.mrb[111].mxu0  ;;  %v11650_v24 = vpop.f32.mrb[111].mxu1  ;;  %14150 = vmatprep.subr.bf16.mxu0 %v16849_v62  ;;  %14191 = vmatprep.subr.bf16.mxu1 %v16851_v40  ;;  %v16858_v42 = vcombine.low %v13896_v59, %v13900_v47  ;;  %v16880_v54 = vcombine.low %v14253_v31, %v14257_v52  ;;  %v16891_v59 = vcombine.high %v14262_v14, %v14266_v34  ;;  %v14239_v47 = vld [vmem:[#allocation4 + $0x1710] sm:$0xff]  ;;  %v5785_v39 = vmax.f32 %v20678_v45, 0.0  ;;  %v14264_v31 = vld [vmem:[#allocation4 + $0x17d8] sm:$0xff] }
 0x9e2   :  { %v16869_v21 = vcombine.high %v14239_v47, %v14243_v57  ;;  %v14247_v0 = vld [vmem:[#allocation4 + $0x1750] sm:$0xff]  ;;  %v16868_v13 = vcombine.low %v14239_v47, %v14243_v57  ;;  %v14268_v52 = vld [vmem:[#allocation4 + $0x17f8] sm:$0xff] }
 0x9e3   :  { %v14251_v24 = vld [vmem:[#allocation4 + $0x1770] sm:$0xff]  ;;  %v21367_v12 = vpack.c.bf16 %v5785_v39, %v5785_v39  ;;  %v14622_v39 = vld [vmem:[#allocation4 + $0x1888] sm:$0xff] }
 0x9e4   :  { %14151 = vmatpush1.bf16.msra.mxu0 %v16848_v48  ;;  %14192 = vmatpush1.bf16.msra.mxu1 %v16850_v29  ;;  %v14244_v48 = vld [vmem:[#allocation4 + $0x1738] sm:$0xff]  ;;  %v16877_v63 = vcombine.high %v14247_v0, %v14251_v24  ;;  %v14259_v45 = vld [vmem:[#allocation4 + $0x17b0] sm:$0xff]  ;;  %v16876_v7 = vcombine.low %v14247_v0, %v14251_v24 }
 0x9e5   :  { %14152 = vmatprep.subr.bf16.mxu0 %v16857_v18  ;;  %14193 = vmatprep.subr.bf16.mxu1 %v16859_v2  ;;  %v16871_v29 = vcombine.high %v14240_v11, %v14244_v48  ;;  %v14248_v18 = vld [vmem:[#allocation4 + $0x1758] sm:$0xff]  ;;  %v16870_v49 = vcombine.low %v14240_v11, %v14244_v48 }
 0x9e6   :  { %v14252_v2 = vld [vmem:[#allocation4 + $0x1778] sm:$0xff] }
 0x9e7   :  { %v16878_v43 = vcombine.low %v14248_v18, %v14252_v2 }
 0x9e8   :  { %14153 = vmatpush1.bf16.msra.mxu0 %v16856_v19  ;;  %14194 = vmatpush1.bf16.msra.mxu1 %v16858_v42  ;;  %v16879_v19 = vcombine.high %v14248_v18, %v14252_v2  ;;  %v14255_v42 = vld [vmem:[#allocation4 + $0x1790] sm:$0xff]  ;;  %v14629_v2 = vld [vmem:[#allocation4 + $0x18c0] sm:$0xff] }
 0x9e9   :  { %14432 = vmatprep.subr.bf16.mxu0 %v16865_v5  ;;  %14473 = vmatprep.subr.bf16.mxu1 %v16867_v26  ;;  %v14256_v5 = vld [vmem:[#allocation4 + $0x1798] sm:$0xff]  ;;  %v16885_v1 = vcombine.high %v14255_v42, %v14259_v45 }
 0x9ea   :  { %v14260_v26 = vld [vmem:[#allocation4 + $0x17b8] sm:$0xff] }
 0x9eb   :  { %16862 = vmatmul.mubr.msk.bf16.vlgmr.msra.gmra.mrb[164].mxu0 %vm6013_vm2, %v21328_v27  ;;  %16863 = vmatmul.mubr.msk.bf16.vlgmr.msra.gmra.mrb[164].mxu1 %vm6013_vm2, %v21328_v27  ;;  %v16887_v6 = vcombine.high %v14256_v5, %v14260_v26 }
 0x9ec   :  { %14433 = vmatpush1.bf16.msra.mxu0 %v16864_v32  ;;  %14474 = vmatpush1.bf16.msra.mxu1 %v16866_v58  ;;  %v14263_v32 = vld [vmem:[#allocation4 + $0x17d0] sm:$0xff] }
 0x9ed   :  { %14434 = vmatprep.subr.bf16.mxu0 %v16873_v53  ;;  %14475 = vmatprep.subr.bf16.mxu1 %v16875_v22  ;;  %v14267_v22 = vld [vmem:[#allocation4 + $0x17f0] sm:$0xff] }
 0x9ee   :  { %v11890_v16 = vpop.f32.mrb[112].mxu0  ;;  %v11931_v30 = vpop.f32.mrb[112].mxu1  ;;  %14464 = vmatprep.mubr.bf16.mxu0 %v18662_v3  ;;  %14505 = vmatprep.mubr.bf16.mxu1 %v18662_v3 }
 0x9ef   :  { %v21355_v27 = vadd.f32 %v11890_v16, %v21316_v4  ;;  %v21358_v10 = vadd.f32 %v11931_v30, %v21319_v46  ;;  %v11892_v44 = vpop.f32.mrb[113].mxu0  ;;  %v11933_v28 = vpop.f32.mrb[113].mxu1  ;;  %v16889_v46 = vcombine.high %v14261_v41, %v14265_v38 }
 0x9f0   :  { %v21361_v62 = vadd.f32 %v11892_v44, %v21322_v15  ;;  %v21364_v40 = vadd.f32 %v11933_v28, %v21325_v35  ;;  %v11894_v51 = vpop.f32.mrb[114].mxu0  ;;  %v11935_v20 = vpop.f32.mrb[114].mxu1  ;;  %14435 = vmatpush1.bf16.msra.mxu0 %v16872_v55  ;;  %14476 = vmatpush1.bf16.msra.mxu1 %v16874_v50  ;;  %v16888_v15 = vcombine.low %v14261_v41, %v14265_v38  ;;  %v14605_v44 = vld [vmem:[#allocation4 + $0x1800] sm:$0xff] }
 0x9f1   :  { %v11895_v9 = vpop.f32.mrb[115].mxu0  ;;  %v11936_v4 = vpop.f32.mrb[115].mxu1  ;;  %14436 = vmatprep.subr.bf16.mxu0 %v16881_v60  ;;  %14477 = vmatprep.subr.bf16.mxu1 %v16883_v17  ;;  %v16890_v35 = vcombine.low %v14262_v14, %v14266_v34  ;;  %v16884_v60 = vcombine.low %v14255_v42, %v14259_v45  ;;  %v16886_v38 = vcombine.low %v14256_v5, %v14260_v26  ;;  %v14609_v28 = vld [vmem:[#allocation4 + $0x1820] sm:$0xff]  ;;  %v14610_v51 = vld [vmem:[#allocation4 + $0x1828] sm:$0xff] }
 0x9f2   :  { %v16895_v34 = vcombine.high %v14264_v31, %v14268_v52  ;;  %v16901_v20 = vcombine.high %v14605_v44, %v14609_v28  ;;  %v14613_v9 = vld [vmem:[#allocation4 + $0x1840] sm:$0xff]  ;;  %v16900_v47 = vcombine.low %v14605_v44, %v14609_v28  ;;  %v14634_v42 = vld [vmem:[#allocation4 + $0x18e8] sm:$0xff] }
 0x9f3   :  { %v14617_v4 = vld [vmem:[#allocation4 + $0x1860] sm:$0xff] }
 0x9f4   :  { %14437 = vmatpush1.bf16.msra.mxu0 %v16880_v54  ;;  %14478 = vmatpush1.bf16.msra.mxu1 %v16882_v61  ;;  %v14606_v54 = vld [vmem:[#allocation4 + $0x1808] sm:$0xff]  ;;  %v16909_v11 = vcombine.high %v14613_v9, %v14617_v4 }
 0x9f5   :  { %14438 = vmatprep.subr.bf16.mxu0 %v16889_v46  ;;  %14479 = vmatprep.subr.bf16.mxu1 %v16891_v59  ;;  %v16903_v61 = vcombine.high %v14606_v54, %v14610_v51  ;;  %v14614_v46 = vld [vmem:[#allocation4 + $0x1848] sm:$0xff]  ;;  %v16902_v57 = vcombine.low %v14606_v54, %v14610_v51 }
 0x9f6   :  { %v14618_v59 = vld [vmem:[#allocation4 + $0x1868] sm:$0xff] }
 0x9f7   :  { %v16911_v48 = vcombine.high %v14614_v46, %v14618_v59  ;;  %v16910_v0 = vcombine.low %v14614_v46, %v14618_v59  ;;  %v14631_v59 = vld [vmem:[#allocation4 + $0x18d0] sm:$0xff] }
 0x9f8   :  { %14439 = vmatpush1.bf16.msra.mxu0 %v16888_v15  ;;  %14480 = vmatpush1.bf16.msra.mxu1 %v16890_v35  ;;  %v14621_v15 = vld [vmem:[#allocation4 + $0x1880] sm:$0xff] }
 0x9f9   :  { %14514 = vmatprep.subr.bf16.mxu0 %v16869_v21  ;;  %14555 = vmatprep.subr.bf16.mxu1 %v16871_v29  ;;  %v14625_v35 = vld [vmem:[#allocation4 + $0x18a0] sm:$0xff]  ;;  %v14626_v21 = vld [vmem:[#allocation4 + $0x18a8] sm:$0xff]  ;;  %v16908_v29 = vcombine.low %v14613_v9, %v14617_v4 }
 0x9fa   :  { %v16917_v24 = vcombine.high %v14621_v15, %v14625_v35  ;;  %v16919_v18 = vcombine.high %v14622_v39, %v14626_v21 }
 0x9fb   :  { %16896 = vmatmul.mubr.msk.bf16.vlgmr.msra.gmra.mrb[168].mxu0 %vm6013_vm2, %v21367_v12  ;;  %16897 = vmatmul.mubr.msk.bf16.vlgmr.msra.gmra.mrb[168].mxu1 %vm6013_vm2, %v21367_v12 }
 0x9fc   :  { %14515 = vmatpush1.bf16.msra.mxu0 %v16868_v13  ;;  %14556 = vmatpush1.bf16.msra.mxu1 %v16870_v49 }
 0x9fd   :  { %14516 = vmatprep.subr.bf16.mxu0 %v16877_v63  ;;  %14557 = vmatprep.subr.bf16.mxu1 %v16879_v19  ;;  %v14633_v63 = vld [vmem:[#allocation4 + $0x18e0] sm:$0xff]  ;;  %v14630_v19 = vld [vmem:[#allocation4 + $0x18c8] sm:$0xff] }
 0x9fe   :  { %v11972_v58 = vpop.f32.mrb[116].mxu0  ;;  %v12013_v53 = vpop.f32.mrb[116].mxu1  ;;  %14546 = vmatprep.mubr.bf16.mxu0 %v18662_v3  ;;  %14587 = vmatprep.mubr.bf16.mxu1 %v18662_v3 }
 0x9ff   :  { %v21376_v33 = vadd.f32 %v11972_v58, %v21337_v25  ;;  %v21379_v37 = vadd.f32 %v12013_v53, %v21340_v23  ;;  %v11974_v55 = vpop.f32.mrb[117].mxu0  ;;  %v12015_v50 = vpop.f32.mrb[117].mxu1  ;;  %v16893_v23 = vcombine.high %v14263_v32, %v14267_v22  ;;  %v16918_v58 = vcombine.low %v14622_v39, %v14626_v21 }
 0xa00   :  { %v21382_v17 = vadd.f32 %v11974_v55, %v21343_v8  ;;  %v21385_v41 = vadd.f32 %v12015_v50, %v21346_v56  ;;  %v11976_v16 = vpop.f32.mrb[118].mxu0  ;;  %v12017_v30 = vpop.f32.mrb[118].mxu1  ;;  %14517 = vmatpush1.bf16.msra.mxu0 %v16876_v7  ;;  %14558 = vmatpush1.bf16.msra.mxu1 %v16878_v43  ;;  %v16892_v8 = vcombine.low %v14263_v32, %v14267_v22  ;;  %v14608_v55 = vld [vmem:[#allocation4 + $0x1818] sm:$0xff] }
 0xa01   :  { %v11977_v14 = vpop.f32.mrb[119].mxu0  ;;  %v12018_v25 = vpop.f32.mrb[119].mxu1  ;;  %14518 = vmatprep.subr.bf16.mxu0 %v16885_v1  ;;  %14559 = vmatprep.subr.bf16.mxu1 %v16887_v6  ;;  %v16894_v56 = vcombine.low %v14264_v31, %v14268_v52  ;;  %v16916_v7 = vcombine.low %v14621_v15, %v14625_v35  ;;  %v16927_v22 = vcombine.high %v14630_v19, %v14634_v42  ;;  %v14607_v31 = vld [vmem:[#allocation4 + $0x1810] sm:$0xff]  ;;  %v14612_v50 = vld [vmem:[#allocation4 + $0x1838] sm:$0xff] }
 0xa02   :  { %v14611_v52 = vld [vmem:[#allocation4 + $0x1830] sm:$0xff]  ;;  %v16907_v30 = vcombine.high %v14608_v55, %v14612_v50  ;;  %v14616_v25 = vld [vmem:[#allocation4 + $0x1858] sm:$0xff]  ;;  %v16906_v44 = vcombine.low %v14608_v55, %v14612_v50 }
 0xa03   :  { %v16905_v16 = vcombine.high %v14607_v31, %v14611_v52  ;;  %v14619_v14 = vld [vmem:[#allocation4 + $0x1870] sm:$0xff]  ;;  %v14636_v15 = vld [vmem:[#allocation4 + $0x18f8] sm:$0xff] }
 0xa04   :  { %14519 = vmatpush1.bf16.msra.mxu0 %v16884_v60  ;;  %14560 = vmatpush1.bf16.msra.mxu1 %v16886_v38  ;;  %v5786_v60 = vmax.f32 %v20689_v36, 0.0  ;;  %v14615_v38 = vld [vmem:[#allocation4 + $0x1850] sm:$0xff]  ;;  %v14624_v36 = vld [vmem:[#allocation4 + $0x1898] sm:$0xff] }
 0xa05   :  { %14520 = vmatprep.subr.bf16.mxu0 %v16893_v23  ;;  %14561 = vmatprep.subr.bf16.mxu1 %v16895_v34  ;;  %v14620_v23 = vld [vmem:[#allocation4 + $0x1878] sm:$0xff]  ;;  %v16904_v34 = vcombine.low %v14607_v31, %v14611_v52  ;;  %v16913_v54 = vcombine.high %v14615_v38, %v14619_v14 }
 0xa06   :  { %v14604_v28 = vpack.c.bf16 %v5786_v60, %v5786_v60  ;;  %v16915_v51 = vcombine.high %v14616_v25, %v14620_v23  ;;  %v16914_v9 = vcombine.low %v14616_v25, %v14620_v23 }
 0xa08   :  { %14521 = vmatpush1.bf16.msra.mxu0 %v16892_v8  ;;  %14562 = vmatpush1.bf16.msra.mxu1 %v16894_v56  ;;  %v14623_v8 = vld [vmem:[#allocation4 + $0x1890] sm:$0xff] }
 0xa09   :  { %14800 = vmatprep.subr.bf16.mxu0 %v16901_v20  ;;  %14841 = vmatprep.subr.bf16.mxu1 %v16903_v61  ;;  %v14627_v56 = vld [vmem:[#allocation4 + $0x18b0] sm:$0xff]  ;;  %v14628_v20 = vld [vmem:[#allocation4 + $0x18b8] sm:$0xff]  ;;  %v16912_v61 = vcombine.low %v14615_v38, %v14619_v14 }
 0xa0a   :  { %v16921_v4 = vcombine.high %v14623_v8, %v14627_v56  ;;  %v16923_v46 = vcombine.high %v14624_v36, %v14628_v20 }
 0xa0b   :  { %16898 = vmatmul.mubr.msk.bf16.vlgmr.msra.gmra.mrb[172].mxu0 %vm6013_vm2, %v21367_v12  ;;  %16899 = vmatmul.mubr.msk.bf16.vlgmr.msra.gmra.mrb[172].mxu1 %vm6013_vm2, %v21367_v12 }
 0xa0c   :  { %14801 = vmatpush1.bf16.msra.mxu0 %v16900_v47  ;;  %14842 = vmatpush1.bf16.msra.mxu1 %v16902_v57 }
 0xa0d   :  { %14802 = vmatprep.subr.bf16.mxu0 %v16909_v11  ;;  %14843 = vmatprep.subr.bf16.mxu1 %v16911_v48  ;;  %v14635_v11 = vld [vmem:[#allocation4 + $0x18f0] sm:$0xff]  ;;  %v14632_v48 = vld [vmem:[#allocation4 + $0x18d8] sm:$0xff] }
 0xa0e   :  { %v12258_v13 = vpop.f32.mrb[120].mxu0  ;;  %v12299_v49 = vpop.f32.mrb[120].mxu1  ;;  %14832 = vmatprep.mubr.bf16.mxu0 %v18662_v3  ;;  %14873 = vmatprep.mubr.bf16.mxu1 %v18662_v3 }
 0xa0f   :  { %v21394_v12 = vadd.f32 %v12258_v13, %v21355_v27  ;;  %v21397_v45 = vadd.f32 %v12299_v49, %v21358_v10  ;;  %v12260_v5 = vpop.f32.mrb[121].mxu0  ;;  %v12301_v26 = vpop.f32.mrb[121].mxu1  ;;  %v16925_v10 = vcombine.high %v14629_v2, %v14633_v63  ;;  %v16922_v49 = vcombine.low %v14624_v36, %v14628_v20  ;;  %v18378_v36 = vld [vmem:[#allocation6 + $0x40] sm:$0xff]  }
 0xa10   :  { %v21400_v43 = vadd.f32 %v12260_v5, %v21361_v62  ;;  %v21403_v1 = vadd.f32 %v12301_v26, %v21364_v40  ;;  %v12262_v6 = vpop.f32.mrb[122].mxu0  ;;  %v12303_v32 = vpop.f32.mrb[122].mxu1  ;;  %14803 = vmatpush1.bf16.msra.mxu0 %v16908_v29  ;;  %14844 = vmatpush1.bf16.msra.mxu1 %v16910_v0  ;;  %v16924_v62 = vcombine.low %v14629_v2, %v14633_v63  ;;  %v18379_v20 = vld [vmem:[#allocation6 + $0xc0] sm:$0xff]  }
 0xa11   :  { %v12263_v53 = vpop.f32.mrb[123].mxu0  ;;  %v12304_v27 = vpop.f32.mrb[123].mxu1  ;;  %14804 = vmatprep.subr.bf16.mxu0 %v16917_v24  ;;  %14845 = vmatprep.subr.bf16.mxu1 %v16919_v18  ;;  %v16926_v40 = vcombine.low %v14630_v19, %v14634_v42  ;;  %v16920_v0 = vcombine.low %v14623_v8, %v14627_v56  ;;  %v16930_v42 = vcombine.low %v14632_v48, %v14636_v15 }
 0xa14   :  { %14805 = vmatpush1.bf16.msra.mxu0 %v16916_v7  ;;  %14846 = vmatpush1.bf16.msra.mxu1 %v16918_v58 }
 0xa15   :  { %14806 = vmatprep.subr.bf16.mxu0 %v16925_v10  ;;  %14847 = vmatprep.subr.bf16.mxu1 %v16927_v22 }
 0xa18   :  { %14807 = vmatpush1.bf16.msra.mxu0 %v16924_v62  ;;  %14848 = vmatpush1.bf16.msra.mxu1 %v16926_v40 }
 0xa19   :  { %14882 = vmatprep.subr.bf16.mxu0 %v16905_v16  ;;  %14923 = vmatprep.subr.bf16.mxu1 %v16907_v30 }
 0xa1b   :  { %16932 = vmatmul.mubr.msk.bf16.vlgmr.msra.gmra.mrb[176].mxu0 %vm6013_vm2, %v14604_v28  ;;  %16933 = vmatmul.mubr.msk.bf16.vlgmr.msra.gmra.mrb[176].mxu1 %vm6013_vm2, %v14604_v28 }
 0xa1c   :  { %14883 = vmatpush1.bf16.msra.mxu0 %v16904_v34  ;;  %14924 = vmatpush1.bf16.msra.mxu1 %v16906_v44 }
 0xa1d   :  { %14884 = vmatprep.subr.bf16.mxu0 %v16913_v54  ;;  %14925 = vmatprep.subr.bf16.mxu1 %v16915_v51 }
 0xa1e   :  { %v12340_v47 = vpop.f32.mrb[124].mxu0  ;;  %v12381_v57 = vpop.f32.mrb[124].mxu1  ;;  %14914 = vmatprep.mubr.bf16.mxu0 %v18662_v3  ;;  %14955 = vmatprep.mubr.bf16.mxu1 %v18662_v3  ;;  %v16929_v3 = vcombine.high %v14631_v59, %v14635_v11 }
 0xa1f   :  { %v12392_v35 = vadd.f32 %v12340_v47, %v21376_v33  ;;  %v12394_v39 = vadd.f32 %v12381_v57, %v21379_v37  ;;  %v12342_v21 = vpop.f32.mrb[125].mxu0  ;;  %v12383_v29 = vpop.f32.mrb[125].mxu1  ;;  %v16931_v33 = vcombine.high %v14632_v48, %v14636_v15  ;;  %v16928_v37 = vcombine.low %v14631_v59, %v14635_v11  ;;  %v18384_v59 = vld [vmem:[#allocation6 + $0x8] sm:$0xff]   ;;  %v18386_v48 = vld [vmem:[#allocation6 + $0x50] sm:$0xff]  }
 0xa20   :  { %v12393_v24 = vadd.f32 %v12342_v21, %v21382_v17  ;;  %v12395_v18 = vadd.f32 %v12383_v29, %v21385_v41  ;;  %v12344_v2 = vpop.f32.mrb[126].mxu0  ;;  %v12385_v13 = vpop.f32.mrb[126].mxu1  ;;  %14885 = vmatpush1.bf16.msra.mxu0 %v16912_v61  ;;  %14926 = vmatpush1.bf16.msra.mxu1 %v16914_v9  ;;  %v18380_v61 = vld [vmem:[#allocation6] sm:$0xff]   ;;  %v18385_v47 = vld [vmem:[#allocation6 + $0x88] sm:$0xff]   ;;  %v18387_v15 = vld [vmem:[#allocation6 + $0xd0] sm:$0xff]  }
 0xa21   :  { %v12345_v63 = vpop.f32.mrb[127].mxu0  ;;  %v12386_v19 = vpop.f32.mrb[127].mxu1  ;;  %14886 = vmatprep.subr.bf16.mxu0 %v16921_v4  ;;  %14927 = vmatprep.subr.bf16.mxu1 %v16923_v46  ;;  %v18381_v9 = vld [vmem:[#allocation6 + $0x80] sm:$0xff]   ;;  %v18382_v4 = vld [vmem:[#allocation6 + $0x48] sm:$0xff]  }
 0xa22   :  { %v18383_v46 = vld [vmem:[#allocation6 + $0xc8] sm:$0xff]  }
 0xa24   :  { %14887 = vmatpush1.bf16.msra.mxu0 %v16920_v0  ;;  %14928 = vmatpush1.bf16.msra.mxu1 %v16922_v49  ;;  %v18388_v0 = vld [vmem:[#allocation6 + $0x10] sm:$0xff]  }
 0xa25   :  { %14888 = vmatprep.subr.bf16.mxu0 %v16929_v3  ;;  %14929 = vmatprep.subr.bf16.mxu1 %v16931_v33  ;;  %v18390_v3 = vld [vmem:[#allocation6 + $0x58] sm:$0xff]  }
 0xa26   :  { %v18391_v33 = vld [vmem:[#allocation6 + $0xd8] sm:$0xff]  }
 0xa28   :  { %14889 = vmatpush1.bf16.msra.mxu0 %v16928_v37  ;;  %14930 = vmatpush1.bf16.msra.mxu1 %v16930_v42  ;;  %v18392_v37 = vld [vmem:[#allocation6 + $0x18] sm:$0xff]  }
 0xa29   :  { %17352 = vmatprep.subr.bf16.mxu0 %v18378_v36  ;;  %17374 = vmatprep.subr.bf16.mxu1 %v18379_v20  ;;  %v18393_v42 = vld [vmem:[#allocation6 + $0x98] sm:$0xff]  }
 0xa2b   :  { %16934 = vmatmul.mubr.msk.bf16.vlgmr.msra.gmra.mrb[180].mxu0 %vm6013_vm2, %v14604_v28  ;;  %16935 = vmatmul.mubr.msk.bf16.vlgmr.msra.gmra.mrb[180].mxu1 %vm6013_vm2, %v14604_v28 }
 0xa2c   :  { %17353 = vmatpush3.bf16.msra.mxu0 %v18380_v61  ;;  %17375 = vmatpush3.bf16.msra.mxu1 %v18381_v9 }
 0xa2d   :  { %17354 = vmatprep.subr.bf16.mxu0 %v18382_v4  ;;  %17376 = vmatprep.subr.bf16.mxu1 %v18383_v46 }
 0xa2e   :  { %v12626_v17 = vpop.f32.mrb[128].mxu0  ;;  %v12667_v41 = vpop.f32.mrb[128].mxu1 }
 0xa2f   :  { %v12756_v5 = vadd.f32 %v12626_v17, %v21394_v12  ;;  %v12758_v26 = vadd.f32 %v12667_v41, %v21397_v45  ;;  %v12628_v7 = vpop.f32.mrb[129].mxu0  ;;  %v12669_v6 = vpop.f32.mrb[129].mxu1  ;;  %v18394_v17 = vld [vmem:[#allocation6 + $0x60] sm:$0xff]  }
 0xa30   :  { %v12757_v32 = vadd.f32 %v12628_v7, %v21400_v43  ;;  %v12759_v58 = vadd.f32 %v12669_v6, %v21403_v1  ;;  %v12630_v53 = vpop.f32.mrb[130].mxu0  ;;  %v12671_v27 = vpop.f32.mrb[130].mxu1  ;;  %17355 = vmatpush3.bf16.msra.mxu0 %v18384_v59  ;;  %17377 = vmatpush3.bf16.msra.mxu1 %v18385_v47  ;;  %v18395_v41 = vld [vmem:[#allocation6 + $0xe0] sm:$0xff]   ;;  %v18398_v7 = vld [vmem:[#allocation6 + $0x68] sm:$0xff]  }
 0xa31   :  { %v12631_v10 = vpop.f32.mrb[131].mxu0  ;;  %v12672_v22 = vpop.f32.mrb[131].mxu1  ;;  %17356 = vmatprep.subr.bf16.mxu0 %v18386_v48  ;;  %17378 = vmatprep.subr.bf16.mxu1 %v18387_v15  ;;  %v18399_v6 = vld [vmem:[#allocation6 + $0xe8] sm:$0xff]  }
 0xa32   :  { %v18402_v10 = vld [vmem:[#allocation6 + $0x70] sm:$0xff]  }
 0xa34   :  { %17357 = vmatpush3.bf16.msra.mxu0 %v18388_v0 }
 0xa35   :  { %17358 = vmatprep.subr.bf16.mxu0 %v18390_v3 }
 0xa38   :  { %17359 = vmatpush3.bf16.msra.mxu0 %v18392_v37 }
 0xa39   :  { %17360 = vmatprep.subr.bf16.mxu0 %v18394_v17 }
 0xa3e   :  { %v12708_v31 = vpop.f32.mrb[132].mxu0  ;;  %v12749_v52 = vpop.f32.mrb[132].mxu1 }
 0xa3f   :  { %v12760_v55 = vadd.f32 %v12708_v31, %v12392_v35  ;;  %v12762_v50 = vadd.f32 %v12749_v52, %v12394_v39  ;;  %v12710_v62 = vpop.f32.mrb[133].mxu0  ;;  %v12751_v40 = vpop.f32.mrb[133].mxu1 }
 0xa40   :  { %v12761_v60 = vadd.f32 %v12710_v62, %v12393_v24  ;;  %v12763_v12 = vadd.f32 %v12751_v40, %v12395_v18  ;;  %v12712_v16 = vpop.f32.mrb[134].mxu0  ;;  %v12753_v45 = vpop.f32.mrb[134].mxu1  ;;  %v18389_v24 = vld [vmem:[#allocation6 + $0x90] sm:$0xff]  }
 0xa41   :  { %v12713_v30 = vpop.f32.mrb[135].mxu0  ;;  %v12754_v38 = vpop.f32.mrb[135].mxu1  ;;  %17379 = vmatpush3.bf16.msra.mxu1 %v18389_v24  ;;  %v18404_v62 = vld [vmem:[#allocation6 + $0x30] sm:$0xff]  }
 0xa42   :  { %17380 = vmatprep.subr.bf16.mxu1 %v18391_v33  ;;  %v18405_v40 = vld [vmem:[#allocation6 + $0xb0] sm:$0xff]  }
 0xa45   :  { %17381 = vmatpush3.bf16.msra.mxu1 %v18393_v42 }
 0xa46   :  { %17382 = vmatprep.subr.bf16.mxu1 %v18395_v41 }
 0xa4e   :  { %v12994_v14 = vpop.f32.mrb[136].mxu0  ;;  %v13035_v43 = vpop.f32.mrb[136].mxu1 }
 0xa4f   :  { %v21420_v25 = vadd.f32 %v12994_v14, %v12756_v5  ;;  %v21422_v1 = vadd.f32 %v13035_v43, %v12758_v26  ;;  %v12996_v23 = vpop.f32.mrb[137].mxu0  ;;  %v13037_v34 = vpop.f32.mrb[137].mxu1  ;;  %v18396_v5 = vld [vmem:[#allocation6 + $0x20] sm:$0xff]   ;;  %v18406_v14 = vld [vmem:[#allocation6 + $0x78] sm:$0xff]  }
 0xa50   :  { %v21424_v44 = vadd.f32 %v12996_v23, %v12757_v32  ;;  %v21426_v28 = vadd.f32 %v13037_v34, %v12759_v58  ;;  %v12998_v54 = vpop.f32.mrb[138].mxu0  ;;  %v13039_v51 = vpop.f32.mrb[138].mxu1  ;;  %v18397_v26 = vld [vmem:[#allocation6 + $0xa0] sm:$0xff]   ;;  %17361 = vmatpush3.bf16.msra.mxu0 %v18396_v5  ;;  %v18400_v32 = vld [vmem:[#allocation6 + $0x28] sm:$0xff]   ;;  %v18407_v43 = vld [vmem:[#allocation6 + $0xf8] sm:$0xff]  }
 0xa51   :  { %v12999_v8 = vpop.f32.mrb[139].mxu0  ;;  %v13040_v56 = vpop.f32.mrb[139].mxu1  ;;  %17383 = vmatpush3.bf16.msra.mxu1 %v18397_v26  ;;  %v18401_v58 = vld [vmem:[#allocation6 + $0xa8] sm:$0xff]   ;;  %17362 = vmatprep.subr.bf16.mxu0 %v18398_v7  ;;  %v18410_v23 = vld [vmem:[#allocation6 + $0x140] sm:$0xff]  }
 0xa52   :  { %17384 = vmatprep.subr.bf16.mxu1 %v18399_v6  ;;  %v18411_v34 = vld [vmem:[#allocation6 + $0x1c0] sm:$0xff]  }
 0xa54   :  { %17363 = vmatpush3.bf16.msra.mxu0 %v18400_v32 }
 0xa55   :  { %17385 = vmatpush3.bf16.msra.mxu1 %v18401_v58  ;;  %17364 = vmatprep.subr.bf16.mxu0 %v18402_v10 }
 0xa58   :  { %17365 = vmatpush3.bf16.msra.mxu0 %v18404_v62 }
 0xa59   :  { %17366 = vmatprep.subr.bf16.mxu0 %v18406_v14 }
 0xa5e   :  { %v13076_v57 = vpop.f32.mrb[140].mxu0  ;;  %v13117_v11 = vpop.f32.mrb[140].mxu1 }
 0xa5f   :  { %v21428_v35 = vadd.f32 %v13076_v57, %v12760_v55  ;;  %v21430_v39 = vadd.f32 %v13117_v11, %v12762_v50  ;;  %v13078_v21 = vpop.f32.mrb[141].mxu0  ;;  %v13119_v29 = vpop.f32.mrb[141].mxu1  ;;  %v18403_v50 = vld [vmem:[#allocation6 + $0xf0] sm:$0xff]  }
 0xa60   :  { %v21432_v18 = vadd.f32 %v13078_v21, %v12761_v60  ;;  %v21434_v2 = vadd.f32 %v13119_v29, %v12763_v12  ;;  %v13080_v13 = vpop.f32.mrb[142].mxu0  ;;  %v13121_v49 = vpop.f32.mrb[142].mxu1  ;;  %17386 = vmatprep.subr.bf16.mxu1 %v18403_v50 }
 0xa61   :  { %v13081_v63 = vpop.f32.mrb[143].mxu0  ;;  %v13122_v19 = vpop.f32.mrb[143].mxu1  ;;  %17387 = vmatpush3.bf16.msra.mxu1 %v18405_v40 }
 0xa62   :  { %17388 = vmatprep.subr.bf16.mxu1 %v18407_v43 }
 0xa6e   :  { %v13362_v53 = vpop.f32.mrb[144].mxu0  ;;  %v13403_v27 = vpop.f32.mrb[144].mxu1 }
 0xa6f   :  { %v13492_v22 = vadd.f32 %v13362_v53, %v21420_v25  ;;  %v13494_v31 = vadd.f32 %v13403_v27, %v21422_v1  ;;  %v13364_v52 = vpop.f32.mrb[145].mxu0  ;;  %v13405_v55 = vpop.f32.mrb[145].mxu1  ;;  %v18408_v25 = vld [vmem:[#allocation6 + $0x38] sm:$0xff]  }
 0xa70   :  { %v13493_v60 = vadd.f32 %v13364_v52, %v21424_v44  ;;  %v13495_v12 = vadd.f32 %v13405_v55, %v21426_v28  ;;  %v13366_v16 = vpop.f32.mrb[146].mxu0  ;;  %v13407_v45 = vpop.f32.mrb[146].mxu1  ;;  %v18409_v1 = vld [vmem:[#allocation6 + $0xb8] sm:$0xff]   ;;  %17367 = vmatpush3.bf16.msra.mxu0 %v18408_v25 }
 0xa71   :  { %v13367_v30 = vpop.f32.mrb[147].mxu0  ;;  %v13408_v38 = vpop.f32.mrb[147].mxu1  ;;  %17389 = vmatpush3.bf16.msra.mxu1 %v18409_v1  ;;  %17396 = vmatprep.subr.bf16.mxu0 %v18410_v23 }
 0xa72   :  { %17418 = vmatprep.subr.bf16.mxu1 %v18411_v34 }
 0xa7e   :  { %v13444_v44 = vpop.f32.mrb[148].mxu0  ;;  %v13485_v28 = vpop.f32.mrb[148].mxu1 }
 0xa7f   :  { %v13496_v54 = vadd.f32 %v13444_v44, %v21428_v35  ;;  %v13498_v51 = vadd.f32 %v13485_v28, %v21430_v39  ;;  %v13446_v8 = vpop.f32.mrb[149].mxu0  ;;  %v13487_v56 = vpop.f32.mrb[149].mxu1 }
 0xa80   :  { %v13497_v36 = vadd.f32 %v13446_v8, %v21432_v18  ;;  %v13499_v20 = vadd.f32 %v13487_v56, %v21434_v2  ;;  %v13448_v61 = vpop.f32.mrb[150].mxu0  ;;  %v13489_v9 = vpop.f32.mrb[150].mxu1 }
 0xa81   :  { %v13449_v4 = vpop.f32.mrb[151].mxu0  ;;  %v13490_v46 = vpop.f32.mrb[151].mxu1 }
 0xa8e   :  { %v13730_v59 = vpop.f32.mrb[152].mxu0  ;;  %v13771_v47 = vpop.f32.mrb[152].mxu1 }
 0xa8f   :  { %v13860_v57 = vadd.f32 %v13730_v59, %v13492_v22  ;;  %v13862_v11 = vadd.f32 %v13771_v47, %v13494_v31  ;;  %v13732_v48 = vpop.f32.mrb[153].mxu0  ;;  %v13773_v15 = vpop.f32.mrb[153].mxu1 }
 0xa90   :  { %v13861_v21 = vadd.f32 %v13732_v48, %v13493_v60  ;;  %v13863_v35 = vadd.f32 %v13773_v15, %v13495_v12  ;;  %v13734_v29 = vpop.f32.mrb[154].mxu0  ;;  %v13775_v39 = vpop.f32.mrb[154].mxu1 }
 0xa91   :  { %v13735_v0 = vpop.f32.mrb[155].mxu0  ;;  %v13776_v24 = vpop.f32.mrb[155].mxu1  ;;  %v14974_v29 = vlaneseq }
 0xa93   :  { %v21452_v39 = vshrl.u32 %v14974_v29, 7 }
 0xa95   :  { %v14976_v0 = vsub.s32 0, %v21452_v39  ;;  %v14984_v24 = vsub.s32 2, %v21452_v39 }
 0xa9e   :  { %v13812_v13 = vpop.f32.mrb[156].mxu0  ;;  %v13853_v18 = vpop.f32.mrb[156].mxu1 }
 0xa9f   :  { %v13864_v49 = vadd.f32 %v13812_v13, %v13496_v54  ;;  %v13866_v2 = vadd.f32 %v13853_v18, %v13498_v51  ;;  %v13814_v63 = vpop.f32.mrb[157].mxu0  ;;  %v13855_v19 = vpop.f32.mrb[157].mxu1  ;;  %v21456_v13 = vld [vmem:[#allocation12] sm:$0xff]  ;;  %v14980_v18 = vsub.s32 1, %v21452_v39 }
 0xaa0   :  { %v13865_v3 = vadd.f32 %v13814_v63, %v13497_v36  ;;  %v13867_v33 = vadd.f32 %v13855_v19, %v13499_v20  ;;  %v13816_v37 = vpop.f32.mrb[158].mxu0  ;;  %v13857_v42 = vpop.f32.mrb[158].mxu1  ;;  %v14985_v63 = vrot.slane %v21456_v13, %v14984_v24 }
 0xaa1   :  { %v13817_v17 = vpop.f32.mrb[159].mxu0  ;;  %v13858_v41 = vpop.f32.mrb[159].mxu1 }
 0xaae   :  { %v14098_v5 = vpop.f32.mrb[160].mxu0  ;;  %v14139_v26 = vpop.f32.mrb[160].mxu1 }
 0xaaf   :  { %v14228_v7 = vadd.f32 %v14098_v5, %v13860_v57  ;;  %v14230_v6 = vadd.f32 %v14139_v26, %v13862_v11  ;;  %v14100_v32 = vpop.f32.mrb[161].mxu0  ;;  %v14141_v58 = vpop.f32.mrb[161].mxu1 }
 0xab0   :  { %v14229_v53 = vadd.f32 %v14100_v32, %v13861_v21  ;;  %v14231_v27 = vadd.f32 %v14141_v58, %v13863_v35  ;;  %v14102_v10 = vpop.f32.mrb[162].mxu0  ;;  %v14143_v22 = vpop.f32.mrb[162].mxu1 }
 0xab1   :  { %v14103_v31 = vpop.f32.mrb[163].mxu0  ;;  %v14144_v52 = vpop.f32.mrb[163].mxu1 }
 0xabe   :  { %v14180_v55 = vpop.f32.mrb[164].mxu0  ;;  %v14221_v50 = vpop.f32.mrb[164].mxu1 }
 0xabf   :  { %v14232_v62 = vadd.f32 %v14180_v55, %v13864_v49  ;;  %v14234_v40 = vadd.f32 %v14221_v50, %v13866_v2  ;;  %v14182_v60 = vpop.f32.mrb[165].mxu0  ;;  %v14223_v12 = vpop.f32.mrb[165].mxu1  ;;  %v14988_v49 = vsub.s32 3, %v21452_v39  ;;  %v14977_v2 = vrot.slane %v21456_v13, %v14976_v0 }
 0xac0   :  { %v14233_v16 = vadd.f32 %v14182_v60, %v13865_v3  ;;  %v14235_v45 = vadd.f32 %v14223_v12, %v13867_v33  ;;  %v14184_v30 = vpop.f32.mrb[166].mxu0  ;;  %v14225_v38 = vpop.f32.mrb[166].mxu1  ;;  %v14981_v33 = vrot.slane %v21456_v13, %v14980_v18  ;;  %v18412_v12 = vld [vmem:[#allocation6 + $0x100] sm:$0xff]  }
 0xac1   :  { %v14185_v14 = vpop.f32.mrb[167].mxu0  ;;  %v14226_v43 = vpop.f32.mrb[167].mxu1  ;;  %v14989_v37 = vrot.slane %v21456_v13, %v14988_v49  ;;  %v18414_v38 = vld [vmem:[#allocation6 + $0x148] sm:$0xff]  }
 0xac2   :  { %v18415_v14 = vld [vmem:[#allocation6 + $0x1c8] sm:$0xff]  }
 0xac3   :  { %v18416_v43 = vld [vmem:[#allocation6 + $0x108] sm:$0xff]  }
 0xace   :  { %v14466_v25 = vpop.f32.mrb[168].mxu0  ;;  %v14507_v1 = vpop.f32.mrb[168].mxu1 }
 0xacf   :  { %v14596_v23 = vadd.f32 %v14466_v25, %v14228_v7  ;;  %v14598_v34 = vadd.f32 %v14507_v1, %v14230_v6  ;;  %v14468_v44 = vpop.f32.mrb[169].mxu0  ;;  %v14509_v28 = vpop.f32.mrb[169].mxu1  ;;  %v18417_v25 = vld [vmem:[#allocation6 + $0x188] sm:$0xff]   ;;  %v14996_v1 = vsub.s32 5, %v21452_v39 }
 0xad0   :  { %v14597_v54 = vadd.f32 %v14468_v44, %v14229_v53  ;;  %v14599_v51 = vadd.f32 %v14509_v28, %v14231_v27  ;;  %v14470_v8 = vpop.f32.mrb[170].mxu0  ;;  %v14511_v56 = vpop.f32.mrb[170].mxu1  ;;  %v18419_v44 = vld [vmem:[#allocation6 + $0x1d0] sm:$0xff]  }
 0xad1   :  { %v14471_v36 = vpop.f32.mrb[171].mxu0  ;;  %v14512_v20 = vpop.f32.mrb[171].mxu1  ;;  %v18420_v56 = vld [vmem:[#allocation6 + $0x110] sm:$0xff]  }
 0xad2   :  { %v18421_v36 = vld [vmem:[#allocation6 + $0x190] sm:$0xff]  }
 0xade   :  { %v14548_v61 = vpop.f32.mrb[172].mxu0  ;;  %v14589_v9 = vpop.f32.mrb[172].mxu1 }
 0xadf   :  { %v21444_v4 = vadd.f32 %v14548_v61, %v14232_v62  ;;  %v21446_v46 = vadd.f32 %v14589_v9, %v14234_v40  ;;  %v14550_v59 = vpop.f32.mrb[173].mxu0  ;;  %v14591_v47 = vpop.f32.mrb[173].mxu1 }
 0xae0   :  { %v21448_v57 = vadd.f32 %v14550_v59, %v14233_v16  ;;  %v21450_v11 = vadd.f32 %v14591_v47, %v14235_v45  ;;  %v14552_v48 = vpop.f32.mrb[174].mxu0  ;;  %v14593_v15 = vpop.f32.mrb[174].mxu1  ;;  %v18413_v16 = vld [vmem:[#allocation6 + $0x180] sm:$0xff]   ;;  %v18422_v47 = vld [vmem:[#allocation6 + $0x158] sm:$0xff]  }
 0xae1   :  { %v14553_v21 = vpop.f32.mrb[175].mxu0  ;;  %v14594_v35 = vpop.f32.mrb[175].mxu1  ;;  %v18423_v48 = vld [vmem:[#allocation6 + $0x1d8] sm:$0xff]  }
 0xaee   :  { %v14834_v19 = vpop.f32.mrb[176].mxu0  ;;  %v14875_v3 = vpop.f32.mrb[176].mxu1 }
 0xaef   :  { %v14964_v42 = vadd.f32 %v14834_v19, %v14596_v23  ;;  %v14966_v17 = vadd.f32 %v14875_v3, %v14598_v34  ;;  %v14836_v41 = vpop.f32.mrb[177].mxu0  ;;  %v14877_v5 = vpop.f32.mrb[177].mxu1  ;;  %v15004_v23 = vsub.s32 7, %v21452_v39  ;;  %v18418_v34 = vld [vmem:[#allocation6 + $0x150] sm:$0xff]  }
 0xaf0   :  { %v14965_v26 = vadd.f32 %v14836_v41, %v14597_v54  ;;  %v14967_v7 = vadd.f32 %v14877_v5, %v14599_v51  ;;  %v14838_v6 = vpop.f32.mrb[178].mxu0  ;;  %v14879_v32 = vpop.f32.mrb[178].mxu1  ;;  %v14997_v51 = vrot.slane %v21456_v13, %v14996_v1  ;;  %v18430_v41 = vld [vmem:[#allocation6 + $0x168] sm:$0xff]  }
 0xaf1   :  { %v15014_v58 = vadd.f32 %v14977_v2, %v14964_v42  ;;  %v15016_v53 = vadd.f32 %v14985_v63, %v14966_v17  ;;  %v14839_v27 = vpop.f32.mrb[179].mxu0  ;;  %v14880_v10 = vpop.f32.mrb[179].mxu1  ;;  %v15005_v8 = vrot.slane %v21456_v13, %v15004_v23  ;;  %v18426_v2 = vld [vmem:[#allocation6 + $0x160] sm:$0xff]   ;;  %v14992_v42 = vsub.s32 4, %v21452_v39  ;;  %v18431_v5 = vld [vmem:[#allocation6 + $0x1e8] sm:$0xff]  }
 0xaf2   :  { %v15015_v22 = vadd.f32 %v14981_v33, %v14965_v26  ;;  %v15017_v31 = vadd.f32 %v14989_v37, %v14967_v7  ;;  %v18427_v63 = vld [vmem:[#allocation6 + $0x1e0] sm:$0xff]   ;;  %v15000_v17 = vsub.s32 6, %v21452_v39  ;;  %v18432_v26 = vld [vmem:[#allocation6 + $0x128] sm:$0xff]   ;;  %v18436_v39 = vld [vmem:[#allocation6 + $0x130] sm:$0xff]  }
 0xaf3   :  { %v15022_v52 = vmax.f32 %v15014_v58, 0.0  ;;  %v15024_v55 = vmax.f32 %v15016_v53, 0.0  ;;  %v18429_v37 = vld [vmem:[#allocation6 + $0x1a0] sm:$0xff]   ;;  %v18433_v7 = vld [vmem:[#allocation6 + $0x1a8] sm:$0xff]   ;;  %v14993_v6 = vrot.slane %v21456_v13, %v14992_v42  ;;  %v18434_v58 = vld [vmem:[#allocation6 + $0x170] sm:$0xff]  }
 0xaf4   :  { %v15023_v50 = vmax.f32 %v15015_v22, 0.0  ;;  %v15025_v62 = vmax.f32 %v15017_v31, 0.0  ;;  %v15001_v32 = vrot.slane %v21456_v13, %v15000_v17  ;;  %v18435_v53 = vld [vmem:[#allocation6 + $0x1f0] sm:$0xff]   ;;  %v18438_v31 = vld [vmem:[#allocation6 + $0x178] sm:$0xff]  }
 0xaf5   :  { %v15030_v45 = vpack.c.bf16 %v15022_v52, %v15022_v52  ;;  %v15032_v30 = vpack.c.bf16 %v15024_v55, %v15024_v55  ;;  %v18437_v27 = vld [vmem:[#allocation6 + $0x1b0] sm:$0xff]   ;;  %v18439_v52 = vld [vmem:[#allocation6 + $0x1f8] sm:$0xff]  }
 0xaf6   :  { %v15031_v40 = vpack.c.bf16 %v15023_v50, %v15023_v50  ;;  %v15033_v60 = vpack.c.bf16 %v15025_v62, %v15025_v62  ;;  %v18440_v55 = vld [vmem:[#allocation6 + $0x138] sm:$0xff]  }
 0xaf7   :  { %v18441_v50 = vld [vmem:[#allocation6 + $0x1b8] sm:$0xff]  }
 0xaf8   :  { %15589 = vmatprep.mubr.bf16.mxu0 %v15031_v40  ;;  %15629 = vmatprep.mubr.bf16.mxu1 %v15033_v60 }
 0xaf9   :  { %15590 = vmatmul.mubr.bf16.vlgmr.msra.gmra.mrb[184].mxu0 %v15030_v45  ;;  %15630 = vmatmul.mubr.bf16.vlgmr.msra.gmra.mrb[184].mxu1 %v15032_v30  ;;  %v16936_v45 = vld [vmem:[#allocation13] ss:$0 sm:$0xff] }
 0xafa   :  { %17397 = vmatpush3.bf16.msra.mxu0 %v18412_v12  ;;  %17419 = vmatpush3.bf16.msra.mxu1 %v18413_v16 }
 0xafb   :  { %17398 = vmatprep.subr.bf16.mxu0 %v18414_v38  ;;  %17420 = vmatprep.subr.bf16.mxu1 %v18415_v14 }
 0xafe   :  { %17399 = vmatpush3.bf16.msra.mxu0 %v18416_v43  ;;  %17421 = vmatpush3.bf16.msra.mxu1 %v18417_v25  ;;  %v14916_v28 = vpop.f32.mrb[180].mxu0  ;;  %v14957_v54 = vpop.f32.mrb[180].mxu1 }
 0xaff   :  { %v14968_v20 = vadd.f32 %v14916_v28, %v21444_v4  ;;  %v14970_v61 = vadd.f32 %v14957_v54, %v21446_v46  ;;  %v14918_v9 = vpop.f32.mrb[181].mxu0  ;;  %v14959_v59 = vpop.f32.mrb[181].mxu1  ;;  %17400 = vmatprep.subr.bf16.mxu0 %v18418_v34  ;;  %17422 = vmatprep.subr.bf16.mxu1 %v18419_v44  ;;  %v18424_v4 = vld [vmem:[#allocation6 + $0x118] sm:$0xff]  }
 0xb00   :  { %v14969_v15 = vadd.f32 %v14918_v9, %v21448_v57  ;;  %v14971_v21 = vadd.f32 %v14959_v59, %v21450_v11  ;;  %v14920_v35 = vpop.f32.mrb[182].mxu0  ;;  %v14961_v29 = vpop.f32.mrb[182].mxu1  ;;  %v18425_v46 = vld [vmem:[#allocation6 + $0x198] sm:$0xff]   ;;  %v18428_v11 = vld [vmem:[#allocation6 + $0x120] sm:$0xff]  }
 0xb01   :  { %v14921_v0 = vpop.f32.mrb[183].mxu0  ;;  %v14962_v24 = vpop.f32.mrb[183].mxu1  ;;  %v15018_v10 = vadd.f32 %v14993_v6, %v14968_v20  ;;  %v15020_v22 = vadd.f32 %v15001_v32, %v14970_v61 }
 0xb02   :  { %v15019_v18 = vadd.f32 %v14997_v51, %v14969_v15  ;;  %v15021_v49 = vadd.f32 %v15005_v8, %v14971_v21  ;;  %17401 = vmatpush3.bf16.msra.mxu0 %v18420_v56  ;;  %17423 = vmatpush3.bf16.msra.mxu1 %v18421_v36 }
 0xb03   :  { %17402 = vmatprep.subr.bf16.mxu0 %v18422_v47  ;;  %17424 = vmatprep.subr.bf16.mxu1 %v18423_v48  ;;  %v15026_v62 = vmax.f32 %v15018_v10, 0.0  ;;  %v15028_v13 = vmax.f32 %v15020_v22, 0.0 }
 0xb04   :  { %v15027_v19 = vmax.f32 %v15019_v18, 0.0  ;;  %v15029_v3 = vmax.f32 %v15021_v49, 0.0 }
 0xb05   :  { %v15034_v40 = vpack.c.bf16 %v15026_v62, %v15026_v62  ;;  %v15036_v60 = vpack.c.bf16 %v15028_v13, %v15028_v13 }
 0xb06   :  { %v15035_v33 = vpack.c.bf16 %v15027_v19, %v15027_v19  ;;  %v15037_v57 = vpack.c.bf16 %v15029_v3, %v15029_v3  ;;  %17403 = vmatpush3.bf16.msra.mxu0 %v18424_v4  ;;  %17425 = vmatpush3.bf16.msra.mxu1 %v18425_v46 }
 0xb07   :  { %17404 = vmatprep.subr.bf16.mxu0 %v18426_v2  ;;  %17426 = vmatprep.subr.bf16.mxu1 %v18427_v63 }
 0xb08   :  { %15669 = vmatprep.mubr.bf16.mxu0 %v15035_v33  ;;  %15709 = vmatprep.mubr.bf16.mxu1 %v15037_v57 }
 0xb0a   :  { %17405 = vmatpush3.bf16.msra.mxu0 %v18428_v11  ;;  %17427 = vmatpush3.bf16.msra.mxu1 %v18429_v37 }
 0xb0b   :  { %17406 = vmatprep.subr.bf16.mxu0 %v18430_v41  ;;  %17428 = vmatprep.subr.bf16.mxu1 %v18431_v5 }
 0xb0e   :  { %17407 = vmatpush3.bf16.msra.mxu0 %v18432_v26  ;;  %17429 = vmatpush3.bf16.msra.mxu1 %v18433_v7 }
 0xb0f   :  { %17408 = vmatprep.subr.bf16.mxu0 %v18434_v58  ;;  %17430 = vmatprep.subr.bf16.mxu1 %v18435_v53 }
 0xb12   :  { %17409 = vmatpush3.bf16.msra.mxu0 %v18436_v39  ;;  %17431 = vmatpush3.bf16.msra.mxu1 %v18437_v27 }
 0xb13   :  { %17410 = vmatprep.subr.bf16.mxu0 %v18438_v31  ;;  %17432 = vmatprep.subr.bf16.mxu1 %v18439_v52 }
 0xb16   :  { %17411 = vmatpush3.bf16.msra.mxu0 %v18440_v55  ;;  %17433 = vmatpush3.bf16.msra.mxu1 %v18441_v50 }
 0xb19   :  { %15670 = vmatmul.mubr.bf16.vlgmr.msra.gmra.mrb[188].mxu0 %v15034_v40  ;;  %15710 = vmatmul.mubr.bf16.vlgmr.msra.gmra.mrb[188].mxu1 %v15036_v60 }
 0xbcc   :  { %v17368_v12 = vpop.f32.mrb[184].mxu0  ;;  %v17390_v16 = vpop.f32.mrb[184].mxu1 }
 0xbcd   :  { %v17369_v30 = vpop.f32.mrb[185].mxu0  ;;  %v17391_v38 = vpop.f32.mrb[185].mxu1 }
 0xbce   :  { %v17370_v14 = vadd.f32 %v17369_v30, %v17368_v12  ;;  %v17392_v43 = vadd.f32 %v17391_v38, %v17390_v16  ;;  %v17371_v25 = vpop.f32.mrb[186].mxu0  ;;  %v17393_v1 = vpop.f32.mrb[186].mxu1 }
 0xbcf   :  { %v17372_v23 = vpop.f32.mrb[187].mxu0  ;;  %v17394_v34 = vpop.f32.mrb[187].mxu1 }
 0xbd0   :  { %v15592_v44 = vadd.f32 %v17370_v14, %v16936_v45 }
 0xbd2   :  { %v15632_v28 = vadd.f32 %v17392_v43, %v15592_v44 }
 0xbec   :  { %v17412_v54 = vpop.f32.mrb[188].mxu0  ;;  %v17434_v51 = vpop.f32.mrb[188].mxu1 }
 0xbed   :  { %v17413_v8 = vpop.f32.mrb[189].mxu0  ;;  %v17435_v56 = vpop.f32.mrb[189].mxu1 }
 0xbee   :  { %v17414_v36 = vadd.f32 %v17413_v8, %v17412_v54  ;;  %v17436_v20 = vadd.f32 %v17435_v56, %v17434_v51  ;;  %v17415_v61 = vpop.f32.mrb[190].mxu0  ;;  %v17437_v9 = vpop.f32.mrb[190].mxu1 }
 0xbef   :  { %v17416_v59 = vpop.f32.mrb[191].mxu0  ;;  %v17438_v47 = vpop.f32.mrb[191].mxu1 }
 0xbf0   :  { %v15672_v48 = vadd.f32 %v17414_v36, %v15632_v28 }
 0xbf2   :  { %v15712_v15 = vadd.f32 %v17436_v20, %v15672_v48 }
 0xbf4   :  { %15717 = vst [vmem:[%s21490_s11] sm:$0xff] %v15712_v15 }
 0xbf5   :  { %15722 = vsyncpa [#allocation3], 1 }
 0xbf6   :  { %15723 = vsyncpa [#allocation5], 1 }
 0xbf7   :  { %15724 = vsyncpa [#allocation8], 1 }
 0xbf8   :  { %15725 = vsyncpa [#allocation11], 1 }
 0xbf9   :  { %15726 = vsyncpa [#allocation14], 1 }

</bundles_post_ra>
